<compile_context>
chip_gen: v6e
topology: v6e:2x2x1
jax: 0.10.0
libtpu: 0.0.40
codegen_flags: <defaults>
</compile_context>

<pallas_src>
import functools

import jax
import jax.numpy as jnp
from jax.experimental import pallas as pl
from jax.experimental.pallas import tpu as pltpu

EPS = 1e-5
LANE = 128
_VMEM_BLOCK_BUDGET = 10 * (1 << 20)   # activation-block budget per grid step
_TARGET_ROWS = 256                    # aim for >= one MXU height of M rows/step


def _round_up(n, m):
    return ((n + m - 1) // m) * m


# ----------------------------- in-kernel helpers ------------------------------


def _conv3x3_block(src_ref, w_ref, out_ref, *, Ho, Wo, stride, h_blk):
    """3x3 conv over a spatially padded (B, H+2, W+2, Cin) block.

    The 9 taps of each M-chunk are accumulated in values (vregs / MXU result
    path) and stored exactly once to out_ref (bf16), avoiding f32 accumulator
    read-modify-write traffic through VMEM.  Returns f32 partial BatchNorm
    statistics (sum, sum-of-squares) computed before the bf16 cast.
    """
    # TODO(synk): if MXU-issue-bound on v6e, fold the three kw taps into one
    # K=3*Cin contraction (kw-only im2col in VMEM) to cut vmatmul count 3x.
    B, cin = src_ref.shape[0], src_ref.shape[-1]
    cout = out_ref.shape[-1]
    ssum = jnp.zeros((1, cout), jnp.float32)
    ssq = jnp.zeros((1, cout), jnp.float32)
    for b in range(B):
        for h0 in range(0, Ho, h_blk):
            hb = min(h_blk, Ho - h0)
            acc = None
            for kh in range(3):
                for kw in range(3):
                    if stride == 1:
                        p = src_ref[b, h0 + kh:h0 + kh + hb, kw:kw + Wo, :]
                    else:
                        # TODO(synk): strided-window loads (stride > 1) use
                        # pl.ds(stride=...) and are not exercised by the
                        # stride=1 demo below.
                        p = src_ref[b,
                                    pl.ds(h0 * stride + kh, hb, stride=stride),
                                    pl.ds(kw, Wo, stride=stride), :]
                    t = jnp.dot(p.reshape(hb * Wo, cin), w_ref[kh, kw],
                                preferred_element_type=jnp.float32)
                    acc = t if acc is None else acc + t
            ssum = ssum + jnp.sum(acc, axis=0, keepdims=True)
            ssq = ssq + jnp.sum(acc * acc, axis=0, keepdims=True)
            out_ref[b, h0:h0 + hb, :, :] = (
                acc.reshape(hb, Wo, cout).astype(out_ref.dtype))
    return ssum, ssq


# ------------------------------- kernels --------------------------------------


def _stage1_kernel(x_ref, w1_ref, *rest, Ho, Wo, stride, projection, h_blk):
    # conv1 (3x3, stride, pad 1) + optional 1x1 projection conv.  Emits bf16
    # pre-BN activations and f32 per-block partial BN statistics.
    if projection:
        ws_ref, y1_ref, sc_ref, s1_ref, ss_ref = rest
    else:
        y1_ref, s1_ref = rest

    ssum, ssq = _conv3x3_block(x_ref, w1_ref, y1_ref,
                               Ho=Ho, Wo=Wo, stride=stride, h_blk=h_blk)
    s1_ref[...] = jnp.concatenate([ssum, ssq], axis=0)

    if projection:
        B, cin = x_ref.shape[0], x_ref.shape[-1]
        cout = sc_ref.shape[-1]
        psum = jnp.zeros((1, cout), jnp.float32)
        psq = jnp.zeros((1, cout), jnp.float32)
        for b in range(B):
            if stride == 1:
                xs = x_ref[b, 1:1 + Ho, 1:1 + Wo, :]
            else:
                xs = x_ref[b, pl.ds(1, Ho, stride=stride),
                           pl.ds(1, Wo, stride=stride), :]
            sc = jnp.dot(xs.reshape(Ho * Wo, cin), ws_ref[...],
                         preferred_element_type=jnp.float32)
            psum = psum + jnp.sum(sc, axis=0, keepdims=True)
            psq = psq + jnp.sum(sc * sc, axis=0, keepdims=True)
            sc_ref[b] = sc.reshape(Ho, Wo, cout).astype(sc_ref.dtype)
        ss_ref[...] = jnp.concatenate([psum, psq], axis=0)


def _stage2_kernel(y1_ref, sc1_ref, sh1_ref, w2_ref, y2_ref, s2_ref, apad_ref,
                   *, Ho, Wo, h_blk):
    # BN1 (precomputed global scale/shift) + ReLU, then conv2 (3x3, stride 1,
    # pad 1) with the spatial padding fused via a VMEM scratch.  Only the top /
    # bottom halo rows are zeroed each step; interior rows are written exactly
    # once at full minor width (zero side columns folded into the value).
    B = y1_ref.shape[0]
    C = y2_ref.shape[-1]
    scale = sc1_ref[...]
    shift = sh1_ref[...]

    zrow = jnp.zeros((B, 1, Wo + 2, C), apad_ref.dtype)
    apad_ref[:, 0:1, :, :] = zrow
    apad_ref[:, Ho + 1:Ho + 2, :, :] = zrow

    zcol = jnp.zeros((Ho, 1, C), jnp.float32)
    for b in range(B):
        a = jnp.maximum(y1_ref[b].astype(jnp.float32) * scale + shift, 0.0)
        a = jnp.concatenate([zcol, a, zcol], axis=1)        # (Ho, Wo+2, C)
        apad_ref[b, 1:1 + Ho, :, :] = a.astype(apad_ref.dtype)

    ssum, ssq = _conv3x3_block(apad_ref, w2_ref, y2_ref,
                               Ho=Ho, Wo=Wo, stride=1, h_blk=h_blk)
    s2_ref[...] = jnp.concatenate([ssum, ssq], axis=0)


def _stage3_kernel(y2_ref, sc2_ref, sh2_ref, *rest, projection):
    # BN2 apply + shortcut (projection-conv BN, or identity) + residual + ReLU.
    if projection:
        s_ref, scs_ref, shs_ref, out_ref = rest
    else:
        x_ref, out_ref = rest

    y = y2_ref[...].astype(jnp.float32) * sc2_ref[...] + sh2_ref[...]
    if projection:
        shortcut = s_ref[...].astype(jnp.float32) * scs_ref[...] + shs_ref[...]
    else:
        shortcut = x_ref[...]
    out_ref[...] = jnp.maximum(y + shortcut, 0.0)


# ------------------------------ wrapper helpers --------------------------------


def _bn_fold(stats, gamma, beta, m_total):
    # Global training-mode BN scale/shift from per-block partial (sum, sumsq).
    # Tiny XLA reduction, hoisted out of the per-image grid.
    tot = jnp.sum(stats, axis=0)                                   # (2, C)
    mean = tot[0] / m_total
    var = jnp.maximum(tot[1] / m_total - mean * mean, 0.0)
    inv = jax.lax.rsqrt(var + EPS)
    scale = gamma.reshape(-1) * inv
    shift = beta.reshape(-1) - mean * scale
    return scale.reshape(1, -1), shift.reshape(1, -1)


def _per_image_block_bytes(Hp, Wp, Ho, Wo, Cin_p, Cout_p, projection):
    # VMEM bytes per image for the most demanding stage (double-buffered blocks
    # + scratch), used to size the batch block.
    act = Ho * Wo * Cout_p * 2
    xin = Hp * Wp * Cin_p * 2
    s1 = 2 * xin + 2 * act * (2 if projection else 1)
    s2 = 4 * act + (Ho + 2) * (Wo + 2) * Cout_p * 2
    s3 = (2 * act * (2 if projection else 1)
          + (0 if projection else 2 * Ho * Wo * Cin_p * 4)
          + 2 * Ho * Wo * Cout_p * 4)
    return max(s1, s2, s3)


def _pick_batch_block(N, Ho, Wo, per_img_bytes):
    cap = max(1, _VMEM_BLOCK_BUDGET // max(per_img_bytes, 1))
    best = 1
    for d in range(1, N + 1):
        if N % d or d > cap:
            continue
        if N // d < min(2, N):      # keep >= 2 grid steps (v7x megacore split)
            continue
        best = d
        if d * Ho * Wo >= _TARGET_ROWS:
            break
    return best


# -------------------------------- wrapper --------------------------------------


def residual_block_forward(x_nchw, params, stride=1):
    """Pallas implementation of ResidualBlock.forward.  x is NCHW (PyTorch)."""
    N, Cin, H, W = x_nchw.shape
    w1, w2 = params["w1"], params["w2"]
    Cout = w1.shape[0]
    Ho = (H + 2 - 3) // stride + 1
    Wo = (W + 2 - 3) // stride + 1
    Hp, Wp = H + 2, W + 2
    Cin_p = _round_up(Cin, LANE)
    Cout_p = _round_up(Cout, LANE)
    M_total = N * Ho * Wo
    projection = (stride != 1) or (Cin != Cout)

    # TODO(synk): in a full network keep activations NHWC + lane-padded
    # end-to-end; the transposes / pads / final slice here are per-block demo
    # glue that would amortize to zero across a real ResNet.
    x_nhwc = jnp.transpose(x_nchw, (0, 2, 3, 1)).astype(jnp.float32)
    xp = jnp.pad(x_nhwc, ((0, 0), (1, 1), (1, 1), (0, Cin_p - Cin)))
    xp = xp.astype(jnp.bfloat16)

    def pack3x3(w, cip, cop):
        wt = jnp.transpose(w, (2, 3, 1, 0)).astype(jnp.float32)   # (3,3,ci,co)
        wt = jnp.pad(wt, ((0, 0), (0, 0),
                          (0, cip - wt.shape[2]), (0, cop - wt.shape[3])))
        return wt.astype(jnp.bfloat16)

    def pack_vec(v, fill):
        return jnp.pad(v.astype(jnp.float32), (0, Cout_p - Cout),
                       constant_values=fill).reshape(1, Cout_p)

    w1p = pack3x3(w1, Cin_p, Cout_p)
    w2p = pack3x3(w2, Cout_p, Cout_p)
    g1, b1 = pack_vec(params["g1"], 1.0), pack_vec(params["b1"], 0.0)
    g2, b2 = pack_vec(params["g2"], 1.0), pack_vec(params["b2"], 0.0)

    # ---- tiling choices -------------------------------------------------------
    per_img = _per_image_block_bytes(Hp, Wp, Ho, Wo, Cin_p, Cout_p, projection)
    Bb = _pick_batch_block(N, Ho, Wo, per_img)
    G = N // Bb
    h_blk = max(1, min(Ho, max(1, 128 // Wo)))      # ~128 M rows per acc chunk
    weight_bytes = (9 * Cin_p * Cout_p + 9 * Cout_p * Cout_p
                    + (Cin_p * Cout_p if projection else 0)) * 2
    vmem_limit = int(min(64 << 20,
                         max(32 << 20, 2 * (Bb * per_img + weight_bytes))))
    cparams = pltpu.CompilerParams(dimension_semantics=("parallel",),
                                   vmem_limit_bytes=vmem_limit)

    # ---- shared specs ---------------------------------------------------------
    # TODO(synk): weight / scale-shift blocks have constant index maps and could
    # be single-buffered (pipeline_mode=pl.Buffered(1)) to save VMEM on v7x.
    x_spec = pl.BlockSpec((Bb, Hp, Wp, Cin_p), lambda n: (n, 0, 0, 0))
    act_spec = pl.BlockSpec((Bb, Ho, Wo, Cout_p), lambda n: (n, 0, 0, 0))
    xid_spec = pl.BlockSpec((Bb, Ho, Wo, Cin_p), lambda n: (n, 0, 0, 0))
    pstat_spec = pl.BlockSpec((None, 2, Cout_p), lambda n: (n, 0, 0))
    vec_spec = pl.BlockSpec((1, Cout_p), lambda n: (0, 0))
    w1_spec = pl.BlockSpec((3, 3, Cin_p, Cout_p), lambda n: (0, 0, 0, 0))
    w2_spec = pl.BlockSpec((3, 3, Cout_p, Cout_p), lambda n: (0, 0, 0, 0))
    ws_spec = pl.BlockSpec((Cin_p, Cout_p), lambda n: (0, 0))

    act_shape = jax.ShapeDtypeStruct((N, Ho, Wo, Cout_p), jnp.bfloat16)
    stat_shape = jax.ShapeDtypeStruct((G, 2, Cout_p), jnp.float32)
    out_struct = jax.ShapeDtypeStruct((N, Ho, Wo, Cout_p), jnp.float32)

    act_bytes = N * Ho * Wo * Cout_p * 2
    stat_bytes = G * 2 * Cout_p * 4
    conv_flops = 2 * 9 * M_total

    # ---- stage 1: conv1 (+ shortcut 1x1 conv) + partial BN stats --------------
    kern1 = functools.partial(_stage1_kernel, Ho=Ho, Wo=Wo, stride=stride,
                              projection=projection, h_blk=h_blk)
    if projection:
        ws = params["ws"][:, :, 0, 0].T.astype(jnp.float32)        # (Cin, Cout)
        wsp = jnp.pad(ws, ((0, Cin_p - Cin),
                           (0, Cout_p - Cout))).astype(jnp.bfloat16)
        gs, bs = pack_vec(params["gs"], 1.0), pack_vec(params["bs"], 0.0)
        ce1 = pl.CostEstimate(
            flops=conv_flops * Cin_p * Cout_p + 2 * M_total * Cin_p * Cout_p,
            transcendentals=0,
            bytes_accessed=xp.size * 2 + w1p.size * 2 + wsp.size * 2
                           + 2 * act_bytes + 2 * stat_bytes)
        y1, sc, s1, ss = pl.pallas_call(
            kern1,
            grid_spec=pltpu.PrefetchScalarGridSpec(
                num_scalar_prefetch=0, grid=(G,),
                in_specs=[x_spec, w1_spec, ws_spec],
                out_specs=[act_spec, act_spec, pstat_spec, pstat_spec]),
            out_shape=(act_shape, act_shape, stat_shape, stat_shape),
            compiler_params=cparams, cost_estimate=ce1,
        )(xp, w1p, wsp)
    else:
        ce1 = pl.CostEstimate(
            flops=conv_flops * Cin_p * Cout_p, transcendentals=0,
            bytes_accessed=xp.size * 2 + w1p.size * 2 + act_bytes + stat_bytes)
        y1, s1 = pl.pallas_call(
            kern1,
            grid_spec=pltpu.PrefetchScalarGridSpec(
                num_scalar_prefetch=0, grid=(G,),
                in_specs=[x_spec, w1_spec],
                out_specs=[act_spec, pstat_spec]),
            out_shape=(act_shape, stat_shape),
            compiler_params=cparams, cost_estimate=ce1,
        )(xp, w1p)

    # Global batch statistics folded once per stage (exact: f32 partial sums).
    scale1, shift1 = _bn_fold(s1, g1, b1, M_total)

    # ---- stage 2: BN1 apply + ReLU + conv2 + partial BN2 stats ----------------
    kern2 = functools.partial(_stage2_kernel, Ho=Ho, Wo=Wo, h_blk=h_blk)
    ce2 = pl.CostEstimate(
        flops=conv_flops * Cout_p * Cout_p + 4 * M_total * Cout_p,
        transcendentals=0,
        bytes_accessed=2 * act_bytes + w2p.size * 2 + stat_bytes
                       + 4 * Cout_p * 4)
    y2, s2 = pl.pallas_call(
        kern2,
        grid_spec=pltpu.PrefetchScalarGridSpec(
            num_scalar_prefetch=0, grid=(G,),
            in_specs=[act_spec, vec_spec, vec_spec, w2_spec],
            out_specs=[act_spec, pstat_spec],
            scratch_shapes=[pltpu.VMEM((Bb, Ho + 2, Wo + 2, Cout_p),
                                       jnp.bfloat16)]),
        out_shape=(act_shape, stat_shape),
        compiler_params=cparams, cost_estimate=ce2,
    )(y1, scale1, shift1, w2p)

    scale2, shift2 = _bn_fold(s2, g2, b2, M_total)

    # ---- stage 3: BN2 apply + shortcut + residual add + ReLU ------------------
    kern3 = functools.partial(_stage3_kernel, projection=projection)
    if projection:
        scale_s, shift_s = _bn_fold(ss, gs, bs, M_total)
        ce3 = pl.CostEstimate(
            flops=8 * M_total * Cout_p, transcendentals=0,
            bytes_accessed=2 * act_bytes + N * Ho * Wo * Cout_p * 4)
        out = pl.pallas_call(
            kern3,
            grid_spec=pltpu.PrefetchScalarGridSpec(
                num_scalar_prefetch=0, grid=(G,),
                in_specs=[act_spec, vec_spec, vec_spec,
                          act_spec, vec_spec, vec_spec],
                out_specs=act_spec),
            out_shape=out_struct,
            compiler_params=cparams, cost_estimate=ce3,
        )(y2, scale2, shift2, sc, scale_s, shift_s)
    else:
        # Identity shortcut: un-padded, lane-padded f32 input (no halo traffic,
        # no bf16 rounding on the residual path).
        x_id = jnp.pad(x_nhwc, ((0, 0), (0, 0), (0, 0), (0, Cin_p - Cin)))
        ce3 = pl.CostEstimate(
            flops=6 * M_total * Cout_p, transcendentals=0,
            bytes_accessed=act_bytes + N * Ho * Wo * Cin_p * 4
                           + N * Ho * Wo * Cout_p * 4)
        out = pl.pallas_call(
            kern3,
            grid_spec=pltpu.PrefetchScalarGridSpec(
                num_scalar_prefetch=0, grid=(G,),
                in_specs=[act_spec, vec_spec, vec_spec, xid_spec],
                out_specs=act_spec),
            out_shape=out_struct,
            compiler_params=cparams, cost_estimate=ce3,
        )(y2, scale2, shift2, x_id)

    out = out[:, :, :, :Cout]                       # drop lane padding
    return jnp.transpose(out, (0, 3, 1, 2))         # back to NCHW


# ---------------------------- pure-JAX reference -------------------------------


def reference_forward(x, p, stride=1):
    conv = functools.partial(
        jax.lax.conv_general_dilated,
        dimension_numbers=("NCHW", "OIHW", "NCHW"),
        precision=jax.lax.Precision.HIGHEST)

    def bn(y, g, b):
        mean = jnp.mean(y, axis=(0, 2, 3), keepdims=True)
        var = jnp.mean((y - mean) ** 2, axis=(0, 2, 3), keepdims=True)
        return ((y - mean) * jax.lax.rsqrt(var + EPS)
                * g.reshape(1, -1, 1, 1) + b.reshape(1, -1, 1, 1))

    out = conv(x, p["w1"], (stride, stride), ((1, 1), (1, 1)))
    out = jnp.maximum(bn(out, p["g1"], p["b1"]), 0.0)
    out = bn(conv(out, p["w2"], (1, 1), ((1, 1), (1, 1))), p["g2"], p["b2"])

    Cout, Cin = p["w1"].shape[0], p["w1"].shape[1]
    if stride != 1 or Cin != Cout:
        sc = bn(conv(x, p["ws"], (stride, stride), ((0, 0), (0, 0))),
                p["gs"], p["bs"])
    else:
        sc = x
    return jnp.maximum(out + sc, 0.0)


# ----------------------------------- main ---------------------------------------


def _run_case(name, key, N, Cin, Cout, H, W, stride):
    ks = jax.random.split(key, 8)
    params = {
        "w1": 0.1 * jax.random.normal(ks[0], (Cout, Cin, 3, 3), jnp.float32),
        "w2": 0.1 * jax.random.normal(ks[1], (Cout, Cout, 3, 3), jnp.float32),
        "ws": 0.1 * jax.random.normal(ks[2], (Cout, Cin, 1, 1), jnp.float32),
        "g1": 1.0 + 0.1 * jax.random.normal(ks[3], (Cout,), jnp.float32),
        "b1": 0.1 * jax.random.normal(ks[4], (Cout,), jnp.float32),
        "g2": 1.0 + 0.1 * jax.random.normal(ks[5], (Cout,), jnp.float32),
        "b2": 0.1 * jax.random.normal(ks[6], (Cout,), jnp.float32),
        "gs": jnp.ones((Cout,), jnp.float32),
        "bs": jnp.zeros((Cout,), jnp.float32),
    }
    x = jax.random.normal(ks[7], (N, Cin, H, W), jnp.float32)

    fwd = jax.jit(functools.partial(residual_block_forward, stride=stride))
    out = jax.block_until_ready(fwd(x, params))

    # Reference in f32; conv inputs/weights rounded through bf16 so the check
    # isolates kernel correctness from the intentional bf16 MXU rounding (the
    # kernel additionally stores inter-stage activations in bf16, hence the
    # slightly looser tolerance).
    def rt(v):
        return v.astype(jnp.bfloat16).astype(jnp.float32)

    ref_params = {k: (rt(v) if k in ("w1", "w2", "ws") else v)
                  for k, v in params.items()}
    ref = jax.block_until_ready(
        reference_forward(rt(x), ref_params, stride=stride))

    Ho = (H + 2 - 3) // stride + 1
    Wo = (W + 2 - 3) // stride + 1
    assert out.shape == (N, Cout, Ho, Wo), out.shape
    err = float(jnp.max(jnp.abs(out - ref)))
    if err > 7.5e-2:
        raise AssertionError(
            f"{name}: Pallas output mismatch vs reference: max abs err = {err}")


if __name__ == "__main__":
    k_proj, k_ident = jax.random.split(jax.random.PRNGKey(0), 2)
    # Projection shortcut (Cin != Cout): 1x1-conv + BN residual branch.
    _run_case("projection", k_proj, N=2, Cin=4, Cout=8, H=16, W=16, stride=1)
    # Identity shortcut (Cin == Cout, stride 1), exercising a batch block of
    # 2 images per grid step.
    _run_case("identity", k_ident, N=4, Cin=8, Cout=8, H=8, W=8, stride=1)
    print("KERNEL_OK")
</pallas_src>

<mosaic_0001>
module attributes {stable_mosaic.version = 11 : i64} {
  func.func @_stage1_kernel(%arg0: i32, %arg1: memref<1x18x18x128xbf16, #tpu.memory_space<vmem>>, %arg2: memref<3x3x128x128xbf16, #tpu.memory_space<vmem>>, %arg3: memref<128x128xbf16, #tpu.memory_space<vmem>>, %arg4: memref<1x16x16x128xbf16, #tpu.memory_space<vmem>>, %arg5: memref<1x16x16x128xbf16, #tpu.memory_space<vmem>>, %arg6: memref<1x2x128xf32, #tpu.memory_space<vmem>>, %arg7: memref<1x2x128xf32, #tpu.memory_space<vmem>>) attributes {dimension_semantics = [#tpu.dimension_semantics<parallel>], iteration_bounds = array<i64: 2>, scalar_prefetch = 0 : i64, scratch_operands = 0 : i64, tpu.core_type = #tpu.core_type<tc>, window_params = [{transform_indices = @transform_0, window_bounds = array<i64: 1, 18, 18, 128>}, {pipeline_mode = #tpu.pipeline_mode<synchronous>, transform_indices = @transform_1, window_bounds = array<i64: 3, 3, 128, 128>}, {pipeline_mode = #tpu.pipeline_mode<synchronous>, transform_indices = @transform_2, window_bounds = array<i64: 128, 128>}, {transform_indices = @transform_3, window_bounds = array<i64: 1, 16, 16, 128>}, {transform_indices = @transform_4, window_bounds = array<i64: 1, 16, 16, 128>}, {transform_indices = @transform_5, window_bounds = array<i64: 1, 2, 128>}, {transform_indices = @transform_6, window_bounds = array<i64: 1, 2, 128>}]} {
    %cst = arith.constant 0.000000e+00 : f32
    %0 = vector.broadcast %cst : f32 to vector<1x128xf32>
    %cst_0 = arith.constant 0.000000e+00 : f32
    %1 = vector.broadcast %cst_0 : f32 to vector<1x128xf32>
    %c0 = arith.constant 0 : index
    %c0_1 = arith.constant 0 : index
    %c0_2 = arith.constant 0 : index
    %c0_3 = arith.constant 0 : index
    %2 = vector.load %arg1[%c0, %c0_1, %c0_2, %c0_3] : memref<1x18x18x128xbf16, #tpu.memory_space<vmem>>, vector<1x8x16x128xbf16>
    %3 = vector.shape_cast %2 : vector<1x8x16x128xbf16> to vector<8x16x128xbf16>
    %4 = vector.shape_cast %3 : vector<8x16x128xbf16> to vector<128x128xbf16>
    %c0_4 = arith.constant 0 : index
    %c0_5 = arith.constant 0 : index
    %c0_6 = arith.constant 0 : index
    %c0_7 = arith.constant 0 : index
    %5 = vector.load %arg2[%c0_4, %c0_5, %c0_6, %c0_7] : memref<3x3x128x128xbf16, #tpu.memory_space<vmem>>, vector<1x1x128x128xbf16>
    %6 = vector.shape_cast %5 : vector<1x1x128x128xbf16> to vector<128x128xbf16>
    %cst_8 = arith.constant dense<0.000000e+00> : vector<128x128xf32>
    %7 = tpu.matmul %4, %6, %cst_8 {dimension_numbers = #tpu.dot_dimension_numbers<[1], [0], [0], [1], [0, 0, 1, 1], [], []>} : vector<128x128xbf16>, vector<128x128xbf16>, vector<128x128xf32> -> vector<128x128xf32>
    %c0_9 = arith.constant 0 : index
    %c0_10 = arith.constant 0 : index
    %c1 = arith.constant 1 : index
    %c0_11 = arith.constant 0 : index
    %8 = vector.load %arg1[%c0_9, %c0_10, %c1, %c0_11] : memref<1x18x18x128xbf16, #tpu.memory_space<vmem>>, vector<1x8x16x128xbf16>
    %9 = vector.shape_cast %8 : vector<1x8x16x128xbf16> to vector<8x16x128xbf16>
    %10 = vector.shape_cast %9 : vector<8x16x128xbf16> to vector<128x128xbf16>
    %c0_12 = arith.constant 0 : index
    %c1_13 = arith.constant 1 : index
    %c0_14 = arith.constant 0 : index
    %c0_15 = arith.constant 0 : index
    %11 = vector.load %arg2[%c0_12, %c1_13, %c0_14, %c0_15] : memref<3x3x128x128xbf16, #tpu.memory_space<vmem>>, vector<1x1x128x128xbf16>
    %12 = vector.shape_cast %11 : vector<1x1x128x128xbf16> to vector<128x128xbf16>
    %cst_16 = arith.constant dense<0.000000e+00> : vector<128x128xf32>
    %13 = tpu.matmul %10, %12, %cst_16 {dimension_numbers = #tpu.dot_dimension_numbers<[1], [0], [0], [1], [0, 0, 1, 1], [], []>} : vector<128x128xbf16>, vector<128x128xbf16>, vector<128x128xf32> -> vector<128x128xf32>
    %14 = arith.addf %7, %13 : vector<128x128xf32>
    %c0_17 = arith.constant 0 : index
    %c0_18 = arith.constant 0 : index
    %c2 = arith.constant 2 : index
    %c0_19 = arith.constant 0 : index
    %15 = vector.load %arg1[%c0_17, %c0_18, %c2, %c0_19] : memref<1x18x18x128xbf16, #tpu.memory_space<vmem>>, vector<1x8x16x128xbf16>
    %16 = vector.shape_cast %15 : vector<1x8x16x128xbf16> to vector<8x16x128xbf16>
    %17 = vector.shape_cast %16 : vector<8x16x128xbf16> to vector<128x128xbf16>
    %c0_20 = arith.constant 0 : index
    %c2_21 = arith.constant 2 : index
    %c0_22 = arith.constant 0 : index
    %c0_23 = arith.constant 0 : index
    %18 = vector.load %arg2[%c0_20, %c2_21, %c0_22, %c0_23] : memref<3x3x128x128xbf16, #tpu.memory_space<vmem>>, vector<1x1x128x128xbf16>
    %19 = vector.shape_cast %18 : vector<1x1x128x128xbf16> to vector<128x128xbf16>
    %cst_24 = arith.constant dense<0.000000e+00> : vector<128x128xf32>
    %20 = tpu.matmul %17, %19, %cst_24 {dimension_numbers = #tpu.dot_dimension_numbers<[1], [0], [0], [1], [0, 0, 1, 1], [], []>} : vector<128x128xbf16>, vector<128x128xbf16>, vector<128x128xf32> -> vector<128x128xf32>
    %21 = arith.addf %14, %20 : vector<128x128xf32>
    %c0_25 = arith.constant 0 : index
    %c1_26 = arith.constant 1 : index
    %c0_27 = arith.constant 0 : index
    %c0_28 = arith.constant 0 : index
    %22 = vector.load %arg1[%c0_25, %c1_26, %c0_27, %c0_28] : memref<1x18x18x128xbf16, #tpu.memory_space<vmem>>, vector<1x8x16x128xbf16>
    %23 = vector.shape_cast %22 : vector<1x8x16x128xbf16> to vector<8x16x128xbf16>
    %24 = vector.shape_cast %23 : vector<8x16x128xbf16> to vector<128x128xbf16>
    %c1_29 = arith.constant 1 : index
    %c0_30 = arith.constant 0 : index
    %c0_31 = arith.constant 0 : index
    %c0_32 = arith.constant 0 : index
    %25 = vector.load %arg2[%c1_29, %c0_30, %c0_31, %c0_32] : memref<3x3x128x128xbf16, #tpu.memory_space<vmem>>, vector<1x1x128x128xbf16>
    %26 = vector.shape_cast %25 : vector<1x1x128x128xbf16> to vector<128x128xbf16>
    %cst_33 = arith.constant dense<0.000000e+00> : vector<128x128xf32>
    %27 = tpu.matmul %24, %26, %cst_33 {dimension_numbers = #tpu.dot_dimension_numbers<[1], [0], [0], [1], [0, 0, 1, 1], [], []>} : vector<128x128xbf16>, vector<128x128xbf16>, vector<128x128xf32> -> vector<128x128xf32>
    %28 = arith.addf %21, %27 : vector<128x128xf32>
    %c0_34 = arith.constant 0 : index
    %c1_35 = arith.constant 1 : index
    %c1_36 = arith.constant 1 : index
    %c0_37 = arith.constant 0 : index
    %29 = vector.load %arg1[%c0_34, %c1_35, %c1_36, %c0_37] : memref<1x18x18x128xbf16, #tpu.memory_space<vmem>>, vector<1x8x16x128xbf16>
    %30 = vector.shape_cast %29 : vector<1x8x16x128xbf16> to vector<8x16x128xbf16>
    %31 = vector.shape_cast %30 : vector<8x16x128xbf16> to vector<128x128xbf16>
    %c1_38 = arith.constant 1 : index
    %c1_39 = arith.constant 1 : index
    %c0_40 = arith.constant 0 : index
    %c0_41 = arith.constant 0 : index
    %32 = vector.load %arg2[%c1_38, %c1_39, %c0_40, %c0_41] : memref<3x3x128x128xbf16, #tpu.memory_space<vmem>>, vector<1x1x128x128xbf16>
    %33 = vector.shape_cast %32 : vector<1x1x128x128xbf16> to vector<128x128xbf16>
    %cst_42 = arith.constant dense<0.000000e+00> : vector<128x128xf32>
    %34 = tpu.matmul %31, %33, %cst_42 {dimension_numbers = #tpu.dot_dimension_numbers<[1], [0], [0], [1], [0, 0, 1, 1], [], []>} : vector<128x128xbf16>, vector<128x128xbf16>, vector<128x128xf32> -> vector<128x128xf32>
    %35 = arith.addf %28, %34 : vector<128x128xf32>
    %c0_43 = arith.constant 0 : index
    %c1_44 = arith.constant 1 : index
    %c2_45 = arith.constant 2 : index
    %c0_46 = arith.constant 0 : index
    %36 = vector.load %arg1[%c0_43, %c1_44, %c2_45, %c0_46] : memref<1x18x18x128xbf16, #tpu.memory_space<vmem>>, vector<1x8x16x128xbf16>
    %37 = vector.shape_cast %36 : vector<1x8x16x128xbf16> to vector<8x16x128xbf16>
    %38 = vector.shape_cast %37 : vector<8x16x128xbf16> to vector<128x128xbf16>
    %c1_47 = arith.constant 1 : index
    %c2_48 = arith.constant 2 : index
    %c0_49 = arith.constant 0 : index
    %c0_50 = arith.constant 0 : index
    %39 = vector.load %arg2[%c1_47, %c2_48, %c0_49, %c0_50] : memref<3x3x128x128xbf16, #tpu.memory_space<vmem>>, vector<1x1x128x128xbf16>
    %40 = vector.shape_cast %39 : vector<1x1x128x128xbf16> to vector<128x128xbf16>
    %cst_51 = arith.constant dense<0.000000e+00> : vector<128x128xf32>
    %41 = tpu.matmul %38, %40, %cst_51 {dimension_numbers = #tpu.dot_dimension_numbers<[1], [0], [0], [1], [0, 0, 1, 1], [], []>} : vector<128x128xbf16>, vector<128x128xbf16>, vector<128x128xf32> -> vector<128x128xf32>
    %42 = arith.addf %35, %41 : vector<128x128xf32>
    %c0_52 = arith.constant 0 : index
    %c2_53 = arith.constant 2 : index
    %c0_54 = arith.constant 0 : index
    %c0_55 = arith.constant 0 : index
    %43 = vector.load %arg1[%c0_52, %c2_53, %c0_54, %c0_55] : memref<1x18x18x128xbf16, #tpu.memory_space<vmem>>, vector<1x8x16x128xbf16>
    %44 = vector.shape_cast %43 : vector<1x8x16x128xbf16> to vector<8x16x128xbf16>
    %45 = vector.shape_cast %44 : vector<8x16x128xbf16> to vector<128x128xbf16>
    %c2_56 = arith.constant 2 : index
    %c0_57 = arith.constant 0 : index
    %c0_58 = arith.constant 0 : index
    %c0_59 = arith.constant 0 : index
    %46 = vector.load %arg2[%c2_56, %c0_57, %c0_58, %c0_59] : memref<3x3x128x128xbf16, #tpu.memory_space<vmem>>, vector<1x1x128x128xbf16>
    %47 = vector.shape_cast %46 : vector<1x1x128x128xbf16> to vector<128x128xbf16>
    %cst_60 = arith.constant dense<0.000000e+00> : vector<128x128xf32>
    %48 = tpu.matmul %45, %47, %cst_60 {dimension_numbers = #tpu.dot_dimension_numbers<[1], [0], [0], [1], [0, 0, 1, 1], [], []>} : vector<128x128xbf16>, vector<128x128xbf16>, vector<128x128xf32> -> vector<128x128xf32>
    %49 = arith.addf %42, %48 : vector<128x128xf32>
    %c0_61 = arith.constant 0 : index
    %c2_62 = arith.constant 2 : index
    %c1_63 = arith.constant 1 : index
    %c0_64 = arith.constant 0 : index
    %50 = vector.load %arg1[%c0_61, %c2_62, %c1_63, %c0_64] : memref<1x18x18x128xbf16, #tpu.memory_space<vmem>>, vector<1x8x16x128xbf16>
    %51 = vector.shape_cast %50 : vector<1x8x16x128xbf16> to vector<8x16x128xbf16>
    %52 = vector.shape_cast %51 : vector<8x16x128xbf16> to vector<128x128xbf16>
    %c2_65 = arith.constant 2 : index
    %c1_66 = arith.constant 1 : index
    %c0_67 = arith.constant 0 : index
    %c0_68 = arith.constant 0 : index
    %53 = vector.load %arg2[%c2_65, %c1_66, %c0_67, %c0_68] : memref<3x3x128x128xbf16, #tpu.memory_space<vmem>>, vector<1x1x128x128xbf16>
    %54 = vector.shape_cast %53 : vector<1x1x128x128xbf16> to vector<128x128xbf16>
    %cst_69 = arith.constant dense<0.000000e+00> : vector<128x128xf32>
    %55 = tpu.matmul %52, %54, %cst_69 {dimension_numbers = #tpu.dot_dimension_numbers<[1], [0], [0], [1], [0, 0, 1, 1], [], []>} : vector<128x128xbf16>, vector<128x128xbf16>, vector<128x128xf32> -> vector<128x128xf32>
    %56 = arith.addf %49, %55 : vector<128x128xf32>
    %c0_70 = arith.constant 0 : index
    %c2_71 = arith.constant 2 : index
    %c2_72 = arith.constant 2 : index
    %c0_73 = arith.constant 0 : index
    %57 = vector.load %arg1[%c0_70, %c2_71, %c2_72, %c0_73] : memref<1x18x18x128xbf16, #tpu.memory_space<vmem>>, vector<1x8x16x128xbf16>
    %58 = vector.shape_cast %57 : vector<1x8x16x128xbf16> to vector<8x16x128xbf16>
    %59 = vector.shape_cast %58 : vector<8x16x128xbf16> to vector<128x128xbf16>
    %c2_74 = arith.constant 2 : index
    %c2_75 = arith.constant 2 : index
    %c0_76 = arith.constant 0 : index
    %c0_77 = arith.constant 0 : index
    %60 = vector.load %arg2[%c2_74, %c2_75, %c0_76, %c0_77] : memref<3x3x128x128xbf16, #tpu.memory_space<vmem>>, vector<1x1x128x128xbf16>
    %61 = vector.shape_cast %60 : vector<1x1x128x128xbf16> to vector<128x128xbf16>
    %cst_78 = arith.constant dense<0.000000e+00> : vector<128x128xf32>
    %62 = tpu.matmul %59, %61, %cst_78 {dimension_numbers = #tpu.dot_dimension_numbers<[1], [0], [0], [1], [0, 0, 1, 1], [], []>} : vector<128x128xbf16>, vector<128x128xbf16>, vector<128x128xf32> -> vector<128x128xf32>
    %63 = arith.addf %56, %62 : vector<128x128xf32>
    %cst_79 = arith.constant dense<0.000000e+00> : vector<128xf32>
    %64 = vector.multi_reduction <add>, %63, %cst_79 [0] : vector<128x128xf32> to vector<128xf32>
    %65 = vector.shape_cast %64 : vector<128xf32> to vector<1x128xf32>
    %66 = arith.addf %0, %65 : vector<1x128xf32>
    %67 = arith.mulf %63, %63 : vector<128x128xf32>
    %cst_80 = arith.constant dense<0.000000e+00> : vector<128xf32>
    %68 = vector.multi_reduction <add>, %67, %cst_80 [0] : vector<128x128xf32> to vector<128xf32>
    %69 = vector.shape_cast %68 : vector<128xf32> to vector<1x128xf32>
    %70 = arith.addf %1, %69 : vector<1x128xf32>
    %71 = vector.shape_cast %63 : vector<128x128xf32> to vector<8x16x128xf32>
    %72 = arith.truncf %71 : vector<8x16x128xf32> to vector<8x16x128xbf16>
    %c0_81 = arith.constant 0 : index
    %c0_82 = arith.constant 0 : index
    %c0_83 = arith.constant 0 : index
    %c0_84 = arith.constant 0 : index
    %73 = vector.load %arg4[%c0_81, %c0_82, %c0_83, %c0_84] : memref<1x16x16x128xbf16, #tpu.memory_space<vmem>>, vector<1x8x16x128xbf16>
    %74 = vector.shape_cast %73 : vector<1x8x16x128xbf16> to vector<8x16x128xbf16>
    %75 = vector.shape_cast %72 : vector<8x16x128xbf16> to vector<1x8x16x128xbf16>
    tpu.vector_store %arg4[%c0_81, %c0_82, %c0_83, %c0_84], %75 {strides = array<i32>} : memref<1x16x16x128xbf16, #tpu.memory_space<vmem>>, vector<1x8x16x128xbf16>,
    %c0_85 = arith.constant 0 : index
    %c8 = arith.constant 8 : index
    %c0_86 = arith.constant 0 : index
    %c0_87 = arith.constant 0 : index
    %76 = vector.load %arg1[%c0_85, %c8, %c0_86, %c0_87] : memref<1x18x18x128xbf16, #tpu.memory_space<vmem>>, vector<1x8x16x128xbf16>
    %77 = vector.shape_cast %76 : vector<1x8x16x128xbf16> to vector<8x16x128xbf16>
    %78 = vector.shape_cast %77 : vector<8x16x128xbf16> to vector<128x128xbf16>
    %c0_88 = arith.constant 0 : index
    %c0_89 = arith.constant 0 : index
    %c0_90 = arith.constant 0 : index
    %c0_91 = arith.constant 0 : index
    %79 = vector.load %arg2[%c0_88, %c0_89, %c0_90, %c0_91] : memref<3x3x128x128xbf16, #tpu.memory_space<vmem>>, vector<1x1x128x128xbf16>
    %80 = vector.shape_cast %79 : vector<1x1x128x128xbf16> to vector<128x128xbf16>
    %cst_92 = arith.constant dense<0.000000e+00> : vector<128x128xf32>
    %81 = tpu.matmul %78, %80, %cst_92 {dimension_numbers = #tpu.dot_dimension_numbers<[1], [0], [0], [1], [0, 0, 1, 1], [], []>} : vector<128x128xbf16>, vector<128x128xbf16>, vector<128x128xf32> -> vector<128x128xf32>
    %c0_93 = arith.constant 0 : index
    %c8_94 = arith.constant 8 : index
    %c1_95 = arith.constant 1 : index
    %c0_96 = arith.constant 0 : index
    %82 = vector.load %arg1[%c0_93, %c8_94, %c1_95, %c0_96] : memref<1x18x18x128xbf16, #tpu.memory_space<vmem>>, vector<1x8x16x128xbf16>
    %83 = vector.shape_cast %82 : vector<1x8x16x128xbf16> to vector<8x16x128xbf16>
    %84 = vector.shape_cast %83 : vector<8x16x128xbf16> to vector<128x128xbf16>
    %c0_97 = arith.constant 0 : index
    %c1_98 = arith.constant 1 : index
    %c0_99 = arith.constant 0 : index
    %c0_100 = arith.constant 0 : index
    %85 = vector.load %arg2[%c0_97, %c1_98, %c0_99, %c0_100] : memref<3x3x128x128xbf16, #tpu.memory_space<vmem>>, vector<1x1x128x128xbf16>
    %86 = vector.shape_cast %85 : vector<1x1x128x128xbf16> to vector<128x128xbf16>
    %cst_101 = arith.constant dense<0.000000e+00> : vector<128x128xf32>
    %87 = tpu.matmul %84, %86, %cst_101 {dimension_numbers = #tpu.dot_dimension_numbers<[1], [0], [0], [1], [0, 0, 1, 1], [], []>} : vector<128x128xbf16>, vector<128x128xbf16>, vector<128x128xf32> -> vector<128x128xf32>
    %88 = arith.addf %81, %87 : vector<128x128xf32>
    %c0_102 = arith.constant 0 : index
    %c8_103 = arith.constant 8 : index
    %c2_104 = arith.constant 2 : index
    %c0_105 = arith.constant 0 : index
    %89 = vector.load %arg1[%c0_102, %c8_103, %c2_104, %c0_105] : memref<1x18x18x128xbf16, #tpu.memory_space<vmem>>, vector<1x8x16x128xbf16>
    %90 = vector.shape_cast %89 : vector<1x8x16x128xbf16> to vector<8x16x128xbf16>
    %91 = vector.shape_cast %90 : vector<8x16x128xbf16> to vector<128x128xbf16>
    %c0_106 = arith.constant 0 : index
    %c2_107 = arith.constant 2 : index
    %c0_108 = arith.constant 0 : index
    %c0_109 = arith.constant 0 : index
    %92 = vector.load %arg2[%c0_106, %c2_107, %c0_108, %c0_109] : memref<3x3x128x128xbf16, #tpu.memory_space<vmem>>, vector<1x1x128x128xbf16>
    %93 = vector.shape_cast %92 : vector<1x1x128x128xbf16> to vector<128x128xbf16>
    %cst_110 = arith.constant dense<0.000000e+00> : vector<128x128xf32>
    %94 = tpu.matmul %91, %93, %cst_110 {dimension_numbers = #tpu.dot_dimension_numbers<[1], [0], [0], [1], [0, 0, 1, 1], [], []>} : vector<128x128xbf16>, vector<128x128xbf16>, vector<128x128xf32> -> vector<128x128xf32>
    %95 = arith.addf %88, %94 : vector<128x128xf32>
    %c0_111 = arith.constant 0 : index
    %c9 = arith.constant 9 : index
    %c0_112 = arith.constant 0 : index
    %c0_113 = arith.constant 0 : index
    %96 = vector.load %arg1[%c0_111, %c9, %c0_112, %c0_113] : memref<1x18x18x128xbf16, #tpu.memory_space<vmem>>, vector<1x8x16x128xbf16>
    %97 = vector.shape_cast %96 : vector<1x8x16x128xbf16> to vector<8x16x128xbf16>
    %98 = vector.shape_cast %97 : vector<8x16x128xbf16> to vector<128x128xbf16>
    %c1_114 = arith.constant 1 : index
    %c0_115 = arith.constant 0 : index
    %c0_116 = arith.constant 0 : index
    %c0_117 = arith.constant 0 : index
    %99 = vector.load %arg2[%c1_114, %c0_115, %c0_116, %c0_117] : memref<3x3x128x128xbf16, #tpu.memory_space<vmem>>, vector<1x1x128x128xbf16>
    %100 = vector.shape_cast %99 : vector<1x1x128x128xbf16> to vector<128x128xbf16>
    %cst_118 = arith.constant dense<0.000000e+00> : vector<128x128xf32>
    %101 = tpu.matmul %98, %100, %cst_118 {dimension_numbers = #tpu.dot_dimension_numbers<[1], [0], [0], [1], [0, 0, 1, 1], [], []>} : vector<128x128xbf16>, vector<128x128xbf16>, vector<128x128xf32> -> vector<128x128xf32>
    %102 = arith.addf %95, %101 : vector<128x128xf32>
    %c0_119 = arith.constant 0 : index
    %c9_120 = arith.constant 9 : index
    %c1_121 = arith.constant 1 : index
    %c0_122 = arith.constant 0 : index
    %103 = vector.load %arg1[%c0_119, %c9_120, %c1_121, %c0_122] : memref<1x18x18x128xbf16, #tpu.memory_space<vmem>>, vector<1x8x16x128xbf16>
    %104 = vector.shape_cast %103 : vector<1x8x16x128xbf16> to vector<8x16x128xbf16>
    %105 = vector.shape_cast %104 : vector<8x16x128xbf16> to vector<128x128xbf16>
    %c1_123 = arith.constant 1 : index
    %c1_124 = arith.constant 1 : index
    %c0_125 = arith.constant 0 : index
    %c0_126 = arith.constant 0 : index
    %106 = vector.load %arg2[%c1_123, %c1_124, %c0_125, %c0_126] : memref<3x3x128x128xbf16, #tpu.memory_space<vmem>>, vector<1x1x128x128xbf16>
    %107 = vector.shape_cast %106 : vector<1x1x128x128xbf16> to vector<128x128xbf16>
    %cst_127 = arith.constant dense<0.000000e+00> : vector<128x128xf32>
    %108 = tpu.matmul %105, %107, %cst_127 {dimension_numbers = #tpu.dot_dimension_numbers<[1], [0], [0], [1], [0, 0, 1, 1], [], []>} : vector<128x128xbf16>, vector<128x128xbf16>, vector<128x128xf32> -> vector<128x128xf32>
    %109 = arith.addf %102, %108 : vector<128x128xf32>
    %c0_128 = arith.constant 0 : index
    %c9_129 = arith.constant 9 : index
    %c2_130 = arith.constant 2 : index
    %c0_131 = arith.constant 0 : index
    %110 = vector.load %arg1[%c0_128, %c9_129, %c2_130, %c0_131] : memref<1x18x18x128xbf16, #tpu.memory_space<vmem>>, vector<1x8x16x128xbf16>
    %111 = vector.shape_cast %110 : vector<1x8x16x128xbf16> to vector<8x16x128xbf16>
    %112 = vector.shape_cast %111 : vector<8x16x128xbf16> to vector<128x128xbf16>
    %c1_132 = arith.constant 1 : index
    %c2_133 = arith.constant 2 : index
    %c0_134 = arith.constant 0 : index
    %c0_135 = arith.constant 0 : index
    %113 = vector.load %arg2[%c1_132, %c2_133, %c0_134, %c0_135] : memref<3x3x128x128xbf16, #tpu.memory_space<vmem>>, vector<1x1x128x128xbf16>
    %114 = vector.shape_cast %113 : vector<1x1x128x128xbf16> to vector<128x128xbf16>
    %cst_136 = arith.constant dense<0.000000e+00> : vector<128x128xf32>
    %115 = tpu.matmul %112, %114, %cst_136 {dimension_numbers = #tpu.dot_dimension_numbers<[1], [0], [0], [1], [0, 0, 1, 1], [], []>} : vector<128x128xbf16>, vector<128x128xbf16>, vector<128x128xf32> -> vector<128x128xf32>
    %116 = arith.addf %109, %115 : vector<128x128xf32>
    %c0_137 = arith.constant 0 : index
    %c10 = arith.constant 10 : index
    %c0_138 = arith.constant 0 : index
    %c0_139 = arith.constant 0 : index
    %117 = vector.load %arg1[%c0_137, %c10, %c0_138, %c0_139] : memref<1x18x18x128xbf16, #tpu.memory_space<vmem>>, vector<1x8x16x128xbf16>
    %118 = vector.shape_cast %117 : vector<1x8x16x128xbf16> to vector<8x16x128xbf16>
    %119 = vector.shape_cast %118 : vector<8x16x128xbf16> to vector<128x128xbf16>
    %c2_140 = arith.constant 2 : index
    %c0_141 = arith.constant 0 : index
    %c0_142 = arith.constant 0 : index
    %c0_143 = arith.constant 0 : index
    %120 = vector.load %arg2[%c2_140, %c0_141, %c0_142, %c0_143] : memref<3x3x128x128xbf16, #tpu.memory_space<vmem>>, vector<1x1x128x128xbf16>
    %121 = vector.shape_cast %120 : vector<1x1x128x128xbf16> to vector<128x128xbf16>
    %cst_144 = arith.constant dense<0.000000e+00> : vector<128x128xf32>
    %122 = tpu.matmul %119, %121, %cst_144 {dimension_numbers = #tpu.dot_dimension_numbers<[1], [0], [0], [1], [0, 0, 1, 1], [], []>} : vector<128x128xbf16>, vector<128x128xbf16>, vector<128x128xf32> -> vector<128x128xf32>
    %123 = arith.addf %116, %122 : vector<128x128xf32>
    %c0_145 = arith.constant 0 : index
    %c10_146 = arith.constant 10 : index
    %c1_147 = arith.constant 1 : index
    %c0_148 = arith.constant 0 : index
    %124 = vector.load %arg1[%c0_145, %c10_146, %c1_147, %c0_148] : memref<1x18x18x128xbf16, #tpu.memory_space<vmem>>, vector<1x8x16x128xbf16>
    %125 = vector.shape_cast %124 : vector<1x8x16x128xbf16> to vector<8x16x128xbf16>
    %126 = vector.shape_cast %125 : vector<8x16x128xbf16> to vector<128x128xbf16>
    %c2_149 = arith.constant 2 : index
    %c1_150 = arith.constant 1 : index
    %c0_151 = arith.constant 0 : index
    %c0_152 = arith.constant 0 : index
    %127 = vector.load %arg2[%c2_149, %c1_150, %c0_151, %c0_152] : memref<3x3x128x128xbf16, #tpu.memory_space<vmem>>, vector<1x1x128x128xbf16>
    %128 = vector.shape_cast %127 : vector<1x1x128x128xbf16> to vector<128x128xbf16>
    %cst_153 = arith.constant dense<0.000000e+00> : vector<128x128xf32>
    %129 = tpu.matmul %126, %128, %cst_153 {dimension_numbers = #tpu.dot_dimension_numbers<[1], [0], [0], [1], [0, 0, 1, 1], [], []>} : vector<128x128xbf16>, vector<128x128xbf16>, vector<128x128xf32> -> vector<128x128xf32>
    %130 = arith.addf %123, %129 : vector<128x128xf32>
    %c0_154 = arith.constant 0 : index
    %c10_155 = arith.constant 10 : index
    %c2_156 = arith.constant 2 : index
    %c0_157 = arith.constant 0 : index
    %131 = vector.load %arg1[%c0_154, %c10_155, %c2_156, %c0_157] : memref<1x18x18x128xbf16, #tpu.memory_space<vmem>>, vector<1x8x16x128xbf16>
    %132 = vector.shape_cast %131 : vector<1x8x16x128xbf16> to vector<8x16x128xbf16>
    %133 = vector.shape_cast %132 : vector<8x16x128xbf16> to vector<128x128xbf16>
    %c2_158 = arith.constant 2 : index
    %c2_159 = arith.constant 2 : index
    %c0_160 = arith.constant 0 : index
    %c0_161 = arith.constant 0 : index
    %134 = vector.load %arg2[%c2_158, %c2_159, %c0_160, %c0_161] : memref<3x3x128x128xbf16, #tpu.memory_space<vmem>>, vector<1x1x128x128xbf16>
    %135 = vector.shape_cast %134 : vector<1x1x128x128xbf16> to vector<128x128xbf16>
    %cst_162 = arith.constant dense<0.000000e+00> : vector<128x128xf32>
    %136 = tpu.matmul %133, %135, %cst_162 {dimension_numbers = #tpu.dot_dimension_numbers<[1], [0], [0], [1], [0, 0, 1, 1], [], []>} : vector<128x128xbf16>, vector<128x128xbf16>, vector<128x128xf32> -> vector<128x128xf32>
    %137 = arith.addf %130, %136 : vector<128x128xf32>
    %cst_163 = arith.constant dense<0.000000e+00> : vector<128xf32>
    %138 = vector.multi_reduction <add>, %137, %cst_163 [0] : vector<128x128xf32> to vector<128xf32>
    %139 = vector.shape_cast %138 : vector<128xf32> to vector<1x128xf32>
    %140 = arith.addf %66, %139 : vector<1x128xf32>
    %141 = arith.mulf %137, %137 : vector<128x128xf32>
    %cst_164 = arith.constant dense<0.000000e+00> : vector<128xf32>
    %142 = vector.multi_reduction <add>, %141, %cst_164 [0] : vector<128x128xf32> to vector<128xf32>
    %143 = vector.shape_cast %142 : vector<128xf32> to vector<1x128xf32>
    %144 = arith.addf %70, %143 : vector<1x128xf32>
    %145 = vector.shape_cast %137 : vector<128x128xf32> to vector<8x16x128xf32>
    %146 = arith.truncf %145 : vector<8x16x128xf32> to vector<8x16x128xbf16>
    %c0_165 = arith.constant 0 : index
    %c8_166 = arith.constant 8 : index
    %c0_167 = arith.constant 0 : index
    %c0_168 = arith.constant 0 : index
    %147 = vector.load %arg4[%c0_165, %c8_166, %c0_167, %c0_168] : memref<1x16x16x128xbf16, #tpu.memory_space<vmem>>, vector<1x8x16x128xbf16>
    %148 = vector.shape_cast %147 : vector<1x8x16x128xbf16> to vector<8x16x128xbf16>
    %149 = vector.shape_cast %146 : vector<8x16x128xbf16> to vector<1x8x16x128xbf16>
    tpu.vector_store %arg4[%c0_165, %c8_166, %c0_167, %c0_168], %149 {strides = array<i32>} : memref<1x16x16x128xbf16, #tpu.memory_space<vmem>>, vector<1x8x16x128xbf16>,
    %150 = tpu.concatenate %140, %144 in 0 : vector<1x128xf32>, vector<1x128xf32> -> vector<2x128xf32>
    %c0_169 = arith.constant 0 : index
    %c0_170 = arith.constant 0 : index
    %c0_171 = arith.constant 0 : index
    %151 = vector.load %arg6[%c0_169, %c0_170, %c0_171] : memref<1x2x128xf32, #tpu.memory_space<vmem>>, vector<1x2x128xf32>
    %152 = vector.shape_cast %151 : vector<1x2x128xf32> to vector<2x128xf32>
    %153 = vector.shape_cast %150 : vector<2x128xf32> to vector<1x2x128xf32>
    tpu.vector_store %arg6[%c0_169, %c0_170, %c0_171], %153 {strides = array<i32>} : memref<1x2x128xf32, #tpu.memory_space<vmem>>, vector<1x2x128xf32>,
    %cst_172 = arith.constant 0.000000e+00 : f32
    %154 = vector.broadcast %cst_172 : f32 to vector<1x128xf32>
    %cst_173 = arith.constant 0.000000e+00 : f32
    %155 = vector.broadcast %cst_173 : f32 to vector<1x128xf32>
    %c0_174 = arith.constant 0 : index
    %c1_175 = arith.constant 1 : index
    %c1_176 = arith.constant 1 : index
    %c0_177 = arith.constant 0 : index
    %156 = vector.load %arg1[%c0_174, %c1_175, %c1_176, %c0_177] : memref<1x18x18x128xbf16, #tpu.memory_space<vmem>>, vector<1x16x16x128xbf16>
    %157 = vector.shape_cast %156 : vector<1x16x16x128xbf16> to vector<16x16x128xbf16>
    %158 = vector.shape_cast %157 : vector<16x16x128xbf16> to vector<256x128xbf16>
    %c0_178 = arith.constant 0 : index
    %c0_179 = arith.constant 0 : index
    %159 = vector.load %arg3[%c0_178, %c0_179] : memref<128x128xbf16, #tpu.memory_space<vmem>>, vector<128x128xbf16>
    %cst_180 = arith.constant dense<0.000000e+00> : vector<256x128xf32>
    %160 = tpu.matmul %158, %159, %cst_180 {dimension_numbers = #tpu.dot_dimension_numbers<[1], [0], [0], [1], [0, 0, 1, 1], [], []>} : vector<256x128xbf16>, vector<128x128xbf16>, vector<256x128xf32> -> vector<256x128xf32>
    %cst_181 = arith.constant dense<0.000000e+00> : vector<128xf32>
    %161 = vector.multi_reduction <add>, %160, %cst_181 [0] : vector<256x128xf32> to vector<128xf32>
    %162 = vector.shape_cast %161 : vector<128xf32> to vector<1x128xf32>
    %163 = arith.addf %154, %162 : vector<1x128xf32>
    %164 = arith.mulf %160, %160 : vector<256x128xf32>
    %cst_182 = arith.constant dense<0.000000e+00> : vector<128xf32>
    %165 = vector.multi_reduction <add>, %164, %cst_182 [0] : vector<256x128xf32> to vector<128xf32>
    %166 = vector.shape_cast %165 : vector<128xf32> to vector<1x128xf32>
    %167 = arith.addf %155, %166 : vector<1x128xf32>
    %168 = vector.shape_cast %160 : vector<256x128xf32> to vector<16x16x128xf32>
    %169 = arith.truncf %168 : vector<16x16x128xf32> to vector<16x16x128xbf16>
    %c0_183 = arith.constant 0 : index
    %c0_184 = arith.constant 0 : index
    %c0_185 = arith.constant 0 : index
    %c0_186 = arith.constant 0 : index
    %170 = vector.load %arg5[%c0_183, %c0_184, %c0_185, %c0_186] : memref<1x16x16x128xbf16, #tpu.memory_space<vmem>>, vector<1x16x16x128xbf16>
    %171 = vector.shape_cast %170 : vector<1x16x16x128xbf16> to vector<16x16x128xbf16>
    %172 = vector.shape_cast %169 : vector<16x16x128xbf16> to vector<1x16x16x128xbf16>
    tpu.vector_store %arg5[%c0_183, %c0_184, %c0_185, %c0_186], %172 {strides = array<i32>} : memref<1x16x16x128xbf16, #tpu.memory_space<vmem>>, vector<1x16x16x128xbf16>,
    %173 = tpu.concatenate %163, %167 in 0 : vector<1x128xf32>, vector<1x128xf32> -> vector<2x128xf32>
    %c0_187 = arith.constant 0 : index
    %c0_188 = arith.constant 0 : index
    %c0_189 = arith.constant 0 : index
    %174 = vector.load %arg7[%c0_187, %c0_188, %c0_189] : memref<1x2x128xf32, #tpu.memory_space<vmem>>, vector<1x2x128xf32>
    %175 = vector.shape_cast %174 : vector<1x2x128xf32> to vector<2x128xf32>
    %176 = vector.shape_cast %173 : vector<2x128xf32> to vector<1x2x128xf32>
    tpu.vector_store %arg7[%c0_187, %c0_188, %c0_189], %176 {strides = array<i32>} : memref<1x2x128xf32, #tpu.memory_space<vmem>>, vector<1x2x128xf32>,
    return
  }
  func.func @transform_0(%arg0: i32) -> (i32, i32, i32, i32) {
    %c0_i32 = arith.constant 0 : i32
    %c0_i32_0 = arith.constant 0 : i32
    %c0_i32_1 = arith.constant 0 : i32
    %c0_i32_2 = arith.constant 0 : i32
    return %arg0, %c0_i32, %c0_i32_0, %c0_i32_1 : i32, i32, i32, i32
  }
  func.func @transform_1(%arg0: i32) -> (i32, i32, i32, i32) {
    %c0_i32 = arith.constant 0 : i32
    %c0_i32_0 = arith.constant 0 : i32
    %c0_i32_1 = arith.constant 0 : i32
    %c0_i32_2 = arith.constant 0 : i32
    %c0_i32_3 = arith.constant 0 : i32
    return %c0_i32, %c0_i32_0, %c0_i32_1, %c0_i32_2 : i32, i32, i32, i32
  }
  func.func @transform_2(%arg0: i32) -> (i32, i32) {
    %c0_i32 = arith.constant 0 : i32
    %c0_i32_0 = arith.constant 0 : i32
    %c0_i32_1 = arith.constant 0 : i32
    return %c0_i32, %c0_i32_0 : i32, i32
  }
  func.func @transform_3(%arg0: i32) -> (i32, i32, i32, i32) {
    %c0_i32 = arith.constant 0 : i32
    %c0_i32_0 = arith.constant 0 : i32
    %c0_i32_1 = arith.constant 0 : i32
    %c0_i32_2 = arith.constant 0 : i32
    return %arg0, %c0_i32, %c0_i32_0, %c0_i32_1 : i32, i32, i32, i32
  }
  func.func @transform_4(%arg0: i32) -> (i32, i32, i32, i32) {
    %c0_i32 = arith.constant 0 : i32
    %c0_i32_0 = arith.constant 0 : i32
    %c0_i32_1 = arith.constant 0 : i32
    %c0_i32_2 = arith.constant 0 : i32
    return %arg0, %c0_i32, %c0_i32_0, %c0_i32_1 : i32, i32, i32, i32
  }
  func.func @transform_5(%arg0: i32) -> (i32, i32, i32) {
    %c0_i32 = arith.constant 0 : i32
    %c0_i32_0 = arith.constant 0 : i32
    %c0_i32_1 = arith.constant 0 : i32
    return %arg0, %c0_i32, %c0_i32_0 : i32, i32, i32
  }
  func.func @transform_6(%arg0: i32) -> (i32, i32, i32) {
    %c0_i32 = arith.constant 0 : i32
    %c0_i32_0 = arith.constant 0 : i32
    %c0_i32_1 = arith.constant 0 : i32
    return %arg0, %c0_i32, %c0_i32_0 : i32, i32, i32
  }
}

module attributes {stable_mosaic.version = 11 : i64} {
  func.func @_stage3_kernel(%arg0: i32, %arg1: memref<1x16x16x128xbf16, #tpu.memory_space<vmem>>, %arg2: memref<1x128xf32, #tpu.memory_space<vmem>>, %arg3: memref<1x128xf32, #tpu.memory_space<vmem>>, %arg4: memref<1x16x16x128xbf16, #tpu.memory_space<vmem>>, %arg5: memref<1x128xf32, #tpu.memory_space<vmem>>, %arg6: memref<1x128xf32, #tpu.memory_space<vmem>>, %arg7: memref<1x16x16x128xf32, #tpu.memory_space<vmem>>) attributes {dimension_semantics = [#tpu.dimension_semantics<parallel>], iteration_bounds = array<i64: 2>, scalar_prefetch = 0 : i64, scratch_operands = 0 : i64, tpu.core_type = #tpu.core_type<tc>, window_params = [{transform_indices = @transform_0, window_bounds = array<i64: 1, 16, 16, 128>}, {pipeline_mode = #tpu.pipeline_mode<synchronous>, transform_indices = @transform_1, window_bounds = array<i64: 1, 128>}, {pipeline_mode = #tpu.pipeline_mode<synchronous>, transform_indices = @transform_2, window_bounds = array<i64: 1, 128>}, {transform_indices = @transform_3, window_bounds = array<i64: 1, 16, 16, 128>}, {pipeline_mode = #tpu.pipeline_mode<synchronous>, transform_indices = @transform_4, window_bounds = array<i64: 1, 128>}, {pipeline_mode = #tpu.pipeline_mode<synchronous>, transform_indices = @transform_5, window_bounds = array<i64: 1, 128>}, {transform_indices = @transform_6, window_bounds = array<i64: 1, 16, 16, 128>}]} {
    %c0 = arith.constant 0 : index
    %c0_0 = arith.constant 0 : index
    %c0_1 = arith.constant 0 : index
    %c0_2 = arith.constant 0 : index
    %0 = vector.load %arg1[%c0, %c0_0, %c0_1, %c0_2] : memref<1x16x16x128xbf16, #tpu.memory_space<vmem>>, vector<1x16x16x128xbf16>
    %1 = arith.extf %0 : vector<1x16x16x128xbf16> to vector<1x16x16x128xf32>
    %c0_3 = arith.constant 0 : index
    %c0_4 = arith.constant 0 : index
    %2 = vector.load %arg2[%c0_3, %c0_4] : memref<1x128xf32, #tpu.memory_space<vmem>>, vector<1x128xf32>
    %3 = vector.shape_cast %2 : vector<1x128xf32> to vector<1x1x1x128xf32>
    %4 = vector.broadcast %3 : vector<1x1x1x128xf32> to vector<1x16x16x128xf32>
    %5 = arith.mulf %1, %4 : vector<1x16x16x128xf32>
    %c0_5 = arith.constant 0 : index
    %c0_6 = arith.constant 0 : index
    %6 = vector.load %arg3[%c0_5, %c0_6] : memref<1x128xf32, #tpu.memory_space<vmem>>, vector<1x128xf32>
    %7 = vector.shape_cast %6 : vector<1x128xf32> to vector<1x1x1x128xf32>
    %8 = vector.broadcast %7 : vector<1x1x1x128xf32> to vector<1x16x16x128xf32>
    %9 = arith.addf %5, %8 : vector<1x16x16x128xf32>
    %c0_7 = arith.constant 0 : index
    %c0_8 = arith.constant 0 : index
    %c0_9 = arith.constant 0 : index
    %c0_10 = arith.constant 0 : index
    %10 = vector.load %arg4[%c0_7, %c0_8, %c0_9, %c0_10] : memref<1x16x16x128xbf16, #tpu.memory_space<vmem>>, vector<1x16x16x128xbf16>
    %11 = arith.extf %10 : vector<1x16x16x128xbf16> to vector<1x16x16x128xf32>
    %c0_11 = arith.constant 0 : index
    %c0_12 = arith.constant 0 : index
    %12 = vector.load %arg5[%c0_11, %c0_12] : memref<1x128xf32, #tpu.memory_space<vmem>>, vector<1x128xf32>
    %13 = vector.shape_cast %12 : vector<1x128xf32> to vector<1x1x1x128xf32>
    %14 = vector.broadcast %13 : vector<1x1x1x128xf32> to vector<1x16x16x128xf32>
    %15 = arith.mulf %11, %14 : vector<1x16x16x128xf32>
    %c0_13 = arith.constant 0 : index
    %c0_14 = arith.constant 0 : index
    %16 = vector.load %arg6[%c0_13, %c0_14] : memref<1x128xf32, #tpu.memory_space<vmem>>, vector<1x128xf32>
    %17 = vector.shape_cast %16 : vector<1x128xf32> to vector<1x1x1x128xf32>
    %18 = vector.broadcast %17 : vector<1x1x1x128xf32> to vector<1x16x16x128xf32>
    %19 = arith.addf %15, %18 : vector<1x16x16x128xf32>
    %20 = arith.addf %9, %19 : vector<1x16x16x128xf32>
    %cst = arith.constant 0.000000e+00 : f32
    %21 = vector.broadcast %cst : f32 to vector<1x16x16x128xf32>
    %22 = arith.maximumf %20, %21 : vector<1x16x16x128xf32>
    %c0_15 = arith.constant 0 : index
    %c0_16 = arith.constant 0 : index
    %c0_17 = arith.constant 0 : index
    %c0_18 = arith.constant 0 : index
    %23 = vector.load %arg7[%c0_15, %c0_16, %c0_17, %c0_18] : memref<1x16x16x128xf32, #tpu.memory_space<vmem>>, vector<1x16x16x128xf32>
    tpu.vector_store %arg7[%c0_15, %c0_16, %c0_17, %c0_18], %22 {strides = array<i32>} : memref<1x16x16x128xf32, #tpu.memory_space<vmem>>, vector<1x16x16x128xf32>,
    return
  }
  func.func @transform_0(%arg0: i32) -> (i32, i32, i32, i32) {
    %c0_i32 = arith.constant 0 : i32
    %c0_i32_0 = arith.constant 0 : i32
    %c0_i32_1 = arith.constant 0 : i32
    %c0_i32_2 = arith.constant 0 : i32
    return %arg0, %c0_i32, %c0_i32_0, %c0_i32_1 : i32, i32, i32, i32
  }
  func.func @transform_1(%arg0: i32) -> (i32, i32) {
    %c0_i32 = arith.constant 0 : i32
    %c0_i32_0 = arith.constant 0 : i32
    %c0_i32_1 = arith.constant 0 : i32
    return %c0_i32, %c0_i32_0 : i32, i32
  }
  func.func @transform_2(%arg0: i32) -> (i32, i32) {
    %c0_i32 = arith.constant 0 : i32
    %c0_i32_0 = arith.constant 0 : i32
    %c0_i32_1 = arith.constant 0 : i32
    return %c0_i32, %c0_i32_0 : i32, i32
  }
  func.func @transform_3(%arg0: i32) -> (i32, i32, i32, i32) {
    %c0_i32 = arith.constant 0 : i32
    %c0_i32_0 = arith.constant 0 : i32
    %c0_i32_1 = arith.constant 0 : i32
    %c0_i32_2 = arith.constant 0 : i32
    return %arg0, %c0_i32, %c0_i32_0, %c0_i32_1 : i32, i32, i32, i32
  }
  func.func @transform_4(%arg0: i32) -> (i32, i32) {
    %c0_i32 = arith.constant 0 : i32
    %c0_i32_0 = arith.constant 0 : i32
    %c0_i32_1 = arith.constant 0 : i32
    return %c0_i32, %c0_i32_0 : i32, i32
  }
  func.func @transform_5(%arg0: i32) -> (i32, i32) {
    %c0_i32 = arith.constant 0 : i32
    %c0_i32_0 = arith.constant 0 : i32
    %c0_i32_1 = arith.constant 0 : i32
    return %c0_i32, %c0_i32_0 : i32, i32
  }
  func.func @transform_6(%arg0: i32) -> (i32, i32, i32, i32) {
    %c0_i32 = arith.constant 0 : i32
    %c0_i32_0 = arith.constant 0 : i32
    %c0_i32_1 = arith.constant 0 : i32
    %c0_i32_2 = arith.constant 0 : i32
    return %arg0, %c0_i32, %c0_i32_0, %c0_i32_1 : i32, i32, i32, i32
  }
}

module attributes {stable_mosaic.version = 11 : i64} {
  func.func @_stage2_kernel(%arg0: i32, %arg1: memref<1x16x16x128xbf16, #tpu.memory_space<vmem>>, %arg2: memref<1x128xf32, #tpu.memory_space<vmem>>, %arg3: memref<1x128xf32, #tpu.memory_space<vmem>>, %arg4: memref<3x3x128x128xbf16, #tpu.memory_space<vmem>>, %arg5: memref<1x16x16x128xbf16, #tpu.memory_space<vmem>>, %arg6: memref<1x2x128xf32, #tpu.memory_space<vmem>>, %arg7: memref<1x18x18x128xbf16, #tpu.memory_space<vmem>>) attributes {dimension_semantics = [#tpu.dimension_semantics<parallel>], iteration_bounds = array<i64: 2>, scalar_prefetch = 0 : i64, scratch_operands = 1 : i64, tpu.core_type = #tpu.core_type<tc>, window_params = [{transform_indices = @transform_0, window_bounds = array<i64: 1, 16, 16, 128>}, {pipeline_mode = #tpu.pipeline_mode<synchronous>, transform_indices = @transform_1, window_bounds = array<i64: 1, 128>}, {pipeline_mode = #tpu.pipeline_mode<synchronous>, transform_indices = @transform_2, window_bounds = array<i64: 1, 128>}, {pipeline_mode = #tpu.pipeline_mode<synchronous>, transform_indices = @transform_3, window_bounds = array<i64: 3, 3, 128, 128>}, {transform_indices = @transform_4, window_bounds = array<i64: 1, 16, 16, 128>}, {transform_indices = @transform_5, window_bounds = array<i64: 1, 2, 128>}]} {
    %c0 = arith.constant 0 : index
    %c0_0 = arith.constant 0 : index
    %0 = vector.load %arg2[%c0, %c0_0] : memref<1x128xf32, #tpu.memory_space<vmem>>, vector<1x128xf32>
    %c0_1 = arith.constant 0 : index
    %c0_2 = arith.constant 0 : index
    %1 = vector.load %arg3[%c0_1, %c0_2] : memref<1x128xf32, #tpu.memory_space<vmem>>, vector<1x128xf32>
    %cst = arith.constant 0.000000e+00 : bf16
    %2 = vector.broadcast %cst : bf16 to vector<1x1x18x128xbf16>
    %c0_3 = arith.constant 0 : index
    %c0_4 = arith.constant 0 : index
    %c0_5 = arith.constant 0 : index
    %c0_6 = arith.constant 0 : index
    %3 = vector.load %arg7[%c0_3, %c0_4, %c0_5, %c0_6] : memref<1x18x18x128xbf16, #tpu.memory_space<vmem>>, vector<1x1x18x128xbf16>
    tpu.vector_store %arg7[%c0_3, %c0_4, %c0_5, %c0_6], %2 {strides = array<i32>} : memref<1x18x18x128xbf16, #tpu.memory_space<vmem>>, vector<1x1x18x128xbf16>,
    %c0_7 = arith.constant 0 : index
    %c17 = arith.constant 17 : index
    %c0_8 = arith.constant 0 : index
    %c0_9 = arith.constant 0 : index
    %4 = vector.load %arg7[%c0_7, %c17, %c0_8, %c0_9] : memref<1x18x18x128xbf16, #tpu.memory_space<vmem>>, vector<1x1x18x128xbf16>
    tpu.vector_store %arg7[%c0_7, %c17, %c0_8, %c0_9], %2 {strides = array<i32>} : memref<1x18x18x128xbf16, #tpu.memory_space<vmem>>, vector<1x1x18x128xbf16>,
    %cst_10 = arith.constant 0.000000e+00 : f32
    %5 = vector.broadcast %cst_10 : f32 to vector<16x1x128xf32>
    %c0_11 = arith.constant 0 : index
    %c0_12 = arith.constant 0 : index
    %c0_13 = arith.constant 0 : index
    %c0_14 = arith.constant 0 : index
    %6 = vector.load %arg1[%c0_11, %c0_12, %c0_13, %c0_14] : memref<1x16x16x128xbf16, #tpu.memory_space<vmem>>, vector<1x16x16x128xbf16>
    %7 = vector.shape_cast %6 : vector<1x16x16x128xbf16> to vector<16x16x128xbf16>
    %8 = arith.extf %7 : vector<16x16x128xbf16> to vector<16x16x128xf32>
    %9 = vector.shape_cast %0 : vector<1x128xf32> to vector<1x1x128xf32>
    %10 = vector.broadcast %9 : vector<1x1x128xf32> to vector<16x16x128xf32>
    %11 = arith.mulf %8, %10 : vector<16x16x128xf32>
    %12 = vector.shape_cast %1 : vector<1x128xf32> to vector<1x1x128xf32>
    %13 = vector.broadcast %12 : vector<1x1x128xf32> to vector<16x16x128xf32>
    %14 = arith.addf %11, %13 : vector<16x16x128xf32>
    %cst_15 = arith.constant 0.000000e+00 : f32
    %15 = vector.broadcast %cst_15 : f32 to vector<16x16x128xf32>
    %16 = arith.maximumf %14, %15 : vector<16x16x128xf32>
    %17 = tpu.concatenate %5, %16, %5 in 1 : vector<16x1x128xf32>, vector<16x16x128xf32>, vector<16x1x128xf32> -> vector<16x18x128xf32>
    %18 = arith.truncf %17 : vector<16x18x128xf32> to vector<16x18x128xbf16>
    %c0_16 = arith.constant 0 : index
    %c1 = arith.constant 1 : index
    %c0_17 = arith.constant 0 : index
    %c0_18 = arith.constant 0 : index
    %19 = vector.load %arg7[%c0_16, %c1, %c0_17, %c0_18] : memref<1x18x18x128xbf16, #tpu.memory_space<vmem>>, vector<1x16x18x128xbf16>
    %20 = vector.shape_cast %19 : vector<1x16x18x128xbf16> to vector<16x18x128xbf16>
    %21 = vector.shape_cast %18 : vector<16x18x128xbf16> to vector<1x16x18x128xbf16>
    tpu.vector_store %arg7[%c0_16, %c1, %c0_17, %c0_18], %21 {strides = array<i32>} : memref<1x18x18x128xbf16, #tpu.memory_space<vmem>>, vector<1x16x18x128xbf16>,
    %cst_19 = arith.constant 0.000000e+00 : f32
    %22 = vector.broadcast %cst_19 : f32 to vector<1x128xf32>
    %cst_20 = arith.constant 0.000000e+00 : f32
    %23 = vector.broadcast %cst_20 : f32 to vector<1x128xf32>
    %c0_21 = arith.constant 0 : index
    %c0_22 = arith.constant 0 : index
    %c0_23 = arith.constant 0 : index
    %c0_24 = arith.constant 0 : index
    %24 = vector.load %arg7[%c0_21, %c0_22, %c0_23, %c0_24] : memref<1x18x18x128xbf16, #tpu.memory_space<vmem>>, vector<1x8x16x128xbf16>
    %25 = vector.shape_cast %24 : vector<1x8x16x128xbf16> to vector<8x16x128xbf16>
    %26 = vector.shape_cast %25 : vector<8x16x128xbf16> to vector<128x128xbf16>
    %c0_25 = arith.constant 0 : index
    %c0_26 = arith.constant 0 : index
    %c0_27 = arith.constant 0 : index
    %c0_28 = arith.constant 0 : index
    %27 = vector.load %arg4[%c0_25, %c0_26, %c0_27, %c0_28] : memref<3x3x128x128xbf16, #tpu.memory_space<vmem>>, vector<1x1x128x128xbf16>
    %28 = vector.shape_cast %27 : vector<1x1x128x128xbf16> to vector<128x128xbf16>
    %cst_29 = arith.constant dense<0.000000e+00> : vector<128x128xf32>
    %29 = tpu.matmul %26, %28, %cst_29 {dimension_numbers = #tpu.dot_dimension_numbers<[1], [0], [0], [1], [0, 0, 1, 1], [], []>} : vector<128x128xbf16>, vector<128x128xbf16>, vector<128x128xf32> -> vector<128x128xf32>
    %c0_30 = arith.constant 0 : index
    %c0_31 = arith.constant 0 : index
    %c1_32 = arith.constant 1 : index
    %c0_33 = arith.constant 0 : index
    %30 = vector.load %arg7[%c0_30, %c0_31, %c1_32, %c0_33] : memref<1x18x18x128xbf16, #tpu.memory_space<vmem>>, vector<1x8x16x128xbf16>
    %31 = vector.shape_cast %30 : vector<1x8x16x128xbf16> to vector<8x16x128xbf16>
    %32 = vector.shape_cast %31 : vector<8x16x128xbf16> to vector<128x128xbf16>
    %c0_34 = arith.constant 0 : index
    %c1_35 = arith.constant 1 : index
    %c0_36 = arith.constant 0 : index
    %c0_37 = arith.constant 0 : index
    %33 = vector.load %arg4[%c0_34, %c1_35, %c0_36, %c0_37] : memref<3x3x128x128xbf16, #tpu.memory_space<vmem>>, vector<1x1x128x128xbf16>
    %34 = vector.shape_cast %33 : vector<1x1x128x128xbf16> to vector<128x128xbf16>
    %cst_38 = arith.constant dense<0.000000e+00> : vector<128x128xf32>
    %35 = tpu.matmul %32, %34, %cst_38 {dimension_numbers = #tpu.dot_dimension_numbers<[1], [0], [0], [1], [0, 0, 1, 1], [], []>} : vector<128x128xbf16>, vector<128x128xbf16>, vector<128x128xf32> -> vector<128x128xf32>
    %36 = arith.addf %29, %35 : vector<128x128xf32>
    %c0_39 = arith.constant 0 : index
    %c0_40 = arith.constant 0 : index
    %c2 = arith.constant 2 : index
    %c0_41 = arith.constant 0 : index
    %37 = vector.load %arg7[%c0_39, %c0_40, %c2, %c0_41] : memref<1x18x18x128xbf16, #tpu.memory_space<vmem>>, vector<1x8x16x128xbf16>
    %38 = vector.shape_cast %37 : vector<1x8x16x128xbf16> to vector<8x16x128xbf16>
    %39 = vector.shape_cast %38 : vector<8x16x128xbf16> to vector<128x128xbf16>
    %c0_42 = arith.constant 0 : index
    %c2_43 = arith.constant 2 : index
    %c0_44 = arith.constant 0 : index
    %c0_45 = arith.constant 0 : index
    %40 = vector.load %arg4[%c0_42, %c2_43, %c0_44, %c0_45] : memref<3x3x128x128xbf16, #tpu.memory_space<vmem>>, vector<1x1x128x128xbf16>
    %41 = vector.shape_cast %40 : vector<1x1x128x128xbf16> to vector<128x128xbf16>
    %cst_46 = arith.constant dense<0.000000e+00> : vector<128x128xf32>
    %42 = tpu.matmul %39, %41, %cst_46 {dimension_numbers = #tpu.dot_dimension_numbers<[1], [0], [0], [1], [0, 0, 1, 1], [], []>} : vector<128x128xbf16>, vector<128x128xbf16>, vector<128x128xf32> -> vector<128x128xf32>
    %43 = arith.addf %36, %42 : vector<128x128xf32>
    %c0_47 = arith.constant 0 : index
    %c1_48 = arith.constant 1 : index
    %c0_49 = arith.constant 0 : index
    %c0_50 = arith.constant 0 : index
    %44 = vector.load %arg7[%c0_47, %c1_48, %c0_49, %c0_50] : memref<1x18x18x128xbf16, #tpu.memory_space<vmem>>, vector<1x8x16x128xbf16>
    %45 = vector.shape_cast %44 : vector<1x8x16x128xbf16> to vector<8x16x128xbf16>
    %46 = vector.shape_cast %45 : vector<8x16x128xbf16> to vector<128x128xbf16>
    %c1_51 = arith.constant 1 : index
    %c0_52 = arith.constant 0 : index
    %c0_53 = arith.constant 0 : index
    %c0_54 = arith.constant 0 : index
    %47 = vector.load %arg4[%c1_51, %c0_52, %c0_53, %c0_54] : memref<3x3x128x128xbf16, #tpu.memory_space<vmem>>, vector<1x1x128x128xbf16>
    %48 = vector.shape_cast %47 : vector<1x1x128x128xbf16> to vector<128x128xbf16>
    %cst_55 = arith.constant dense<0.000000e+00> : vector<128x128xf32>
    %49 = tpu.matmul %46, %48, %cst_55 {dimension_numbers = #tpu.dot_dimension_numbers<[1], [0], [0], [1], [0, 0, 1, 1], [], []>} : vector<128x128xbf16>, vector<128x128xbf16>, vector<128x128xf32> -> vector<128x128xf32>
    %50 = arith.addf %43, %49 : vector<128x128xf32>
    %c0_56 = arith.constant 0 : index
    %c1_57 = arith.constant 1 : index
    %c1_58 = arith.constant 1 : index
    %c0_59 = arith.constant 0 : index
    %51 = vector.load %arg7[%c0_56, %c1_57, %c1_58, %c0_59] : memref<1x18x18x128xbf16, #tpu.memory_space<vmem>>, vector<1x8x16x128xbf16>
    %52 = vector.shape_cast %51 : vector<1x8x16x128xbf16> to vector<8x16x128xbf16>
    %53 = vector.shape_cast %52 : vector<8x16x128xbf16> to vector<128x128xbf16>
    %c1_60 = arith.constant 1 : index
    %c1_61 = arith.constant 1 : index
    %c0_62 = arith.constant 0 : index
    %c0_63 = arith.constant 0 : index
    %54 = vector.load %arg4[%c1_60, %c1_61, %c0_62, %c0_63] : memref<3x3x128x128xbf16, #tpu.memory_space<vmem>>, vector<1x1x128x128xbf16>
    %55 = vector.shape_cast %54 : vector<1x1x128x128xbf16> to vector<128x128xbf16>
    %cst_64 = arith.constant dense<0.000000e+00> : vector<128x128xf32>
    %56 = tpu.matmul %53, %55, %cst_64 {dimension_numbers = #tpu.dot_dimension_numbers<[1], [0], [0], [1], [0, 0, 1, 1], [], []>} : vector<128x128xbf16>, vector<128x128xbf16>, vector<128x128xf32> -> vector<128x128xf32>
    %57 = arith.addf %50, %56 : vector<128x128xf32>
    %c0_65 = arith.constant 0 : index
    %c1_66 = arith.constant 1 : index
    %c2_67 = arith.constant 2 : index
    %c0_68 = arith.constant 0 : index
    %58 = vector.load %arg7[%c0_65, %c1_66, %c2_67, %c0_68] : memref<1x18x18x128xbf16, #tpu.memory_space<vmem>>, vector<1x8x16x128xbf16>
    %59 = vector.shape_cast %58 : vector<1x8x16x128xbf16> to vector<8x16x128xbf16>
    %60 = vector.shape_cast %59 : vector<8x16x128xbf16> to vector<128x128xbf16>
    %c1_69 = arith.constant 1 : index
    %c2_70 = arith.constant 2 : index
    %c0_71 = arith.constant 0 : index
    %c0_72 = arith.constant 0 : index
    %61 = vector.load %arg4[%c1_69, %c2_70, %c0_71, %c0_72] : memref<3x3x128x128xbf16, #tpu.memory_space<vmem>>, vector<1x1x128x128xbf16>
    %62 = vector.shape_cast %61 : vector<1x1x128x128xbf16> to vector<128x128xbf16>
    %cst_73 = arith.constant dense<0.000000e+00> : vector<128x128xf32>
    %63 = tpu.matmul %60, %62, %cst_73 {dimension_numbers = #tpu.dot_dimension_numbers<[1], [0], [0], [1], [0, 0, 1, 1], [], []>} : vector<128x128xbf16>, vector<128x128xbf16>, vector<128x128xf32> -> vector<128x128xf32>
    %64 = arith.addf %57, %63 : vector<128x128xf32>
    %c0_74 = arith.constant 0 : index
    %c2_75 = arith.constant 2 : index
    %c0_76 = arith.constant 0 : index
    %c0_77 = arith.constant 0 : index
    %65 = vector.load %arg7[%c0_74, %c2_75, %c0_76, %c0_77] : memref<1x18x18x128xbf16, #tpu.memory_space<vmem>>, vector<1x8x16x128xbf16>
    %66 = vector.shape_cast %65 : vector<1x8x16x128xbf16> to vector<8x16x128xbf16>
    %67 = vector.shape_cast %66 : vector<8x16x128xbf16> to vector<128x128xbf16>
    %c2_78 = arith.constant 2 : index
    %c0_79 = arith.constant 0 : index
    %c0_80 = arith.constant 0 : index
    %c0_81 = arith.constant 0 : index
    %68 = vector.load %arg4[%c2_78, %c0_79, %c0_80, %c0_81] : memref<3x3x128x128xbf16, #tpu.memory_space<vmem>>, vector<1x1x128x128xbf16>
    %69 = vector.shape_cast %68 : vector<1x1x128x128xbf16> to vector<128x128xbf16>
    %cst_82 = arith.constant dense<0.000000e+00> : vector<128x128xf32>
    %70 = tpu.matmul %67, %69, %cst_82 {dimension_numbers = #tpu.dot_dimension_numbers<[1], [0], [0], [1], [0, 0, 1, 1], [], []>} : vector<128x128xbf16>, vector<128x128xbf16>, vector<128x128xf32> -> vector<128x128xf32>
    %71 = arith.addf %64, %70 : vector<128x128xf32>
    %c0_83 = arith.constant 0 : index
    %c2_84 = arith.constant 2 : index
    %c1_85 = arith.constant 1 : index
    %c0_86 = arith.constant 0 : index
    %72 = vector.load %arg7[%c0_83, %c2_84, %c1_85, %c0_86] : memref<1x18x18x128xbf16, #tpu.memory_space<vmem>>, vector<1x8x16x128xbf16>
    %73 = vector.shape_cast %72 : vector<1x8x16x128xbf16> to vector<8x16x128xbf16>
    %74 = vector.shape_cast %73 : vector<8x16x128xbf16> to vector<128x128xbf16>
    %c2_87 = arith.constant 2 : index
    %c1_88 = arith.constant 1 : index
    %c0_89 = arith.constant 0 : index
    %c0_90 = arith.constant 0 : index
    %75 = vector.load %arg4[%c2_87, %c1_88, %c0_89, %c0_90] : memref<3x3x128x128xbf16, #tpu.memory_space<vmem>>, vector<1x1x128x128xbf16>
    %76 = vector.shape_cast %75 : vector<1x1x128x128xbf16> to vector<128x128xbf16>
    %cst_91 = arith.constant dense<0.000000e+00> : vector<128x128xf32>
    %77 = tpu.matmul %74, %76, %cst_91 {dimension_numbers = #tpu.dot_dimension_numbers<[1], [0], [0], [1], [0, 0, 1, 1], [], []>} : vector<128x128xbf16>, vector<128x128xbf16>, vector<128x128xf32> -> vector<128x128xf32>
    %78 = arith.addf %71, %77 : vector<128x128xf32>
    %c0_92 = arith.constant 0 : index
    %c2_93 = arith.constant 2 : index
    %c2_94 = arith.constant 2 : index
    %c0_95 = arith.constant 0 : index
    %79 = vector.load %arg7[%c0_92, %c2_93, %c2_94, %c0_95] : memref<1x18x18x128xbf16, #tpu.memory_space<vmem>>, vector<1x8x16x128xbf16>
    %80 = vector.shape_cast %79 : vector<1x8x16x128xbf16> to vector<8x16x128xbf16>
    %81 = vector.shape_cast %80 : vector<8x16x128xbf16> to vector<128x128xbf16>
    %c2_96 = arith.constant 2 : index
    %c2_97 = arith.constant 2 : index
    %c0_98 = arith.constant 0 : index
    %c0_99 = arith.constant 0 : index
    %82 = vector.load %arg4[%c2_96, %c2_97, %c0_98, %c0_99] : memref<3x3x128x128xbf16, #tpu.memory_space<vmem>>, vector<1x1x128x128xbf16>
    %83 = vector.shape_cast %82 : vector<1x1x128x128xbf16> to vector<128x128xbf16>
    %cst_100 = arith.constant dense<0.000000e+00> : vector<128x128xf32>
    %84 = tpu.matmul %81, %83, %cst_100 {dimension_numbers = #tpu.dot_dimension_numbers<[1], [0], [0], [1], [0, 0, 1, 1], [], []>} : vector<128x128xbf16>, vector<128x128xbf16>, vector<128x128xf32> -> vector<128x128xf32>
    %85 = arith.addf %78, %84 : vector<128x128xf32>
    %cst_101 = arith.constant dense<0.000000e+00> : vector<128xf32>
    %86 = vector.multi_reduction <add>, %85, %cst_101 [0] : vector<128x128xf32> to vector<128xf32>
    %87 = vector.shape_cast %86 : vector<128xf32> to vector<1x128xf32>
    %88 = arith.addf %22, %87 : vector<1x128xf32>
    %89 = arith.mulf %85, %85 : vector<128x128xf32>
    %cst_102 = arith.constant dense<0.000000e+00> : vector<128xf32>
    %90 = vector.multi_reduction <add>, %89, %cst_102 [0] : vector<128x128xf32> to vector<128xf32>
    %91 = vector.shape_cast %90 : vector<128xf32> to vector<1x128xf32>
    %92 = arith.addf %23, %91 : vector<1x128xf32>
    %93 = vector.shape_cast %85 : vector<128x128xf32> to vector<8x16x128xf32>
    %94 = arith.truncf %93 : vector<8x16x128xf32> to vector<8x16x128xbf16>
    %c0_103 = arith.constant 0 : index
    %c0_104 = arith.constant 0 : index
    %c0_105 = arith.constant 0 : index
    %c0_106 = arith.constant 0 : index
    %95 = vector.load %arg5[%c0_103, %c0_104, %c0_105, %c0_106] : memref<1x16x16x128xbf16, #tpu.memory_space<vmem>>, vector<1x8x16x128xbf16>
    %96 = vector.shape_cast %95 : vector<1x8x16x128xbf16> to vector<8x16x128xbf16>
    %97 = vector.shape_cast %94 : vector<8x16x128xbf16> to vector<1x8x16x128xbf16>
    tpu.vector_store %arg5[%c0_103, %c0_104, %c0_105, %c0_106], %97 {strides = array<i32>} : memref<1x16x16x128xbf16, #tpu.memory_space<vmem>>, vector<1x8x16x128xbf16>,
    %c0_107 = arith.constant 0 : index
    %c8 = arith.constant 8 : index
    %c0_108 = arith.constant 0 : index
    %c0_109 = arith.constant 0 : index
    %98 = vector.load %arg7[%c0_107, %c8, %c0_108, %c0_109] : memref<1x18x18x128xbf16, #tpu.memory_space<vmem>>, vector<1x8x16x128xbf16>
    %99 = vector.shape_cast %98 : vector<1x8x16x128xbf16> to vector<8x16x128xbf16>
    %100 = vector.shape_cast %99 : vector<8x16x128xbf16> to vector<128x128xbf16>
    %c0_110 = arith.constant 0 : index
    %c0_111 = arith.constant 0 : index
    %c0_112 = arith.constant 0 : index
    %c0_113 = arith.constant 0 : index
    %101 = vector.load %arg4[%c0_110, %c0_111, %c0_112, %c0_113] : memref<3x3x128x128xbf16, #tpu.memory_space<vmem>>, vector<1x1x128x128xbf16>
    %102 = vector.shape_cast %101 : vector<1x1x128x128xbf16> to vector<128x128xbf16>
    %cst_114 = arith.constant dense<0.000000e+00> : vector<128x128xf32>
    %103 = tpu.matmul %100, %102, %cst_114 {dimension_numbers = #tpu.dot_dimension_numbers<[1], [0], [0], [1], [0, 0, 1, 1], [], []>} : vector<128x128xbf16>, vector<128x128xbf16>, vector<128x128xf32> -> vector<128x128xf32>
    %c0_115 = arith.constant 0 : index
    %c8_116 = arith.constant 8 : index
    %c1_117 = arith.constant 1 : index
    %c0_118 = arith.constant 0 : index
    %104 = vector.load %arg7[%c0_115, %c8_116, %c1_117, %c0_118] : memref<1x18x18x128xbf16, #tpu.memory_space<vmem>>, vector<1x8x16x128xbf16>
    %105 = vector.shape_cast %104 : vector<1x8x16x128xbf16> to vector<8x16x128xbf16>
    %106 = vector.shape_cast %105 : vector<8x16x128xbf16> to vector<128x128xbf16>
    %c0_119 = arith.constant 0 : index
    %c1_120 = arith.constant 1 : index
    %c0_121 = arith.constant 0 : index
    %c0_122 = arith.constant 0 : index
    %107 = vector.load %arg4[%c0_119, %c1_120, %c0_121, %c0_122] : memref<3x3x128x128xbf16, #tpu.memory_space<vmem>>, vector<1x1x128x128xbf16>
    %108 = vector.shape_cast %107 : vector<1x1x128x128xbf16> to vector<128x128xbf16>
    %cst_123 = arith.constant dense<0.000000e+00> : vector<128x128xf32>
    %109 = tpu.matmul %106, %108, %cst_123 {dimension_numbers = #tpu.dot_dimension_numbers<[1], [0], [0], [1], [0, 0, 1, 1], [], []>} : vector<128x128xbf16>, vector<128x128xbf16>, vector<128x128xf32> -> vector<128x128xf32>
    %110 = arith.addf %103, %109 : vector<128x128xf32>
    %c0_124 = arith.constant 0 : index
    %c8_125 = arith.constant 8 : index
    %c2_126 = arith.constant 2 : index
    %c0_127 = arith.constant 0 : index
    %111 = vector.load %arg7[%c0_124, %c8_125, %c2_126, %c0_127] : memref<1x18x18x128xbf16, #tpu.memory_space<vmem>>, vector<1x8x16x128xbf16>
    %112 = vector.shape_cast %111 : vector<1x8x16x128xbf16> to vector<8x16x128xbf16>
    %113 = vector.shape_cast %112 : vector<8x16x128xbf16> to vector<128x128xbf16>
    %c0_128 = arith.constant 0 : index
    %c2_129 = arith.constant 2 : index
    %c0_130 = arith.constant 0 : index
    %c0_131 = arith.constant 0 : index
    %114 = vector.load %arg4[%c0_128, %c2_129, %c0_130, %c0_131] : memref<3x3x128x128xbf16, #tpu.memory_space<vmem>>, vector<1x1x128x128xbf16>
    %115 = vector.shape_cast %114 : vector<1x1x128x128xbf16> to vector<128x128xbf16>
    %cst_132 = arith.constant dense<0.000000e+00> : vector<128x128xf32>
    %116 = tpu.matmul %113, %115, %cst_132 {dimension_numbers = #tpu.dot_dimension_numbers<[1], [0], [0], [1], [0, 0, 1, 1], [], []>} : vector<128x128xbf16>, vector<128x128xbf16>, vector<128x128xf32> -> vector<128x128xf32>
    %117 = arith.addf %110, %116 : vector<128x128xf32>
    %c0_133 = arith.constant 0 : index
    %c9 = arith.constant 9 : index
    %c0_134 = arith.constant 0 : index
    %c0_135 = arith.constant 0 : index
    %118 = vector.load %arg7[%c0_133, %c9, %c0_134, %c0_135] : memref<1x18x18x128xbf16, #tpu.memory_space<vmem>>, vector<1x8x16x128xbf16>
    %119 = vector.shape_cast %118 : vector<1x8x16x128xbf16> to vector<8x16x128xbf16>
    %120 = vector.shape_cast %119 : vector<8x16x128xbf16> to vector<128x128xbf16>
    %c1_136 = arith.constant 1 : index
    %c0_137 = arith.constant 0 : index
    %c0_138 = arith.constant 0 : index
    %c0_139 = arith.constant 0 : index
    %121 = vector.load %arg4[%c1_136, %c0_137, %c0_138, %c0_139] : memref<3x3x128x128xbf16, #tpu.memory_space<vmem>>, vector<1x1x128x128xbf16>
    %122 = vector.shape_cast %121 : vector<1x1x128x128xbf16> to vector<128x128xbf16>
    %cst_140 = arith.constant dense<0.000000e+00> : vector<128x128xf32>
    %123 = tpu.matmul %120, %122, %cst_140 {dimension_numbers = #tpu.dot_dimension_numbers<[1], [0], [0], [1], [0, 0, 1, 1], [], []>} : vector<128x128xbf16>, vector<128x128xbf16>, vector<128x128xf32> -> vector<128x128xf32>
    %124 = arith.addf %117, %123 : vector<128x128xf32>
    %c0_141 = arith.constant 0 : index
    %c9_142 = arith.constant 9 : index
    %c1_143 = arith.constant 1 : index
    %c0_144 = arith.constant 0 : index
    %125 = vector.load %arg7[%c0_141, %c9_142, %c1_143, %c0_144] : memref<1x18x18x128xbf16, #tpu.memory_space<vmem>>, vector<1x8x16x128xbf16>
    %126 = vector.shape_cast %125 : vector<1x8x16x128xbf16> to vector<8x16x128xbf16>
    %127 = vector.shape_cast %126 : vector<8x16x128xbf16> to vector<128x128xbf16>
    %c1_145 = arith.constant 1 : index
    %c1_146 = arith.constant 1 : index
    %c0_147 = arith.constant 0 : index
    %c0_148 = arith.constant 0 : index
    %128 = vector.load %arg4[%c1_145, %c1_146, %c0_147, %c0_148] : memref<3x3x128x128xbf16, #tpu.memory_space<vmem>>, vector<1x1x128x128xbf16>
    %129 = vector.shape_cast %128 : vector<1x1x128x128xbf16> to vector<128x128xbf16>
    %cst_149 = arith.constant dense<0.000000e+00> : vector<128x128xf32>
    %130 = tpu.matmul %127, %129, %cst_149 {dimension_numbers = #tpu.dot_dimension_numbers<[1], [0], [0], [1], [0, 0, 1, 1], [], []>} : vector<128x128xbf16>, vector<128x128xbf16>, vector<128x128xf32> -> vector<128x128xf32>
    %131 = arith.addf %124, %130 : vector<128x128xf32>
    %c0_150 = arith.constant 0 : index
    %c9_151 = arith.constant 9 : index
    %c2_152 = arith.constant 2 : index
    %c0_153 = arith.constant 0 : index
    %132 = vector.load %arg7[%c0_150, %c9_151, %c2_152, %c0_153] : memref<1x18x18x128xbf16, #tpu.memory_space<vmem>>, vector<1x8x16x128xbf16>
    %133 = vector.shape_cast %132 : vector<1x8x16x128xbf16> to vector<8x16x128xbf16>
    %134 = vector.shape_cast %133 : vector<8x16x128xbf16> to vector<128x128xbf16>
    %c1_154 = arith.constant 1 : index
    %c2_155 = arith.constant 2 : index
    %c0_156 = arith.constant 0 : index
    %c0_157 = arith.constant 0 : index
    %135 = vector.load %arg4[%c1_154, %c2_155, %c0_156, %c0_157] : memref<3x3x128x128xbf16, #tpu.memory_space<vmem>>, vector<1x1x128x128xbf16>
    %136 = vector.shape_cast %135 : vector<1x1x128x128xbf16> to vector<128x128xbf16>
    %cst_158 = arith.constant dense<0.000000e+00> : vector<128x128xf32>
    %137 = tpu.matmul %134, %136, %cst_158 {dimension_numbers = #tpu.dot_dimension_numbers<[1], [0], [0], [1], [0, 0, 1, 1], [], []>} : vector<128x128xbf16>, vector<128x128xbf16>, vector<128x128xf32> -> vector<128x128xf32>
    %138 = arith.addf %131, %137 : vector<128x128xf32>
    %c0_159 = arith.constant 0 : index
    %c10 = arith.constant 10 : index
    %c0_160 = arith.constant 0 : index
    %c0_161 = arith.constant 0 : index
    %139 = vector.load %arg7[%c0_159, %c10, %c0_160, %c0_161] : memref<1x18x18x128xbf16, #tpu.memory_space<vmem>>, vector<1x8x16x128xbf16>
    %140 = vector.shape_cast %139 : vector<1x8x16x128xbf16> to vector<8x16x128xbf16>
    %141 = vector.shape_cast %140 : vector<8x16x128xbf16> to vector<128x128xbf16>
    %c2_162 = arith.constant 2 : index
    %c0_163 = arith.constant 0 : index
    %c0_164 = arith.constant 0 : index
    %c0_165 = arith.constant 0 : index
    %142 = vector.load %arg4[%c2_162, %c0_163, %c0_164, %c0_165] : memref<3x3x128x128xbf16, #tpu.memory_space<vmem>>, vector<1x1x128x128xbf16>
    %143 = vector.shape_cast %142 : vector<1x1x128x128xbf16> to vector<128x128xbf16>
    %cst_166 = arith.constant dense<0.000000e+00> : vector<128x128xf32>
    %144 = tpu.matmul %141, %143, %cst_166 {dimension_numbers = #tpu.dot_dimension_numbers<[1], [0], [0], [1], [0, 0, 1, 1], [], []>} : vector<128x128xbf16>, vector<128x128xbf16>, vector<128x128xf32> -> vector<128x128xf32>
    %145 = arith.addf %138, %144 : vector<128x128xf32>
    %c0_167 = arith.constant 0 : index
    %c10_168 = arith.constant 10 : index
    %c1_169 = arith.constant 1 : index
    %c0_170 = arith.constant 0 : index
    %146 = vector.load %arg7[%c0_167, %c10_168, %c1_169, %c0_170] : memref<1x18x18x128xbf16, #tpu.memory_space<vmem>>, vector<1x8x16x128xbf16>
    %147 = vector.shape_cast %146 : vector<1x8x16x128xbf16> to vector<8x16x128xbf16>
    %148 = vector.shape_cast %147 : vector<8x16x128xbf16> to vector<128x128xbf16>
    %c2_171 = arith.constant 2 : index
    %c1_172 = arith.constant 1 : index
    %c0_173 = arith.constant 0 : index
    %c0_174 = arith.constant 0 : index
    %149 = vector.load %arg4[%c2_171, %c1_172, %c0_173, %c0_174] : memref<3x3x128x128xbf16, #tpu.memory_space<vmem>>, vector<1x1x128x128xbf16>
    %150 = vector.shape_cast %149 : vector<1x1x128x128xbf16> to vector<128x128xbf16>
    %cst_175 = arith.constant dense<0.000000e+00> : vector<128x128xf32>
    %151 = tpu.matmul %148, %150, %cst_175 {dimension_numbers = #tpu.dot_dimension_numbers<[1], [0], [0], [1], [0, 0, 1, 1], [], []>} : vector<128x128xbf16>, vector<128x128xbf16>, vector<128x128xf32> -> vector<128x128xf32>
    %152 = arith.addf %145, %151 : vector<128x128xf32>
    %c0_176 = arith.constant 0 : index
    %c10_177 = arith.constant 10 : index
    %c2_178 = arith.constant 2 : index
    %c0_179 = arith.constant 0 : index
    %153 = vector.load %arg7[%c0_176, %c10_177, %c2_178, %c0_179] : memref<1x18x18x128xbf16, #tpu.memory_space<vmem>>, vector<1x8x16x128xbf16>
    %154 = vector.shape_cast %153 : vector<1x8x16x128xbf16> to vector<8x16x128xbf16>
    %155 = vector.shape_cast %154 : vector<8x16x128xbf16> to vector<128x128xbf16>
    %c2_180 = arith.constant 2 : index
    %c2_181 = arith.constant 2 : index
    %c0_182 = arith.constant 0 : index
    %c0_183 = arith.constant 0 : index
    %156 = vector.load %arg4[%c2_180, %c2_181, %c0_182, %c0_183] : memref<3x3x128x128xbf16, #tpu.memory_space<vmem>>, vector<1x1x128x128xbf16>
    %157 = vector.shape_cast %156 : vector<1x1x128x128xbf16> to vector<128x128xbf16>
    %cst_184 = arith.constant dense<0.000000e+00> : vector<128x128xf32>
    %158 = tpu.matmul %155, %157, %cst_184 {dimension_numbers = #tpu.dot_dimension_numbers<[1], [0], [0], [1], [0, 0, 1, 1], [], []>} : vector<128x128xbf16>, vector<128x128xbf16>, vector<128x128xf32> -> vector<128x128xf32>
    %159 = arith.addf %152, %158 : vector<128x128xf32>
    %cst_185 = arith.constant dense<0.000000e+00> : vector<128xf32>
    %160 = vector.multi_reduction <add>, %159, %cst_185 [0] : vector<128x128xf32> to vector<128xf32>
    %161 = vector.shape_cast %160 : vector<128xf32> to vector<1x128xf32>
    %162 = arith.addf %88, %161 : vector<1x128xf32>
    %163 = arith.mulf %159, %159 : vector<128x128xf32>
    %cst_186 = arith.constant dense<0.000000e+00> : vector<128xf32>
    %164 = vector.multi_reduction <add>, %163, %cst_186 [0] : vector<128x128xf32> to vector<128xf32>
    %165 = vector.shape_cast %164 : vector<128xf32> to vector<1x128xf32>
    %166 = arith.addf %92, %165 : vector<1x128xf32>
    %167 = vector.shape_cast %159 : vector<128x128xf32> to vector<8x16x128xf32>
    %168 = arith.truncf %167 : vector<8x16x128xf32> to vector<8x16x128xbf16>
    %c0_187 = arith.constant 0 : index
    %c8_188 = arith.constant 8 : index
    %c0_189 = arith.constant 0 : index
    %c0_190 = arith.constant 0 : index
    %169 = vector.load %arg5[%c0_187, %c8_188, %c0_189, %c0_190] : memref<1x16x16x128xbf16, #tpu.memory_space<vmem>>, vector<1x8x16x128xbf16>
    %170 = vector.shape_cast %169 : vector<1x8x16x128xbf16> to vector<8x16x128xbf16>
    %171 = vector.shape_cast %168 : vector<8x16x128xbf16> to vector<1x8x16x128xbf16>
    tpu.vector_store %arg5[%c0_187, %c8_188, %c0_189, %c0_190], %171 {strides = array<i32>} : memref<1x16x16x128xbf16, #tpu.memory_space<vmem>>, vector<1x8x16x128xbf16>,
    %172 = tpu.concatenate %162, %166 in 0 : vector<1x128xf32>, vector<1x128xf32> -> vector<2x128xf32>
    %c0_191 = arith.constant 0 : index
    %c0_192 = arith.constant 0 : index
    %c0_193 = arith.constant 0 : index
    %173 = vector.load %arg6[%c0_191, %c0_192, %c0_193] : memref<1x2x128xf32, #tpu.memory_space<vmem>>, vector<1x2x128xf32>
    %174 = vector.shape_cast %173 : vector<1x2x128xf32> to vector<2x128xf32>
    %175 = vector.shape_cast %172 : vector<2x128xf32> to vector<1x2x128xf32>
    tpu.vector_store %arg6[%c0_191, %c0_192, %c0_193], %175 {strides = array<i32>} : memref<1x2x128xf32, #tpu.memory_space<vmem>>, vector<1x2x128xf32>,
    return
  }
  func.func @transform_0(%arg0: i32) -> (i32, i32, i32, i32) {
    %c0_i32 = arith.constant 0 : i32
    %c0_i32_0 = arith.constant 0 : i32
    %c0_i32_1 = arith.constant 0 : i32
    %c0_i32_2 = arith.constant 0 : i32
    return %arg0, %c0_i32, %c0_i32_0, %c0_i32_1 : i32, i32, i32, i32
  }
  func.func @transform_1(%arg0: i32) -> (i32, i32) {
    %c0_i32 = arith.constant 0 : i32
    %c0_i32_0 = arith.constant 0 : i32
    %c0_i32_1 = arith.constant 0 : i32
    return %c0_i32, %c0_i32_0 : i32, i32
  }
  func.func @transform_2(%arg0: i32) -> (i32, i32) {
    %c0_i32 = arith.constant 0 : i32
    %c0_i32_0 = arith.constant 0 : i32
    %c0_i32_1 = arith.constant 0 : i32
    return %c0_i32, %c0_i32_0 : i32, i32
  }
  func.func @transform_3(%arg0: i32) -> (i32, i32, i32, i32) {
    %c0_i32 = arith.constant 0 : i32
    %c0_i32_0 = arith.constant 0 : i32
    %c0_i32_1 = arith.constant 0 : i32
    %c0_i32_2 = arith.constant 0 : i32
    %c0_i32_3 = arith.constant 0 : i32
    return %c0_i32, %c0_i32_0, %c0_i32_1, %c0_i32_2 : i32, i32, i32, i32
  }
  func.func @transform_4(%arg0: i32) -> (i32, i32, i32, i32) {
    %c0_i32 = arith.constant 0 : i32
    %c0_i32_0 = arith.constant 0 : i32
    %c0_i32_1 = arith.constant 0 : i32
    %c0_i32_2 = arith.constant 0 : i32
    return %arg0, %c0_i32, %c0_i32_0, %c0_i32_1 : i32, i32, i32, i32
  }
  func.func @transform_5(%arg0: i32) -> (i32, i32, i32) {
    %c0_i32 = arith.constant 0 : i32
    %c0_i32_0 = arith.constant 0 : i32
    %c0_i32_1 = arith.constant 0 : i32
    return %arg0, %c0_i32, %c0_i32_0 : i32, i32, i32
  }
}

</mosaic_0001>

<bundles_post_ra>
// kernel: residual_block_forward.5
= control target key start
LH: loop header
LB: loop body
LE: loop exit
PB: predicated region body
PF: predicated region fallthrough
CT: control target
= control target key end

     0   :  { %s948_s21 = smov 0   ;;  %s1190_s0 = inlined_call_operand.vmem [shape: bf16[2,16,16,128], index: 0, kind: input, shape index: {}]   ;;  %s1191_s1 = inlined_call_operand.vmem [shape: f32[1,128], index: 1, kind: input, shape index: {}]   ;;  %s1192_s2 = inlined_call_operand.vmem [shape: f32[1,128], index: 2, kind: input, shape index: {}]   ;;  %s1193_s3 = inlined_call_operand.vmem [shape: bf16[2,16,16,128], index: 3, kind: input, shape index: {}]   ;;  %s1194_s4 = inlined_call_operand.vmem [shape: f32[1,128], index: 4, kind: input, shape index: {}]   ;;  %s1195_s5 = inlined_call_operand.vmem [shape: f32[1,128], index: 5, kind: input, shape index: {}]   ;;  %s1196_s6 = inlined_call_operand.vmem [shape: f32[2,16,16,128], index: 6, kind: output, shape index: {}]  }
   0x1 LB: > { %s719_s22 = sadd.s32 4294967295, %s911_s21   ;;  %p723_p0 = scmp.ge.s32.totalorder %s911_s21, 1  ;;  %s911_s21 = sphi %s948_s21, %s16_s21  }
   0x2   : > { %p222_p1 = scmp.lt.s32.totalorder %s911_s21, 3 }
   0x4   : > { %p223_p2 = pnand %p723_p0, %p222_p1 }
   0x5   : > { %p257_p3 = scmp.lt.s32.totalorder (!%p223_p2), %s719_s22, 1 }
   0x6   : > { %226 = sbr.rel (%p223_p2) target bundleno = 86 (0x56), region = 44 }
   0xb   : > { %s1198_s22 = smov (!%p257_p3, %s719_s22), 1  ;;  %v972_v0 = vld [vmem:[%s1191_s1] ss:$0 sm:$0xff] }
   0xc   : > { %s736_s23 = sshll.u32 %s1198_s22, 7  ;;  %v977_v1 = vld [vmem:[%s1194_s4] ss:$0 sm:$0xff]  ;;  %s738_s14 = sshll.u32 %s1198_s22, 8 }
   0xd   : > { %s962_s26 = scalar_lea.vmem %s1190_s0, %s736_s23  ;;  %s967_s29 = scalar_lea.vmem %s1193_s3, %s736_s23  ;;  %v986_v10 = vld [vmem:[%s1192_s2] ss:$0 sm:$0xff] }
   0xe   : > { %v740_v2 = vld [vmem:[%s962_s26] sm:$0xff]   ;;  %v867_v4 = vld [vmem:[%s962_s26 + $0x8] sm:$0xff]   ;;  %v868_v24 = vld [vmem:[%s962_s26 + $0x10] sm:$0xff]   ;;  %s1015_s17 = scalar_lea.vmem %s1196_s6, %s738_s14 }
   0xf   : > { %v804_v3 = vld [vmem:[%s967_s29] sm:$0xff]   ;;  %v741_v5 = vunpack.c.l.bf16 %v740_v2  ;;  %v742_v7 = vunpack.c.h.bf16 %v740_v2  ;;  %v882_v9 = vld [vmem:[%s967_s29 + $0x8] sm:$0xff]   ;;  %v745_v12 = vunpack.c.l.bf16 %v867_v4  ;;  %v746_v14 = vunpack.c.h.bf16 %v867_v4  ;;  %v883_v25 = vld [vmem:[%s967_s29 + $0x10] sm:$0xff]  }
  0x10   : > { %v805_v6 = vunpack.c.l.bf16 %v804_v3  ;;  %v806_v8 = vunpack.c.h.bf16 %v804_v3  ;;  %v991_v11 = vld [vmem:[%s1195_s5] ss:$0 sm:$0xff]  ;;  %v809_v13 = vunpack.c.l.bf16 %v882_v9  ;;  %v810_v15 = vunpack.c.h.bf16 %v882_v9  ;;  %v869_v42 = vld [vmem:[%s962_s26 + $0x18] sm:$0xff]  }
  0x11   : > { %v343_v16 = vmul.f32 %v741_v5, %v972_v0  ;;  %v344_v18 = vmul.f32 %v742_v7, %v972_v0  ;;  %v345_v20 = vmul.f32 %v745_v12, %v972_v0  ;;  %v346_v22 = vmul.f32 %v746_v14, %v972_v0  ;;  %v884_v43 = vld [vmem:[%s967_s29 + $0x18] sm:$0xff]   ;;  %v870_v52 = vld [vmem:[%s962_s26 + $0x20] sm:$0xff]   ;;  %v871_v14 = vld [vmem:[%s962_s26 + $0x28] sm:$0xff]  }
  0x12   : > { %v485_v17 = vmul.f32 %v805_v6, %v977_v1  ;;  %v486_v19 = vmul.f32 %v806_v8, %v977_v1  ;;  %v487_v21 = vmul.f32 %v809_v13, %v977_v1  ;;  %v488_v23 = vmul.f32 %v810_v15, %v977_v1  ;;  %v885_v57 = vld [vmem:[%s967_s29 + $0x20] sm:$0xff]   ;;  %v886_v15 = vld [vmem:[%s967_s29 + $0x28] sm:$0xff]  }
  0x13   : > { %v382_v26 = vadd.f32 %v986_v10, %v343_v16  ;;  %v383_v28 = vadd.f32 %v986_v10, %v344_v18  ;;  %v384_v30 = vadd.f32 %v986_v10, %v345_v20  ;;  %v385_v32 = vadd.f32 %v986_v10, %v346_v22 }
  0x14   : > { %v524_v27 = vadd.f32 %v991_v11, %v485_v17  ;;  %v525_v29 = vadd.f32 %v991_v11, %v486_v19  ;;  %v526_v31 = vadd.f32 %v991_v11, %v487_v21  ;;  %v527_v33 = vadd.f32 %v991_v11, %v488_v23 }
  0x15   : > { %v749_v36 = vunpack.c.l.bf16 %v868_v24  ;;  %v813_v37 = vunpack.c.l.bf16 %v883_v25  ;;  %v750_v40 = vunpack.c.h.bf16 %v868_v24  ;;  %v814_v41 = vunpack.c.h.bf16 %v883_v25 }
  0x16   : > { %v556_v34 = vadd.f32 %v524_v27, %v382_v26  ;;  %v557_v35 = vadd.f32 %v525_v29, %v383_v28  ;;  %v558_v38 = vadd.f32 %v526_v31, %v384_v30  ;;  %v559_v39 = vadd.f32 %v527_v33, %v385_v32  ;;  %v872_v32 = vld [vmem:[%s962_s26 + $0x30] sm:$0xff]  }
  0x17   : > { %v347_v46 = vmul.f32 %v749_v36, %v972_v0  ;;  %v489_v47 = vmul.f32 %v813_v37, %v977_v1  ;;  %v348_v50 = vmul.f32 %v750_v40, %v972_v0  ;;  %v490_v51 = vmul.f32 %v814_v41, %v977_v1  ;;  %v887_v37 = vld [vmem:[%s967_s29 + $0x30] sm:$0xff]  }
  0x18   : > { %v588_v44 = vmax.f32 %v556_v34, 0.0  ;;  %v589_v45 = vmax.f32 %v557_v35, 0.0  ;;  %v590_v48 = vmax.f32 %v558_v38, 0.0  ;;  %v591_v49 = vmax.f32 %v559_v39, 0.0 }
  0x19   : > { %v386_v53 = vadd.f32 %v986_v10, %v347_v46  ;;  %v528_v54 = vadd.f32 %v991_v11, %v489_v47  ;;  %v753_v55 = vunpack.c.l.bf16 %v869_v42  ;;  %v817_v56 = vunpack.c.l.bf16 %v884_v43  ;;  %v873_v46 = vld [vmem:[%s962_s26 + $0x38] sm:$0xff]  }
  0x1a   : > { %620 = vst [vmem:[%s1015_s17] sm:$0xff] %v588_v44  ;;  %621 = vst [vmem:[%s1015_s17 + $0x8] sm:$0xff] %v589_v45  ;;  %v387_v58 = vadd.f32 %v986_v10, %v348_v50  ;;  %v529_v59 = vadd.f32 %v991_v11, %v490_v51  ;;  %v754_v60 = vunpack.c.h.bf16 %v869_v42  ;;  %v818_v61 = vunpack.c.h.bf16 %v884_v43 }
  0x1b   : > { %622 = vst [vmem:[%s1015_s17 + $0x10] sm:$0xff] %v590_v48  ;;  %623 = vst [vmem:[%s1015_s17 + $0x18] sm:$0xff] %v591_v49  ;;  %v560_v62 = vadd.f32 %v528_v54, %v386_v53  ;;  %v349_v63 = vmul.f32 %v753_v55, %v972_v0  ;;  %v491_v2 = vmul.f32 %v817_v56, %v977_v1  ;;  %v757_v3 = vunpack.c.l.bf16 %v870_v52  ;;  %v888_v55 = vld [vmem:[%s967_s29 + $0x38] sm:$0xff]  }
  0x1c   : > { %v561_v4 = vadd.f32 %v529_v59, %v387_v58  ;;  %v350_v5 = vmul.f32 %v754_v60, %v972_v0  ;;  %v492_v6 = vmul.f32 %v818_v61, %v977_v1  ;;  %v821_v7 = vunpack.c.l.bf16 %v885_v57 }
  0x1d   : > { %v592_v8 = vmax.f32 %v560_v62, 0.0  ;;  %v388_v9 = vadd.f32 %v986_v10, %v349_v63  ;;  %v530_v12 = vadd.f32 %v991_v11, %v491_v2  ;;  %v351_v13 = vmul.f32 %v757_v3, %v972_v0 }
  0x1e   : > { %v593_v16 = vmax.f32 %v561_v4, 0.0  ;;  %v389_v17 = vadd.f32 %v986_v10, %v350_v5  ;;  %v531_v18 = vadd.f32 %v991_v11, %v492_v6  ;;  %v493_v19 = vmul.f32 %v821_v7, %v977_v1  ;;  %v874_v6 = vld [vmem:[%s962_s26 + $0x40] sm:$0xff]  }
  0x1f   : > { %624 = vst [vmem:[%s1015_s17 + $0x20] sm:$0xff] %v592_v8  ;;  %v562_v20 = vadd.f32 %v530_v12, %v388_v9  ;;  %v390_v21 = vadd.f32 %v986_v10, %v351_v13  ;;  %v758_v22 = vunpack.c.h.bf16 %v870_v52  ;;  %v822_v23 = vunpack.c.h.bf16 %v885_v57  ;;  %v889_v13 = vld [vmem:[%s967_s29 + $0x40] sm:$0xff]  }
  0x20   : > { %625 = vst [vmem:[%s1015_s17 + $0x28] sm:$0xff] %v593_v16  ;;  %v563_v24 = vadd.f32 %v531_v18, %v389_v17  ;;  %v532_v25 = vadd.f32 %v991_v11, %v493_v19  ;;  %v761_v26 = vunpack.c.l.bf16 %v871_v14  ;;  %v825_v27 = vunpack.c.l.bf16 %v886_v15 }
  0x21   : > { %v594_v28 = vmax.f32 %v562_v20, 0.0  ;;  %v352_v29 = vmul.f32 %v758_v22, %v972_v0  ;;  %v494_v30 = vmul.f32 %v822_v23, %v977_v1  ;;  %v762_v31 = vunpack.c.h.bf16 %v871_v14 }
  0x22   : > { %v595_v33 = vmax.f32 %v563_v24, 0.0  ;;  %v564_v34 = vadd.f32 %v532_v25, %v390_v21  ;;  %v353_v35 = vmul.f32 %v761_v26, %v972_v0  ;;  %v495_v36 = vmul.f32 %v825_v27, %v977_v1  ;;  %v875_v26 = vld [vmem:[%s962_s26 + $0x48] sm:$0xff]  }
  0x23   : > { %626 = vst [vmem:[%s1015_s17 + $0x30] sm:$0xff] %v594_v28  ;;  %v391_v38 = vadd.f32 %v986_v10, %v352_v29  ;;  %v533_v39 = vadd.f32 %v991_v11, %v494_v30  ;;  %v354_v40 = vmul.f32 %v762_v31, %v972_v0  ;;  %v826_v41 = vunpack.c.h.bf16 %v886_v15  ;;  %v890_v27 = vld [vmem:[%s967_s29 + $0x48] sm:$0xff]  }
  0x24   : > { %627 = vst [vmem:[%s1015_s17 + $0x38] sm:$0xff] %v595_v33  ;;  %v596_v42 = vmax.f32 %v564_v34, 0.0  ;;  %v392_v43 = vadd.f32 %v986_v10, %v353_v35  ;;  %v534_v44 = vadd.f32 %v991_v11, %v495_v36  ;;  %v765_v45 = vunpack.c.l.bf16 %v872_v32 }
  0x25   : > { %v565_v47 = vadd.f32 %v533_v39, %v391_v38  ;;  %v393_v48 = vadd.f32 %v986_v10, %v354_v40  ;;  %v496_v49 = vmul.f32 %v826_v41, %v977_v1  ;;  %v829_v50 = vunpack.c.l.bf16 %v887_v37  ;;  %v876_v40 = vld [vmem:[%s962_s26 + $0x50] sm:$0xff]  }
  0x26   : > { %628 = vst [vmem:[%s1015_s17 + $0x40] sm:$0xff] %v596_v42  ;;  %v566_v51 = vadd.f32 %v534_v44, %v392_v43  ;;  %v355_v52 = vmul.f32 %v765_v45, %v972_v0  ;;  %v766_v53 = vunpack.c.h.bf16 %v872_v32  ;;  %v830_v54 = vunpack.c.h.bf16 %v887_v37  ;;  %v891_v45 = vld [vmem:[%s967_s29 + $0x50] sm:$0xff]  }
  0x27   : > { %v597_v56 = vmax.f32 %v565_v47, 0.0  ;;  %v535_v57 = vadd.f32 %v991_v11, %v496_v49  ;;  %v497_v58 = vmul.f32 %v829_v50, %v977_v1  ;;  %v769_v59 = vunpack.c.l.bf16 %v873_v46 }
  0x28   : > { %v598_v60 = vmax.f32 %v566_v51, 0.0  ;;  %v394_v61 = vadd.f32 %v986_v10, %v355_v52  ;;  %v356_v62 = vmul.f32 %v766_v53, %v972_v0  ;;  %v498_v63 = vmul.f32 %v830_v54, %v977_v1 }
  0x29   : > { %629 = vst [vmem:[%s1015_s17 + $0x48] sm:$0xff] %v597_v56  ;;  %v567_v2 = vadd.f32 %v535_v57, %v393_v48  ;;  %v536_v3 = vadd.f32 %v991_v11, %v497_v58  ;;  %v357_v4 = vmul.f32 %v769_v59, %v972_v0  ;;  %v833_v5 = vunpack.c.l.bf16 %v888_v55 }
  0x2a   : > { %630 = vst [vmem:[%s1015_s17 + $0x50] sm:$0xff] %v598_v60  ;;  %v395_v7 = vadd.f32 %v986_v10, %v356_v62  ;;  %v537_v8 = vadd.f32 %v991_v11, %v498_v63  ;;  %v770_v9 = vunpack.c.h.bf16 %v873_v46  ;;  %v834_v12 = vunpack.c.h.bf16 %v888_v55  ;;  %v877_v62 = vld [vmem:[%s962_s26 + $0x58] sm:$0xff]  }
  0x2b   : > { %v599_v14 = vmax.f32 %v567_v2, 0.0  ;;  %v568_v15 = vadd.f32 %v536_v3, %v394_v61  ;;  %v396_v16 = vadd.f32 %v986_v10, %v357_v4  ;;  %v499_v17 = vmul.f32 %v833_v5, %v977_v1  ;;  %v892_v5 = vld [vmem:[%s967_s29 + $0x58] sm:$0xff]  }
  0x2c   : > { %v569_v18 = vadd.f32 %v537_v8, %v395_v7  ;;  %v358_v19 = vmul.f32 %v770_v9, %v972_v0  ;;  %v500_v20 = vmul.f32 %v834_v12, %v977_v1  ;;  %v773_v21 = vunpack.c.l.bf16 %v874_v6 }
  0x2d   : > { %631 = vst [vmem:[%s1015_s17 + $0x58] sm:$0xff] %v599_v14  ;;  %v600_v22 = vmax.f32 %v568_v15, 0.0  ;;  %v538_v23 = vadd.f32 %v991_v11, %v499_v17  ;;  %v837_v24 = vunpack.c.l.bf16 %v889_v13  ;;  %v774_v25 = vunpack.c.h.bf16 %v874_v6 }
  0x2e   : > { %v601_v28 = vmax.f32 %v569_v18, 0.0  ;;  %v397_v29 = vadd.f32 %v986_v10, %v358_v19  ;;  %v539_v30 = vadd.f32 %v991_v11, %v500_v20  ;;  %v359_v31 = vmul.f32 %v773_v21, %v972_v0  ;;  %v878_v20 = vld [vmem:[%s962_s26 + $0x60] sm:$0xff]  }
  0x2f   : > { %632 = vst [vmem:[%s1015_s17 + $0x60] sm:$0xff] %v600_v22  ;;  %v570_v32 = vadd.f32 %v538_v23, %v396_v16  ;;  %v501_v33 = vmul.f32 %v837_v24, %v977_v1  ;;  %v360_v34 = vmul.f32 %v774_v25, %v972_v0  ;;  %v838_v35 = vunpack.c.h.bf16 %v889_v13  ;;  %v893_v25 = vld [vmem:[%s967_s29 + $0x60] sm:$0xff]  }
  0x30   : > { %633 = vst [vmem:[%s1015_s17 + $0x68] sm:$0xff] %v601_v28  ;;  %v571_v36 = vadd.f32 %v539_v30, %v397_v29  ;;  %v398_v37 = vadd.f32 %v986_v10, %v359_v31  ;;  %v777_v38 = vunpack.c.l.bf16 %v875_v26  ;;  %v841_v39 = vunpack.c.l.bf16 %v890_v27 }
  0x31   : > { %v602_v41 = vmax.f32 %v570_v32, 0.0  ;;  %v540_v42 = vadd.f32 %v991_v11, %v501_v33  ;;  %v399_v43 = vadd.f32 %v986_v10, %v360_v34  ;;  %v502_v44 = vmul.f32 %v838_v35, %v977_v1  ;;  %v879_v34 = vld [vmem:[%s962_s26 + $0x68] sm:$0xff]  }
  0x32   : > { %v603_v46 = vmax.f32 %v571_v36, 0.0  ;;  %v361_v47 = vmul.f32 %v777_v38, %v972_v0  ;;  %v503_v48 = vmul.f32 %v841_v39, %v977_v1  ;;  %v778_v49 = vunpack.c.h.bf16 %v875_v26 }
  0x33   : > { %634 = vst [vmem:[%s1015_s17 + $0x70] sm:$0xff] %v602_v41  ;;  %v572_v50 = vadd.f32 %v540_v42, %v398_v37  ;;  %v541_v51 = vadd.f32 %v991_v11, %v502_v44  ;;  %v842_v52 = vunpack.c.h.bf16 %v890_v27  ;;  %v781_v53 = vunpack.c.l.bf16 %v876_v40 }
  0x34   : > { %635 = vst [vmem:[%s1015_s17 + $0x78] sm:$0xff] %v603_v46  ;;  %v400_v54 = vadd.f32 %v986_v10, %v361_v47  ;;  %v542_v55 = vadd.f32 %v991_v11, %v503_v48  ;;  %v362_v56 = vmul.f32 %v778_v49, %v972_v0  ;;  %v845_v57 = vunpack.c.l.bf16 %v891_v45 }
  0x35   : > { %v604_v58 = vmax.f32 %v572_v50, 0.0  ;;  %v573_v59 = vadd.f32 %v541_v51, %v399_v43  ;;  %v504_v60 = vmul.f32 %v842_v52, %v977_v1  ;;  %v363_v61 = vmul.f32 %v781_v53, %v972_v0  ;;  %v894_v43 = vld [vmem:[%s967_s29 + $0x68] sm:$0xff]  }
  0x36   : > { %v574_v63 = vadd.f32 %v542_v55, %v400_v54  ;;  %v401_v2 = vadd.f32 %v986_v10, %v362_v56  ;;  %v505_v3 = vmul.f32 %v845_v57, %v977_v1  ;;  %v782_v4 = vunpack.c.h.bf16 %v876_v40  ;;  %v880_v56 = vld [vmem:[%s962_s26 + $0x70] sm:$0xff]  }
  0x37   : > { %636 = vst [vmem:[%s1015_s17 + $0x80] sm:$0xff] %v604_v58  ;;  %v605_v6 = vmax.f32 %v573_v59, 0.0  ;;  %v543_v7 = vadd.f32 %v991_v11, %v504_v60  ;;  %v402_v8 = vadd.f32 %v986_v10, %v363_v61  ;;  %v846_v9 = vunpack.c.h.bf16 %v891_v45  ;;  %v895_v57 = vld [vmem:[%s967_s29 + $0x70] sm:$0xff]  }
  0x38   : > { %v606_v12 = vmax.f32 %v574_v63, 0.0  ;;  %v544_v13 = vadd.f32 %v991_v11, %v505_v3  ;;  %v364_v14 = vmul.f32 %v782_v4, %v972_v0  ;;  %v785_v15 = vunpack.c.l.bf16 %v877_v62 }
  0x39   : > { %637 = vst [vmem:[%s1015_s17 + $0x88] sm:$0xff] %v605_v6  ;;  %v575_v16 = vadd.f32 %v543_v7, %v401_v2  ;;  %v506_v17 = vmul.f32 %v846_v9, %v977_v1  ;;  %v849_v18 = vunpack.c.l.bf16 %v892_v5  ;;  %v786_v19 = vunpack.c.h.bf16 %v877_v62 }
  0x3a   : > { %638 = vst [vmem:[%s1015_s17 + $0x90] sm:$0xff] %v606_v12  ;;  %v576_v21 = vadd.f32 %v544_v13, %v402_v8  ;;  %v403_v22 = vadd.f32 %v986_v10, %v364_v14  ;;  %v365_v23 = vmul.f32 %v785_v15, %v972_v0  ;;  %v850_v24 = vunpack.c.h.bf16 %v892_v5  ;;  %v881_v14 = vld [vmem:[%s962_s26 + $0x78] sm:$0xff]  }
  0x3b   : > { %v607_v26 = vmax.f32 %v575_v16, 0.0  ;;  %v545_v27 = vadd.f32 %v991_v11, %v506_v17  ;;  %v507_v28 = vmul.f32 %v849_v18, %v977_v1  ;;  %v366_v29 = vmul.f32 %v786_v19, %v972_v0  ;;  %v896_v15 = vld [vmem:[%s967_s29 + $0x78] sm:$0xff]  }
  0x3c   : > { %v608_v30 = vmax.f32 %v576_v21, 0.0  ;;  %v404_v31 = vadd.f32 %v986_v10, %v365_v23  ;;  %v508_v32 = vmul.f32 %v850_v24, %v977_v1  ;;  %v789_v33 = vunpack.c.l.bf16 %v878_v20 }
  0x3d   : > { %639 = vst [vmem:[%s1015_s17 + $0x98] sm:$0xff] %v607_v26  ;;  %v577_v35 = vadd.f32 %v545_v27, %v403_v22  ;;  %v546_v36 = vadd.f32 %v991_v11, %v507_v28  ;;  %v405_v37 = vadd.f32 %v986_v10, %v366_v29  ;;  %v853_v38 = vunpack.c.l.bf16 %v893_v25 }
  0x3e   : > { %640 = vst [vmem:[%s1015_s17 + $0xa0] sm:$0xff] %v608_v30  ;;  %v547_v39 = vadd.f32 %v991_v11, %v508_v32  ;;  %v367_v40 = vmul.f32 %v789_v33, %v972_v0  ;;  %v790_v41 = vunpack.c.h.bf16 %v878_v20  ;;  %v854_v42 = vunpack.c.h.bf16 %v893_v25 }
  0x3f   : > { %v609_v44 = vmax.f32 %v577_v35, 0.0  ;;  %v578_v45 = vadd.f32 %v546_v36, %v404_v31  ;;  %v509_v46 = vmul.f32 %v853_v38, %v977_v1  ;;  %v793_v47 = vunpack.c.l.bf16 %v879_v34 }
  0x40   : > { %v579_v48 = vadd.f32 %v547_v39, %v405_v37  ;;  %v406_v49 = vadd.f32 %v986_v10, %v367_v40  ;;  %v368_v50 = vmul.f32 %v790_v41, %v972_v0  ;;  %v510_v51 = vmul.f32 %v854_v42, %v977_v1 }
  0x41   : > { %641 = vst [vmem:[%s1015_s17 + $0xa8] sm:$0xff] %v609_v44  ;;  %v610_v52 = vmax.f32 %v578_v45, 0.0  ;;  %v548_v53 = vadd.f32 %v991_v11, %v509_v46  ;;  %v369_v54 = vmul.f32 %v793_v47, %v972_v0  ;;  %v857_v55 = vunpack.c.l.bf16 %v894_v43 }
  0x42   : > { %v611_v58 = vmax.f32 %v579_v48, 0.0  ;;  %v407_v59 = vadd.f32 %v986_v10, %v368_v50  ;;  %v549_v60 = vadd.f32 %v991_v11, %v510_v51  ;;  %v794_v61 = vunpack.c.h.bf16 %v879_v34 }
  0x43   : > { %642 = vst [vmem:[%s1015_s17 + $0xb0] sm:$0xff] %v610_v52  ;;  %v580_v62 = vadd.f32 %v548_v53, %v406_v49  ;;  %v408_v63 = vadd.f32 %v986_v10, %v369_v54  ;;  %v511_v2 = vmul.f32 %v857_v55, %v977_v1  ;;  %v858_v3 = vunpack.c.h.bf16 %v894_v43 }
  0x44   : > { %643 = vst [vmem:[%s1015_s17 + $0xb8] sm:$0xff] %v611_v58  ;;  %v581_v4 = vadd.f32 %v549_v60, %v407_v59  ;;  %v370_v5 = vmul.f32 %v794_v61, %v972_v0  ;;  %v797_v6 = vunpack.c.l.bf16 %v880_v56  ;;  %v861_v7 = vunpack.c.l.bf16 %v895_v57 }
  0x45   : > { %v612_v8 = vmax.f32 %v580_v62, 0.0  ;;  %v550_v9 = vadd.f32 %v991_v11, %v511_v2  ;;  %v512_v12 = vmul.f32 %v858_v3, %v977_v1  ;;  %v798_v13 = vunpack.c.h.bf16 %v880_v56 }
  0x46   : > { %v613_v16 = vmax.f32 %v581_v4, 0.0  ;;  %v409_v17 = vadd.f32 %v986_v10, %v370_v5  ;;  %v371_v18 = vmul.f32 %v797_v6, %v972_v0  ;;  %v513_v19 = vmul.f32 %v861_v7, %v977_v1 }
  0x47   : > { %644 = vst [vmem:[%s1015_s17 + $0xc0] sm:$0xff] %v612_v8  ;;  %v582_v20 = vadd.f32 %v550_v9, %v408_v63  ;;  %v551_v21 = vadd.f32 %v991_v11, %v512_v12  ;;  %v372_v22 = vmul.f32 %v798_v13, %v972_v0  ;;  %v862_v23 = vunpack.c.h.bf16 %v895_v57 }
  0x48   : > { %645 = vst [vmem:[%s1015_s17 + $0xc8] sm:$0xff] %v613_v16  ;;  %v410_v24 = vadd.f32 %v986_v10, %v371_v18  ;;  %v552_v25 = vadd.f32 %v991_v11, %v513_v19  ;;  %v801_v26 = vunpack.c.l.bf16 %v881_v14  ;;  %v865_v27 = vunpack.c.l.bf16 %v896_v15 }
  0x49   : > { %v614_v28 = vmax.f32 %v582_v20, 0.0  ;;  %v583_v29 = vadd.f32 %v551_v21, %v409_v17  ;;  %v411_v30 = vadd.f32 %v986_v10, %v372_v22  ;;  %v514_v31 = vmul.f32 %v862_v23, %v977_v1 }
  0x4a   : > { %v584_v32 = vadd.f32 %v552_v25, %v410_v24  ;;  %v373_v33 = vmul.f32 %v801_v26, %v972_v0  ;;  %v515_v34 = vmul.f32 %v865_v27, %v977_v1  ;;  %v802_v35 = vunpack.c.h.bf16 %v881_v14 }
  0x4b   : > { %646 = vst [vmem:[%s1015_s17 + $0xd0] sm:$0xff] %v614_v28  ;;  %v615_v36 = vmax.f32 %v583_v29, 0.0  ;;  %v553_v37 = vadd.f32 %v991_v11, %v514_v31  ;;  %v866_v38 = vunpack.c.h.bf16 %v896_v15 }
  0x4c   : > { %v616_v39 = vmax.f32 %v584_v32, 0.0  ;;  %v412_v40 = vadd.f32 %v986_v10, %v373_v33  ;;  %v554_v41 = vadd.f32 %v991_v11, %v515_v34  ;;  %v374_v42 = vmul.f32 %v802_v35, %v972_v0 }
  0x4d   : > { %647 = vst [vmem:[%s1015_s17 + $0xd8] sm:$0xff] %v615_v36  ;;  %v585_v43 = vadd.f32 %v553_v37, %v411_v30  ;;  %v516_v44 = vmul.f32 %v866_v38, %v977_v1 }
  0x4e   : > { %648 = vst [vmem:[%s1015_s17 + $0xe0] sm:$0xff] %v616_v39  ;;  %v586_v45 = vadd.f32 %v554_v41, %v412_v40  ;;  %v413_v46 = vadd.f32 %v986_v10, %v374_v42 }
  0x4f   : > { %v617_v47 = vmax.f32 %v585_v43, 0.0  ;;  %v555_v48 = vadd.f32 %v991_v11, %v516_v44 }
  0x50   : > { %v618_v49 = vmax.f32 %v586_v45, 0.0 }
  0x51   : > { %649 = vst [vmem:[%s1015_s17 + $0xe8] sm:$0xff] %v617_v47  ;;  %v587_v50 = vadd.f32 %v555_v48, %v413_v46 }
  0x52   : > { %650 = vst [vmem:[%s1015_s17 + $0xf0] sm:$0xff] %v618_v49 }
  0x53   : > { %v619_v51 = vmax.f32 %v587_v50, 0.0 }
  0x55   : > { %651 = vst [vmem:[%s1015_s17 + $0xf8] sm:$0xff] %v619_v51 }
  0x56 PF: > { %s16_s21 = sadd.s32 1, %s911_s21  }
  0x57   : > { %p13_p4 = scmp.ge.s32.totalorder %s16_s21, 4  }
  0x59   :  { %15 = sbr.rel (!%p13_p4) target bundleno = 1 (0x1), region = 77 }

// kernel: residual_block_forward.4
= control target key start
LH: loop header
LB: loop body
LE: loop exit
PB: predicated region body
PF: predicated region fallthrough
CT: control target
= control target key end

     0   :  { %s9006_s18 = smov 0   ;;  %s11996_s0 = inlined_call_operand.vmem [shape: bf16[2,16,16,128], index: 0, kind: input, shape index: {}]   ;;  %s11997_s1 = inlined_call_operand.vmem [shape: f32[1,128], index: 1, kind: input, shape index: {}]   ;;  %s11998_s2 = inlined_call_operand.vmem [shape: f32[1,128], index: 2, kind: input, shape index: {}]   ;;  %s11999_s3 = inlined_call_operand.vmem [shape: bf16[3,3,128,128], index: 3, kind: input, shape index: {}]   ;;  %s12000_s4 = inlined_call_operand.vmem [shape: bf16[2,16,16,128], index: 4, kind: output, shape index: {0}]   ;;  %s12001_s5 = inlined_call_operand.vmem [shape: f32[2,2,128], index: 5, kind: output, shape index: {1}]  }
   0x1 LB: > { %s6889_s19 = sadd.s32 4294967295, %s8973_s18   ;;  %p6893_p0 = scmp.ge.s32.totalorder %s8973_s18, 1  ;;  %s8973_s18 = sphi %s9006_s18, %s16_s18  }
   0x2   : > { %p190_p1 = scmp.lt.s32.totalorder %s8973_s18, 3 }
   0x4   : > { %p191_p2 = pnand %p6893_p0, %p190_p1 }
   0x6   : > { %194 = sbr.rel (%p191_p2) target bundleno = 631 (0x277), region = 36 }
   0xb   : > { %v8768_v0 = vld [vmem:[%s11999_s3 + $0x38] sm:$0xff]   ;;  %v8975_v2 = vmov 0   ;;  %v8770_v3 = vld [vmem:[%s11999_s3 + $0x30] sm:$0xff]   ;;  %p222_p3 = scmp.lt.s32.totalorder %s6889_s19, 1  ;;  %v8772_v5 = vld [vmem:[%s11999_s3 + $0x28] sm:$0xff]   ;;  %vm450_vm0 = vcmask 1040384  }
   0xc   : > { %v8769_v1 = vld [vmem:[%s11999_s3 + $0x78] sm:$0xff]   ;;  %239 = vst [vmem:[#allocation2] sm:$0xf] %v8975_v2  ;;  %240 = vst [vmem:[#allocation2 + $0x4] sm:$0xf] %v8975_v2  ;;  %8215 = vmatprep.subr.bf16.mxu1 %v8768_v0  ;;  %v8771_v4 = vld [vmem:[%s11999_s3 + $0x70] sm:$0xff]  }
   0xd   : > { %241 = vst [vmem:[#allocation2 + $0x8] sm:$0x1] %v8975_v2  ;;  %243 = vst [vmem:[#allocation2 + $0xcc] sm:$0xf] %v8975_v2  ;;  %8216 = vmatpush3.bf16.msra.mxu1 %v8768_v0  ;;  %8183 = vmatprep.subr.bf16.mxu0 %v8769_v1  ;;  %v8773_v6 = vld [vmem:[%s11999_s3 + $0x68] sm:$0xff]   ;;  %s12230_s19 = smov (!%p222_p3, %s6889_s19), 1 }
   0xe   : > { %244 = vst [vmem:[#allocation2 + $0xd0] sm:$0xf] %v8975_v2  ;;  %245 = vst [vmem:[#allocation2 + $0xd4] sm:$0x1] %v8975_v2  ;;  %8184 = vmatpush3.bf16.msra.mxu0 %v8769_v1  ;;  %8217 = vmatprep.subr.bf16.mxu1 %v8770_v3  ;;  %v8774_v7 = vld [vmem:[%s11999_s3 + $0x20] sm:$0xff]   ;;  %s7591_s11 = sshll.u32 %s12230_s19, 7 }
   0xf   : > { %8185 = vmatprep.subr.bf16.mxu0 %v8771_v4  ;;  %v8775_v8 = vld [vmem:[%s11999_s3 + $0x60] sm:$0xff]   ;;  %v8776_v9 = vld [vmem:[%s11999_s3 + $0x18] sm:$0xff]   ;;  %s9052_s20 = scalar_lea.vmem %s11996_s0, %s7591_s11  ;;  %v8778_v11 = vld [vmem:[%s11999_s3 + $0x10] sm:$0xff]   ;;  %vm876_vm1 = vsmask.f32 3328  ;;  %vm1482_vm4 = vcmask 1042432   ;;  %s11696_s6 = scalar_lea.vmem %s12000_s4, %s7591_s11 }
  0x10   : > { %v8777_v10 = vld [vmem:[%s11999_s3 + $0x58] sm:$0xff]   ;;  %v8779_v12 = vld [vmem:[%s11999_s3 + $0x50] sm:$0xff]   ;;  %v9067_v19 = vld [vmem:[%s11997_s1] ss:$0 sm:$0xff]  ;;  %vm877_vm2 = vsmask.f32 7440 }
  0x11   : > { %8218 = vmatpush3.bf16.msra.mxu1 %v8770_v3  ;;  %v7674_v20 = vld [vmem:[%s9052_s20] sm:$0xff]   ;;  %v8780_v27 = vld [vmem:[%s11999_s3 + $0x8] sm:$0xff]   ;;  %vm9087_vm3 = vmor %vm876_vm1, %vm877_vm2  ;;  %vm1483_vm5 = vcmask 1046532   ;;  %s6898_s11 = sshll.u32 %s12230_s19, 1 }
  0x12   : > { %8186 = vmatpush3.bf16.msra.mxu0 %v8771_v4  ;;  %8219 = vmatprep.subr.bf16.mxu1 %v8772_v5  ;;  %v9073_v21 = vld [vmem:[%s11998_s2] ss:$0 sm:$0xff]  ;;  %v7675_v22 = vunpack.c.l.bf16 %v7674_v20  ;;  %v7676_v23 = vunpack.c.h.bf16 %v7674_v20  ;;  %v8781_v31 = vld [vmem:[%s11999_s3 + $0x48] sm:$0xff]   ;;  %v7858_v50 = vld [vmem:[%s9052_s20 + $0x10] sm:$0xff]   ;;  %s235_s9 = scalar_lea.vmem %s12001_s5, %s6898_s11 }
  0x13   : > { %8187 = vmatprep.subr.bf16.mxu0 %v8773_v6  ;;  %v836_v13 = vld [vmem:[#allocation2] sm:$0xf]  ;;  %v9060_v14 = vld [vmem:[#allocation2 + $0x4] sm:$0xf]  ;;  %v7857_v41 = vld [vmem:[%s9052_s20 + $0x8] sm:$0xff]   ;;  %v7683_v55 = vunpack.c.l.bf16 %v7858_v50  ;;  %v7684_v59 = vunpack.c.h.bf16 %v7858_v50 }
  0x14   : > { %v880_v15 = vshrl.u32 %v836_v13, 16  ;;  %v883_v16 = vshll.u32 %v836_v13, 16  ;;  %v893_v17 = vshrl.u32 %v9060_v14, 16  ;;  %v6981_v18 = vcombine.low %v836_v13, %v9060_v14  ;;  %v9075_v26 = vld [vmem:[#allocation2 + $0x8] sm:$0x1]  ;;  %v8782_v37 = vld [vmem:[%s11999_s3] sm:$0xff]   ;;  %vm9241_vm6 = vmor %vm1482_vm4, %vm1483_vm5 }
  0x15   : > { %8220 = vmatpush3.bf16.msra.mxu1 %v8772_v5  ;;  %v316_v28 = vmul.f32 %v7675_v22, %v9067_v19  ;;  %v317_v29 = vmul.f32 %v7676_v23, %v9067_v19  ;;  %v889_v30 = vshll.u32 %v9060_v14, 16  ;;  %v1487_v32 = vrot.slane %v9060_v14, 5  ;;  %v8783_v51 = vld [vmem:[%s11999_s3 + $0x40] sm:$0xff]   ;;  %v9110_v60 = vld [vmem:[%s11999_s3 + $0xf8] sm:$0xff]  }
  0x16   : > { %8188 = vmatpush3.bf16.msra.mxu0 %v8773_v6  ;;  %8221 = vmatprep.subr.bf16.mxu1 %v8774_v7  ;;  %v882_v24 = vrot.slane %v880_v15, 4  ;;  %v885_v25 = vrot.slane %v883_v16, 5  ;;  %v895_v35 = vrot.slane %v893_v17, 4  ;;  %v899_v36 = vshll.u32 %v9075_v26, 16  ;;  %v9126_v4 = vld [vmem:[%s11999_s3 + $0xb8] sm:$0xff]  }
  0x17   : > { %8189 = vmatprep.subr.bf16.mxu0 %v8775_v8  ;;  %8231 = vmatprep.mubr.bf16.mxu1 %v6981_v18  ;;  %v354_v38 = vadd.f32 %v9073_v21, %v316_v28  ;;  %v355_v39 = vadd.f32 %v9073_v21, %v317_v29  ;;  %v891_v40 = vrot.slane %v889_v30, 5  ;;  %v1490_v43 = vrot.slane %v9075_v26, 5  ;;  %v7859_v6 = vld [vmem:[%s9052_s20 + $0x18] sm:$0xff]  }
  0x18   : > { %v886_v34 = vor.u32 %v885_v25, %v882_v24  ;;  %v7679_v44 = vunpack.c.l.bf16 %v7857_v41  ;;  %v7680_v45 = vunpack.c.h.bf16 %v7857_v41  ;;  %v901_v49 = vrot.slane %v899_v36, 5 }
  0x19   : > { %8222 = vmatpush3.bf16.msra.mxu1 %v8774_v7  ;;  %v386_v46 = vmax.f32 %v354_v38, 0.0  ;;  %v387_v47 = vmax.f32 %v355_v39, 0.0  ;;  %v896_v48 = vor.u32 %v895_v35, %v891_v40  ;;  %v320_v63 = vmul.f32 %v7683_v55, %v9067_v19  ;;  %v9143_v38 = vld [vmem:[%s9052_s20 + $0x28] sm:$0xff]  }
  0x1a   : > { %8190 = vmatpush3.bf16.msra.mxu0 %v8775_v8  ;;  %8223 = vmatprep.subr.bf16.mxu1 %v8776_v9  ;;  %v887_v42 = vrot.slane %v886_v34, 4  ;;  %v318_v53 = vmul.f32 %v7679_v44, %v9067_v19  ;;  %v319_v54 = vmul.f32 %v7680_v45, %v9067_v19  ;;  %v9117_v0 = vrot.slane %v1487_v32, 4  ;;  %v9149_v44 = vld [vmem:[%s9052_s20 + $0x30] sm:$0xff]  }
  0x1b   : > { %8191 = vmatprep.subr.bf16.mxu0 %v8777_v10  ;;  %v451_v56 = vrot.slane %v386_v46, 7  ;;  %v452_v57 = vrot.slane %v387_v47, 7  ;;  %v897_v58 = vrot.slane %v896_v48, 4  ;;  %v321_v15 = vmul.f32 %v7684_v59, %v9067_v19 }
  0x1c   : > { %v892_v52 = vsel %vm9087_vm3, %v887_v42, %v891_v40  ;;  %v356_v61 = vadd.f32 %v9073_v21, %v318_v53  ;;  %v357_v62 = vadd.f32 %v9073_v21, %v319_v54  ;;  %v358_v16 = vadd.f32 %v9073_v21, %v320_v63 }
  0x1d   : > { %8224 = vmatpush3.bf16.msra.mxu1 %v8776_v9  ;;  %v453_v1 = vsel %vm450_vm0, %v451_v56, %v452_v57  ;;  %v547_v2 = vsel %vm450_vm0, 0.0, %v451_v56  ;;  %v902_v3 = vsel %vm9087_vm3, %v897_v58, %v901_v49  ;;  %v563_v5 = vsel %vm450_vm0, %v452_v57, 0.0 }
  0x1e   : > { %8192 = vmatpush3.bf16.msra.mxu0 %v8777_v10  ;;  %8225 = vmatprep.subr.bf16.mxu1 %v8778_v11  ;;  %v7593_v7 = vpack.c.bf16 %v547_v2, %v547_v2  ;;  %v7594_v8 = vpack.c.bf16 %v453_v1, %v453_v1  ;;  %v6965_v9 = vcombine.low %v892_v52, %v902_v3  ;;  %v389_v13 = vmax.f32 %v357_v62, 0.0  ;;  %v8788_v1 = vld [vmem:[%s11999_s3 + $0xf0] sm:$0xff]  }
  0x1f   : > { %8193 = vmatprep.subr.bf16.mxu0 %v8779_v12  ;;  %v7595_v10 = vpack.c.bf16 %v563_v5, %v563_v5  ;;  %v7687_v17 = vunpack.c.l.bf16 %v7859_v6  ;;  %v7688_v18 = vunpack.c.h.bf16 %v7859_v6  ;;  %v359_v25 = vadd.f32 %v9073_v21, %v321_v15 }
  0x20   : > { %788 = vst [vmem:[#allocation2 + $0xc] sm:$0xf] %v7593_v7  ;;  %789 = vst [vmem:[#allocation2 + $0x10] sm:$0xf] %v7594_v8  ;;  %8199 = vmatprep.mubr.bf16.mxu0 %v6965_v9  ;;  %v455_v24 = vrot.slane %v389_v13, 7  ;;  %v7695_v57 = vunpack.c.l.bf16 %v9143_v38  ;;  %v7696_v58 = vunpack.c.h.bf16 %v9143_v38  ;;  %v7699_v6 = vunpack.c.l.bf16 %v9149_v44  ;;  %v8799_v38 = vld [vmem:[%s11999_s3 + $0x98] sm:$0xff]  }
  0x21   : > { %8226 = vmatpush3.bf16.msra.mxu1 %v8778_v11  ;;  %v7860_v11 = vld [vmem:[%s9052_s20 + $0x20] sm:$0xff]   ;;  %790 = vst [vmem:[#allocation2 + $0x14] sm:$0x1] %v7595_v10  ;;  %v322_v28 = vmul.f32 %v7687_v17, %v9067_v19  ;;  %v323_v29 = vmul.f32 %v7688_v18, %v9067_v19  ;;  %v391_v36 = vmax.f32 %v359_v25, 0.0  ;;  %v8792_v17 = vld [vmem:[%s11999_s3 + $0xe8] sm:$0xff]  }
  0x22   : > { %8194 = vmatpush3.bf16.msra.mxu0 %v8779_v12  ;;  %8227 = vmatprep.subr.bf16.mxu1 %v8780_v27  ;;  %v388_v12 = vmax.f32 %v356_v61, 0.0  ;;  %v7691_v20 = vunpack.c.l.bf16 %v7860_v11  ;;  %v7692_v22 = vunpack.c.h.bf16 %v7860_v11  ;;  %v564_v40 = vsel %vm450_vm0, %v455_v24, 0.0 }
  0x23   : > { %8195 = vmatprep.subr.bf16.mxu0 %v8781_v31  ;;  %v360_v41 = vadd.f32 %v9073_v21, %v322_v28  ;;  %v361_v42 = vadd.f32 %v9073_v21, %v323_v29  ;;  %v458_v45 = vrot.slane %v391_v36, 7  ;;  %v7598_v47 = vpack.c.bf16 %v564_v40, %v564_v40 }
  0x24   : > { %v454_v23 = vrot.slane %v388_v12, 7  ;;  %v324_v30 = vmul.f32 %v7691_v20, %v9067_v19  ;;  %v9187_v28 = vmul.f32 %v7695_v57, %v9067_v19 }
  0x25   : > { %8228 = vmatpush3.bf16.msra.mxu1 %v8780_v27  ;;  %v390_v27 = vmax.f32 %v358_v16, 0.0  ;;  %v392_v49 = vmax.f32 %v360_v41, 0.0  ;;  %v393_v50 = vmax.f32 %v361_v42, 0.0  ;;  %793 = vst [vmem:[#allocation2 + $0x20] sm:$0x1] %v7598_v47  ;;  %v565_v15 = vsel %vm450_vm0, %v458_v45, 0.0 }
  0x26   : > { %8196 = vmatpush3.bf16.msra.mxu0 %v8781_v31  ;;  %8229 = vmatprep.subr.bf16.mxu1 %v8782_v37  ;;  %v325_v31 = vmul.f32 %v7692_v22, %v9067_v19  ;;  %v456_v34 = vsel %vm450_vm0, %v454_v23, %v455_v24  ;;  %v548_v35 = vsel %vm450_vm0, 0.0, %v454_v23  ;;  %v7601_v18 = vpack.c.bf16 %v565_v15, %v565_v15 }
  0x27   : > { %8197 = vmatprep.subr.bf16.mxu0 %v8783_v51  ;;  %v7740_v39 = vpack.c.bf16 %v456_v34, %v548_v35  ;;  %v838_v52 = vld [vmem:[#allocation2 + $0xc] sm:$0xf]  ;;  %v9155_v53 = vld [vmem:[#allocation2 + $0x10] sm:$0xf]  ;;  %v460_v20 = vrot.slane %v392_v49, 7  ;;  %v9180_v22 = vrot.slane %v393_v50, 7 }
  0x28   : > { %v9157_v54 = vld [vmem:[#allocation2 + $0x14] sm:$0x1]  ;;  %v9161_v56 = vadd.f32 %v9073_v21, %v325_v31  ;;  %v904_v59 = vshrl.u32 %v838_v52, 16  ;;  %v907_v61 = vshll.u32 %v838_v52, 16  ;;  %v917_v62 = vshrl.u32 %v9155_v53, 16 }
  0x29   : > { %8230 = vmatpush3.bf16.msra.mxu1 %v8782_v37  ;;  %v457_v37 = vrot.slane %v390_v27, 7  ;;  %7872 = vst [vmem:[#allocation2 + $0x18] sm:$0xff] %v7740_v39   ;;  %v6982_v63 = vcombine.low %v838_v52, %v9155_v53  ;;  %v1494_v2 = vrot.slane %v9155_v53, 5  ;;  %v913_v3 = vshll.u32 %v9155_v53, 16  ;;  %796 = vst [vmem:[#allocation2 + $0x2c] sm:$0x1] %v7601_v18 }
  0x2a   : > { %8198 = vmatpush3.bf16.msra.mxu0 %v8783_v51  ;;  %8279 = vmatprep.subr.bf16.mxu1 %v9110_v60  ;;  %v9153_v51 = vadd.f32 %v9073_v21, %v324_v30  ;;  %v923_v5 = vshll.u32 %v9157_v54, 16  ;;  %v906_v7 = vrot.slane %v904_v59, 4  ;;  %v909_v8 = vrot.slane %v907_v61, 5 }
  0x2b   : > { %8247 = vmatprep.subr.bf16.mxu0 %v9126_v4  ;;  %v549_v46 = vsel %vm450_vm0, 0.0, %v457_v37  ;;  %v459_v55 = vsel %vm450_vm0, %v457_v37, %v458_v45  ;;  %v919_v9 = vrot.slane %v917_v62, 4  ;;  %v915_v11 = vrot.slane %v913_v3, 5 }
  0x2c   : > { %v7599_v48 = vpack.c.bf16 %v549_v46, %v549_v46  ;;  %8232 = vmatmul.mubr.bf16.vlgmr.msra.gmra.mxu1 %v6982_v63  ;;  %v7600_v10 = vpack.c.bf16 %v459_v55, %v459_v55  ;;  %v925_v12 = vrot.slane %v923_v5, 5  ;;  %v1497_v13 = vrot.slane %v9157_v54, 5  ;;  %v9190_v35 = vld [vmem:[#allocation2 + $0x20] sm:$0x1] }
  0x2d   : > { %8280 = vmatpush3.bf16.msra.mxu1 %v9110_v60  ;;  %v910_v16 = vor.u32 %v909_v8, %v906_v7  ;;  %v920_v23 = vor.u32 %v919_v9, %v915_v11  ;;  %v394_v25 = vmax.f32 %v9153_v51, 0.0  ;;  %v395_v27 = vmax.f32 %v9161_v56, 0.0  ;;  %v8790_v56 = vld [vmem:[%s11999_s3 + $0xb0] sm:$0xff]  }
  0x2e   : > { %794 = vst [vmem:[#allocation2 + $0x24] sm:$0xf] %v7599_v48  ;;  %8281 = vmatprep.subr.bf16.mxu1 %v8788_v1  ;;  %795 = vst [vmem:[#allocation2 + $0x28] sm:$0xf] %v7600_v10  ;;  %v947_v41 = vshll.u32 %v9190_v35, 16  ;;  %v8794_v48 = vld [vmem:[%s11999_s3 + $0xe0] sm:$0xff]   ;;  %v462_v3 = vsel %vm450_vm0, %v460_v20, %v9180_v22 }
  0x2f   : > { %v911_v29 = vrot.slane %v910_v16, 4  ;;  %v921_v36 = vrot.slane %v920_v23, 4  ;;  %v550_v5 = vsel %vm450_vm0, 0.0, %v460_v20  ;;  %v463_v18 = vrot.slane %v394_v25, 7  ;;  %v8793_v23 = vld [vmem:[%s11999_s3 + $0xa8] sm:$0xff]  }
  0x30   : > { %v840_v24 = vld [vmem:[#allocation2 + $0x18] sm:$0xf]  ;;  %v9182_v60 = vld [vmem:[#allocation2 + $0x1c] sm:$0xf]  ;;  %v949_v61 = vrot.slane %v947_v41, 5  ;;  %v464_v25 = vrot.slane %v395_v27, 7 }
  0x31   : > { %v928_v30 = vshrl.u32 %v840_v24, 16  ;;  %v931_v31 = vshll.u32 %v840_v24, 16  ;;  %v941_v34 = vshrl.u32 %v9182_v60, 16  ;;  %8282 = vmatpush3.bf16.msra.mxu1 %v8788_v1  ;;  %v6983_v37 = vcombine.low %v840_v24, %v9182_v60  ;;  %v9217_v15 = vld [vmem:[#allocation2 + $0x2c] sm:$0x1] }
  0x32   : > { %v937_v40 = vshll.u32 %v9182_v60, 16  ;;  %v916_v42 = vsel %vm9087_vm3, %v911_v29, %v915_v11  ;;  %8283 = vmatprep.subr.bf16.mxu1 %v8792_v17  ;;  %v926_v49 = vsel %vm9087_vm3, %v921_v36, %v925_v12  ;;  %v8798_v11 = vld [vmem:[%s11999_s3 + $0xd8] sm:$0xff]   ;;  %v1458_v36 = vld [vmem:[#allocation2] sm:$0xe]  ;;  %v465_v27 = vsel %vm450_vm0, %v463_v18, %v464_v25 }
  0x33   : > { %v930_v45 = vrot.slane %v928_v30, 4  ;;  %v933_v46 = vrot.slane %v931_v31, 5  ;;  %8235 = vmatprep.mubr.bf16.mxu1 %v6983_v37  ;;  %v943_v52 = vrot.slane %v941_v34, 4  ;;  %v6966_v55 = vcombine.low %v916_v42, %v926_v49  ;;  %v8800_v42 = vld [vmem:[%s11999_s3 + $0xd0] sm:$0xff]  }
  0x34   : > { %v939_v51 = vrot.slane %v937_v40, 5  ;;  %v971_v30 = vshll.u32 %v9217_v15, 16  ;;  %v551_v34 = vsel %vm450_vm0, 0.0, %v463_v18 }
  0x35   : > { %v842_v39 = vld [vmem:[#allocation2 + $0x24] sm:$0xf]  ;;  %v934_v59 = vor.u32 %v933_v46, %v930_v45  ;;  %v9205_v62 = vld [vmem:[#allocation2 + $0x28] sm:$0xf]  ;;  %8284 = vmatpush3.bf16.msra.mxu1 %v8792_v17  ;;  %8200 = vmatmul.mubr.bf16.vlgmr.msra.gmra.mxu0 %v6966_v55  ;;  %v7745_v17 = vpack.c.bf16 %v462_v3, %v550_v5  ;;  %v7605_v41 = vpack.c.bf16 %v551_v34, %v551_v34  ;;  %v9231_v45 = vld [vmem:[#allocation2 + $0xc] sm:$0xe] }
  0x36   : > { %v952_v47 = vshrl.u32 %v842_v39, 16  ;;  %v955_v50 = vshll.u32 %v842_v39, 16  ;;  %v944_v1 = vor.u32 %v943_v52, %v939_v51  ;;  %v965_v7 = vshrl.u32 %v9205_v62, 16  ;;  %8285 = vmatprep.subr.bf16.mxu1 %v8794_v48  ;;  %8248 = vmatpush3.bf16.msra.mxu0 %v9126_v4 }
  0x37   : > { %v6984_v8 = vcombine.low %v842_v39, %v9205_v62  ;;  %v935_v9 = vrot.slane %v934_v59, 4  ;;  %v961_v10 = vshll.u32 %v9205_v62, 16  ;;  %8249 = vmatprep.subr.bf16.mxu0 %v8790_v56  ;;  %7873 = vst [vmem:[#allocation2 + $0x30] sm:$0xff] %v7745_v17   ;;  %v973_v40 = vrot.slane %v971_v30, 5  ;;  %800 = vst [vmem:[#allocation2 + $0x3c] sm:$0xf] %v7605_v41 }
  0x38   : > { %v954_v57 = vrot.slane %v952_v47, 4  ;;  %v957_v63 = vrot.slane %v955_v50, 5  ;;  %v945_v12 = vrot.slane %v944_v1, 4  ;;  %v967_v29 = vrot.slane %v965_v7, 4 }
  0x39   : > { %8236 = vmatmul.mubr.bf16.gmra.mxu1 %v6984_v8  ;;  %v940_v20 = vsel %vm9087_vm3, %v935_v9, %v939_v51  ;;  %v963_v24 = vrot.slane %v961_v10, 5  ;;  %v566_v47 = vsel %vm450_vm0, %v9180_v22, 0.0  ;;  %v8796_v51 = vld [vmem:[%s11999_s3 + $0xa0] sm:$0xff]   ;;  %v7606_v52 = vpack.c.bf16 %v465_v27, %v465_v27 }
  0x3a   : > { %v958_v16 = vor.u32 %v957_v63, %v954_v57  ;;  %v950_v4 = vsel %vm9087_vm3, %v945_v12, %v949_v61  ;;  %8286 = vmatpush3.bf16.msra.mxu1 %v8794_v48  ;;  %8250 = vmatpush3.bf16.msra.mxu0 %v8790_v56  ;;  %v567_v48 = vsel %vm450_vm0, %v464_v25, 0.0  ;;  %v7604_v55 = vpack.c.bf16 %v566_v47, %v566_v47 }
  0x3b   : > { %v6967_v37 = vcombine.low %v940_v20, %v950_v4  ;;  %v968_v39 = vor.u32 %v967_v29, %v963_v24  ;;  %8287 = vmatprep.subr.bf16.mxu1 %v8798_v11  ;;  %8251 = vmatprep.subr.bf16.mxu0 %v8793_v23  ;;  %v7607_v56 = vpack.c.bf16 %v567_v48, %v567_v48  ;;  %v7700_v59 = vunpack.c.h.bf16 %v9149_v44  ;;  %v8804_v44 = vld [vmem:[%s11999_s3 + $0xc8] sm:$0xff]   ;;  %v8802_v20 = vld [vmem:[%s11999_s3 + $0x90] sm:$0xff]  }
  0x3c   : > { %v959_v31 = vrot.slane %v958_v16, 4  ;;  %v327_v22 = vmul.f32 %v7696_v58, %v9067_v19  ;;  %v364_v57 = vadd.f32 %v9073_v21, %v9187_v28  ;;  %v328_v61 = vmul.f32 %v7699_v6, %v9067_v19  ;;  %801 = vst [vmem:[#allocation2 + $0x40] sm:$0xf] %v7606_v52  ;;  %799 = vst [vmem:[#allocation2 + $0x38] sm:$0x1] %v7604_v55 }
  0x3d   : > { %8203 = vmatprep.mubr.bf16.mxu0 %v6967_v37  ;;  %v969_v50 = vrot.slane %v968_v39, 4  ;;  %v9259_v63 = vrot.slane %v1494_v2, 4  ;;  %802 = vst [vmem:[#allocation2 + $0x44] sm:$0x1] %v7607_v56  ;;  %v6997_v58 = vrot.slane %v1458_v36, 9  ;;  %v9274_v6 = vsel %vm9241_vm6, %v9117_v0, %v1490_v43 }
  0x3e   : > { %v964_v46 = vsel %vm9087_vm3, %v959_v31, %v963_v24  ;;  %8288 = vmatpush3.bf16.msra.mxu1 %v8798_v11  ;;  %8252 = vmatpush3.bf16.msra.mxu0 %v8793_v23  ;;  %v365_v3 = vadd.f32 %v9073_v21, %v327_v22  ;;  %v396_v5 = vmax.f32 %v364_v57, 0.0  ;;  %v6998_v7 = vrot.slane %v9231_v45, 9  ;;  %v844_v8 = vld [vmem:[#allocation2 + $0x30] sm:$0xf]  ;;  %v9278_v9 = vld [vmem:[#allocation2 + $0x34] sm:$0xf] }
  0x3f   : > { %v974_v1 = vsel %vm9087_vm3, %v969_v50, %v973_v40  ;;  %8289 = vmatprep.subr.bf16.mxu1 %v8800_v42  ;;  %8253 = vmatprep.subr.bf16.mxu0 %v8796_v51  ;;  %v329_v10 = vmul.f32 %v7700_v59, %v9067_v19  ;;  %v9282_v26 = vadd.f32 %v9073_v21, %v328_v61  ;;  %v976_v11 = vshrl.u32 %v844_v8, 16  ;;  %v8806_v23 = vld [vmem:[%s11999_s3 + $0xc0] sm:$0xff]   ;;  %v846_v4 = vld [vmem:[#allocation2 + $0x3c] sm:$0xf]  ;;  %v1460_v61 = vld [vmem:[#allocation2 + $0x18] sm:$0xe] }
  0x40   : > { %v6968_v28 = vcombine.low %v964_v46, %v974_v1  ;;  %v979_v43 = vshll.u32 %v844_v8, 16  ;;  %v989_v0 = vshrl.u32 %v9278_v9, 16  ;;  %v6985_v12 = vcombine.low %v844_v8, %v9278_v9 }
  0x41   : > { %v985_v16 = vshll.u32 %v9278_v9, 16  ;;  %v397_v17 = vmax.f32 %v365_v3, 0.0  ;;  %v466_v18 = vrot.slane %v396_v5, 7  ;;  %v9297_v24 = vsel %vm9241_vm6, %v6997_v58, %v1487_v32 }
  0x42   : > { %8204 = vmatmul.mubr.bf16.gmra.mxu0 %v6968_v28  ;;  %8290 = vmatpush3.bf16.msra.mxu1 %v8800_v42  ;;  %v978_v29 = vrot.slane %v976_v11, 4  ;;  %v981_v30 = vrot.slane %v979_v43, 5  ;;  %v991_v31 = vrot.slane %v989_v0, 4  ;;  %v398_v25 = vmax.f32 %v9282_v26, 0.0  ;;  %v8807_v43 = vld [vmem:[%s11999_s3 + $0x80] sm:$0xff]  }
  0x43   : > { %8291 = vmatprep.subr.bf16.mxu1 %v8804_v44  ;;  %8239 = vmatprep.mubr.bf16.mxu1 %v6985_v12  ;;  %v1000_v34 = vshrl.u32 %v846_v4, 16  ;;  %v1003_v36 = vshll.u32 %v846_v4, 16  ;;  %v987_v37 = vrot.slane %v985_v16, 5  ;;  %v467_v39 = vrot.slane %v397_v17, 7  ;;  %v9300_v40 = vld [vmem:[#allocation2 + $0x40] sm:$0xf] }
  0x44   : > { %8254 = vmatpush3.bf16.msra.mxu0 %v8796_v51  ;;  %v9302_v14 = vld [vmem:[#allocation2 + $0x38] sm:$0x1]  ;;  %v982_v41 = vor.u32 %v981_v30, %v978_v29  ;;  %v9304_v32 = vld [vmem:[#allocation2 + $0x44] sm:$0x1]  ;;  %v367_v42 = vadd.f32 %v9073_v21, %v329_v10  ;;  %v7021_v45 = vcombine.low %v9297_v24, %v9274_v6  ;;  %v9313_v46 = vsel %vm9241_vm6, %v6998_v7, %v1494_v2  ;;  %v8805_v2 = vld [vmem:[%s11999_s3 + $0x88] sm:$0xff]  }
  0x45   : > { %8255 = vmatprep.subr.bf16.mxu0 %v8799_v38  ;;  %v1002_v27 = vrot.slane %v1000_v34, 4  ;;  %v1005_v47 = vrot.slane %v1003_v36, 5  ;;  %v1013_v48 = vshrl.u32 %v9300_v40, 16  ;;  %v6986_v50 = vcombine.low %v846_v4, %v9300_v40  ;;  %v9320_v21 = vld [vmem:[%s11999_s3 + $0x178] sm:$0xff]   ;;  %v1461_v0 = vld [vmem:[#allocation2 + $0x24] sm:$0xe] }
  0x46   : > { %8292 = vmatpush3.bf16.msra.mxu1 %v8804_v44  ;;  %v983_v51 = vrot.slane %v982_v41, 4  ;;  %v992_v52 = vor.u32 %v991_v31, %v987_v37  ;;  %v995_v53 = vshll.u32 %v9302_v14, 16  ;;  %v1009_v55 = vshll.u32 %v9300_v40, 16  ;;  %v1463_v31 = vld [vmem:[#allocation2 + $0x3c] sm:$0xe]  ;;  %v8818_v24 = vld [vmem:[%s11999_s3 + $0x160] sm:$0xff]  }
  0x47   : > { %8293 = vmatprep.subr.bf16.mxu1 %v8806_v23  ;;  %8240 = vmatmul.mubr.bf16.gmra.mxu1 %v6986_v50  ;;  %v1006_v56 = vor.u32 %v1005_v47, %v1002_v27  ;;  %v1015_v22 = vrot.slane %v1013_v48, 4  ;;  %v1019_v57 = vshll.u32 %v9304_v32, 16  ;;  %v468_v59 = vsel %vm450_vm0, %v466_v18, %v467_v39  ;;  %v9351_v48 = vld [vmem:[%s11999_s3 + $0x138] sm:$0xff]  }
  0x48   : > { %8256 = vmatpush3.bf16.msra.mxu0 %v8799_v38  ;;  %v988_v1 = vsel %vm9087_vm3, %v983_v51, %v987_v37  ;;  %v993_v44 = vrot.slane %v992_v52, 4  ;;  %v997_v58 = vrot.slane %v995_v53, 5  ;;  %v1011_v28 = vrot.slane %v1009_v55, 5 }
  0x49   : > { %8257 = vmatprep.subr.bf16.mxu0 %v8802_v20  ;;  %v1007_v38 = vrot.slane %v1006_v56, 4  ;;  %v1021_v3 = vrot.slane %v1019_v57, 5  ;;  %v552_v5 = vsel %vm450_vm0, 0.0, %v466_v18  ;;  %v399_v7 = vmax.f32 %v367_v42, 0.0  ;;  %v7863_v57 = vld [vmem:[%s9052_s20 + $0x38] sm:$0xff]  }
  0x4a   : > { %8294 = vmatpush3.bf16.msra.mxu1 %v8806_v23  ;;  %v998_v8 = vsel %vm9087_vm3, %v993_v44, %v997_v58  ;;  %v1016_v10 = vor.u32 %v1015_v22, %v1011_v28  ;;  %v7750_v26 = vpack.c.bf16 %v468_v59, %v552_v5  ;;  %v469_v11 = vrot.slane %v398_v25, 7  ;;  %v1462_v23 = vld [vmem:[#allocation2 + $0x30] sm:$0xe] }
  0x4b   : > { %8343 = vmatprep.subr.bf16.mxu1 %v9320_v21  ;;  %v6969_v12 = vcombine.low %v988_v1, %v998_v8  ;;  %v1012_v16 = vsel %vm9087_vm3, %v1007_v38, %v1011_v28  ;;  %v470_v17 = vrot.slane %v399_v7, 7  ;;  %v568_v18 = vsel %vm450_vm0, %v467_v39, 0.0  ;;  %v8808_v7 = vld [vmem:[#allocation2 + $0xc] sm:$0xff]  }
  0x4c   : > { %8258 = vmatpush3.bf16.msra.mxu0 %v8802_v20  ;;  %v1017_v29 = vrot.slane %v1016_v10, 4  ;;  %7874 = vst [vmem:[#allocation2 + $0x48] sm:$0xff] %v7750_v26   ;;  %v553_v30 = vsel %vm450_vm0, 0.0, %v469_v11  ;;  %v7610_v4 = vpack.c.bf16 %v568_v18, %v568_v18  ;;  %v6999_v20 = vrot.slane %v1460_v61, 9 }
  0x4d   : > { %8259 = vmatprep.subr.bf16.mxu0 %v8805_v2  ;;  %8207 = vmatprep.mubr.bf16.mxu0 %v6969_v12  ;;  %v471_v25 = vsel %vm450_vm0, %v469_v11, %v470_v17  ;;  %v7611_v34 = vpack.c.bf16 %v553_v30, %v553_v30  ;;  %v569_v36 = vsel %vm450_vm0, %v470_v17, 0.0  ;;  %v1501_v37 = vrot.slane %v9182_v60, 5 }
  0x4e   : > { %v1022_v39 = vsel %vm9087_vm3, %v1017_v29, %v1021_v3  ;;  %v7612_v41 = vpack.c.bf16 %v471_v25, %v471_v25  ;;  %805 = vst [vmem:[#allocation2 + $0x50] sm:$0x1] %v7610_v4  ;;  %v7613_v42 = vpack.c.bf16 %v569_v36, %v569_v36  ;;  %v1504_v27 = vrot.slane %v9190_v35, 5 }
  0x4f   : > { %v6970_v47 = vcombine.low %v1012_v16, %v1022_v39  ;;  %806 = vst [vmem:[#allocation2 + $0x54] sm:$0xf] %v7611_v34  ;;  %v9358_v60 = vsel %vm9241_vm6, %v9259_v63, %v1497_v13  ;;  %v1503_v50 = vrot.slane %v1501_v37, 4  ;;  %v7000_v51 = vrot.slane %v1461_v0, 9 }
  0x50   : > { %8260 = vmatpush3.bf16.msra.mxu0 %v8805_v2  ;;  %807 = vst [vmem:[#allocation2 + $0x58] sm:$0xf] %v7612_v41  ;;  %808 = vst [vmem:[#allocation2 + $0x5c] sm:$0x1] %v7613_v42  ;;  %v9362_v35 = vsel %vm9241_vm6, %v6999_v20, %v1501_v37  ;;  %v1508_v52 = vrot.slane %v9205_v62, 5  ;;  %v1511_v53 = vrot.slane %v9217_v15, 5  ;;  %v7022_v56 = vcombine.low %v9313_v46, %v9358_v60 }
  0x51   : > { %8261 = vmatprep.subr.bf16.mxu0 %v8807_v43  ;;  %v7001_v55 = vrot.slane %v1462_v23, 9  ;;  %8208 = vmatmul.mubr.bf16.gmra.mxu0 %v6970_v47  ;;  %v9368_v54 = vsel %vm9241_vm6, %v1503_v50, %v1504_v27  ;;  %v1515_v13 = vrot.slane %v9278_v9, 5  ;;  %v7002_v63 = vrot.slane %v1463_v31, 9 }
  0x52   : > { %v1522_v2 = vrot.slane %v9300_v40, 5  ;;  %v1510_v22 = vrot.slane %v1508_v52, 4  ;;  %v1518_v62 = vrot.slane %v9302_v14, 5  ;;  %v7023_v61 = vcombine.low %v9362_v35, %v9368_v54  ;;  %v9440_v14 = vld [vmem:[#allocation2 + $0x10] sm:$0xf] }
  0x53   : > { %v848_v15 = vld [vmem:[#allocation2 + $0x48] sm:$0xf]  ;;  %v9376_v59 = vld [vmem:[#allocation2 + $0x4c] sm:$0xf]  ;;  %v9383_v9 = vsel %vm9241_vm6, %v7000_v51, %v1508_v52  ;;  %v9387_v40 = vsel %vm9241_vm6, %v7001_v55, %v1515_v13  ;;  %v7703_v10 = vunpack.c.l.bf16 %v7863_v57  ;;  %v7704_v26 = vunpack.c.h.bf16 %v7863_v57 }
  0x54   : > { %8262 = vmatpush3.bf16.msra.mxu0 %v8807_v43  ;;  %v9391_v1 = vsel %vm9241_vm6, %v7002_v63, %v1522_v2  ;;  %v1024_v44 = vshrl.u32 %v848_v15, 16  ;;  %v1027_v58 = vshll.u32 %v848_v15, 16  ;;  %v1037_v28 = vshrl.u32 %v9376_v59, 16 }
  0x55   : > { %8311 = vmatprep.subr.bf16.mxu0 %v9351_v48  ;;  %v6987_v38 = vcombine.low %v848_v15, %v9376_v59  ;;  %v9395_v3 = vld [vmem:[#allocation2 + $0x50] sm:$0x1]  ;;  %v1033_v5 = vshll.u32 %v9376_v59, 16  ;;  %v9400_v8 = vsel %vm9241_vm6, %v1510_v22, %v1511_v53  ;;  %v1517_v30 = vrot.slane %v1515_v13, 4  ;;  %v1464_v15 = vld [vmem:[#allocation2 + $0x48] sm:$0xe] }
  0x56   : > { %v1026_v11 = vrot.slane %v1024_v44, 4  ;;  %v1029_v43 = vrot.slane %v1027_v58, 5  ;;  %v850_v0 = vld [vmem:[#allocation2 + $0x54] sm:$0xf]  ;;  %v1039_v12 = vrot.slane %v1037_v28, 4  ;;  %v1043_v16 = vshll.u32 %v9395_v3, 16 }
  0x57   : > { %8243 = vmatprep.mubr.bf16.mxu1 %v6987_v38  ;;  %v9403_v17 = vld [vmem:[#allocation2 + $0x58] sm:$0xf]  ;;  %v1048_v18 = vshrl.u32 %v850_v0, 16  ;;  %v1051_v23 = vshll.u32 %v850_v0, 16  ;;  %v1035_v29 = vrot.slane %v1033_v5, 5  ;;  %v1524_v50 = vrot.slane %v1522_v2, 4 }
  0x58   : > { %v1061_v4 = vshrl.u32 %v9403_v17, 16  ;;  %v6988_v20 = vcombine.low %v850_v0, %v9403_v17  ;;  %v1030_v31 = vor.u32 %v1029_v43, %v1026_v11  ;;  %v1045_v25 = vrot.slane %v1043_v16, 5  ;;  %v9407_v34 = vld [vmem:[#allocation2 + $0x5c] sm:$0x1]  ;;  %v8960_v38 = vld [vmem:[%s11997_s1] ss:$0 sm:$0xff] }
  0x59   : > { %v1050_v36 = vrot.slane %v1048_v18, 4  ;;  %v1053_v37 = vrot.slane %v1051_v23, 5  ;;  %v1040_v39 = vor.u32 %v1039_v12, %v1035_v29  ;;  %v1057_v41 = vshll.u32 %v9403_v17, 16  ;;  %v8809_v28 = vld [vmem:[#allocation2 + $0x18] sm:$0xff]   ;;  %v8813_v43 = vld [vmem:[#allocation2 + $0x24] sm:$0xff]  }
  0x5a   : > { %8244 = vmatmul.mubr.bf16.gmra.mxu1 %v6988_v20  ;;  %v1031_v42 = vrot.slane %v1030_v31, 4  ;;  %v1063_v27 = vrot.slane %v1061_v4, 4  ;;  %v1067_v47 = vshll.u32 %v9407_v34, 16  ;;  %v7024_v55 = vcombine.low %v9383_v9, %v9400_v8  ;;  %v9444_v20 = vld [vmem:[#allocation2 + $0x14] sm:$0x1]  ;;  %v8823_v9 = vld [vmem:[%s11999_s3 + $0x118] sm:$0xff]  }
  0x5b   : > { %v1041_v51 = vrot.slane %v1040_v39, 4  ;;  %v1054_v52 = vor.u32 %v1053_v37, %v1050_v36  ;;  %v1059_v53 = vrot.slane %v1057_v41, 5  ;;  %8295 = vmatprep.mubr.bf16.mxu1 %v8808_v7  ;;  %v1525_v22 = vrot.slane %v9304_v32, 5  ;;  %v1465_v7 = vld [vmem:[#allocation2 + $0x54] sm:$0xe] }
  0x5c   : > { %v1036_v13 = vsel %vm9087_vm3, %v1031_v42, %v1035_v29  ;;  %v1069_v63 = vrot.slane %v1067_v47, 5  ;;  %v330_v57 = vmul.f32 %v7703_v10, %v9067_v19  ;;  %v331_v5 = vmul.f32 %v8960_v38, %v7704_v26  ;;  %v8812_v32 = vld [vmem:[%s11999_s3 + $0x170] sm:$0xff]   ;;  %v8961_v26 = vld [vmem:[%s11998_s2] ss:$0 sm:$0xff]  ;;  %v2419_v39 = vld [vmem:[#allocation2 + $0xc] sm:$0xe] }
  0x5d   : > { %v1046_v44 = vsel %vm9087_vm3, %v1041_v51, %v1045_v25  ;;  %v1055_v2 = vrot.slane %v1054_v52, 4  ;;  %v1064_v58 = vor.u32 %v1063_v27, %v1059_v53  ;;  %v9429_v19 = vsel %vm9241_vm6, %v1517_v30, %v1518_v62  ;;  %v2420_v51 = vld [vmem:[#allocation2 + $0x18] sm:$0xe] }
  0x5e   : > { %v6971_v11 = vcombine.low %v1036_v13, %v1046_v44  ;;  %v9433_v10 = vsel %vm9241_vm6, %v1524_v50, %v1525_v22  ;;  %v368_v0 = vadd.f32 %v8961_v26, %v330_v57  ;;  %v369_v18 = vadd.f32 %v8961_v26, %v331_v5  ;;  %v1993_v22 = vld [vmem:[#allocation2 + $0xc] sm:$0xf] }
  0x5f   : > { %v1060_v12 = vsel %vm9087_vm3, %v1055_v2, %v1059_v53  ;;  %v1065_v16 = vrot.slane %v1064_v58, 4  ;;  %v7003_v23 = vrot.slane %v1464_v15, 9  ;;  %v1529_v29 = vrot.slane %v9376_v59, 5  ;;  %v9486_v58 = vld [vmem:[#allocation2 + $0x20] sm:$0x1] }
  0x60   : > { %8211 = vmatprep.mubr.bf16.mxu0 %v6971_v11  ;;  %v400_v62 = vmax.f32 %v368_v0, 0.0  ;;  %v1532_v30 = vrot.slane %v9395_v3, 5  ;;  %v7004_v4 = vrot.slane %v1465_v7, 9  ;;  %v401_v25 = vmax.f32 %v369_v18, 0.0  ;;  %v8816_v3 = vld [vmem:[%s11999_s3 + $0x168] sm:$0xff]  }
  0x61   : > { %v1070_v31 = vsel %vm9087_vm3, %v1065_v16, %v1069_v63  ;;  %v1536_v36 = vrot.slane %v9403_v17, 5  ;;  %v1539_v37 = vrot.slane %v9407_v34, 5  ;;  %v7025_v42 = vcombine.low %v9387_v40, %v9429_v19  ;;  %v9474_v63 = vld [vmem:[#allocation2 + $0x1c] sm:$0xf] }
  0x62   : > { %v6972_v41 = vcombine.low %v1060_v12, %v1070_v31  ;;  %8296 = vmatmul.mubr.bf16.vlgmr.msra.gmra.mxu1 %v8809_v28  ;;  %v472_v59 = vrot.slane %v400_v62, 7  ;;  %v1531_v27 = vrot.slane %v1529_v29, 4  ;;  %v7026_v17 = vcombine.low %v9391_v1, %v9433_v10  ;;  %v8815_v28 = vld [vmem:[#allocation2 + $0x30] sm:$0xff]   ;;  %v1996_v62 = vld [vmem:[#allocation2 + $0x18] sm:$0xf] }
  0x63   : > { %8344 = vmatpush3.bf16.msra.mxu1 %v9320_v21  ;;  %8299 = vmatprep.mubr.bf16.mxu1 %v8813_v43  ;;  %v9458_v47 = vrot.slane %v401_v25, 7  ;;  %v9462_v34 = vsel %vm9241_vm6, %v7003_v23, %v1529_v29  ;;  %v1538_v50 = vrot.slane %v1536_v36, 4  ;;  %v9471_v53 = vsel %vm9241_vm6, %v7004_v4, %v1536_v36  ;;  %v8814_v12 = vld [vmem:[%s11999_s3 + $0x130] sm:$0xff]   ;;  %v8822_v25 = vld [vmem:[%s11999_s3 + $0x158] sm:$0xff]  }
  0x64   : > { %8212 = vmatmul.mubr.bf16.gmra.mxu0 %v6972_v41  ;;  %8345 = vmatprep.subr.bf16.mxu1 %v8812_v32  ;;  %v554_v21 = vsel %vm450_vm0, 0.0, %v472_v59  ;;  %v9467_v52 = vsel %vm9241_vm6, %v1531_v27, %v1532_v30  ;;  %v2453_v13 = vrot.slane %v9440_v14, 5  ;;  %v7101_v44 = vrot.slane %v2419_v39, 9  ;;  %v2421_v39 = vld [vmem:[#allocation2 + $0x24] sm:$0xe] }
  0x65   : > { %8263 = vmatprep.mubr.bf16.mxu0 %v7021_v45  ;;  %v474_v57 = vsel %vm450_vm0, %v472_v59, %v9458_v47  ;;  %v9483_v15 = vsel %vm9241_vm6, %v1538_v50, %v1539_v37  ;;  %v2456_v2 = vrot.slane %v9444_v20, 5  ;;  %v7027_v5 = vcombine.low %v9462_v34, %v9467_v52  ;;  %v8819_v45 = vld [vmem:[#allocation2 + $0x3c] sm:$0xff]  }
  0x66   : > { %v7755_v38 = vpack.c.bf16 %v474_v57, %v554_v21  ;;  %v2455_v7 = vrot.slane %v2453_v13, 4  ;;  %v7102_v6 = vrot.slane %v2420_v51, 9  ;;  %v7028_v11 = vcombine.low %v9471_v53, %v9483_v15  ;;  %v9519_v51 = vld [vmem:[#allocation2 + $0x28] sm:$0xf] }
  0x67   : > { %8346 = vmatpush3.bf16.msra.mxu1 %v8812_v32  ;;  %v2460_v43 = vrot.slane %v9474_v63, 5  ;;  %v2018_v26 = vshrl.u32 %v1993_v22, 16  ;;  %v2021_v0 = vshll.u32 %v1993_v22, 16  ;;  %v2463_v32 = vrot.slane %v9486_v58, 5  ;;  %v8817_v21 = vld [vmem:[%s11999_s3 + $0x128] sm:$0xff]  }
  0x68   : > { %8347 = vmatprep.subr.bf16.mxu1 %v8816_v3  ;;  %7875 = vst [vmem:[#allocation2 + $0x60] sm:$0xff] %v7755_v38   ;;  %v2027_v16 = vshll.u32 %v9440_v14, 16  ;;  %v2031_v18 = vshrl.u32 %v9440_v14, 16  ;;  %v2037_v23 = vshll.u32 %v9444_v20, 16  ;;  %v9505_v29 = vsel %vm9241_vm6, %v7101_v44, %v2453_v13  ;;  %v8821_v13 = vld [vmem:[#allocation2 + $0x48] sm:$0xff]  }
  0x69   : > { %v9509_v30 = vsel %vm9241_vm6, %v2455_v7, %v2456_v2  ;;  %v2462_v4 = vrot.slane %v2460_v43, 4  ;;  %v2020_v31 = vrot.slane %v2018_v26, 4  ;;  %v9516_v14 = vsel %vm9241_vm6, %v7102_v6, %v2460_v43  ;;  %v9532_v2 = vld [vmem:[#allocation2 + $0x2c] sm:$0x1]  ;;  %v9539_v7 = vld [vmem:[#allocation2 + $0x34] sm:$0xf] }
  0x6a   : > { %8300 = vmatmul.mubr.bf16.gmra.mxu1 %v8815_v28  ;;  %v2023_v20 = vrot.slane %v2021_v0, 5  ;;  %v2029_v36 = vrot.slane %v2027_v16, 5  ;;  %v2033_v37 = vrot.slane %v2031_v18, 4  ;;  %v2039_v41 = vrot.slane %v2037_v23, 5  ;;  %v2422_v28 = vld [vmem:[#allocation2 + $0x30] sm:$0xe] }
  0x6b   : > { %8348 = vmatpush3.bf16.msra.mxu1 %v8816_v3  ;;  %8303 = vmatprep.mubr.bf16.mxu1 %v8819_v45  ;;  %v2042_v59 = vshrl.u32 %v1996_v62, 16  ;;  %v2045_v27 = vshll.u32 %v1996_v62, 16  ;;  %v2051_v50 = vshll.u32 %v9474_v63, 16  ;;  %v9529_v3 = vsel %vm9241_vm6, %v2462_v4, %v2463_v32  ;;  %v8825_v26 = vld [vmem:[#allocation2 + $0x54] sm:$0xff]   ;;  %v1999_v23 = vld [vmem:[#allocation2 + $0x24] sm:$0xf] }
  0x6c   : > { %8264 = vmatmul.mubr.bf16.vlgmr.msra.gmra.mxu0 %v7022_v56  ;;  %8349 = vmatprep.subr.bf16.mxu1 %v8818_v24  ;;  %v2024_v22 = vor.u32 %v2023_v20, %v2020_v31  ;;  %v2034_v57 = vor.u32 %v2033_v37, %v2029_v36  ;;  %v2055_v44 = vshrl.u32 %v9474_v63, 16  ;;  %v2061_v38 = vshll.u32 %v9486_v58, 16  ;;  %v8824_v58 = vld [vmem:[%s11999_s3 + $0x150] sm:$0xff]   ;;  %v9553_v18 = vld [vmem:[#allocation2 + $0x38] sm:$0x1] }
  0x6d   : > { %8312 = vmatpush3.bf16.msra.mxu0 %v9351_v48  ;;  %8267 = vmatprep.mubr.bf16.mxu0 %v7023_v61  ;;  %v2044_v46 = vrot.slane %v2042_v59, 4  ;;  %v2047_v60 = vrot.slane %v2045_v27, 5  ;;  %v2053_v56 = vrot.slane %v2051_v50, 5  ;;  %v7103_v43 = vrot.slane %v2421_v39, 9 }
  0x6e   : > { %8313 = vmatprep.subr.bf16.mxu0 %v8814_v12  ;;  %v2025_v6 = vrot.slane %v2024_v22, 4  ;;  %v2035_v45 = vrot.slane %v2034_v57, 4  ;;  %v2057_v63 = vrot.slane %v2055_v44, 4  ;;  %v7125_v48 = vcombine.low %v9505_v29, %v9509_v30 }
  0x6f   : > { %8350 = vmatpush3.bf16.msra.mxu1 %v8818_v24  ;;  %v7126_v35 = vcombine.low %v9516_v14, %v9529_v3  ;;  %v2048_v54 = vor.u32 %v2047_v60, %v2044_v46  ;;  %v2063_v61 = vrot.slane %v2061_v38, 5  ;;  %v2467_v16 = vrot.slane %v9519_v51, 5  ;;  %v2002_v46 = vld [vmem:[#allocation2 + $0x30] sm:$0xf]  ;;  %v8827_v38 = vld [vmem:[#allocation2 + $0x60] sm:$0xff]  }
  0x70   : > { %8351 = vmatprep.subr.bf16.mxu1 %v8822_v25  ;;  %v2030_v0 = vsel %vm9087_vm3, %v2025_v6, %v2029_v36  ;;  %v2040_v24 = vsel %vm9087_vm3, %v2035_v45, %v2039_v41  ;;  %v2058_v32 = vor.u32 %v2057_v63, %v2053_v56  ;;  %v2470_v31 = vrot.slane %v9532_v2, 5  ;;  %v8820_v36 = vld [vmem:[%s11999_s3 + $0x120] sm:$0xff]  }
  0x71   : > { %8314 = vmatpush3.bf16.msra.mxu0 %v8814_v12  ;;  %v9555_v62 = vcombine.low %v2030_v0, %v2040_v24  ;;  %v2049_v4 = vrot.slane %v2048_v54, 4  ;;  %v7104_v20 = vrot.slane %v2422_v28, 9  ;;  %v9563_v39 = vsel %vm9241_vm6, %v7103_v43, %v2467_v16  ;;  %v9605_v45 = vld [vmem:[#allocation2 + $0x40] sm:$0xf]  ;;  %v2423_v0 = vld [vmem:[#allocation2 + $0x3c] sm:$0xe] }
  0x72   : > { %8315 = vmatprep.subr.bf16.mxu0 %v8817_v21  ;;  %8304 = vmatmul.mubr.bf16.gmra.mxu1 %v8821_v13  ;;  %v2059_v37 = vrot.slane %v2058_v32, 4  ;;  %v2469_v41 = vrot.slane %v2467_v16, 4  ;;  %v2474_v12 = vrot.slane %v9539_v7, 5  ;;  %v2477_v27 = vrot.slane %v9553_v18, 5  ;;  %v8828_v13 = vld [vmem:[%s11999_s3 + $0x148] sm:$0xff]  }
  0x73   : > { %8352 = vmatpush3.bf16.msra.mxu1 %v8822_v25  ;;  %8307 = vmatprep.mubr.bf16.mxu1 %v8825_v26  ;;  %v2054_v59 = vsel %vm9087_vm3, %v2049_v4, %v2053_v56  ;;  %v2066_v50 = vshrl.u32 %v1999_v23, 16  ;;  %v2069_v22 = vshll.u32 %v1999_v23, 16  ;;  %v2075_v19 = vshll.u32 %v9519_v51, 16 }
  0x74   : > { %8268 = vmatmul.mubr.bf16.gmra.mxu0 %v7024_v55  ;;  %8353 = vmatprep.subr.bf16.mxu1 %v8824_v58  ;;  %v2064_v25 = vsel %vm9087_vm3, %v2059_v37, %v2063_v61  ;;  %v9579_v57 = vsel %vm9241_vm6, %v2469_v41, %v2470_v31  ;;  %v9583_v44 = vsel %vm9241_vm6, %v7104_v20, %v2474_v12  ;;  %v2476_v28 = vrot.slane %v2474_v12, 4  ;;  %v9609_v61 = vld [vmem:[#allocation2 + $0x44] sm:$0x1]  ;;  %v9613_v31 = vld [vmem:[#allocation2 + $0x4c] sm:$0xf]  ;;  %v8826_v41 = vld [vmem:[%s11999_s3 + $0x110] sm:$0xff]  }
  0x75   : > { %8316 = vmatpush3.bf16.msra.mxu0 %v8817_v21  ;;  %8271 = vmatprep.mubr.bf16.mxu0 %v7025_v42  ;;  %v9591_v8 = vcombine.low %v2054_v59, %v2064_v25  ;;  %v7127_v55 = vcombine.low %v9563_v39, %v9579_v57  ;;  %v2068_v60 = vrot.slane %v2066_v50, 4  ;;  %v2071_v56 = vrot.slane %v2069_v22, 5  ;;  %v8830_v21 = vld [vmem:[%s11999_s3 + $0x140] sm:$0xff]   ;;  %v9615_v20 = vld [vmem:[#allocation2 + $0x50] sm:$0x1]  ;;  %v8833_v39 = vld [vmem:[%s11999_s3 + $0x1b8] sm:$0xff]  }
  0x76   : > { %8317 = vmatprep.subr.bf16.mxu0 %v8820_v36  ;;  %v9600_v40 = vsel %vm9241_vm6, %v2476_v28, %v2477_v27  ;;  %v2079_v42 = vshrl.u32 %v9519_v51, 16  ;;  %v2085_v6 = vshll.u32 %v9532_v2, 16  ;;  %v2090_v26 = vshrl.u32 %v2002_v46, 16  ;;  %v2424_v37 = vld [vmem:[#allocation2 + $0x48] sm:$0xe] }
  0x77   : > { %8354 = vmatpush3.bf16.msra.mxu1 %v8824_v58  ;;  %v7128_v63 = vcombine.low %v9583_v44, %v9600_v40  ;;  %v2072_v43 = vor.u32 %v2071_v56, %v2068_v60  ;;  %v2093_v54 = vshll.u32 %v2002_v46, 16  ;;  %v2077_v24 = vrot.slane %v2075_v19, 5  ;;  %v2005_v28 = vld [vmem:[#allocation2 + $0x3c] sm:$0xf]  ;;  %v9736_v40 = vld [vmem:[#allocation2 + $0x18] sm:$0xf] }
  0x78   : > { %8355 = vmatprep.subr.bf16.mxu1 %v8828_v13  ;;  %v2081_v32 = vrot.slane %v2079_v42, 4  ;;  %v2087_v16 = vrot.slane %v2085_v6, 5  ;;  %v2099_v51 = vshll.u32 %v9539_v7, 16  ;;  %v2092_v23 = vrot.slane %v2090_v26, 4 }
  0x79   : > { %8318 = vmatpush3.bf16.msra.mxu0 %v8820_v36  ;;  %v2073_v2 = vrot.slane %v2072_v43, 4  ;;  %v2095_v4 = vrot.slane %v2093_v54, 5  ;;  %v2103_v58 = vshrl.u32 %v9539_v7, 16  ;;  %v2109_v36 = vshll.u32 %v9553_v18, 16  ;;  %v8832_v18 = vld [vmem:[%s11999_s3 + $0x1f8] sm:$0xff]  }
  0x7a   : > { %8319 = vmatprep.subr.bf16.mxu0 %v8823_v9  ;;  %8308 = vmatmul.mubr.bf16.gmra.mxu1 %v8827_v38  ;;  %v2082_v12 = vor.u32 %v2081_v32, %v2077_v24  ;;  %v2101_v59 = vrot.slane %v2099_v51, 5  ;;  %v7105_v27 = vrot.slane %v2423_v0, 9  ;;  %v2481_v25 = vrot.slane %v9605_v45, 5  ;;  %v2008_v43 = vld [vmem:[#allocation2 + $0x48] sm:$0xf] }
  0x7b   : > { %8356 = vmatpush3.bf16.msra.mxu1 %v8828_v13  ;;  %8359 = vmatprep.mubr.bf16.mxu1 %v7125_v48  ;;  %v2078_v7 = vsel %vm9087_vm3, %v2073_v2, %v2077_v24  ;;  %v2096_v50 = vor.u32 %v2095_v4, %v2092_v23  ;;  %v2105_v22 = vrot.slane %v2103_v58, 4  ;;  %v2111_v29 = vrot.slane %v2109_v36, 5  ;;  %v8831_v24 = vld [vmem:[%s11999_s3 + $0x100] sm:$0xff]   ;;  %v9672_v23 = vld [vmem:[#allocation2 + $0x58] sm:$0xf] }
  0x7c   : > { %8272 = vmatmul.mubr.bf16.gmra.mxu0 %v7026_v17  ;;  %8357 = vmatprep.subr.bf16.mxu1 %v8830_v21  ;;  %v2083_v13 = vrot.slane %v2082_v12, 4  ;;  %v2484_v30 = vrot.slane %v9609_v61, 5  ;;  %v7106_v48 = vrot.slane %v2424_v37, 9  ;;  %v9639_v1 = vsel %vm9241_vm6, %v7105_v27, %v2481_v25  ;;  %v8829_v17 = vld [vmem:[%s11999_s3 + $0x108] sm:$0xff]   ;;  %v2425_v36 = vld [vmem:[#allocation2 + $0x54] sm:$0xe] }
  0x7d   : > { %8320 = vmatpush3.bf16.msra.mxu0 %v8823_v9  ;;  %8275 = vmatprep.mubr.bf16.mxu0 %v7027_v5  ;;  %v2097_v46 = vrot.slane %v2096_v50, 4  ;;  %v2106_v60 = vor.u32 %v2105_v22, %v2101_v59  ;;  %v2483_v10 = vrot.slane %v2481_v25, 4  ;;  %v2488_v9 = vrot.slane %v9613_v31, 5  ;;  %v8834_v5 = vld [vmem:[%s11999_s3 + $0x1f0] sm:$0xff]  }
  0x7e   : > { %8321 = vmatprep.subr.bf16.mxu0 %v8826_v41  ;;  %v2088_v56 = vsel %vm9087_vm3, %v2083_v13, %v2087_v16  ;;  %v2491_v34 = vrot.slane %v9615_v20, 5  ;;  %v2114_v52 = vshrl.u32 %v2005_v28, 16  ;;  %v2117_v16 = vshll.u32 %v2005_v28, 16 }
  0x7f   : > { %8358 = vmatpush3.bf16.msra.mxu1 %v8830_v21  ;;  %v9651_v38 = vcombine.low %v2078_v7, %v2088_v56  ;;  %v2102_v19 = vsel %vm9087_vm3, %v2097_v46, %v2101_v59  ;;  %v2107_v42 = vrot.slane %v2106_v60, 4  ;;  %v9657_v6 = vsel %vm9241_vm6, %v2483_v10, %v2484_v30  ;;  %v9692_v59 = vld [vmem:[#allocation2 + $0x5c] sm:$0x1]  ;;  %v9713_v60 = vld [vmem:[#allocation2 + $0x64] sm:$0xf] }
  0x80   : > { %8407 = vmatprep.subr.bf16.mxu1 %v8832_v18  ;;  %v7129_v26 = vcombine.low %v9639_v1, %v9657_v6  ;;  %v9663_v21 = vsel %vm9241_vm6, %v7106_v48, %v2488_v9  ;;  %v2490_v54 = vrot.slane %v2488_v9, 4  ;;  %v2116_v0 = vrot.slane %v2114_v52, 4  ;;  %v2426_v10 = vld [vmem:[#allocation2 + $0x60] sm:$0xe]  ;;  %v2011_v52 = vld [vmem:[#allocation2 + $0x54] sm:$0xf] }
  0x81   : > { %8322 = vmatpush3.bf16.msra.mxu0 %v8826_v41  ;;  %v2112_v32 = vsel %vm9087_vm3, %v2107_v42, %v2111_v29  ;;  %v2123_v51 = vshll.u32 %v9605_v45, 16  ;;  %v2127_v2 = vshrl.u32 %v9605_v45, 16  ;;  %v2133_v37 = vshll.u32 %v9609_v61, 16  ;;  %v8836_v45 = vld [vmem:[%s11999_s3 + $0x1e8] sm:$0xff]  }
  0x82   : > { %8323 = vmatprep.subr.bf16.mxu0 %v8829_v17  ;;  %8360 = vmatmul.mubr.bf16.vlgmr.msra.gmra.mxu1 %v7126_v35  ;;  %v9677_v4 = vcombine.low %v2102_v19, %v2112_v32  ;;  %v9681_v58 = vsel %vm9241_vm6, %v2490_v54, %v2491_v34  ;;  %v2138_v41 = vshrl.u32 %v2008_v43, 16  ;;  %v2119_v3 = vrot.slane %v2117_v16, 5 }
  0x83   : > { %8408 = vmatpush3.bf16.msra.mxu1 %v8832_v18  ;;  %8363 = vmatprep.mubr.bf16.mxu1 %v7127_v55  ;;  %v7130_v14 = vcombine.low %v9663_v21, %v9681_v58  ;;  %v2125_v35 = vrot.slane %v2123_v51, 5  ;;  %v2129_v12 = vrot.slane %v2127_v2, 4  ;;  %v2135_v57 = vrot.slane %v2133_v37, 5  ;;  %v8838_v18 = vld [vmem:[%s11999_s3 + $0x1e0] sm:$0xff]  }
  0x84   : > { %8276 = vmatmul.mubr.bf16.gmra.mxu0 %v7028_v11  ;;  %8409 = vmatprep.subr.bf16.mxu1 %v8834_v5  ;;  %v2140_v55 = vrot.slane %v2138_v41, 4  ;;  %v2141_v61 = vshll.u32 %v2008_v43, 16  ;;  %v2147_v27 = vshll.u32 %v9613_v31, 16  ;;  %v2120_v7 = vor.u32 %v2119_v3, %v2116_v0  ;;  %v2014_v0 = vld [vmem:[#allocation2 + $0x60] sm:$0xf]  ;;  %v8837_v41 = vld [vmem:[%s11999_s3 + $0x1a8] sm:$0xff]  }
  0x85   : > { %8324 = vmatpush3.bf16.msra.mxu0 %v8829_v17  ;;  %8327 = vmatprep.mubr.bf16.mxu0 %v9555_v62  ;;  %v2130_v50 = vor.u32 %v2129_v12, %v2125_v35  ;;  %v2151_v22 = vshrl.u32 %v9613_v31, 16  ;;  %v2157_v53 = vshll.u32 %v9615_v20, 16  ;;  %v7107_v25 = vrot.slane %v2425_v36, 9  ;;  %v9758_v12 = vld [vmem:[#allocation2 + $0x1c] sm:$0xf] }
  0x86   : > { %8325 = vmatprep.subr.bf16.mxu0 %v8831_v24  ;;  %v2143_v15 = vrot.slane %v2141_v61, 5  ;;  %v2149_v11 = vrot.slane %v2147_v27, 5  ;;  %v2495_v28 = vrot.slane %v9672_v23, 5  ;;  %v2121_v13 = vrot.slane %v2120_v7, 4 }
  0x87   : > { %8410 = vmatpush3.bf16.msra.mxu1 %v8834_v5  ;;  %v2131_v29 = vrot.slane %v2130_v50, 4  ;;  %v2153_v62 = vrot.slane %v2151_v22, 4  ;;  %v2159_v30 = vrot.slane %v2157_v53, 5  ;;  %v2498_v46 = vrot.slane %v9692_v59, 5  ;;  %v8835_v5 = vld [vmem:[%s11999_s3 + $0x1b0] sm:$0xff]   ;;  %v8839_v22 = vld [vmem:[%s11999_s3 + $0x1a0] sm:$0xff]  }
  0x88   : > { %8411 = vmatprep.subr.bf16.mxu1 %v8836_v45  ;;  %v2144_v48 = vor.u32 %v2143_v15, %v2140_v55  ;;  %v9710_v31 = vsel %vm9241_vm6, %v7107_v25, %v2495_v28  ;;  %v2497_v20 = vrot.slane %v2495_v28, 4  ;;  %v2126_v17 = vsel %vm9087_vm3, %v2121_v13, %v2125_v35 }
  0x89   : > { %8326 = vmatpush3.bf16.msra.mxu0 %v8831_v24  ;;  %v2136_v56 = vsel %vm9087_vm3, %v2131_v29, %v2135_v57  ;;  %v2154_v9 = vor.u32 %v2153_v62, %v2149_v11  ;;  %v570_v34 = vsel %vm450_vm0, %v9458_v47, 0.0  ;;  %v7108_v32 = vrot.slane %v2426_v10, 9  ;;  %v8844_v62 = vld [vmem:[%s11999_s3 + $0x1c8] sm:$0xff]   ;;  %v2963_v10 = vld [vmem:[#allocation2 + $0x24] sm:$0xf] }
  0x8a   : > { %8375 = vmatprep.subr.bf16.mxu0 %v8833_v39  ;;  %8364 = vmatmul.mubr.bf16.gmra.mxu1 %v7128_v63  ;;  %v9727_v19 = vcombine.low %v2126_v17, %v2136_v56  ;;  %v2145_v42 = vrot.slane %v2144_v48, 4  ;;  %v2499_v43 = vsel %vm9241_vm6, %v2497_v20, %v2498_v46  ;;  %v7616_v54 = vpack.c.bf16 %v570_v34, %v570_v34  ;;  %v8840_v63 = vld [vmem:[%s11999_s3 + $0x1d8] sm:$0xff]  }
  0x8b   : > { %8412 = vmatpush3.bf16.msra.mxu1 %v8836_v45  ;;  %8367 = vmatprep.mubr.bf16.mxu1 %v7129_v26  ;;  %v2155_v47 = vrot.slane %v2154_v9, 4  ;;  %v7131_v24 = vcombine.low %v9710_v31, %v2499_v43  ;;  %v2502_v44 = vrot.slane %v9713_v60, 5  ;;  %v2162_v1 = vshrl.u32 %v2011_v52, 16  ;;  %v8841_v17 = vld [vmem:[%s11999_s3 + $0x198] sm:$0xff]  }
  0x8c   : > { %8328 = vmatmul.mubr.bf16.vlgmr.msra.gmra.mxu0 %v9591_v8  ;;  %8413 = vmatprep.subr.bf16.mxu1 %v8838_v18  ;;  %v2150_v16 = vsel %vm9087_vm3, %v2145_v42, %v2149_v11  ;;  %811 = vst [vmem:[#allocation2 + $0x68] sm:$0x1] %v7616_v54  ;;  %v2165_v6 = vshll.u32 %v2011_v52, 16  ;;  %v2171_v26 = vshll.u32 %v9672_v23, 16  ;;  %v2175_v37 = vshrl.u32 %v9672_v23, 16  ;;  %v8842_v23 = vld [vmem:[%s11999_s3 + $0x1d0] sm:$0xff]  }
  0x8d   : > { %8376 = vmatpush3.bf16.msra.mxu0 %v8833_v39  ;;  %8331 = vmatprep.mubr.bf16.mxu0 %v9651_v38  ;;  %v2160_v51 = vsel %vm9087_vm3, %v2155_v47, %v2159_v30  ;;  %v9750_v8 = vsel %vm9241_vm6, %v7108_v32, %v2502_v44  ;;  %v2504_v2 = vrot.slane %v2502_v44, 4  ;;  %v2164_v3 = vrot.slane %v2162_v1, 4  ;;  %v9791_v52 = vld [vmem:[#allocation2 + $0x28] sm:$0xf]  ;;  %v9799_v32 = vld [vmem:[#allocation2 + $0x2c] sm:$0x1] }
  0x8e   : > { %8377 = vmatprep.subr.bf16.mxu0 %v8835_v5  ;;  %v9756_v45 = vcombine.low %v2150_v16, %v2160_v51  ;;  %v2167_v35 = vrot.slane %v2165_v6, 5  ;;  %v2173_v38 = vrot.slane %v2171_v26, 5  ;;  %v2177_v36 = vrot.slane %v2175_v37, 4  ;;  %v2966_v44 = vld [vmem:[#allocation2 + $0x30] sm:$0xf] }
  0x8f   : > { %8414 = vmatpush3.bf16.msra.mxu1 %v8838_v18  ;;  %v2181_v39 = vshll.u32 %v9692_v59, 16  ;;  %v2186_v57 = vshrl.u32 %v2014_v0, 16  ;;  %v2189_v55 = vshll.u32 %v2014_v0, 16  ;;  %v2195_v27 = vshll.u32 %v9713_v60, 16  ;;  %v9807_v26 = vld [vmem:[#allocation2 + $0x34] sm:$0xf] }
  0x90   : > { %8415 = vmatprep.subr.bf16.mxu1 %v8840_v63  ;;  %v2168_v61 = vor.u32 %v2167_v35, %v2164_v3  ;;  %v2199_v7 = vshrl.u32 %v9713_v60, 16  ;;  %v2985_v50 = vshrl.u32 %v9736_v40, 16  ;;  %v2178_v59 = vor.u32 %v2177_v36, %v2173_v38  ;;  %v9781_v60 = vld [vmem:[#allocation2 + $0x20] sm:$0x1]  ;;  %v8843_v51 = vld [vmem:[%s11999_s3 + $0x190] sm:$0xff]  }
  0x91   : > { %8378 = vmatpush3.bf16.msra.mxu0 %v8835_v5  ;;  %v2183_v53 = vrot.slane %v2181_v39, 5  ;;  %v2188_v15 = vrot.slane %v2186_v57, 4  ;;  %v2191_v11 = vrot.slane %v2189_v55, 5  ;;  %v2197_v28 = vrot.slane %v2195_v27, 5  ;;  %v9816_v39 = vld [vmem:[#allocation2 + $0x38] sm:$0x1] }
  0x92   : > { %8379 = vmatprep.subr.bf16.mxu0 %v8837_v41  ;;  %8368 = vmatmul.mubr.bf16.gmra.mxu1 %v7130_v14  ;;  %v2169_v25 = vrot.slane %v2168_v61, 4  ;;  %v2201_v18 = vrot.slane %v2199_v7, 4  ;;  %v2987_v13 = vrot.slane %v2985_v50, 4  ;;  %v2179_v30 = vrot.slane %v2178_v59, 4  ;;  %v8848_v50 = vld [vmem:[%s11999_s3 + $0x78] sm:$0xff]  }
  0x93   : > { %8416 = vmatpush3.bf16.msra.mxu1 %v8840_v63  ;;  %8371 = vmatprep.mubr.bf16.mxu1 %v7131_v24  ;;  %v2016_v29 = vld [vmem:[#allocation2 + $0x68] sm:$0x1]  ;;  %v2192_v48 = vor.u32 %v2191_v11, %v2188_v15  ;;  %v2988_v31 = vshll.u32 %v9736_v40, 16  ;;  %v2994_v20 = vshll.u32 %v9758_v12, 16  ;;  %v2998_v24 = vshrl.u32 %v9758_v12, 16  ;;  %v8846_v63 = vld [vmem:[%s11999_s3 + $0x1c0] sm:$0xff]  }
  0x94   : > { %8332 = vmatmul.mubr.bf16.gmra.mxu0 %v9677_v4  ;;  %8417 = vmatprep.subr.bf16.mxu1 %v8842_v23  ;;  %v2505_v21 = vrot.slane %v2016_v29, 5  ;;  %v2174_v58 = vsel %vm9087_vm3, %v2169_v25, %v2173_v38  ;;  %v2202_v14 = vor.u32 %v2201_v18, %v2197_v28  ;;  %v2205_v46 = vshll.u32 %v2016_v29, 16  ;;  %v9829_v18 = vld [vmem:[#allocation2 + $0x40] sm:$0xf] }
  0x95   : > { %8380 = vmatpush3.bf16.msra.mxu0 %v8837_v41  ;;  %8335 = vmatprep.mubr.bf16.mxu0 %v9727_v19  ;;  %v2184_v4 = vsel %vm9087_vm3, %v2179_v30, %v2183_v53  ;;  %v2193_v56 = vrot.slane %v2192_v48, 4  ;;  %v2990_v9 = vrot.slane %v2988_v31, 5  ;;  %v9789_v34 = vrot.slane %v2994_v20, 5  ;;  %v2969_v53 = vld [vmem:[#allocation2 + $0x3c] sm:$0xf] }
  0x96   : > { %8381 = vmatprep.subr.bf16.mxu0 %v8839_v22  ;;  %v2506_v5 = vsel %vm9241_vm6, %v2504_v2, %v2505_v21  ;;  %v7091_v42 = vcombine.low %v2174_v58, %v2184_v4  ;;  %v2203_v43 = vrot.slane %v2202_v14, 4  ;;  %v2207_v19 = vrot.slane %v2205_v46, 5  ;;  %v9837_v58 = vld [vmem:[#allocation2 + $0x44] sm:$0x1] }
  0x97   : > { %8418 = vmatpush3.bf16.msra.mxu1 %v8842_v23  ;;  %v7132_v54 = vcombine.low %v9750_v8, %v2506_v5  ;;  %v2198_v0 = vsel %vm9087_vm3, %v2193_v56, %v2197_v28  ;;  %v2991_v47 = vor.u32 %v2990_v9, %v2987_v13  ;;  %v3004_v16 = vshll.u32 %v9781_v60, 16  ;;  %v8847_v4 = vld [vmem:[%s11999_s3 + $0x180] sm:$0xff]  }
  0x98   : > { %8419 = vmatprep.subr.bf16.mxu1 %v8844_v62  ;;  %v2208_v40 = vsel %vm9087_vm3, %v2203_v43, %v2207_v19  ;;  %v3009_v1 = vshrl.u32 %v2963_v10, 16  ;;  %v3012_v6 = vshll.u32 %v2963_v10, 16  ;;  %v3000_v37 = vrot.slane %v2998_v24, 4  ;;  %v8849_v19 = vld [vmem:[#allocation2 + $0x18] sm:$0xff]   ;;  %v9848_v24 = vld [vmem:[#allocation2 + $0x4c] sm:$0xf] }
  0x99   : > { %8382 = vmatpush3.bf16.msra.mxu0 %v8839_v22  ;;  %v9812_v8 = vcombine.low %v2198_v0, %v2208_v40  ;;  %v2992_v2 = vrot.slane %v2991_v47, 4  ;;  %v3018_v41 = vshll.u32 %v9791_v52, 16  ;;  %v3006_v3 = vrot.slane %v3004_v16, 5  ;;  %v8852_v40 = vld [vmem:[%s11999_s3 + $0x70] sm:$0xff]  }
  0x9a   : > { %8383 = vmatprep.subr.bf16.mxu0 %v8841_v17  ;;  %8372 = vmatmul.mubr.bf16.gmra.mxu1 %v7132_v54  ;;  %v3011_v35 = vrot.slane %v3009_v1, 4  ;;  %v3014_v38 = vrot.slane %v3012_v6, 5  ;;  %v3022_v36 = vshrl.u32 %v9791_v52, 16  ;;  %v3001_v55 = vor.u32 %v3000_v37, %v9789_v34  ;;  %v9853_v6 = vld [vmem:[#allocation2 + $0x50] sm:$0x1] }
  0x9b   : > { %8420 = vmatpush3.bf16.msra.mxu1 %v8844_v62  ;;  %v2997_v57 = vsel %vm9087_vm3, %v2992_v2, %v9789_v34  ;;  %v3020_v23 = vrot.slane %v3018_v41, 5  ;;  %v3028_v61 = vshll.u32 %v9799_v32, 16  ;;  %v3033_v22 = vshrl.u32 %v2966_v44, 16 }
  0x9c   : > { %8336 = vmatmul.mubr.bf16.gmra.mxu0 %v9756_v45  ;;  %8421 = vmatprep.subr.bf16.mxu1 %v8846_v63  ;;  %v3015_v27 = vor.u32 %v3014_v38, %v3011_v35  ;;  %v3024_v7 = vrot.slane %v3022_v36, 4  ;;  %v3036_v59 = vshll.u32 %v2966_v44, 16  ;;  %v3002_v15 = vrot.slane %v3001_v55, 4  ;;  %v8845_v45 = vld [vmem:[%s11999_s3 + $0x188] sm:$0xff]  }
  0x9d   : > { %8384 = vmatpush3.bf16.msra.mxu0 %v8841_v17  ;;  %8339 = vmatprep.mubr.bf16.mxu0 %v7091_v42  ;;  %v3030_v11 = vrot.slane %v3028_v61, 5  ;;  %v3042_v25 = vshll.u32 %v9807_v26, 16  ;;  %v3046_v28 = vshrl.u32 %v9807_v26, 16  ;;  %v3035_v62 = vrot.slane %v3033_v22, 4  ;;  %v2972_v42 = vld [vmem:[#allocation2 + $0x48] sm:$0xf] }
  0x9e   : > { %8385 = vmatprep.subr.bf16.mxu0 %v8843_v51  ;;  %v3016_v13 = vrot.slane %v3015_v27, 4  ;;  %v3025_v29 = vor.u32 %v3024_v7, %v3020_v23  ;;  %v3038_v30 = vrot.slane %v3036_v59, 5  ;;  %v3007_v48 = vsel %vm9087_vm3, %v3002_v15, %v3006_v3  ;;  %v8851_v55 = vld [vmem:[#allocation2 + $0x24] sm:$0xff]   ;;  %v9868_v59 = vld [vmem:[#allocation2 + $0x58] sm:$0xf] }
  0x9f   : > { %8422 = vmatpush3.bf16.msra.mxu1 %v8846_v63  ;;  %v3044_v31 = vrot.slane %v3042_v25, 5  ;;  %v3048_v20 = vrot.slane %v3046_v28, 4  ;;  %v3052_v21 = vshll.u32 %v9816_v39, 16  ;;  %v7189_v14 = vcombine.low %v2997_v57, %v3007_v48  ;;  %v8854_v7 = vld [vmem:[%s11999_s3 + $0x68] sm:$0xff]   ;;  %v9874_v28 = vld [vmem:[%s9052_s20 + $0x40] sm:$0xff]  }
  0xa0   : > { %v3021_v46 = vsel %vm9087_vm3, %v3016_v13, %v3020_v23  ;;  %v3026_v10 = vrot.slane %v3025_v29, 4  ;;  %8471 = vmatprep.subr.bf16.mxu1 %v8848_v50  ;;  %v3039_v17 = vor.u32 %v3038_v30, %v3035_v62  ;;  %v3057_v34 = vshrl.u32 %v2969_v53, 16 }
  0xa1   : > { %8386 = vmatpush3.bf16.msra.mxu0 %v8843_v51  ;;  %v3049_v56 = vor.u32 %v3048_v20, %v3044_v31  ;;  %v3054_v9 = vrot.slane %v3052_v21, 5  ;;  %v3060_v5 = vshll.u32 %v2969_v53, 16  ;;  %8423 = vmatprep.mubr.bf16.mxu1 %v7189_v14  ;;  %v3066_v0 = vshll.u32 %v9829_v18, 16  ;;  %v8850_v51 = vld [vmem:[%s11999_s3 + $0x238] sm:$0xff]   ;;  %v8858_v20 = vld [vmem:[%s11999_s3 + $0x60] sm:$0xff]  }
  0xa2   : > { %8387 = vmatprep.subr.bf16.mxu0 %v8845_v45  ;;  %v3031_v43 = vsel %vm9087_vm3, %v3026_v10, %v3030_v11  ;;  %v3040_v54 = vrot.slane %v3039_v17, 4  ;;  %v3070_v47 = vshrl.u32 %v9829_v18, 16  ;;  %v3059_v16 = vrot.slane %v3057_v34, 4 }
  0xa3   : > { %v7190_v44 = vcombine.low %v3021_v46, %v3031_v43  ;;  %v3050_v63 = vrot.slane %v3049_v56, 4  ;;  %v3062_v1 = vrot.slane %v3060_v5, 5  ;;  %v3068_v37 = vrot.slane %v3066_v0, 5 }
  0xa4   : > { %8340 = vmatmul.mubr.bf16.gmra.mxu0 %v9812_v8  ;;  %v3045_v2 = vsel %vm9087_vm3, %v3040_v54, %v3044_v31  ;;  %v3072_v41 = vrot.slane %v3070_v47, 4  ;;  %v3076_v3 = vshll.u32 %v9837_v58, 16  ;;  %v3081_v36 = vshrl.u32 %v2972_v42, 16  ;;  %v2975_v8 = vld [vmem:[#allocation2 + $0x54] sm:$0xf] }
  0xa5   : > { %8388 = vmatpush3.bf16.msra.mxu0 %v8845_v45  ;;  %8424 = vmatmul.mubr.bf16.vlgmr.msra.gmra.mxu1 %v7190_v44  ;;  %v3055_v35 = vsel %vm9087_vm3, %v3050_v63, %v3054_v9  ;;  %v3063_v38 = vor.u32 %v3062_v1, %v3059_v16  ;;  %v3084_v57 = vshll.u32 %v2972_v42, 16  ;;  %v3090_v22 = vshll.u32 %v9848_v24, 16  ;;  %v8853_v45 = vld [vmem:[%s11999_s3 + $0x230] sm:$0xff]   ;;  %v9889_v9 = vld [vmem:[%s9052_s20 + $0x48] sm:$0xff]   ;;  %v8860_v1 = vld [vmem:[%s11999_s3 + $0x58] sm:$0xff]  }
  0xa6   : > { %8389 = vmatprep.subr.bf16.mxu0 %v8847_v4  ;;  %8472 = vmatpush3.bf16.msra.mxu1 %v8848_v50  ;;  %v7191_v23 = vcombine.low %v3045_v2, %v3055_v35  ;;  %v3073_v61 = vor.u32 %v3072_v41, %v3068_v37  ;;  %v3078_v27 = vrot.slane %v3076_v3, 5  ;;  %v3083_v15 = vrot.slane %v3081_v36, 4  ;;  %v9871_v50 = vld [vmem:[#allocation2 + $0x5c] sm:$0x1]  ;;  %v8855_v31 = vld [vmem:[#allocation2 + $0x30] sm:$0xff]  }
  0xa7   : > { %8391 = vmatprep.mubr.bf16.mxu0 %v8849_v19  ;;  %8473 = vmatprep.subr.bf16.mxu1 %v8852_v40  ;;  %v3064_v53 = vrot.slane %v3063_v38, 4  ;;  %v3086_v11 = vrot.slane %v3084_v57, 5  ;;  %v3094_v25 = vshrl.u32 %v9848_v24, 16  ;;  %v3092_v29 = vrot.slane %v3090_v22, 5  ;;  %v8856_v19 = vld [vmem:[%s11999_s3 + $0x228] sm:$0xff]  }
  0xa8   : > { %8427 = vmatprep.mubr.bf16.mxu1 %v7191_v23  ;;  %v3074_v13 = vrot.slane %v3073_v61, 4  ;;  %v3100_v62 = vshll.u32 %v9853_v6, 16  ;;  %v3105_v30 = vshrl.u32 %v2975_v8, 16  ;;  %v3108_v46 = vshll.u32 %v2975_v8, 16  ;;  %v2978_v35 = vld [vmem:[#allocation2 + $0x60] sm:$0xf] }
  0xa9   : > { %8390 = vmatpush3.bf16.msra.mxu0 %v8847_v4  ;;  %v3069_v48 = vsel %vm9087_vm3, %v3064_v53, %v3068_v37  ;;  %v3087_v21 = vor.u32 %v3086_v11, %v3083_v15  ;;  %v3096_v14 = vrot.slane %v3094_v25, 4  ;;  %v3114_v4 = vshll.u32 %v9868_v59, 16  ;;  %v8857_v37 = vld [vmem:[#allocation2 + $0x3c] sm:$0xff]   ;;  %v9903_v38 = vld [vmem:[#allocation2 + $0x64] sm:$0xf]  ;;  %v8861_v23 = vld [vmem:[#allocation2 + $0x48] sm:$0xff]  }
  0xaa   : > { %8439 = vmatprep.subr.bf16.mxu0 %v8850_v51  ;;  %8474 = vmatpush3.bf16.msra.mxu1 %v8852_v40  ;;  %v3079_v10 = vsel %vm9087_vm3, %v3074_v13, %v3078_v27  ;;  %v3102_v17 = vrot.slane %v3100_v62, 5  ;;  %v3107_v56 = vrot.slane %v3105_v30, 4  ;;  %v3110_v43 = vrot.slane %v3108_v46, 5  ;;  %v9914_v61 = vld [vmem:[#allocation2 + $0x68] sm:$0x1]  ;;  %v8859_v53 = vld [vmem:[%s11999_s3 + $0x220] sm:$0xff]  }
  0xab   : > { %v7192_v34 = vcombine.low %v3069_v48, %v3079_v10  ;;  %8475 = vmatprep.subr.bf16.mxu1 %v8854_v7  ;;  %v3088_v5 = vrot.slane %v3087_v21, 4  ;;  %v3097_v42 = vor.u32 %v3096_v14, %v3092_v29  ;;  %v3116_v54 = vrot.slane %v3114_v4, 5  ;;  %v8864_v13 = vld [vmem:[%s11999_s3 + $0x50] sm:$0xff]  }
  0xac   : > { %8392 = vmatmul.mubr.bf16.vlgmr.msra.gmra.mxu0 %v8851_v55  ;;  %v3118_v0 = vshrl.u32 %v9868_v59, 16  ;;  %v3124_v47 = vshll.u32 %v9871_v50, 16  ;;  %v7707_v44 = vunpack.c.l.bf16 %v9874_v28  ;;  %v3111_v16 = vor.u32 %v3110_v43, %v3107_v56  ;;  %v9929_v46 = vld [vmem:[%s9052_s20 + $0x50] sm:$0xff]  }
  0xad   : > { %8440 = vmatpush3.bf16.msra.mxu0 %v8850_v51  ;;  %8428 = vmatmul.mubr.bf16.gmra.mxu1 %v7192_v34  ;;  %v3093_v40 = vsel %vm9087_vm3, %v3088_v5, %v3092_v29  ;;  %v3098_v63 = vrot.slane %v3097_v42, 4  ;;  %v7708_v2 = vunpack.c.h.bf16 %v9874_v28  ;;  %v9908_v51 = vld [vmem:[%s11997_s1] ss:$0 sm:$0xff]  ;;  %v7711_v57 = vunpack.c.l.bf16 %v9889_v9  ;;  %v8862_v34 = vld [vmem:[%s11999_s3 + $0x218] sm:$0xff]  }
  0xae   : > { %8441 = vmatprep.subr.bf16.mxu0 %v8853_v45  ;;  %8476 = vmatpush3.bf16.msra.mxu1 %v8854_v7  ;;  %v3120_v41 = vrot.slane %v3118_v0, 4  ;;  %v3126_v3 = vrot.slane %v3124_v47, 5  ;;  %v332_v36 = vmul.f32 %v9908_v51, %v7707_v44  ;;  %v3112_v55 = vrot.slane %v3111_v16, 4  ;;  %v8866_v44 = vld [vmem:[%s11999_s3 + $0x48] sm:$0xff]  }
  0xaf   : > { %8395 = vmatprep.mubr.bf16.mxu0 %v8855_v31  ;;  %8477 = vmatprep.subr.bf16.mxu1 %v8858_v20  ;;  %v3103_v8 = vsel %vm9087_vm3, %v3098_v63, %v3102_v17  ;;  %v3129_v27 = vshrl.u32 %v2978_v35, 16  ;;  %v3132_v7 = vshll.u32 %v2978_v35, 16  ;;  %v3138_v11 = vshll.u32 %v9903_v38, 16  ;;  %v9934_v17 = vld [vmem:[%s11998_s2] ss:$0 sm:$0xff]  ;;  %v8863_v63 = vld [vmem:[#allocation2 + $0x54] sm:$0xff]  }
  0xb0   : > { %v7193_v22 = vcombine.low %v3093_v40, %v3103_v8  ;;  %v3121_v15 = vor.u32 %v3120_v41, %v3116_v54  ;;  %v3142_v25 = vshrl.u32 %v9903_v38, 16  ;;  %v3117_v28 = vsel %vm9087_vm3, %v3112_v55, %v3116_v54  ;;  %v9957_v35 = vld [vmem:[#allocation2 + $0x64] sm:$0xf]  ;;  %v8865_v55 = vld [vmem:[%s11999_s3 + $0x210] sm:$0xff]  }
  0xb1   : > { %8442 = vmatpush3.bf16.msra.mxu0 %v8853_v45  ;;  %v3131_v29 = vrot.slane %v3129_v27, 4  ;;  %v3134_v62 = vrot.slane %v3132_v7, 5  ;;  %v3148_v30 = vshll.u32 %v9914_v61, 16  ;;  %v3140_v31 = vrot.slane %v3138_v11, 5  ;;  %v8867_v27 = vld [vmem:[#allocation2 + $0x60] sm:$0xff]  }
  0xb2   : > { %8443 = vmatprep.subr.bf16.mxu0 %v8856_v19  ;;  %8478 = vmatpush3.bf16.msra.mxu1 %v8858_v20  ;;  %v3122_v48 = vrot.slane %v3121_v15, 4  ;;  %v3144_v21 = vrot.slane %v3142_v25, 4  ;;  %v333_v14 = vmul.f32 %v9908_v51, %v7708_v2  ;;  %v370_v56 = vadd.f32 %v9934_v17, %v332_v36  ;;  %v3857_v36 = vld [vmem:[#allocation2 + $0x68] sm:$0x1]  ;;  %v8870_v25 = vld [vmem:[%s11999_s3 + $0x40] sm:$0xff]  }
  0xb3   : > { %8431 = vmatprep.mubr.bf16.mxu1 %v7193_v22  ;;  %8479 = vmatprep.subr.bf16.mxu1 %v8860_v1  ;;  %v3135_v45 = vor.u32 %v3134_v62, %v3131_v29  ;;  %v3150_v10 = vrot.slane %v3148_v30, 5  ;;  %v3420_v20 = vrot.slane %v9758_v12, 5  ;;  %v7712_v43 = vunpack.c.h.bf16 %v9889_v9  ;;  %v8871_v12 = vld [vmem:[%s11999_s3 + $0x200] sm:$0xff]  }
  0xb4   : > { %8396 = vmatmul.mubr.bf16.gmra.mxu0 %v8857_v37  ;;  %v3127_v4 = vsel %vm9087_vm3, %v3122_v48, %v3126_v3  ;;  %v3145_v5 = vor.u32 %v3144_v21, %v3140_v31  ;;  %v371_v42 = vadd.f32 %v9934_v17, %v333_v14  ;;  %v402_v47 = vmax.f32 %v370_v56, 0.0  ;;  %v9949_v37 = vld [vmem:[#allocation2 + $0x60] sm:$0xf]  ;;  %v3386_v21 = vld [vmem:[#allocation2 + $0x18] sm:$0xe] }
  0xb5   : > { %8444 = vmatpush3.bf16.msra.mxu0 %v8856_v19  ;;  %v7194_v54 = vcombine.low %v3117_v28, %v3127_v4  ;;  %8399 = vmatprep.mubr.bf16.mxu0 %v8861_v23  ;;  %v3136_v0 = vrot.slane %v3135_v45, 4  ;;  %v334_v40 = vmul.f32 %v9908_v51, %v7711_v57  ;;  %v9952_v9 = vmul.f32 %v9908_v51, %v7712_v43  ;;  %v3387_v56 = vld [vmem:[#allocation2 + $0x24] sm:$0xe]  ;;  %v8868_v43 = vld [vmem:[%s11999_s3 + $0x208] sm:$0xff]  }
  0xb6   : > { %8445 = vmatprep.subr.bf16.mxu0 %v8859_v53  ;;  %8480 = vmatpush3.bf16.msra.mxu1 %v8860_v1  ;;  %v3146_v16 = vrot.slane %v3145_v5, 4  ;;  %v403_v2 = vmax.f32 %v371_v42, 0.0  ;;  %v7715_v19 = vunpack.c.l.bf16 %v9929_v46  ;;  %v475_v3 = vrot.slane %v402_v47, 7 }
  0xb7   : > { %8432 = vmatmul.mubr.bf16.gmra.mxu1 %v7194_v54  ;;  %8481 = vmatprep.subr.bf16.mxu1 %v8864_v13  ;;  %v3141_v41 = vsel %vm9087_vm3, %v3136_v0, %v3140_v31  ;;  %v3866_v1 = vshrl.u32 %v9949_v37, 16  ;;  %v9961_v57 = vadd.f32 %v9934_v17, %v334_v40  ;;  %v3869_v7 = vshll.u32 %v9949_v37, 16 }
  0xb8   : > { %v3151_v8 = vsel %vm9087_vm3, %v3146_v16, %v3150_v10  ;;  %v476_v23 = vrot.slane %v403_v2, 7  ;;  %v3875_v22 = vshll.u32 %v9957_v35, 16  ;;  %v555_v11 = vsel %vm450_vm0, 0.0, %v475_v3 }
  0xb9   : > { %8446 = vmatpush3.bf16.msra.mxu0 %v8859_v53  ;;  %v7195_v15 = vcombine.low %v3141_v41, %v3151_v8  ;;  %v3868_v28 = vrot.slane %v3866_v1, 4  ;;  %v3879_v29 = vshrl.u32 %v9957_v35, 16  ;;  %v7617_v48 = vpack.c.bf16 %v555_v11, %v555_v11  ;;  %v7867_v8 = vld [vmem:[%s9052_s20 + $0x58] sm:$0xff]  }
  0xba   : > { %8447 = vmatprep.subr.bf16.mxu0 %v8862_v34  ;;  %8482 = vmatpush3.bf16.msra.mxu1 %v8864_v13  ;;  %v477_v62 = vsel %vm450_vm0, %v475_v3, %v476_v23  ;;  %v571_v30 = vsel %vm450_vm0, %v476_v23, 0.0  ;;  %v3871_v31 = vrot.slane %v3869_v7, 5  ;;  %v3877_v45 = vrot.slane %v3875_v22, 5 }
  0xbb   : > { %8435 = vmatprep.mubr.bf16.mxu1 %v7195_v15  ;;  %v7618_v53 = vpack.c.bf16 %v477_v62, %v477_v62  ;;  %v7619_v14 = vpack.c.bf16 %v571_v30, %v571_v30  ;;  %8483 = vmatprep.subr.bf16.mxu1 %v8866_v44  ;;  %v3881_v10 = vrot.slane %v3879_v29, 4  ;;  %812 = vst [vmem:[#allocation2 + $0x6c] sm:$0xf] %v7617_v48  ;;  %v3885_v5 = vshll.u32 %v3857_v36, 16  ;;  %v10020_v15 = vld [vmem:[%s9052_s20 + $0x60] sm:$0xff]  }
  0xbc   : > { %8400 = vmatmul.mubr.bf16.gmra.mxu0 %v8863_v63  ;;  %v3872_v4 = vor.u32 %v3871_v31, %v3868_v28  ;;  %v7205_v42 = vrot.slane %v3386_v21, 9  ;;  %v3422_v13 = vrot.slane %v3420_v20, 4  ;;  %v3423_v0 = vrot.slane %v9781_v60, 5 }
  0xbd   : > { %8448 = vmatpush3.bf16.msra.mxu0 %v8862_v34  ;;  %813 = vst [vmem:[#allocation2 + $0x70] sm:$0xf] %v7618_v53  ;;  %814 = vst [vmem:[#allocation2 + $0x74] sm:$0x1] %v7619_v14  ;;  %8403 = vmatprep.mubr.bf16.mxu0 %v8867_v27  ;;  %v3882_v54 = vor.u32 %v3881_v10, %v3877_v45  ;;  %v7206_v47 = vrot.slane %v3387_v56, 9  ;;  %v3427_v40 = vrot.slane %v9791_v52, 5  ;;  %v7716_v7 = vunpack.c.h.bf16 %v9929_v46 }
  0xbe   : > { %8449 = vmatprep.subr.bf16.mxu0 %v8865_v55  ;;  %8484 = vmatpush3.bf16.msra.mxu1 %v8866_v44  ;;  %v3873_v63 = vrot.slane %v3872_v4, 4  ;;  %v3887_v16 = vrot.slane %v3885_v5, 5  ;;  %v9987_v34 = vld [vmem:[%s11999_s3 + $0xb8] sm:$0xff]   ;;  %v3421_v2 = vsel %vm9241_vm6, %v7205_v42, %v3420_v20  ;;  %v3430_v60 = vrot.slane %v9799_v32, 5 }
  0xbf   : > { %8485 = vmatprep.subr.bf16.mxu1 %v8870_v25  ;;  %v3883_v52 = vrot.slane %v3882_v54, 4  ;;  %v3424_v44 = vsel %vm9241_vm6, %v3422_v13, %v3423_v0  ;;  %v9998_v41 = vsel %vm9241_vm6, %v7206_v47, %v3427_v40  ;;  %v3429_v3 = vrot.slane %v3427_v40, 4  ;;  %v10040_v53 = vld [vmem:[%s11999_s3 + $0x38] sm:$0xff]  }
  0xc0   : > { %v3878_v20 = vsel %vm9087_vm3, %v3873_v63, %v3877_v45  ;;  %v7229_v36 = vcombine.low %v3421_v2, %v3424_v44  ;;  %v373_v32 = vadd.f32 %v9934_v17, %v9952_v9  ;;  %v404_v1 = vmax.f32 %v9961_v57, 0.0 }
  0xc1   : > { %8450 = vmatpush3.bf16.msra.mxu0 %v8865_v55  ;;  %v3888_v23 = vsel %vm9087_vm3, %v3883_v52, %v3887_v16  ;;  %v10013_v27 = vsel %vm9241_vm6, %v3429_v3, %v3430_v60  ;;  %v336_v22 = vmul.f32 %v9908_v51, %v7715_v19  ;;  %v337_v46 = vmul.f32 %v9908_v51, %v7716_v7 }
  0xc2   : > { %8451 = vmatprep.subr.bf16.mxu0 %v8868_v43  ;;  %8486 = vmatpush3.bf16.msra.mxu1 %v8870_v25  ;;  %v10022_v9 = vcombine.low %v3878_v20, %v3888_v23  ;;  %v7230_v57 = vcombine.low %v9998_v41, %v10013_v27  ;;  %v405_v55 = vmax.f32 %v373_v32, 0.0  ;;  %v478_v11 = vrot.slane %v404_v1, 7  ;;  %v2981_v28 = vld [vmem:[#allocation2 + $0x6c] sm:$0xf] }
  0xc3   : > { %v10026_v29 = vld [vmem:[#allocation2 + $0x6c] sm:$0xf]  ;;  %8535 = vmatprep.subr.bf16.mxu1 %v9987_v34  ;;  %v10031_v19 = vadd.f32 %v9934_v17, %v336_v22  ;;  %v7719_v62 = vunpack.c.l.bf16 %v7867_v8  ;;  %v7720_v30 = vunpack.c.h.bf16 %v7867_v8  ;;  %v3153_v31 = vshrl.u32 %v2981_v28, 16 }
  0xc4   : > { %v10033_v25 = vld [vmem:[#allocation2 + $0x70] sm:$0xf]  ;;  %v10035_v48 = vld [vmem:[#allocation2 + $0x74] sm:$0x1]  ;;  %v3156_v21 = vshll.u32 %v2981_v28, 16  ;;  %v7723_v14 = vunpack.c.l.bf16 %v10020_v15  ;;  %v7724_v45 = vunpack.c.h.bf16 %v10020_v15  ;;  %v375_v42 = vadd.f32 %v9934_v17, %v337_v46 }
  0xc5   : > { %v3162_v10 = vshll.u32 %v10033_v25, 16  ;;  %v3166_v56 = vshrl.u32 %v10033_v25, 16  ;;  %v3172_v4 = vshll.u32 %v10035_v48, 16  ;;  %v8869_v5 = vld [vmem:[#allocation2 + $0x6c] sm:$0xff]   ;;  %8452 = vmatpush3.bf16.msra.mxu0 %v8868_v43  ;;  %v3155_v13 = vrot.slane %v3153_v31, 4 }
  0xc6   : > { %v3158_v54 = vrot.slane %v3156_v21, 5  ;;  %8453 = vmatprep.subr.bf16.mxu0 %v8871_v12  ;;  %v10048_v0 = vld [vmem:[#allocation2 + $0x70] sm:$0xf]  ;;  %v10050_v47 = vld [vmem:[#allocation2 + $0x74] sm:$0x1]  ;;  %v10053_v40 = vmul.f32 %v9908_v51, %v7719_v62  ;;  %v10056_v63 = vmul.f32 %v9908_v51, %v7720_v30  ;;  %8404 = vmatmul.mubr.bf16.gmra.mxu0 %v8869_v5  ;;  %v3890_v43 = vshrl.u32 %v10026_v29, 16 }
  0xc7   : > { %v3164_v16 = vrot.slane %v3162_v10, 5  ;;  %v3168_v2 = vrot.slane %v3166_v56, 4  ;;  %v3174_v60 = vrot.slane %v3172_v4, 5  ;;  %v3893_v44 = vshll.u32 %v10026_v29, 16  ;;  %8455 = vmatprep.mubr.bf16.mxu0 %v7229_v36  ;;  %v3388_v10 = vld [vmem:[#allocation2 + $0x30] sm:$0xe] }
  0xc8   : > { %v3159_v52 = vor.u32 %v3158_v54, %v3155_v13  ;;  %v3899_v3 = vshll.u32 %v10048_v0, 16  ;;  %v3903_v20 = vshrl.u32 %v10048_v0, 16  ;;  %v3892_v1 = vrot.slane %v3890_v43, 4  ;;  %v8875_v54 = vld [vmem:[%s11999_s3 + $0x30] sm:$0xff]  }
  0xc9   : > { %v3169_v32 = vor.u32 %v3168_v2, %v3164_v16  ;;  %8454 = vmatpush3.bf16.msra.mxu0 %v8871_v12  ;;  %v3909_v8 = vshll.u32 %v10050_v47, 16  ;;  %v479_v23 = vrot.slane %v405_v55, 7  ;;  %v3895_v22 = vrot.slane %v3893_v44, 5 }
  0xca   : > { %v3160_v7 = vrot.slane %v3159_v52, 4  ;;  %v3901_v28 = vrot.slane %v3899_v3, 5  ;;  %v3905_v46 = vrot.slane %v3903_v20, 4  ;;  %8503 = vmatprep.subr.bf16.mxu0 %v10040_v53  ;;  %v556_v21 = vsel %vm450_vm0, 0.0, %v478_v11 }
  0xcb   : > { %v3170_v62 = vrot.slane %v3169_v32, 4  ;;  %v3911_v30 = vrot.slane %v3909_v8, 5  ;;  %v480_v31 = vsel %vm450_vm0, %v478_v11, %v479_v23  ;;  %v3896_v36 = vor.u32 %v3895_v22, %v3892_v1  ;;  %v3389_v11 = vld [vmem:[#allocation2 + $0x3c] sm:$0xe] }
  0xcc   : > { %v3165_v12 = vsel %vm9087_vm3, %v3160_v7, %v3164_v16  ;;  %v3906_v56 = vor.u32 %v3905_v46, %v3901_v28  ;;  %v572_v55 = vsel %vm450_vm0, %v479_v23, 0.0  ;;  %v7760_v13 = vpack.c.bf16 %v480_v31, %v556_v21  ;;  %v10092_v23 = vld [vmem:[#allocation2 + $0x48] sm:$0xe]  ;;  %v10104_v21 = vld [vmem:[%s9052_s20 + $0x70] sm:$0xff]  }
  0xcd   : > { %v3175_v4 = vsel %vm9087_vm3, %v3170_v62, %v3174_v60  ;;  %v7622_v5 = vpack.c.bf16 %v572_v55, %v572_v55  ;;  %v406_v2 = vmax.f32 %v10031_v19, 0.0  ;;  %v3897_v52 = vrot.slane %v3896_v36, 4  ;;  %v8877_v19 = vld [vmem:[%s11999_s3 + $0x28] sm:$0xff]   ;;  %v8879_v55 = vld [vmem:[%s11999_s3 + $0x20] sm:$0xff]  }
  0xce   : > { %v7196_v43 = vcombine.low %v3165_v12, %v3175_v4  ;;  %v3907_v44 = vrot.slane %v3906_v56, 4  ;;  %v407_v16 = vmax.f32 %v375_v42, 0.0  ;;  %8456 = vmatmul.mubr.bf16.vlgmr.msra.gmra.mxu0 %v7230_v57  ;;  %7876 = vst [vmem:[#allocation2 + $0x78] sm:$0xff] %v7760_v13   ;;  %v7207_v3 = vrot.slane %v3388_v10, 9  ;;  %v10101_v31 = vld [vmem:[%s9052_s20 + $0x68] sm:$0xff]   ;;  %v8874_v56 = vld [vmem:[%s11999_s3 + $0xb0] sm:$0xff]  }
  0xcf   : > { %817 = vst [vmem:[#allocation2 + $0x80] sm:$0x1] %v7622_v5  ;;  %v481_v60 = vrot.slane %v406_v2, 7  ;;  %v3434_v20 = vrot.slane %v9807_v26, 5  ;;  %v3437_v32 = vrot.slane %v9816_v39, 5  ;;  %v3902_v42 = vsel %vm9087_vm3, %v3897_v52, %v3901_v28  ;;  %8504 = vmatpush3.bf16.msra.mxu0 %v10040_v53 }
  0xd0   : > { %8436 = vmatmul.mubr.bf16.gmra.mxu1 %v7196_v43  ;;  %v3912_v41 = vsel %vm9087_vm3, %v3907_v44, %v3911_v30  ;;  %v482_v27 = vrot.slane %v407_v16, 7  ;;  %v7208_v57 = vrot.slane %v3389_v11, 9  ;;  %8505 = vmatprep.subr.bf16.mxu0 %v8875_v54  ;;  %v3441_v28 = vrot.slane %v9829_v18, 5 }
  0xd1   : > { %8487 = vmatprep.mubr.bf16.mxu1 %v10022_v9  ;;  %v7278_v26 = vcombine.low %v3902_v42, %v3912_v41  ;;  %v557_v39 = vsel %vm450_vm0, 0.0, %v481_v60  ;;  %v3435_v1 = vsel %vm9241_vm6, %v7207_v3, %v3434_v20  ;;  %v3436_v8 = vrot.slane %v3434_v20, 4 }
  0xd2   : > { %v483_v7 = vsel %vm450_vm0, %v481_v60, %v482_v27  ;;  %v573_v53 = vsel %vm450_vm0, %v482_v27, 0.0  ;;  %v7623_v22 = vpack.c.bf16 %v557_v39, %v557_v39  ;;  %v3444_v30 = vrot.slane %v9837_v58, 5 }
  0xd3   : > { %v7624_v46 = vpack.c.bf16 %v483_v7, %v483_v7  ;;  %v7625_v9 = vpack.c.bf16 %v573_v53, %v573_v53  ;;  %v3438_v62 = vsel %vm9241_vm6, %v3436_v8, %v3437_v32  ;;  %8506 = vmatpush3.bf16.msra.mxu0 %v8875_v54  ;;  %v3442_v12 = vsel %vm9241_vm6, %v7208_v57, %v3441_v28  ;;  %v8881_v32 = vld [vmem:[%s11999_s3 + $0x18] sm:$0xff]  }
  0xd4   : > { %818 = vst [vmem:[#allocation2 + $0x84] sm:$0xf] %v7623_v22  ;;  %v7231_v10 = vcombine.low %v3435_v1, %v3438_v62  ;;  %v3443_v36 = vrot.slane %v3441_v28, 4  ;;  %v376_v18 = vadd.f32 %v9934_v17, %v10053_v40  ;;  %8507 = vmatprep.subr.bf16.mxu0 %v8877_v19  ;;  %v377_v58 = vadd.f32 %v9934_v17, %v10056_v63 }
  0xd5   : > { %819 = vst [vmem:[#allocation2 + $0x88] sm:$0xf] %v7624_v46  ;;  %820 = vst [vmem:[#allocation2 + $0x8c] sm:$0x1] %v7625_v9  ;;  %v340_v4 = vmul.f32 %v9908_v51, %v7723_v14  ;;  %v341_v40 = vmul.f32 %v9908_v51, %v7724_v45  ;;  %v7209_v5 = vrot.slane %v10092_v23, 9  ;;  %v7727_v11 = vunpack.c.l.bf16 %v10101_v31  ;;  %v8883_v46 = vld [vmem:[%s11999_s3 + $0x10] sm:$0xff]  }
  0xd6   : > { %v10125_v13 = vld [vmem:[#allocation2 + $0x78] sm:$0xf]  ;;  %v10127_v54 = vld [vmem:[#allocation2 + $0x7c] sm:$0xf]  ;;  %v10129_v2 = vld [vmem:[#allocation2 + $0x80] sm:$0x1]  ;;  %8459 = vmatprep.mubr.bf16.mxu0 %v7231_v10  ;;  %v3445_v63 = vsel %vm9241_vm6, %v3443_v36, %v3444_v30  ;;  %v7728_v14 = vunpack.c.h.bf16 %v10101_v31  ;;  %v7731_v15 = vunpack.c.l.bf16 %v10104_v21 }
  0xd7   : > { %v3914_v45 = vshrl.u32 %v10125_v13, 16  ;;  %v3917_v43 = vshll.u32 %v10125_v13, 16  ;;  %v3923_v52 = vshll.u32 %v10127_v54, 16  ;;  %v3927_v44 = vshrl.u32 %v10127_v54, 16  ;;  %8508 = vmatpush3.bf16.msra.mxu0 %v8877_v19  ;;  %v10193_v23 = vld [vmem:[#allocation2 + $0x60] sm:$0xe] }
  0xd8   : > { %8488 = vmatmul.mubr.bf16.vlgmr.msra.gmra.mxu1 %v7278_v26  ;;  %v3933_v16 = vshll.u32 %v10129_v2, 16  ;;  %v7232_v60 = vcombine.low %v3442_v12, %v3445_v63  ;;  %v408_v3 = vmax.f32 %v376_v18, 0.0  ;;  %v409_v20 = vmax.f32 %v377_v58, 0.0  ;;  %8509 = vmatprep.subr.bf16.mxu0 %v8879_v55  ;;  %v8876_v26 = vld [vmem:[%s11999_s3 + $0xa8] sm:$0xff]   ;;  %v8878_v12 = vld [vmem:[%s11999_s3 + $0xa0] sm:$0xff]  }
  0xd9   : > { %8536 = vmatpush3.bf16.msra.mxu1 %v9987_v34  ;;  %v3916_v42 = vrot.slane %v3914_v45, 4  ;;  %v3919_v41 = vrot.slane %v3917_v43, 5  ;;  %v3925_v27 = vrot.slane %v3923_v52, 5  ;;  %v3929_v57 = vrot.slane %v3927_v44, 4 }
  0xda   : > { %8537 = vmatprep.subr.bf16.mxu1 %v8874_v56  ;;  %v3935_v39 = vrot.slane %v3933_v16, 5  ;;  %8460 = vmatmul.mubr.bf16.gmra.mxu0 %v7232_v60  ;;  %v484_v19 = vrot.slane %v408_v3, 7  ;;  %v485_v1 = vrot.slane %v409_v20, 7  ;;  %v378_v8 = vadd.f32 %v9934_v17, %v340_v4 }
  0xdb   : > { %v3920_v7 = vor.u32 %v3919_v41, %v3916_v42  ;;  %v3930_v53 = vor.u32 %v3929_v57, %v3925_v27  ;;  %v10149_v22 = vld [vmem:[#allocation2 + $0x84] sm:$0xf]  ;;  %v379_v34 = vadd.f32 %v9934_v17, %v341_v40  ;;  %v3448_v28 = vrot.slane %v9848_v24, 5  ;;  %8510 = vmatpush3.bf16.msra.mxu0 %v8879_v55  ;;  %v3391_v42 = vld [vmem:[#allocation2 + $0x54] sm:$0xe] }
  0xdc   : > { %v10156_v9 = vld [vmem:[#allocation2 + $0x88] sm:$0xf]  ;;  %v10158_v62 = vld [vmem:[#allocation2 + $0x8c] sm:$0x1]  ;;  %v3938_v30 = vshrl.u32 %v10149_v22, 16  ;;  %v3941_v10 = vshll.u32 %v10149_v22, 16  ;;  %v486_v36 = vsel %vm450_vm0, %v484_v19, %v485_v1  ;;  %v10167_v24 = vmul.f32 %v9908_v51, %v7727_v11  ;;  %8511 = vmatprep.subr.bf16.mxu0 %v8881_v32 }
  0xdd   : > { %8538 = vmatpush3.bf16.msra.mxu1 %v8874_v56  ;;  %v3921_v18 = vrot.slane %v3920_v7, 4  ;;  %v3931_v58 = vrot.slane %v3930_v53, 4  ;;  %v3947_v4 = vshll.u32 %v10156_v9, 16  ;;  %v3951_v40 = vshrl.u32 %v10156_v9, 16 }
  0xde   : > { %v3940_v63 = vrot.slane %v3938_v30, 4  ;;  %v3943_v45 = vrot.slane %v3941_v10, 5  ;;  %v3957_v43 = vshll.u32 %v10158_v62, 16  ;;  %8539 = vmatprep.subr.bf16.mxu1 %v8876_v26  ;;  %v558_v52 = vsel %vm450_vm0, 0.0, %v484_v19 }
  0xdf   : > { %v3926_v55 = vsel %vm9087_vm3, %v3921_v18, %v3925_v27  ;;  %v3936_v56 = vsel %vm9087_vm3, %v3931_v58, %v3935_v39  ;;  %v3949_v11 = vrot.slane %v3947_v4, 5  ;;  %v3953_v44 = vrot.slane %v3951_v40, 4  ;;  %8512 = vmatpush3.bf16.msra.mxu0 %v8881_v32  ;;  %v8885_v27 = vld [vmem:[%s11999_s3 + $0x8] sm:$0xff]   ;;  %v8882_v40 = vld [vmem:[%s11999_s3 + $0x90] sm:$0xff]  }
  0xe0   : > { %v7279_v16 = vcombine.low %v3926_v55, %v3936_v56  ;;  %v3944_v60 = vor.u32 %v3943_v45, %v3940_v63  ;;  %v3959_v3 = vrot.slane %v3957_v43, 5  ;;  %v574_v20 = vsel %vm450_vm0, %v485_v1, 0.0  ;;  %8513 = vmatprep.subr.bf16.mxu0 %v8883_v46  ;;  %v8880_v1 = vld [vmem:[%s11999_s3 + $0x98] sm:$0xff]   ;;  %v8887_v45 = vld [vmem:[%s11999_s3] sm:$0xff]  }
  0xe1   : > { %v3954_v41 = vor.u32 %v3953_v44, %v3949_v11  ;;  %8540 = vmatpush3.bf16.msra.mxu1 %v8876_v26  ;;  %v7628_v57 = vpack.c.bf16 %v574_v20, %v574_v20  ;;  %v7765_v7 = vpack.c.bf16 %v486_v36, %v558_v52  ;;  %v410_v19 = vmax.f32 %v378_v8, 0.0 }
  0xe2   : > { %8491 = vmatprep.mubr.bf16.mxu1 %v7279_v16  ;;  %v3945_v39 = vrot.slane %v3944_v60, 4  ;;  %8541 = vmatprep.subr.bf16.mxu1 %v8878_v12  ;;  %v411_v53 = vmax.f32 %v379_v34, 0.0  ;;  %v3449_v32 = vsel %vm9241_vm6, %v7209_v5, %v3448_v28  ;;  %v3450_v26 = vrot.slane %v3448_v28, 4  ;;  %v8884_v16 = vld [vmem:[%s11999_s3 + $0x88] sm:$0xff]  }
  0xe3   : > { %v3955_v8 = vrot.slane %v3954_v41, 4  ;;  %7877 = vst [vmem:[#allocation2 + $0x90] sm:$0xff] %v7765_v7   ;;  %823 = vst [vmem:[#allocation2 + $0x98] sm:$0x1] %v7628_v57  ;;  %v487_v30 = vrot.slane %v410_v19, 7  ;;  %v3451_v10 = vrot.slane %v9853_v6, 5  ;;  %8514 = vmatpush3.bf16.msra.mxu0 %v8883_v46  ;;  %v344_v57 = vmul.f32 %v9908_v51, %v7731_v15 }
  0xe4   : > { %v7210_v36 = vrot.slane %v3391_v42, 9  ;;  %v3950_v34 = vsel %vm9087_vm3, %v3945_v39, %v3949_v11  ;;  %v488_v18 = vrot.slane %v411_v53, 7  ;;  %v3455_v58 = vrot.slane %v9868_v59, 5  ;;  %8515 = vmatprep.subr.bf16.mxu0 %v8885_v27 }
  0xe5   : > { %v3458_v4 = vrot.slane %v9871_v50, 5  ;;  %v3960_v5 = vsel %vm9087_vm3, %v3955_v8, %v3959_v3  ;;  %8542 = vmatpush3.bf16.msra.mxu1 %v8878_v12  ;;  %v559_v28 = vsel %vm450_vm0, 0.0, %v487_v30  ;;  %v3452_v6 = vsel %vm9241_vm6, %v3450_v26, %v3451_v10 }
  0xe6   : > { %v343_v59 = vmul.f32 %v9908_v51, %v7728_v14  ;;  %v7280_v50 = vcombine.low %v3950_v34, %v3960_v5  ;;  %v489_v46 = vsel %vm450_vm0, %v487_v30, %v488_v18  ;;  %v575_v63 = vsel %vm450_vm0, %v488_v18, 0.0  ;;  %8543 = vmatprep.subr.bf16.mxu1 %v8880_v1 }
  0xe7   : > { %v7629_v12 = vpack.c.bf16 %v559_v28, %v559_v28  ;;  %v7630_v43 = vpack.c.bf16 %v489_v46, %v489_v46  ;;  %v7631_v52 = vpack.c.bf16 %v575_v63, %v575_v63  ;;  %v7233_v55 = vcombine.low %v3449_v32, %v3452_v6  ;;  %8516 = vmatpush3.bf16.msra.mxu0 %v8885_v27 }
  0xe8   : > { %8492 = vmatmul.mubr.bf16.gmra.mxu1 %v7280_v50  ;;  %v3457_v31 = vrot.slane %v3455_v58, 4  ;;  %v380_v14 = vadd.f32 %v9934_v17, %v10167_v24  ;;  %v381_v56 = vadd.f32 %v9934_v17, %v343_v59  ;;  %v7732_v11 = vunpack.c.h.bf16 %v10104_v21  ;;  %v10224_v24 = vld [vmem:[%s11999_s3 + $0xf8] sm:$0xff]   ;;  %8517 = vmatprep.subr.bf16.mxu0 %v8887_v45 }
  0xe9   : > { %824 = vst [vmem:[#allocation2 + $0x9c] sm:$0xf] %v7629_v12  ;;  %825 = vst [vmem:[#allocation2 + $0xa0] sm:$0xf] %v7630_v43  ;;  %8544 = vmatpush3.bf16.msra.mxu1 %v8880_v1  ;;  %8463 = vmatprep.mubr.bf16.mxu0 %v7233_v55  ;;  %v3456_v44 = vsel %vm9241_vm6, %v7210_v36, %v3455_v58  ;;  %v7211_v60 = vrot.slane %v10193_v23, 9  ;;  %v3462_v58 = vrot.slane %v9903_v38, 5 }
  0xea   : > { %826 = vst [vmem:[#allocation2 + $0xa4] sm:$0x1] %v7631_v52  ;;  %v10226_v3 = vld [vmem:[#allocation2 + $0x90] sm:$0xf]  ;;  %v10228_v20 = vld [vmem:[#allocation2 + $0x94] sm:$0xf]  ;;  %v3459_v41 = vsel %vm9241_vm6, %v3457_v31, %v3458_v4  ;;  %8545 = vmatprep.subr.bf16.mxu1 %v8882_v40  ;;  %v345_v7 = vmul.f32 %v9908_v51, %v7732_v11  ;;  %v382_v46 = vadd.f32 %v9934_v17, %v344_v57 }
  0xeb   : > { %v10230_v42 = vld [vmem:[#allocation2 + $0x98] sm:$0x1]  ;;  %v3962_v19 = vshrl.u32 %v10226_v3, 16  ;;  %v3965_v27 = vshll.u32 %v10226_v3, 16  ;;  %v3971_v39 = vshll.u32 %v10228_v20, 16  ;;  %v3975_v53 = vshrl.u32 %v10228_v20, 16  ;;  %8518 = vmatpush3.bf16.msra.mxu0 %v8887_v45 }
  0xec   : > { %v10242_v1 = vpop.f32.mrf.mxu1  ;;  %v3981_v32 = vshll.u32 %v10230_v42, 16  ;;  %v7234_v26 = vcombine.low %v3456_v44, %v3459_v41  ;;  %v412_v8 = vmax.f32 %v380_v14, 0.0  ;;  %v413_v21 = vmax.f32 %v381_v56, 0.0  ;;  %v8886_v51 = vld [vmem:[%s11999_s3 + $0x80] sm:$0xff]   ;;  %8567 = vmatprep.subr.bf16.mxu0 %v10224_v24  ;;  %v10267_v43 = vld [vmem:[%s11999_s3 + $0x138] sm:$0xff]  }
  0xed   : > { %v3964_v15 = vrot.slane %v3962_v19, 4  ;;  %v3967_v30 = vrot.slane %v3965_v27, 5  ;;  %v3973_v10 = vrot.slane %v3971_v39, 5  ;;  %v3977_v36 = vrot.slane %v3975_v53, 4  ;;  %8546 = vmatpush3.bf16.msra.mxu1 %v8882_v40 }
  0xee   : > { %8464 = vmatmul.mubr.bf16.gmra.mxu0 %v7234_v26  ;;  %v490_v34 = vrot.slane %v412_v8, 7  ;;  %v491_v18 = vrot.slane %v413_v21, 7  ;;  %8547 = vmatprep.subr.bf16.mxu1 %v8884_v16  ;;  %v3465_v4 = vrot.slane %v9914_v61, 5  ;;  %v10251_v5 = vpop.f32.mrf.mxu1  ;;  %v3983_v59 = vrot.slane %v3981_v32, 5  ;;  %v3393_v26 = vld [vmem:[#allocation2 + $0x6c] sm:$0xe] }
  0xef   : > { %v3968_v28 = vor.u32 %v3967_v30, %v3964_v15  ;;  %v3978_v6 = vor.u32 %v3977_v36, %v3973_v10  ;;  %v383_v61 = vadd.f32 %v9934_v17, %v345_v7  ;;  %v414_v30 = vmax.f32 %v382_v46, 0.0 }
  0xf0   : > { %v10253_v50 = vld [vmem:[#allocation2 + $0x9c] sm:$0xf]  ;;  %v10256_v40 = vld [vmem:[#allocation2 + $0xa0] sm:$0xf]  ;;  %v492_v38 = vsel %vm450_vm0, %v490_v34, %v491_v18  ;;  %v560_v41 = vsel %vm450_vm0, 0.0, %v490_v34  ;;  %v10273_v17 = vpop.f32.mrf.mxu1  ;;  %v576_v32 = vsel %vm450_vm0, %v491_v18, 0.0 }
  0xf1   : > { %v10258_v63 = vld [vmem:[#allocation2 + $0xa4] sm:$0x1]  ;;  %v3986_v12 = vshrl.u32 %v10253_v50, 16  ;;  %v3989_v45 = vshll.u32 %v10253_v50, 16  ;;  %v3969_v52 = vrot.slane %v3968_v28, 4  ;;  %v3979_v55 = vrot.slane %v3978_v6, 4  ;;  %8548 = vmatpush3.bf16.msra.mxu1 %v8884_v16 }
  0xf2   : > { %v3995_v31 = vshll.u32 %v10256_v40, 16  ;;  %v3999_v14 = vshrl.u32 %v10256_v40, 16  ;;  %v4005_v44 = vshll.u32 %v10258_v63, 16  ;;  %8549 = vmatprep.subr.bf16.mxu1 %v8886_v51  ;;  %v7634_v21 = vpack.c.bf16 %v576_v32, %v576_v32  ;;  %v10287_v18 = vpop.f32.mrf.mxu1 }
  0xf3   : > { %v3988_v56 = vrot.slane %v3986_v12, 4  ;;  %v3991_v11 = vrot.slane %v3989_v45, 5  ;;  %v3974_v57 = vsel %vm9087_vm3, %v3969_v52, %v3973_v10  ;;  %v3984_v7 = vsel %vm9087_vm3, %v3979_v55, %v3983_v59  ;;  %12016 = vst [vmem:[#allocation3_spill] sm:$0xff] %v10287_v18 }
  0xf4   : > { %v3997_v19 = vrot.slane %v3995_v31, 5  ;;  %v4001_v27 = vrot.slane %v3999_v14, 4  ;;  %v7281_v39 = vcombine.low %v3974_v57, %v3984_v7  ;;  %v4007_v16 = vrot.slane %v4005_v44, 5  ;;  %829 = vst [vmem:[#allocation2 + $0xb0] sm:$0x1] %v7634_v21 }
  0xf5   : > { %v3992_v53 = vor.u32 %v3991_v11, %v3988_v56  ;;  %v7770_v15 = vpack.c.bf16 %v492_v38, %v560_v41  ;;  %8550 = vmatpush3.bf16.msra.mxu1 %v8886_v51  ;;  %v10280_v36 = vpop.f32.mrf.mxu0  ;;  %v415_v34 = vmax.f32 %v383_v61, 0.0  ;;  %v3463_v28 = vsel %vm9241_vm6, %v7211_v60, %v3462_v58  ;;  %v4444_v60 = vld [vmem:[#allocation2 + $0x6c] sm:$0xe] }
  0xf6   : > { %v4002_v8 = vor.u32 %v4001_v27, %v3997_v19  ;;  %8495 = vmatprep.mubr.bf16.mxu1 %v7281_v39  ;;  %v3464_v6 = vrot.slane %v3462_v58, 4  ;;  %8599 = vmatprep.subr.bf16.mxu1 %v10267_v43  ;;  %v493_v46 = vrot.slane %v414_v30, 7  ;;  %v7212_v51 = vrot.slane %v3393_v26, 9 }
  0xf7   : > { %v3993_v10 = vrot.slane %v3992_v53, 4  ;;  %7878 = vst [vmem:[#allocation2 + $0xa8] sm:$0xff] %v7770_v15   ;;  %v3469_v12 = vrot.slane %v10033_v25, 5  ;;  %v494_v38 = vrot.slane %v415_v34, 7  ;;  %v10294_v58 = vpop.f32.mrf.mxu0  ;;  %v3472_v31 = vrot.slane %v10035_v48, 5 }
  0xf8   : > { %v4003_v59 = vrot.slane %v4002_v8, 4  ;;  %v3466_v23 = vsel %vm9241_vm6, %v3464_v6, %v3465_v4  ;;  %v561_v52 = vsel %vm450_vm0, 0.0, %v493_v46  ;;  %v4476_v48 = vrot.slane %v10048_v0, 5  ;;  %v4443_v6 = vld [vmem:[#allocation2 + $0x60] sm:$0xe] }
  0xf9   : > { %v3998_v45 = vsel %vm9087_vm3, %v3993_v10, %v3997_v19  ;;  %v7235_v55 = vcombine.low %v3463_v28, %v3466_v23  ;;  %v495_v25 = vsel %vm450_vm0, %v493_v46, %v494_v38  ;;  %v577_v56 = vsel %vm450_vm0, %v494_v38, 0.0  ;;  %v10302_v44 = vpop.f32.mrf.mxu1  ;;  %v10307_v27 = vpop.f32.mrf.mxu0 }
  0xfa   : > { %v4008_v61 = vsel %vm9087_vm3, %v4003_v59, %v4007_v16  ;;  %v7635_v11 = vpack.c.bf16 %v561_v52, %v561_v52  ;;  %v7636_v4 = vpack.c.bf16 %v495_v25, %v495_v25  ;;  %v7637_v41 = vpack.c.bf16 %v577_v56, %v577_v56 }
  0xfb   : > { %v7282_v14 = vcombine.low %v3998_v45, %v4008_v61  ;;  %8467 = vmatprep.mubr.bf16.mxu0 %v7235_v55  ;;  %v3470_v57 = vsel %vm9241_vm6, %v7212_v51, %v3469_v12  ;;  %v3471_v7 = vrot.slane %v3469_v12, 4  ;;  %v7310_v19 = vrot.slane %v4444_v60, 9  ;;  %v10319_v21 = vld [vmem:[#allocation2 + $0xb0] sm:$0x1]  ;;  %v10321_v30 = vpop.f32.mrf.mxu1  ;;  %v10332_v46 = vpop.f32.mrf.mxu0  ;;  %v8964_v61 = vld [vmem:[#allocation2 + $0x68] sm:$0x1] }
  0xfc   : > { %830 = vst [vmem:[#allocation2 + $0xb4] sm:$0xf] %v7635_v11  ;;  %831 = vst [vmem:[#allocation2 + $0xb8] sm:$0xf] %v7636_v4  ;;  %v4469_v53 = vrot.slane %v9957_v35, 5  ;;  %v4479_v16 = vrot.slane %v10050_v47, 5  ;;  %v7293_v32 = vcombine.low %v9949_v37, %v9957_v35 }
  0xfd   : > { %8496 = vmatmul.mubr.bf16.gmra.mxu1 %v7282_v14  ;;  %832 = vst [vmem:[#allocation2 + $0xbc] sm:$0x1] %v7637_v41  ;;  %v3473_v39 = vsel %vm9241_vm6, %v3471_v7, %v3472_v31  ;;  %v4029_v37 = vshll.u32 %v10319_v21, 16  ;;  %v10330_v35 = vsel %vm9241_vm6, %v7310_v19, %v4476_v48  ;;  %v4478_v59 = vrot.slane %v4476_v48, 4  ;;  %12017 = vst [vmem:[#allocation4_spill] sm:$0xff] %v10332_v46  ;;  %v10338_v31 = vpop.f32.mrf.mxu1 }
  0xfe   : > { %v10315_v26 = vld [vmem:[#allocation2 + $0xa8] sm:$0xf]  ;;  %v10317_v8 = vld [vmem:[#allocation2 + $0xac] sm:$0xf]  ;;  %v7236_v15 = vcombine.low %v3470_v57, %v3473_v39  ;;  %v7309_v23 = vrot.slane %v4443_v6, 9  ;;  %v4471_v60 = vrot.slane %v4469_v53, 4  ;;  %v7294_v48 = vcombine.low %v10026_v29, %v10048_v0 }
  0xff   : > { %v4010_v10 = vshrl.u32 %v10315_v26, 16  ;;  %v4013_v34 = vshll.u32 %v10315_v26, 16  ;;  %v4019_v28 = vshll.u32 %v10317_v8, 16  ;;  %v4023_v47 = vshrl.u32 %v10317_v8, 16  ;;  %v8893_v29 = vld [vmem:[%s11999_s3 + $0xf0] sm:$0xff]   ;;  %v10364_v0 = vpop.f32.mrf.mxu1 }
 0x100   : > { %8468 = vmatmul.mubr.bf16.gmra.mxu0 %v7236_v15  ;;  %v4472_v52 = vrot.slane %v8964_v61, 5  ;;  %v10336_v55 = vsel %vm9241_vm6, %v4478_v59, %v4479_v16  ;;  %v4031_v56 = vrot.slane %v4029_v37, 5  ;;  %v7295_v39 = vcombine.low %v10125_v13, %v10127_v54  ;;  %12018 = vst [vmem:[#allocation5_spill] sm:$0xff] %v10364_v0 }
 0x101   : > { %v4012_v51 = vrot.slane %v4010_v10, 4  ;;  %v4015_v12 = vrot.slane %v4013_v34, 5  ;;  %v4021_v45 = vrot.slane %v4019_v28, 5  ;;  %v4025_v38 = vrot.slane %v4023_v47, 4  ;;  %8519 = vmatprep.mubr.bf16.mxu0 %v7293_v32 }
 0x102   : > { %v10354_v16 = vpop.f32.mrf.mxu0  ;;  %v4470_v37 = vsel %vm9241_vm6, %v7309_v23, %v4469_v53  ;;  %v4473_v53 = vsel %vm9241_vm6, %v4471_v60, %v4472_v52  ;;  %v4483_v23 = vrot.slane %v10127_v54, 5  ;;  %v8896_v60 = vld [vmem:[%s11999_s3 + $0xe8] sm:$0xff]   ;;  %v4497_v54 = vrot.slane %v10228_v20, 5 }
 0x103   : > { %v4016_v14 = vor.u32 %v4015_v12, %v4012_v51  ;;  %v4026_v25 = vor.u32 %v4025_v38, %v4021_v45  ;;  %v10340_v11 = vld [vmem:[#allocation2 + $0xb4] sm:$0xf]  ;;  %v10344_v41 = vld [vmem:[#allocation2 + $0xb8] sm:$0xf] }
 0x104   : > { %v10346_v57 = vld [vmem:[#allocation2 + $0xbc] sm:$0x1]  ;;  %v4034_v7 = vshrl.u32 %v10340_v11, 16  ;;  %v4037_v19 = vshll.u32 %v10340_v11, 16  ;;  %v4043_v10 = vshll.u32 %v10344_v41, 16  ;;  %v4047_v34 = vshrl.u32 %v10344_v41, 16 }
 0x105   : > { %v4017_v32 = vrot.slane %v4016_v14, 4  ;;  %v4027_v15 = vrot.slane %v4026_v25, 4  ;;  %v4053_v6 = vshll.u32 %v10346_v57, 16  ;;  %v4445_v38 = vld [vmem:[#allocation2 + $0x78] sm:$0xe] }
 0x106   : > { %v4036_v28 = vrot.slane %v4034_v7, 4  ;;  %v4039_v47 = vrot.slane %v4037_v19, 5  ;;  %v4045_v51 = vrot.slane %v4043_v10, 5  ;;  %v4049_v12 = vrot.slane %v4047_v34, 4  ;;  %v4446_v25 = vld [vmem:[#allocation2 + $0x84] sm:$0xe]  ;;  %v10373_v19 = vpop.f32.mrf.mxu0 }
 0x107   : > { %v4022_v13 = vsel %vm9087_vm3, %v4017_v32, %v4021_v45  ;;  %v4032_v59 = vsel %vm9087_vm3, %v4027_v15, %v4031_v56  ;;  %v4447_v7 = vld [vmem:[#allocation2 + $0x90] sm:$0xe]  ;;  %v4055_v45 = vrot.slane %v4053_v6, 5  ;;  %v4490_v32 = vrot.slane %v10156_v9, 5  ;;  %v10381_v52 = vpop.f32.mrf.mxu1 }
 0x108   : > { %v7283_v61 = vcombine.low %v4022_v13, %v4032_v59  ;;  %v4040_v14 = vor.u32 %v4039_v47, %v4036_v28  ;;  %8520 = vmatmul.mubr.bf16.vlgmr.msra.gmra.mxu0 %v7294_v48  ;;  %v4050_v4 = vor.u32 %v4049_v12, %v4045_v51  ;;  %v7333_v15 = vcombine.low %v4470_v37, %v4473_v53  ;;  %v4448_v47 = vld [vmem:[#allocation2 + $0x9c] sm:$0xe]  ;;  %v10390_v13 = vpop.f32.mrf.mxu0 }
 0x109   : > { %8568 = vmatpush3.bf16.msra.mxu0 %v10224_v24  ;;  %8523 = vmatprep.mubr.bf16.mxu0 %v7295_v39  ;;  %v7311_v10 = vrot.slane %v4445_v38, 9  ;;  %v7296_v24 = vcombine.low %v10149_v22, %v10156_v9  ;;  %v4485_v34 = vrot.slane %v4483_v23, 4  ;;  %v4486_v28 = vrot.slane %v10129_v2, 5 }
 0x10a   : > { %8499 = vmatprep.mubr.bf16.mxu1 %v7283_v61  ;;  %v4041_v56 = vrot.slane %v4040_v14, 4  ;;  %8569 = vmatprep.subr.bf16.mxu0 %v8893_v29  ;;  %v4051_v48 = vrot.slane %v4050_v4, 4  ;;  %v7297_v6 = vcombine.low %v10226_v3, %v10228_v20  ;;  %v7312_v37 = vrot.slane %v4446_v25, 9  ;;  %v8899_v3 = vld [vmem:[%s11999_s3 + $0xe0] sm:$0xff]   ;;  %v10399_v20 = vpop.f32.mrf.mxu1  ;;  %v4974_v61 = vld [vmem:[#allocation2 + $0x6c] sm:$0xf]  ;;  %v10404_v14 = vpop.f32.mrf.mxu0 }
 0x10b   : > { %v4493_v59 = vrot.slane %v10158_v62, 5  ;;  %v7313_v22 = vrot.slane %v4447_v7, 9  ;;  %v4492_v12 = vrot.slane %v4490_v32, 4  ;;  %v4500_v2 = vrot.slane %v10230_v42, 5  ;;  %12019 = vst [vmem:[#allocation6_spill] sm:$0xff] %v10404_v14 }
 0x10c   : > { %v4046_v39 = vsel %vm9087_vm3, %v4041_v56, %v4045_v51  ;;  %v4056_v4 = vsel %vm9087_vm3, %v4051_v48, %v4055_v45  ;;  %v4499_v51 = vrot.slane %v4497_v54, 4  ;;  %v4504_v38 = vrot.slane %v10256_v40, 5  ;;  %v10431_v48 = vld [vmem:[#allocation2 + $0xb4] sm:$0xe] }
 0x10d   : > { %8570 = vmatpush3.bf16.msra.mxu0 %v8893_v29  ;;  %v7284_v9 = vcombine.low %v4046_v39, %v4056_v4  ;;  %v4484_v62 = vsel %vm9241_vm6, %v7311_v10, %v4483_v23  ;;  %v4449_v29 = vld [vmem:[#allocation2 + $0xa8] sm:$0xe]  ;;  %v4487_v42 = vsel %vm9241_vm6, %v4485_v34, %v4486_v28  ;;  %v10410_v53 = vsel %vm9241_vm6, %v7312_v37, %v4490_v32  ;;  %v10416_v23 = vld [vmem:[#allocation2 + $0x70] sm:$0xf] }
 0x10e   : > { %8571 = vmatprep.subr.bf16.mxu0 %v8896_v60  ;;  %v10414_v25 = vsel %vm9241_vm6, %v7313_v22, %v4497_v54  ;;  %v7314_v7 = vrot.slane %v4448_v47, 9  ;;  %12020 = vst [vmem:[#allocation7_spill] sm:$0xff] %v10416_v23  ;;  %v10420_v45 = vsel %vm9241_vm6, %v4492_v12, %v4493_v59  ;;  %v10424_v56 = vsel %vm9241_vm6, %v4499_v51, %v4500_v2  ;;  %v10448_v12 = vld [vmem:[#allocation2 + $0x7c] sm:$0xf] }
 0x10f   : > { %8500 = vmatmul.mubr.bf16.gmra.mxu1 %v7284_v9  ;;  %v4507_v32 = vrot.slane %v10258_v63, 5  ;;  %v4511_v54 = vrot.slane %v10317_v8, 5  ;;  %v4506_v10 = vrot.slane %v4504_v38, 4  ;;  %v4999_v39 = vshrl.u32 %v4974_v61, 16  ;;  %12021 = vst [vmem:[#allocation8_spill] sm:$0xff] %v10448_v12 }
 0x110   : > { %8524 = vmatmul.mubr.bf16.gmra.mxu0 %v7296_v24  ;;  %8551 = vmatprep.mubr.bf16.mxu1 %v7333_v15  ;;  %v10433_v15 = vpop.f32.mrf.mxu1  ;;  %v7315_v24 = vrot.slane %v4449_v29, 9  ;;  %v5002_v34 = vshll.u32 %v4974_v61, 16  ;;  %v7298_v28 = vcombine.low %v10253_v50, %v10256_v40  ;;  %v5008_v63 = vshll.u32 %v10416_v23, 16  ;;  %v8892_v50 = vld [vmem:[%s11999_s3 + $0x130] sm:$0xff]  }
 0x111   : > { %8572 = vmatpush3.bf16.msra.mxu0 %v8896_v60  ;;  %8527 = vmatprep.mubr.bf16.mxu0 %v7297_v6  ;;  %v8902_v60 = vld [vmem:[%s11999_s3 + $0xd8] sm:$0xff]   ;;  %v5012_v47 = vshrl.u32 %v10416_v23, 16  ;;  %v10441_v4 = vpop.f32.mrf.mxu0  ;;  %v7335_v37 = vcombine.low %v4484_v62, %v4487_v42  ;;  %v10455_v40 = vsel %vm9241_vm6, %v7314_v7, %v4504_v38  ;;  %v4513_v51 = vrot.slane %v4511_v54, 4  ;;  %v10459_v29 = vld [vmem:[#allocation2 + $0x74] sm:$0x1] }
 0x112   : > { %8573 = vmatprep.subr.bf16.mxu0 %v8899_v3  ;;  %v10439_v6 = vld [vmem:[#allocation2 + $0x78] sm:$0xf]  ;;  %v4514_v2 = vrot.slane %v10319_v21, 5  ;;  %12022 = vst [vmem:[#allocation9_spill] sm:$0xff] %v10459_v29  ;;  %v10461_v61 = vpop.f32.mrf.mxu1  ;;  %v8905_v42 = vld [vmem:[%s11999_s3 + $0xd0] sm:$0xff]   ;;  %v7299_v38 = vcombine.low %v10315_v26, %v10317_v8  ;;  %v10469_v7 = vrot.slane %v4999_v39, 4  ;;  %v12024_v62 = vcombine.low %v10330_v35, %v10336_v55 }
 0x113   : > { %12023 = vst [vmem:[#allocation10_spill] sm:$0xff] %v10461_v61  ;;  %v10471_v59 = vrot.slane %v5002_v34, 5  ;;  %v10473_v21 = vld [vmem:[#allocation2 + $0x80] sm:$0x1]  ;;  %v10480_v9 = vsel %vm9241_vm6, %v4506_v10, %v4507_v32  ;;  %v10484_v22 = vsel %vm9241_vm6, %v7315_v24, %v4511_v54  ;;  %v10486_v26 = vrot.slane %v5008_v63, 5  ;;  %v10492_v34 = vpop.f32.mrf.mxu0  ;;  %v8894_v24 = vld [vmem:[%s11999_s3 + $0x128] sm:$0xff]  }
 0x114   : > { %v10488_v8 = vrot.slane %v5012_v47, 4  ;;  %v10490_v39 = vld [vmem:[#allocation2 + $0x88] sm:$0xf]  ;;  %v12026_v35 = vrot.slane %v10344_v41, 5  ;;  %v5023_v32 = vshrl.u32 %v10439_v6, 16  ;;  %v5026_v10 = vshll.u32 %v10439_v6, 16 }
 0x115   : > { %8574 = vmatpush3.bf16.msra.mxu0 %v8899_v3  ;;  %v4980_v3 = vld [vmem:[#allocation2 + $0x84] sm:$0xf]  ;;  %12025 = vst [vmem:[#allocation11_spill] sm:$0xff] %v10490_v39  ;;  %v5032_v54 = vshll.u32 %v10448_v12, 16  ;;  %v5036_v63 = vshrl.u32 %v10448_v12, 16  ;;  %v10512_v47 = vadd.f32 %v10242_v1, %v10280_v36  ;;  %v5060_v18 = vshrl.u32 %v10490_v39, 16 }
 0x116   : > { %8575 = vmatprep.subr.bf16.mxu0 %v8902_v60  ;;  %v4520_v55 = vrot.slane %v12026_v35, 4  ;;  %v10529_v1 = vld [vmem:[%s11999_s3 + $0x120] sm:$0xff]   ;;  %v5015_v36 = vor.u32 %v10488_v8, %v10486_v26  ;;  %v10535_v35 = vpop.f32.mrf.mxu0  ;;  %v10546_v14 = vrot.slane %v5026_v10, 5  ;;  %v10550_v61 = vld [vmem:[#allocation2 + $0x8c] sm:$0x1] }
 0x117   : > { %8552 = vmatmul.mubr.bf16.vlgmr.msra.gmra.mxu1 %v12024_v62  ;;  %v5042_v62 = vshll.u32 %v10473_v21, 16  ;;  %v10548_v8 = vrot.slane %v5032_v54, 5  ;;  %12028 = vst [vmem:[#allocation13_spill] sm:$0xff] %v10550_v61  ;;  %v5038_v46 = vrot.slane %v5036_v63, 4  ;;  %v5062_v23 = vrot.slane %v5060_v18, 4 }
 0x118   : > { %8528 = vmatmul.mubr.bf16.gmra.mxu0 %v7298_v28  ;;  %8600 = vmatpush3.bf16.msra.mxu1 %v10267_v43  ;;  %v10505_v28 = vsel %vm9241_vm6, %v4513_v51, %v4514_v2  ;;  %v7300_v43 = vcombine.low %v10340_v11, %v10344_v41  ;;  %v5018_v51 = vshll.u32 %v10459_v29, 16  ;;  %v10524_v11 = vadd.f32 %v10251_v5, %v10294_v58  ;;  %v10542_v5 = vld [vmem:[%s11999_s3 + $0xc0] sm:$0xff]  }
 0x119   : > { %8555 = vmatprep.mubr.bf16.mxu1 %v7335_v37  ;;  %8601 = vmatprep.subr.bf16.mxu1 %v8892_v50  ;;  %v5005_v37 = vor.u32 %v10471_v59, %v10469_v7  ;;  %v5047_v2 = vshrl.u32 %v4980_v3, 16  ;;  %v5056_v59 = vshll.u32 %v10490_v39, 16  ;;  %v4983_v7 = vld [vmem:[#allocation2 + $0x90] sm:$0xf]  ;;  %v10544_v58 = vrot.slane %v5023_v32, 4 }
 0x11a   : > { %8576 = vmatpush3.bf16.msra.mxu0 %v8902_v60  ;;  %v10514_v6 = vpop.f32.mrf.mxu1  ;;  %8531 = vmatprep.mubr.bf16.mxu0 %v7299_v38  ;;  %v8908_v60 = vld [vmem:[%s11999_s3 + $0xc8] sm:$0xff]   ;;  %12027 = vst [vmem:[#allocation12_spill] sm:$0xff] %v10524_v11  ;;  %v5050_v38 = vshll.u32 %v4980_v3, 16  ;;  %v10559_v32 = vld [vmem:[#allocation2 + $0x94] sm:$0xf]  ;;  %v10567_v39 = vadd.f32 %v10273_v17, %v10307_v27  ;;  %v12029_v63 = vcombine.low %v10410_v53, %v10420_v45  ;;  %v12031_v18 = vrot.slane %v10431_v48, 9 }
 0x11b   : > { %8577 = vmatprep.subr.bf16.mxu0 %v8905_v42  ;;  %v8913_v3 = vld [vmem:[#allocation2 + $0x6c] sm:$0xff]   ;;  %v10557_v11 = vrot.slane %v5056_v59, 5  ;;  %v12030_v59 = vrot.slane %v10344_v41, 5  ;;  %v12032_v27 = vrot.slane %v10346_v57, 5  ;;  %v5074_v45 = vshll.u32 %v4983_v7, 16 }
 0x11c   : > { %v10537_v0 = vpop.f32.mrf.mxu1  ;;  %8602 = vmatpush3.bf16.msra.mxu1 %v8892_v50  ;;  %v10553_v50 = vrot.slane %v5047_v2, 4  ;;  %v10555_v29 = vrot.slane %v5050_v38, 5  ;;  %v10575_v2 = vld [vmem:[%s11999_s3 + $0x118] sm:$0xff]   ;;  %v12034_v41 = vcombine.low %v10414_v25, %v10424_v56  ;;  %v10600_v48 = vrot.slane %v5005_v37, 4  ;;  %v10655_v38 = vld [vmem:[#allocation2 + $0xac] sm:$0xf] }
 0x11d   : > { %8603 = vmatprep.subr.bf16.mxu1 %v8894_v24  ;;  %v10585_v17 = vsel %vm9241_vm6, %v12031_v18, %v12030_v59  ;;  %v10591_v53 = vsel %vm9241_vm6, %v4520_v55, %v12032_v27  ;;  %v5016_v59 = vrot.slane %v5015_v36, 4  ;;  %v5020_v18 = vrot.slane %v5018_v51, 5  ;;  %v10606_v55 = vld [vmem:[%s11999_s3 + $0x178] sm:$0xff]   ;;  %12037 = vst [vmem:[#allocation17_spill] sm:$0xff] %v10655_v38 }
 0x11e   : > { %8578 = vmatpush3.bf16.msra.mxu0 %v8905_v42  ;;  %v10561_v10 = vpop.f32.mrf.mxu1  ;;  %v5071_v42 = vshrl.u32 %v4983_v7, 16  ;;  %v5039_v25 = vor.u32 %v5038_v46, %v10548_v8  ;;  %v10612_v56 = vrot.slane %v5042_v62, 5  ;;  %v4986_v37 = vld [vmem:[#allocation2 + $0x9c] sm:$0xf]  ;;  %v5053_v36 = vor.u32 %v10555_v29, %v10553_v50  ;;  %v10624_v46 = vld [vmem:[#allocation2 + $0xa0] sm:$0xf] }
 0x11f   : > { %8579 = vmatprep.subr.bf16.mxu0 %v8908_v60  ;;  %8556 = vmatmul.mubr.bf16.gmra.mxu1 %v12029_v63  ;;  %v10593_v63 = vpop.f32.mrf.mxu0  ;;  %v10629_v62 = vld [vmem:[%s11999_s3 + $0x110] sm:$0xff]   ;;  %v5076_v27 = vrot.slane %v5074_v45, 5  ;;  %v5084_v29 = vshrl.u32 %v10559_v32, 16  ;;  %v10638_v50 = vld [vmem:[#allocation2 + $0xa8] sm:$0xf]  ;;  %v5011_v57 = vsel %vm9087_vm3, %v10600_v48, %v10486_v26  ;;  %v5021_v45 = vsel %vm9087_vm3, %v5016_v59, %v5020_v18 }
 0x120   : > { %8532 = vmatmul.mubr.bf16.gmra.mxu0 %v7300_v43  ;;  %v10595_v54 = vpop.f32.mrf.mxu1  ;;  %8604 = vmatpush3.bf16.msra.mxu1 %v8894_v24  ;;  %v5029_v24 = vor.u32 %v10546_v14, %v10544_v58  ;;  %v5066_v43 = vshll.u32 %v10550_v61, 16  ;;  %v10621_v7 = vrot.slane %v5071_v42, 4  ;;  %v5080_v14 = vshll.u32 %v10559_v32, 16  ;;  %v8919_v58 = vld [vmem:[#allocation2 + $0x84] sm:$0xff]   ;;  %v10666_v26 = vld [vmem:[%s11999_s3 + $0x170] sm:$0xff]  }
 0x121   : > { %12033 = vst [vmem:[#allocation14_spill] sm:$0xff] %v10595_v54  ;;  %8559 = vmatprep.mubr.bf16.mxu1 %v12034_v41  ;;  %8605 = vmatprep.subr.bf16.mxu1 %v10529_v1  ;;  %v10668_v48 = vld [vmem:[#allocation2 + $0x98] sm:$0x1]  ;;  %v12039_v61 = vcombine.low %v10455_v40, %v10480_v9  ;;  %v5086_v54 = vrot.slane %v5084_v29, 4  ;;  %v12042_v9 = vcombine.low %v10484_v22, %v10505_v28  ;;  %v8906_v40 = vld [vmem:[%s11999_s3 + $0x108] sm:$0xff]   ;;  %v5122_v22 = vshll.u32 %v10638_v50, 16 }
 0x122   : > { %8580 = vmatpush3.bf16.msra.mxu0 %v8908_v60  ;;  %v10615_v51 = vpop.f32.mrf.mxu1  ;;  %8583 = vmatprep.mubr.bf16.mxu0 %v8913_v3  ;;  %v5063_v60 = vor.u32 %v5062_v23, %v10557_v11  ;;  %v8915_v3 = vld [vmem:[#allocation2 + $0x78] sm:$0xff]   ;;  %v10636_v23 = vadd.f32 %v10302_v44, %v10354_v16  ;;  %v10653_v44 = vadd.f32 %v10321_v30, %v10373_v19  ;;  %v5095_v16 = vshrl.u32 %v4986_v37, 16 }
 0x123   : > { %12035 = vst [vmem:[#allocation15_spill] sm:$0xff] %v10615_v51  ;;  %8581 = vmatprep.subr.bf16.mxu0 %v10542_v5  ;;  %v5098_v30 = vshll.u32 %v4986_v37, 16  ;;  %v5104_v19 = vshll.u32 %v10624_v46, 16  ;;  %v5108_v51 = vshrl.u32 %v10624_v46, 16  ;;  %v5077_v37 = vor.u32 %v5076_v27, %v10621_v7 }
 0x124   : > { %v10640_v42 = vpop.f32.mrf.mxu0  ;;  %v10642_v41 = vpop.f32.mrf.mxu1  ;;  %8606 = vmatpush3.bf16.msra.mxu1 %v10529_v1  ;;  %v10659_v1 = vrot.slane %v5029_v24, 4  ;;  %v10678_v24 = vrot.slane %v5063_v60, 4  ;;  %v10687_v12 = vrot.slane %v5080_v14, 5  ;;  %v10706_v7 = vrot.slane %v5095_v16, 4  ;;  %v8921_v16 = vld [vmem:[#allocation2 + $0x90] sm:$0xff]  }
 0x125   : > { %12036 = vst [vmem:[#allocation16_spill] sm:$0xff] %v10642_v41  ;;  %8607 = vmatprep.subr.bf16.mxu1 %v10575_v2  ;;  %v10661_v41 = vrot.slane %v5039_v25, 4  ;;  %v10680_v25 = vrot.slane %v5066_v43, 5  ;;  %v10708_v14 = vrot.slane %v5098_v30, 5  ;;  %v5128_v28 = vshll.u32 %v10655_v38, 16 }
 0x126   : > { %8582 = vmatpush3.bf16.msra.mxu0 %v10542_v5  ;;  %v10671_v59 = vpop.f32.mrf.mxu0  ;;  %v10673_v18 = vpop.f32.mrf.mxu1  ;;  %v10676_v5 = vrot.slane %v5053_v36, 4  ;;  %v10693_v36 = vadd.f32 %v10338_v31, %v10390_v13  ;;  %v5119_v31 = vshrl.u32 %v10638_v50, 16  ;;  %v10712_v13 = vrot.slane %v5104_v19, 5  ;;  %v8920_v50 = vld [vmem:[%s11999_s3 + $0x168] sm:$0xff]   ;;  %v10751_v30 = vld [vmem:[#allocation2 + $0xb8] sm:$0xf] }
 0x127   : > { %12038 = vst [vmem:[#allocation18_spill] sm:$0xff] %v10673_v18  ;;  %8631 = vmatprep.subr.bf16.mxu0 %v10606_v55  ;;  %8560 = vmatmul.mubr.bf16.gmra.mxu1 %v12039_v61  ;;  %v10689_v18 = vld [vmem:[#allocation2 + $0xa4] sm:$0x1]  ;;  %v7397_v61 = vcombine.low %v5011_v57, %v5021_v45  ;;  %v5035_v57 = vsel %vm9087_vm3, %v10659_v1, %v10548_v8  ;;  %v5132_v45 = vshrl.u32 %v10655_v38, 16  ;;  %v4992_v1 = vld [vmem:[#allocation2 + $0xb4] sm:$0xf] }
 0x128   : > { %12040 = vst [vmem:[#allocation19_spill] sm:$0xff] %v10689_v18  ;;  %v10695_v60 = vpop.f32.mrf.mxu0  ;;  %v10697_v43 = vpop.f32.mrf.mxu1  ;;  %8608 = vmatpush3.bf16.msra.mxu1 %v10575_v2  ;;  %8563 = vmatprep.mubr.bf16.mxu1 %v12042_v9  ;;  %v5110_v2 = vrot.slane %v5108_v51, 4  ;;  %v5090_v51 = vshll.u32 %v10668_v48, 16  ;;  %v10737_v8 = vld [vmem:[%s11999_s3 + $0x100] sm:$0xff]  }
 0x129   : > { %12041 = vst [vmem:[#allocation20_spill] sm:$0xff] %v10697_v43  ;;  %8609 = vmatprep.subr.bf16.mxu1 %v10629_v62  ;;  %8584 = vmatmul.mubr.bf16.vlgmr.msra.gmra.mxu0 %v8915_v3  ;;  %v5045_v3 = vsel %vm9087_vm3, %v10661_v41, %v10612_v56  ;;  %v5059_v56 = vsel %vm9087_vm3, %v10676_v5, %v10557_v11  ;;  %v5114_v11 = vshll.u32 %v10689_v18, 16  ;;  %v10759_v5 = vld [vmem:[#allocation2 + $0xb0] sm:$0x1] }
 0x12a   : > { %v10716_v27 = vpop.f32.mrf.mxu0  ;;  %v10718_v29 = vpop.f32.mrf.mxu1  ;;  %8632 = vmatpush3.bf16.msra.mxu0 %v10606_v55  ;;  %8587 = vmatprep.mubr.bf16.mxu0 %v8919_v58  ;;  %v5069_v55 = vsel %vm9087_vm3, %v10678_v24, %v10680_v25  ;;  %v10748_v58 = vrot.slane %v5077_v37, 4  ;;  %v5087_v41 = vor.u32 %v5086_v54, %v10687_v12  ;;  %v10761_v24 = vrot.slane %v5119_v31, 4  ;;  %v8925_v37 = vld [vmem:[#allocation2 + $0x9c] sm:$0xff]  }
 0x12b   : > { %12043 = vst [vmem:[#allocation21_spill] sm:$0xff] %v10718_v29  ;;  %8633 = vmatprep.subr.bf16.mxu0 %v10666_v26  ;;  %v10763_v25 = vrot.slane %v5122_v22, 5  ;;  %v10765_v54 = vrot.slane %v5128_v28, 5  ;;  %v5101_v29 = vor.u32 %v10708_v14, %v10706_v7  ;;  %v5111_v43 = vor.u32 %v5110_v2, %v10712_v13  ;;  %v7871_v28 = vld [vmem:[%s9052_s20 + $0x78] sm:$0xff]  }
 0x12c   : > { %v10753_v19 = vpop.f32.mrf.mxu0  ;;  %v10755_v9 = vpop.f32.mrf.mxu1  ;;  %8610 = vmatpush3.bf16.msra.mxu1 %v10629_v62  ;;  %v10773_v62 = vld [vmem:[%s11999_s3 + $0x160] sm:$0xff]   ;;  %v10777_v31 = vadd.f32 %v10381_v52, %v10441_v4  ;;  %v10781_v22 = vadd.f32 %v10399_v20, %v10492_v34  ;;  %v10788_v7 = vcombine.low %v5035_v57, %v5045_v3  ;;  %v5134_v14 = vrot.slane %v5132_v45, 4  ;;  %v8912_v3 = vld [vmem:[%s11999_s3 + $0x1b8] sm:$0xff]  }
 0x12d   : > { %12044 = vst [vmem:[#allocation22_spill] sm:$0xff] %v10755_v9  ;;  %8611 = vmatprep.subr.bf16.mxu1 %v8906_v40  ;;  %v5143_v2 = vshrl.u32 %v4992_v1, 16  ;;  %v12047_v18 = vcombine.low %v10585_v17, %v10591_v53  ;;  %v10794_v52 = vrot.slane %v5087_v41, 4  ;;  %v10796_v4 = vrot.slane %v5090_v51, 5 }
 0x12e   : > { %12045 = vst [vmem:[#allocation23_spill] sm:$0xff] %v10781_v22  ;;  %v10784_v9 = vpop.f32.mrf.mxu0  ;;  %v10786_v38 = vpop.f32.mrf.mxu1  ;;  %8634 = vmatpush3.bf16.msra.mxu0 %v10666_v26  ;;  %v5146_v20 = vshll.u32 %v4992_v1, 16  ;;  %v5152_v34 = vshll.u32 %v10751_v30, 16  ;;  %v7399_v26 = vcombine.low %v5059_v56, %v5069_v55  ;;  %v10807_v53 = vrot.slane %v5114_v11, 5 }
 0x12f   : > { %12046 = vst [vmem:[#allocation24_spill] sm:$0xff] %v10786_v38  ;;  %8564 = vmatmul.mubr.bf16.gmra.mxu1 %v12047_v18  ;;  %8635 = vmatprep.subr.bf16.mxu0 %v8920_v50  ;;  %v5156_v18 = vshrl.u32 %v10751_v30, 16  ;;  %v10814_v51 = vrot.slane %v5101_v29, 4  ;;  %v10821_v45 = vadd.f32 %v10433_v15, %v10535_v35  ;;  %v5125_v41 = vor.u32 %v10763_v25, %v10761_v24  ;;  %v10833_v29 = vld [vmem:[#allocation2 + $0xbc] sm:$0x1]  ;;  %v10840_v35 = vld [vmem:[%s11999_s3 + $0x1b0] sm:$0xff]  }
 0x130   : > { %v10799_v22 = vpop.f32.mrf.mxu0  ;;  %v10801_v57 = vpop.f32.mrf.mxu1  ;;  %8612 = vmatpush3.bf16.msra.mxu1 %v8906_v40  ;;  %8615 = vmatprep.mubr.bf16.mxu1 %v7397_v61  ;;  %v10816_v40 = vrot.slane %v5111_v43, 4  ;;  %v5138_v61 = vshll.u32 %v10759_v5, 16  ;;  %v8926_v43 = vld [vmem:[%s11999_s3 + $0x158] sm:$0xff]   ;;  %v10835_v1 = vrot.slane %v5143_v2, 4  ;;  %v7735_v15 = vunpack.c.l.bf16 %v7871_v28  ;;  %v8927_v2 = vld [vmem:[#allocation2 + $0xa8] sm:$0xff]  }
 0x131   : > { %12048 = vst [vmem:[#allocation25_spill] sm:$0xff] %v10801_v57  ;;  %8613 = vmatprep.subr.bf16.mxu1 %v10737_v8  ;;  %8588 = vmatmul.mubr.bf16.gmra.mxu0 %v8921_v16  ;;  %v5135_v16 = vor.u32 %v5134_v14, %v10765_v54  ;;  %v5148_v11 = vrot.slane %v5146_v20, 5  ;;  %v10847_v24 = vrot.slane %v5152_v34, 5  ;;  %v7736_v25 = vunpack.c.h.bf16 %v7871_v28  ;;  %v8965_v57 = vld [vmem:[%s11997_s1] ss:$0 sm:$0xff]  ;;  %v8931_v34 = vld [vmem:[#allocation2 + $0xb4] sm:$0xff]  }
 0x132   : > { %v10823_v56 = vpop.f32.mrf.mxu0  ;;  %v10825_v55 = vpop.f32.mrf.mxu1  ;;  %8636 = vmatpush3.bf16.msra.mxu0 %v8920_v50  ;;  %8591 = vmatprep.mubr.bf16.mxu0 %v8925_v37  ;;  %v5093_v50 = vsel %vm9087_vm3, %v10794_v52, %v10796_v4  ;;  %v5158_v17 = vrot.slane %v5156_v18, 4  ;;  %v346_v38 = vmul.f32 %v8965_v57, %v7735_v15  ;;  %v10859_v52 = vadd.f32 %v10514_v6, %v10640_v42 }
 0x133   : > { %8637 = vmatprep.subr.bf16.mxu0 %v10773_v62  ;;  %v10863_v28 = vadd.f32 %v10537_v0, %v10671_v59  ;;  %v10869_v4 = vrot.slane %v5138_v61, 5  ;;  %v347_v20 = vmul.f32 %v8965_v57, %v7736_v25  ;;  %v10873_v18 = vadd.f32 %v10561_v10, %v10695_v60  ;;  %v8966_v10 = vld [vmem:[%s11998_s2] ss:$0 sm:$0xff] }
 0x134   : > { %v10849_v37 = vpop.f32.mrf.mxu0  ;;  %v10851_v14 = vpop.f32.mrf.mxu1  ;;  %8614 = vmatpush3.bf16.msra.mxu1 %v10737_v8  ;;  %v5107_v8 = vsel %vm9087_vm3, %v10814_v51, %v10712_v13  ;;  %v5117_v0 = vsel %vm9087_vm3, %v10816_v40, %v10807_v53  ;;  %v10883_v59 = vrot.slane %v5125_v41, 4  ;;  %v10885_v13 = vrot.slane %v5135_v16, 4  ;;  %v8929_v53 = vld [vmem:[%s11999_s3 + $0x150] sm:$0xff]   ;;  %v8918_v16 = vld [vmem:[%s11999_s3 + $0x1a8] sm:$0xff]  }
 0x135   : > { %8663 = vmatprep.subr.bf16.mxu1 %v8912_v3  ;;  %v384_v60 = vadd.f32 %v8966_v10, %v346_v38  ;;  %v5149_v57 = vor.u32 %v5148_v11, %v10835_v1  ;;  %v5162_v51 = vshll.u32 %v10833_v29, 16  ;;  %v385_v40 = vadd.f32 %v8966_v10, %v347_v20  ;;  %v12050_v11 = vld [vmem:[#allocation7_spill] sm:$0xff]  ;;  %v12051_v20 = vld [vmem:[#allocation12_spill] sm:$0xff] }
 0x136   : > { %v10875_v6 = vpop.f32.mrf.mxu0  ;;  %v10877_v42 = vpop.f32.mrf.mxu1  ;;  %8638 = vmatpush3.bf16.msra.mxu0 %v10773_v62  ;;  %v10899_v62 = vadd.f32 %v10753_v19, %v10512_v47  ;;  %v5159_v1 = vor.u32 %v5158_v17, %v10847_v24  ;;  %v12049_v47 = vsel %vm9087_vm3, %v10748_v58, %v10687_v12  ;;  %v5433_v25 = vrot.slane %v12050_v11, 5 }
 0x137   : > { %8616 = vmatmul.mubr.bf16.vlgmr.msra.gmra.mxu1 %v10788_v7  ;;  %8639 = vmatprep.subr.bf16.mxu0 %v8926_v43  ;;  %v416_v15 = vmax.f32 %v384_v60, 0.0  ;;  %v7400_v19 = vcombine.low %v12049_v47, %v5093_v50  ;;  %v10918_v10 = vadd.f32 %v10784_v9, %v12051_v20  ;;  %v7401_v60 = vcombine.low %v5107_v8, %v5117_v0  ;;  %v10935_v9 = vld [vmem:[%s11999_s3 + $0x1a0] sm:$0xff]  }
 0x138   : > { %v8270_v61 = vpop.f32.mrf.mxu0  ;;  %v10901_v41 = vpop.f32.mrf.mxu1  ;;  %8664 = vmatpush3.bf16.msra.mxu1 %v8912_v3  ;;  %8619 = vmatprep.mubr.bf16.mxu1 %v7399_v26  ;;  %v417_v3 = vmax.f32 %v385_v40, 0.0  ;;  %v5399_v26 = vld [vmem:[#allocation2 + $0x6c] sm:$0xe]  ;;  %v5131_v12 = vsel %vm9087_vm3, %v10883_v59, %v10765_v54  ;;  %v10930_v50 = vadd.f32 %v10799_v22, %v10567_v39  ;;  %v10941_v8 = vrot.slane %v5149_v57, 4 }
 0x139   : > { %8665 = vmatprep.subr.bf16.mxu1 %v10840_v35  ;;  %8592 = vmatmul.mubr.bf16.gmra.mxu0 %v8927_v2  ;;  %v496_v58 = vrot.slane %v416_v15, 7  ;;  %v5141_v2 = vsel %vm9087_vm3, %v10885_v13, %v10869_v4  ;;  %v10943_v54 = vrot.slane %v5162_v51, 5  ;;  %v8932_v39 = vld [vmem:[%s11999_s3 + $0x148] sm:$0xff]   ;;  %v5160_v0 = vrot.slane %v5159_v1, 4  ;;  %v12057_v1 = vld [vmem:[#allocation3_spill] sm:$0xff] }
 0x13a   : > { %v10920_v7 = vpop.f32.mrf.mxu0  ;;  %v10922_v17 = vpop.f32.mrf.mxu1  ;;  %8640 = vmatpush3.bf16.msra.mxu0 %v8926_v43  ;;  %8595 = vmatprep.mubr.bf16.mxu0 %v8931_v34  ;;  %v497_v43 = vrot.slane %v417_v3, 7  ;;  %v7413_v40 = vrot.slane %v5399_v26, 9  ;;  %v12053_v4 = vld [vmem:[#allocation9_spill] sm:$0xff]  ;;  %v5435_v15 = vrot.slane %v5433_v25, 4  ;;  %v10957_v47 = vadd.f32 %v10849_v37, %v10636_v23  ;;  %v10970_v23 = vld [vmem:[%s11999_s3 + $0x198] sm:$0xff]  }
 0x13b   : > { %12052 = vst [vmem:[#allocation7_spill] sm:$0xff] %v10920_v7  ;;  %8641 = vmatprep.subr.bf16.mxu0 %v8929_v53  ;;  %v562_v59 = vsel %vm450_vm0, 0.0, %v496_v58  ;;  %v5436_v13 = vrot.slane %v12053_v4, 5  ;;  %v5400_v37 = vld [vmem:[#allocation2 + $0x78] sm:$0xe] }
 0x13c   : > { %v8273_v22 = vpop.f32.mrf.mxu0  ;;  %v10948_v34 = vpop.f32.mrf.mxu1  ;;  %8666 = vmatpush3.bf16.msra.mxu1 %v10840_v35  ;;  %v498_v57 = vsel %vm450_vm0, %v496_v58, %v497_v43  ;;  %v578_v51 = vsel %vm450_vm0, %v497_v43, 0.0  ;;  %12054 = vst [vmem:[#allocation12_spill] sm:$0xff] %v10957_v47  ;;  %v12056_v35 = vld [vmem:[#allocation4_spill] sm:$0xff]  ;;  %v7402_v43 = vcombine.low %v5131_v12, %v5141_v2  ;;  %v5165_v12 = vsel %vm9087_vm3, %v5160_v0, %v10943_v54  ;;  %v12067_v26 = vld [vmem:[#allocation23_spill] sm:$0xff] }
 0x13d   : > { %8667 = vmatprep.subr.bf16.mxu1 %v8918_v16  ;;  %v1399_v20 = vadd.f32 %v12057_v1, %v12056_v35  ;;  %v7640_v38 = vpack.c.bf16 %v578_v51, %v578_v51  ;;  %v7775_v4 = vpack.c.bf16 %v498_v57, %v562_v59  ;;  %v8935_v58 = vld [vmem:[%s11999_s3 + $0x140] sm:$0xff]   ;;  %v10974_v35 = vadd.f32 %v10875_v6, %v10653_v44  ;;  %v12061_v44 = vld [vmem:[#allocation10_spill] sm:$0xff] }
 0x13e   : > { %v1704_v3 = vpop.f32.mrf.mxu0  ;;  %v10959_v11 = vpop.f32.mrf.mxu1  ;;  %8642 = vmatpush3.bf16.msra.mxu0 %v8929_v53  ;;  %v10977_v59 = vadd.f32 %v8270_v61, %v10693_v36  ;;  %v10990_v36 = vadd.f32 %v12061_v44, %v10593_v63  ;;  %v5401_v6 = vld [vmem:[#allocation2 + $0x84] sm:$0xe]  ;;  %v10992_v61 = vld [vmem:[#allocation2 + $0x90] sm:$0xe]  ;;  %v12062_v63 = vld [vmem:[#allocation11_spill] sm:$0xff]  ;;  %v5461_v51 = vrot.slane %v10624_v46, 5 }
 0x13f   : > { %12055 = vst [vmem:[#allocation9_spill] sm:$0xff] %v10959_v11  ;;  %8620 = vmatmul.mubr.bf16.gmra.mxu1 %v7400_v19  ;;  %8643 = vmatprep.subr.bf16.mxu0 %v8932_v39  ;;  %12058 = vst [vmem:[#allocation4_spill] sm:$0xff] %v10974_v35  ;;  %v5155_v19 = vsel %vm9087_vm3, %v10941_v8, %v10847_v24  ;;  %v11001_v24 = vsel %vm9241_vm6, %v5435_v15, %v5436_v13  ;;  %v11018_v13 = vld [vmem:[#allocation2 + $0x9c] sm:$0xe]  ;;  %v12065_v1 = vld [vmem:[#allocation8_spill] sm:$0xff] }
 0x140   : > { %12059 = vst [vmem:[#allocation3_spill] sm:$0xff] %v10977_v59  ;;  %v8274_v53 = vpop.f32.mrf.mxu0  ;;  %v10979_v57 = vpop.f32.mrf.mxu1  ;;  %8668 = vmatpush3.bf16.msra.mxu1 %v8918_v16  ;;  %8623 = vmatprep.mubr.bf16.mxu1 %v7401_v60  ;;  %7879 = vst [vmem:[#allocation2 + $0xc0] sm:$0xff] %v7775_v4   ;;  %v10997_v16 = vsel %vm9241_vm6, %v7413_v40, %v5433_v25  ;;  %v5447_v60 = vrot.slane %v12062_v63, 5  ;;  %v12064_v25 = vld [vmem:[#allocation14_spill] sm:$0xff]  ;;  %v7414_v40 = vrot.slane %v5400_v37, 9  ;;  %v12066_v4 = vrot.slane %v12065_v1, 5 }
 0x141   : > { %12060 = vst [vmem:[#allocation26_spill] sm:$0xff] %v10979_v57  ;;  %835 = vst [vmem:[#allocation2 + $0xc8] sm:$0x1] %v7640_v38  ;;  %8669 = vmatprep.subr.bf16.mxu1 %v10935_v9  ;;  %v11006_v38 = vld [vmem:[%s11999_s3 + $0x1f8] sm:$0xff]   ;;  %v11016_v0 = vadd.f32 %v12064_v25, %v10716_v27  ;;  %v11022_v15 = vadd.f32 %v8273_v22, %v10777_v31  ;;  %v7415_v63 = vrot.slane %v5401_v6, 9  ;;  %v12070_v25 = vld [vmem:[#allocation13_spill] sm:$0xff] }
 0x142   : > { %v11010_v8 = vpop.f32.mrf.mxu0  ;;  %v11012_v54 = vpop.f32.mrf.mxu1  ;;  %8644 = vmatpush3.bf16.msra.mxu0 %v8932_v39  ;;  %v5442_v44 = vrot.slane %v12066_v4, 4  ;;  %v11027_v2 = vadd.f32 %v1704_v3, %v12067_v26  ;;  %v11030_v39 = vadd.f32 %v8274_v53, %v10821_v45  ;;  %v7403_v46 = vcombine.low %v5155_v19, %v5165_v12  ;;  %v8928_v45 = vld [vmem:[%s11999_s3 + $0x190] sm:$0xff]   ;;  %v11052_v4 = vld [vmem:[#allocation2 + $0xa8] sm:$0xe] }
 0x143   : > { %12063 = vst [vmem:[#allocation10_spill] sm:$0xff] %v11012_v54  ;;  %8645 = vmatprep.subr.bf16.mxu0 %v8935_v58  ;;  %v7437_v31 = vcombine.low %v10997_v16, %v11001_v24  ;;  %v11038_v22 = vadd.f32 %v10823_v56, %v1399_v20  ;;  %v5450_v6 = vrot.slane %v12070_v25, 5  ;;  %v5449_v3 = vrot.slane %v5447_v60, 4  ;;  %v12073_v20 = vld [vmem:[#allocation19_spill] sm:$0xff] }
 0x144   : > { %v8277_v27 = vpop.f32.mrf.mxu0  ;;  %v11032_v37 = vpop.f32.mrf.mxu1  ;;  %8670 = vmatpush3.bf16.msra.mxu1 %v10935_v9  ;;  %v7416_v26 = vrot.slane %v10992_v61, 9  ;;  %v12071_v9 = vrot.slane %v10559_v32, 5  ;;  %v7417_v19 = vrot.slane %v11018_v13, 9  ;;  %v5463_v56 = vrot.slane %v5461_v51, 4 }
 0x145   : > { %12068 = vst [vmem:[#allocation11_spill] sm:$0xff] %v11032_v37  ;;  %12069 = vst [vmem:[#allocation14_spill] sm:$0xff] %v11038_v22  ;;  %8671 = vmatprep.subr.bf16.mxu1 %v10970_v23  ;;  %v5464_v24 = vrot.slane %v12073_v20, 5  ;;  %v11055_v25 = vadd.f32 %v8277_v27, %v10859_v52  ;;  %v12075_v52 = vrot.slane %v10473_v21, 5  ;;  %v12079_v22 = vrot.slane %v10559_v32, 5 }
 0x146   : > { %v5456_v53 = vrot.slane %v12071_v9, 4  ;;  %v1720_v12 = vpop.f32.mrf.mxu0  ;;  %v11049_v16 = vpop.f32.mrf.mxu1  ;;  %8646 = vmatpush3.bf16.msra.mxu0 %v8935_v58  ;;  %v12074_v58 = vrot.slane %v12065_v1, 5 }
 0x147   : > { %12072 = vst [vmem:[#allocation8_spill] sm:$0xff] %v11049_v16  ;;  %v11058_v59 = vadd.f32 %v1720_v12, %v10863_v28  ;;  %8624 = vmatmul.mubr.bf16.gmra.mxu1 %v7402_v43  ;;  %v4995_v61 = vld [vmem:[#allocation2 + $0xc0] sm:$0xf]  ;;  %v11060_v9 = vld [vmem:[#allocation2 + $0xc4] sm:$0xf]  ;;  %8695 = vmatprep.subr.bf16.mxu0 %v11006_v38  ;;  %v11075_v28 = vsel %vm9241_vm6, %v5442_v44, %v12075_v52 }
 0x148   : > { %v11062_v13 = vld [vmem:[#allocation2 + $0xc8] sm:$0x1]  ;;  %v11069_v20 = vsel %vm9241_vm6, %v7414_v40, %v12074_v58  ;;  %v11079_v43 = vsel %vm9241_vm6, %v7415_v63, %v5447_v60  ;;  %v8278_v27 = vpop.f32.mrf.mxu0  ;;  %v11081_v12 = vpop.f32.mrf.mxu1  ;;  %8672 = vmatpush3.bf16.msra.mxu1 %v10970_v23  ;;  %8627 = vmatprep.mubr.bf16.mxu1 %v7403_v46  ;;  %v5167_v1 = vshrl.u32 %v4995_v61, 16  ;;  %v5170_v47 = vshll.u32 %v4995_v61, 16  ;;  %v5405_v58 = vld [vmem:[#allocation2 + $0xb4] sm:$0xe] }
 0x149   : > { %12076 = vst [vmem:[#allocation23_spill] sm:$0xff] %v11081_v12  ;;  %v5176_v40 = vshll.u32 %v11060_v9, 16  ;;  %v5180_v21 = vshrl.u32 %v11060_v9, 16  ;;  %8673 = vmatprep.subr.bf16.mxu1 %v8928_v45  ;;  %v5186_v44 = vshll.u32 %v11062_v13, 16  ;;  %v8930_v60 = vld [vmem:[%s11999_s3 + $0x188] sm:$0xff]   ;;  %v8933_v63 = vld [vmem:[#allocation2 + $0xc0] sm:$0xff]   ;;  %v11092_v52 = vsel %vm9241_vm6, %v5449_v3, %v5450_v6 }
 0x14a   : > { %v12077_v23 = vld [vmem:[#allocation17_spill] sm:$0xff]  ;;  %v11096_v61 = vadd.f32 %v8278_v27, %v10873_v18  ;;  %v11098_v35 = vpop.f32.mrf.mxu0  ;;  %v11100_v12 = vpop.f32.mrf.mxu1  ;;  %v5169_v7 = vrot.slane %v5167_v1, 4  ;;  %v5172_v16 = vrot.slane %v5170_v47, 5  ;;  %8596 = vmatmul.mubr.bf16.gmra.mxu0 %v8933_v63  ;;  %v11106_v6 = vsel %vm9241_vm6, %v7416_v26, %v12079_v22 }
 0x14b   : > { %v5468_v46 = vrot.slane %v12077_v23, 5  ;;  %12078 = vst [vmem:[#allocation13_spill] sm:$0xff] %v11100_v12  ;;  %v5178_v37 = vrot.slane %v5176_v40, 5  ;;  %v5182_v54 = vrot.slane %v5180_v21, 4  ;;  %v12080_v3 = vrot.slane %v10668_v48, 5  ;;  %8647 = vmatprep.mubr.bf16.mxu0 %v7437_v31 }
 0x14c   : > { %v11116_v27 = vsel %vm9241_vm6, %v7417_v19, %v5461_v51  ;;  %v7418_v47 = vrot.slane %v11052_v4, 9  ;;  %v11119_v1 = vpop.f32.mrf.mxu0  ;;  %v11121_v40 = vpop.f32.mrf.mxu1  ;;  %8674 = vmatpush3.bf16.msra.mxu1 %v8928_v45  ;;  %v5173_v32 = vor.u32 %v5172_v16, %v5169_v7  ;;  %v5188_v26 = vrot.slane %v5186_v44, 5  ;;  %v8934_v51 = vld [vmem:[%s11999_s3 + $0x180] sm:$0xff]   ;;  %v5938_v44 = vld [vmem:[#allocation2 + $0x78] sm:$0xf] }
 0x14d   : > { %v11112_v18 = vsel %vm9241_vm6, %v5456_v53, %v12080_v3  ;;  %12081 = vst [vmem:[#allocation19_spill] sm:$0xff] %v11121_v40  ;;  %v5183_v22 = vor.u32 %v5182_v54, %v5178_v37  ;;  %v11125_v48 = vsel %vm9241_vm6, %v5463_v56, %v5464_v24  ;;  %8675 = vmatprep.subr.bf16.mxu1 %v8930_v60  ;;  %v5470_v45 = vrot.slane %v5468_v46, 4  ;;  %v11134_v54 = vld [vmem:[#allocation2 + $0x78] sm:$0xe]  ;;  %v11154_v23 = vld [vmem:[#allocation2 + $0x7c] sm:$0xf] }
 0x14e   : > { %v7438_v53 = vcombine.low %v11069_v20, %v11075_v28  ;;  %v7419_v7 = vrot.slane %v5405_v58, 9  ;;  %v11136_v31 = vpop.f32.mrf.mxu0  ;;  %v11138_v16 = vpop.f32.mrf.mxu1  ;;  %v5174_v56 = vrot.slane %v5173_v32, 4  ;;  %v5475_v21 = vrot.slane %v10751_v30, 5  ;;  %v11169_v20 = vld [vmem:[%s11999_s3 + $0x238] sm:$0xff]  }
 0x14f   : > { %12082 = vst [vmem:[#allocation17_spill] sm:$0xff] %v11136_v31  ;;  %12083 = vst [vmem:[#allocation27_spill] sm:$0xff] %v11138_v16  ;;  %v5184_v24 = vrot.slane %v5183_v22, 4  ;;  %v11147_v28 = vsel %vm9241_vm6, %v7418_v47, %v5468_v46  ;;  %v11151_v58 = vadd.f32 %v11010_v8, %v10990_v36  ;;  %v5478_v63 = vrot.slane %v10833_v29, 5  ;;  %v8936_v46 = vld [vmem:[#allocation2 + $0x78] sm:$0xff]  }
 0x150   : > { %v11156_v3 = vpop.f32.mrf.mxu0  ;;  %v11158_v32 = vpop.f32.mrf.mxu1  ;;  %v5179_v30 = vsel %vm9087_vm3, %v5174_v56, %v5178_v37  ;;  %8676 = vmatpush3.bf16.msra.mxu1 %v8930_v60  ;;  %v5406_v47 = vld [vmem:[#allocation2 + $0xc0] sm:$0xe]  ;;  %v5482_v36 = vrot.slane %v11060_v9, 5  ;;  %v12086_v4 = vrot.slane %v10759_v5, 5  ;;  %v11179_v60 = vsel %vm9241_vm6, %v7419_v7, %v5475_v21  ;;  %v11181_v9 = vld [vmem:[#allocation2 + $0x88] sm:$0xf] }
 0x151   : > { %12084 = vst [vmem:[#allocation28_spill] sm:$0xff] %v11156_v3  ;;  %12085 = vst [vmem:[#allocation29_spill] sm:$0xff] %v11158_v32  ;;  %v5189_v22 = vsel %vm9087_vm3, %v5184_v24, %v5188_v26  ;;  %8677 = vmatprep.subr.bf16.mxu1 %v8934_v51  ;;  %v5963_v26 = vshrl.u32 %v5938_v44, 16  ;;  %v5941_v56 = vld [vmem:[#allocation2 + $0x84] sm:$0xf]  ;;  %v8942_v5 = vld [vmem:[%s11999_s3 + $0x1f0] sm:$0xff]  }
 0x152   : > { %v7404_v29 = vcombine.low %v5179_v30, %v5189_v22  ;;  %v11175_v37 = vsel %vm9241_vm6, %v5470_v45, %v12086_v4  ;;  %v11183_v24 = vpop.f32.mrf.mxu0  ;;  %v11185_v30 = vpop.f32.mrf.mxu1  ;;  %v5485_v22 = vrot.slane %v11062_v13, 5  ;;  %v5477_v45 = vrot.slane %v5475_v21, 4  ;;  %v12089_v7 = vld [vmem:[#allocation15_spill] sm:$0xff]  ;;  %8648 = vmatmul.mubr.bf16.vlgmr.msra.gmra.mxu0 %v7438_v53  ;;  %v11196_v32 = vld [vmem:[#allocation2 + $0x80] sm:$0x1] }
 0x153   : > { %12087 = vst [vmem:[#allocation30_spill] sm:$0xff] %v11183_v24  ;;  %12088 = vst [vmem:[#allocation31_spill] sm:$0xff] %v11185_v30  ;;  %v6397_v4 = vrot.slane %v11154_v23, 5  ;;  %v11194_v8 = vadd.f32 %v12089_v7, %v10899_v62  ;;  %v7420_v19 = vrot.slane %v5406_v47, 9  ;;  %v5966_v16 = vshll.u32 %v5938_v44, 16  ;;  %8696 = vmatpush3.bf16.msra.mxu0 %v11006_v38  ;;  %v8945_v38 = vld [vmem:[%s11999_s3 + $0x1e8] sm:$0xff]  }
 0x154   : > { %8628 = vmatmul.mubr.bf16.gmra.mxu1 %v7404_v29  ;;  %v5972_v30 = vshll.u32 %v11154_v23, 16  ;;  %v5976_v13 = vshrl.u32 %v11154_v23, 16  ;;  %v11200_v12 = vpop.f32.mrf.mxu0  ;;  %v11202_v40 = vpop.f32.mrf.mxu1  ;;  %v5484_v21 = vrot.slane %v5482_v36, 4  ;;  %v6364_v24 = vld [vmem:[#allocation2 + $0x84] sm:$0xe]  ;;  %v6404_v62 = vrot.slane %v11181_v9, 5  ;;  %8697 = vmatprep.subr.bf16.mxu0 %v8942_v5 }
 0x155   : > { %12090 = vst [vmem:[#allocation15_spill] sm:$0xff] %v11200_v12  ;;  %12091 = vst [vmem:[#allocation32_spill] sm:$0xff] %v11202_v40  ;;  %8678 = vmatpush3.bf16.msra.mxu1 %v8934_v51  ;;  %8679 = vmatprep.mubr.bf16.mxu1 %v8936_v46  ;;  %v5987_v29 = vshrl.u32 %v5941_v56, 16  ;;  %v5990_v53 = vshll.u32 %v5941_v56, 16  ;;  %v11207_v44 = vld [vmem:[#allocation2 + $0x8c] sm:$0x1]  ;;  %v12094_v46 = vcombine.low %v11079_v43, %v11092_v52 }
 0x156   : > { %8727 = vmatprep.subr.bf16.mxu1 %v11169_v20  ;;  %v5965_v47 = vrot.slane %v5963_v26, 4  ;;  %v5968_v23 = vrot.slane %v5966_v16, 5  ;;  %v11209_v7 = vrot.slane %v5972_v30, 5  ;;  %v5978_v12 = vrot.slane %v5976_v13, 4  ;;  %v11211_v40 = vpop.f32.mrf.mxu0  ;;  %v11213_v51 = vpop.f32.mrf.mxu1  ;;  %v8937_v13 = vld [vmem:[#allocation2 + $0x84] sm:$0xff]   ;;  %v8941_v26 = vld [vmem:[#allocation2 + $0x90] sm:$0xff]  }
 0x157   : > { %12092 = vst [vmem:[#allocation33_spill] sm:$0xff] %v11211_v40  ;;  %12093 = vst [vmem:[#allocation34_spill] sm:$0xff] %v11213_v51  ;;  %8651 = vmatprep.mubr.bf16.mxu0 %v12094_v46  ;;  %v11225_v16 = vsel %vm9241_vm6, %v5477_v45, %v5478_v63  ;;  %v6399_v56 = vrot.slane %v6397_v4, 4  ;;  %v6400_v30 = vrot.slane %v11196_v32, 5  ;;  %v11230_v51 = vsel %vm9241_vm6, %v7420_v19, %v5482_v36  ;;  %v8940_v19 = vld [vmem:[%s11999_s3 + $0x230] sm:$0xff]  }
 0x158   : > { %v7518_v43 = vrot.slane %v6364_v24, 9  ;;  %v5989_v52 = vrot.slane %v5987_v29, 4  ;;  %v5992_v46 = vrot.slane %v5990_v53, 5  ;;  %v11232_v40 = vpop.f32.mrf.mxu0  ;;  %v11234_v3 = vpop.f32.mrf.mxu1  ;;  %v6406_v31 = vrot.slane %v6404_v62, 4  ;;  %8698 = vmatpush3.bf16.msra.mxu0 %v8942_v5 }
 0x159   : > { %12095 = vst [vmem:[#allocation35_spill] sm:$0xff] %v11232_v40  ;;  %12096 = vst [vmem:[#allocation36_spill] sm:$0xff] %v11234_v3  ;;  %v6407_v63 = vrot.slane %v11207_v44, 5  ;;  %v5996_v45 = vshll.u32 %v11181_v9, 16  ;;  %v6000_v57 = vshrl.u32 %v11181_v9, 16  ;;  %v11244_v36 = vsel %vm9241_vm6, %v5484_v21, %v5485_v22  ;;  %8699 = vmatprep.subr.bf16.mxu0 %v8945_v38  ;;  %v8948_v9 = vld [vmem:[%s11999_s3 + $0x1e0] sm:$0xff]  }
 0x15a   : > { %v5969_v24 = vor.u32 %v5968_v23, %v5965_v47  ;;  %v5979_v29 = vor.u32 %v5978_v12, %v11209_v7  ;;  %v5982_v53 = vshll.u32 %v11196_v32, 16  ;;  %v11248_v3 = vpop.f32.mrf.mxu0  ;;  %v11250_v40 = vpop.f32.mrf.mxu1  ;;  %v12099_v5 = vrot.slane %v11134_v54, 9  ;;  %v12101_v21 = vld [vmem:[#allocation16_spill] sm:$0xff] }
 0x15b   : > { %12097 = vst [vmem:[#allocation37_spill] sm:$0xff] %v11248_v3  ;;  %12098 = vst [vmem:[#allocation38_spill] sm:$0xff] %v11250_v40  ;;  %v11263_v12 = vsel %vm9241_vm6, %v6399_v56, %v6400_v30  ;;  %v11267_v32 = vadd.f32 %v11098_v35, %v11016_v0  ;;  %v11271_v47 = vadd.f32 %v12101_v21, %v10918_v10  ;;  %v6006_v35 = vshll.u32 %v11207_v44, 16  ;;  %v11283_v0 = vld [vmem:[#allocation2 + $0x94] sm:$0xf] }
 0x15c   : > { %v11259_v22 = vsel %vm9241_vm6, %v12099_v5, %v6397_v4  ;;  %8680 = vmatmul.mubr.bf16.vlgmr.msra.gmra.mxu1 %v8937_v13  ;;  %v12103_v54 = vcombine.low %v11106_v6, %v11112_v18  ;;  %v11280_v23 = vsel %vm9241_vm6, %v7518_v43, %v6404_v62  ;;  %v5993_v56 = vor.u32 %v5992_v46, %v5989_v52  ;;  %v5944_v30 = vld [vmem:[#allocation2 + $0x90] sm:$0xf]  ;;  %v11285_v10 = vpop.f32.mrf.mxu0  ;;  %v11287_v13 = vpop.f32.mrf.mxu1  ;;  %v8944_v52 = vld [vmem:[%s11999_s3 + $0x228] sm:$0xff]  }
 0x15d   : > { %12100 = vst [vmem:[#allocation39_spill] sm:$0xff] %v11267_v32  ;;  %12102 = vst [vmem:[#allocation16_spill] sm:$0xff] %v11271_v47  ;;  %8728 = vmatpush3.bf16.msra.mxu1 %v11169_v20  ;;  %8683 = vmatprep.mubr.bf16.mxu1 %v8941_v26  ;;  %v11294_v18 = vsel %vm9241_vm6, %v6406_v31, %v6407_v63  ;;  %v11296_v62 = vrot.slane %v5996_v45, 5  ;;  %v6002_v44 = vrot.slane %v6000_v57, 4  ;;  %v11298_v43 = vld [vmem:[#allocation2 + $0x90] sm:$0xe] }
 0x15e   : > { %8652 = vmatmul.mubr.bf16.gmra.mxu0 %v12103_v54  ;;  %12104 = vst [vmem:[#allocation40_spill] sm:$0xff] %v11287_v13  ;;  %8729 = vmatprep.subr.bf16.mxu1 %v8940_v19  ;;  %v11305_v26 = vrot.slane %v5969_v24, 4  ;;  %v11307_v46 = vrot.slane %v5979_v29, 4  ;;  %v11309_v31 = vrot.slane %v5982_v53, 5  ;;  %v11311_v63 = vld [vmem:[#allocation2 + $0x98] sm:$0x1]  ;;  %v11313_v57 = vpop.f32.mrf.mxu0  ;;  %v11315_v45 = vpop.f32.mrf.mxu1  ;;  %v12106_v5 = vcombine.low %v11116_v27, %v11125_v48 }
 0x15f   : > { %8700 = vmatpush3.bf16.msra.mxu0 %v8945_v38  ;;  %12105 = vst [vmem:[#allocation41_spill] sm:$0xff] %v11315_v45  ;;  %v8951_v38 = vld [vmem:[%s11999_s3 + $0x1d8] sm:$0xff]   ;;  %v11325_v24 = vadd.f32 %v11119_v1, %v11194_v8  ;;  %v6411_v29 = vrot.slane %v11283_v0, 5  ;;  %v6011_v53 = vshrl.u32 %v5944_v30, 16  ;;  %v6014_v21 = vshll.u32 %v5944_v30, 16  ;;  %v8947_v1 = vld [vmem:[#allocation2 + $0xa8] sm:$0xff]  }
 0x160   : > { %8701 = vmatprep.subr.bf16.mxu0 %v8948_v9  ;;  %8655 = vmatprep.mubr.bf16.mxu0 %v12106_v5  ;;  %v8943_v54 = vld [vmem:[#allocation2 + $0x9c] sm:$0xff]   ;;  %v11330_v6 = vrot.slane %v5993_v56, 4  ;;  %v11332_v27 = vrot.slane %v6006_v35, 5  ;;  %v7519_v48 = vrot.slane %v11298_v43, 9  ;;  %v11335_v4 = vpop.f32.mrf.mxu0  ;;  %v6003_v8 = vor.u32 %v6002_v44, %v11296_v62  ;;  %v11341_v20 = vpop.f32.mrf.mxu1 }
 0x161   : > { %12107 = vst [vmem:[#allocation42_spill] sm:$0xff] %v11325_v24  ;;  %v5947_v5 = vld [vmem:[#allocation2 + $0x9c] sm:$0xf]  ;;  %8730 = vmatpush3.bf16.msra.mxu1 %v8940_v19  ;;  %v6414_v45 = vrot.slane %v11311_v63, 5  ;;  %v6013_v40 = vrot.slane %v6011_v53, 4  ;;  %v6016_v13 = vrot.slane %v6014_v21, 5  ;;  %v5975_v19 = vsel %vm9087_vm3, %v11305_v26, %v11209_v7 }
 0x162   : > { %v11339_v30 = vld [vmem:[#allocation2 + $0x9c] sm:$0xe]  ;;  %12108 = vst [vmem:[#allocation43_spill] sm:$0xff] %v11341_v20  ;;  %8731 = vmatprep.subr.bf16.mxu1 %v8944_v52  ;;  %v8946_v56 = vld [vmem:[%s11999_s3 + $0x220] sm:$0xff]   ;;  %v5985_v35 = vsel %vm9087_vm3, %v11307_v46, %v11309_v31  ;;  %v6020_v43 = vshll.u32 %v11283_v0, 16  ;;  %v6024_v53 = vshrl.u32 %v11283_v0, 16  ;;  %v11358_v21 = vpop.f32.mrf.mxu0  ;;  %v12109_v46 = vcombine.low %v11147_v28, %v11175_v37 }
 0x163   : > { %8702 = vmatpush3.bf16.msra.mxu0 %v8948_v9  ;;  %v11354_v44 = vld [vmem:[#allocation2 + $0xa0] sm:$0xf]  ;;  %v8954_v9 = vld [vmem:[%s11999_s3 + $0x1d0] sm:$0xff]   ;;  %v6413_v20 = vrot.slane %v6411_v29, 4  ;;  %v6017_v7 = vor.u32 %v6016_v13, %v6013_v40  ;;  %v6030_v26 = vshll.u32 %v11311_v63, 16  ;;  %v6035_v3 = vshrl.u32 %v5947_v5, 16 }
 0x164   : > { %8703 = vmatprep.subr.bf16.mxu0 %v8951_v38  ;;  %8684 = vmatmul.mubr.bf16.gmra.mxu1 %v8943_v54  ;;  %v11368_v0 = vrot.slane %v6020_v43, 5  ;;  %v6026_v24 = vrot.slane %v6024_v53, 4  ;;  %v6038_v47 = vshll.u32 %v5947_v5, 16  ;;  %v11370_v32 = vpop.f32.mrf.mxu0  ;;  %v6004_v11 = vrot.slane %v6003_v8, 4  ;;  %v8950_v28 = vld [vmem:[%s11999_s3 + $0x218] sm:$0xff]  }
 0x165   : > { %8732 = vmatpush3.bf16.msra.mxu1 %v8944_v52  ;;  %8687 = vmatprep.mubr.bf16.mxu1 %v8947_v1  ;;  %v6418_v40 = vrot.slane %v11354_v44, 5  ;;  %v6037_v13 = vrot.slane %v6035_v3, 4  ;;  %v6044_v63 = vshll.u32 %v11354_v44, 16  ;;  %v11374_v54 = vpop.f32.mrf.mxu1  ;;  %v5999_v37 = vsel %vm9087_vm3, %v11330_v6, %v11296_v62  ;;  %v5949_v52 = vld [vmem:[#allocation2 + $0xa4] sm:$0x1] }
 0x166   : > { %8656 = vmatmul.mubr.bf16.gmra.mxu0 %v12109_v46  ;;  %12110 = vst [vmem:[#allocation44_spill] sm:$0xff] %v11374_v54  ;;  %8733 = vmatprep.subr.bf16.mxu1 %v8946_v56  ;;  %v6027_v5 = vor.u32 %v6026_v24, %v11368_v0  ;;  %v6040_v1 = vrot.slane %v6038_v47, 5  ;;  %v6048_v3 = vshrl.u32 %v11354_v44, 16  ;;  %v11385_v8 = vpop.f32.mrf.mxu0  ;;  %v12112_v43 = vcombine.low %v11179_v60, %v11225_v16  ;;  %v6367_v44 = vld [vmem:[#allocation2 + $0xa8] sm:$0xe]  ;;  %v8949_v46 = vld [vmem:[#allocation2 + $0xb4] sm:$0xff]  }
 0x167   : > { %8704 = vmatpush3.bf16.msra.mxu0 %v8951_v38  ;;  %12111 = vst [vmem:[#allocation45_spill] sm:$0xff] %v11385_v8  ;;  %v8957_v38 = vld [vmem:[%s11999_s3 + $0x1c8] sm:$0xff]   ;;  %v11395_v6 = vsel %vm9241_vm6, %v7519_v48, %v6411_v29  ;;  %v11399_v47 = vsel %vm9241_vm6, %v6413_v20, %v6414_v45  ;;  %v6018_v62 = vrot.slane %v6017_v7, 4  ;;  %v6032_v24 = vrot.slane %v6030_v26, 5  ;;  %v11401_v53 = vpop.f32.mrf.mxu1  ;;  %v8953_v29 = vld [vmem:[#allocation2 + $0xc0] sm:$0xff]  }
 0x168   : > { %8705 = vmatprep.subr.bf16.mxu0 %v8954_v9  ;;  %8659 = vmatprep.mubr.bf16.mxu0 %v12112_v43  ;;  %12113 = vst [vmem:[#allocation46_spill] sm:$0xff] %v11401_v53  ;;  %v6028_v60 = vrot.slane %v6027_v5, 4  ;;  %v6041_v16 = vor.u32 %v6040_v1, %v6037_v13  ;;  %v11403_v43 = vrot.slane %v6044_v63, 5  ;;  %v6050_v31 = vrot.slane %v6048_v3, 4  ;;  %v11405_v54 = vld [vmem:[#allocation2 + $0xac] sm:$0xf]  ;;  %v11407_v8 = vpop.f32.mrf.mxu0 }
 0x169   : > { %8734 = vmatpush3.bf16.msra.mxu1 %v8946_v56  ;;  %v6009_v20 = vsel %vm9087_vm3, %v6004_v11, %v11332_v27  ;;  %v6420_v45 = vrot.slane %v6418_v40, 4  ;;  %v6421_v48 = vrot.slane %v5949_v52, 5  ;;  %v6054_v7 = vshll.u32 %v5949_v52, 16  ;;  %v11412_v26 = vpop.f32.mrf.mxu1  ;;  %v8952_v13 = vld [vmem:[%s11999_s3 + $0x210] sm:$0xff]   ;;  %v8959_v56 = vld [vmem:[%s11999_s3 + $0x1c0] sm:$0xff]  }
 0x16a   : > { %12114 = vst [vmem:[#allocation47_spill] sm:$0xff] %v11412_v26  ;;  %8735 = vmatprep.subr.bf16.mxu1 %v8950_v28  ;;  %v7501_v63 = vcombine.low %v5975_v19, %v5985_v35  ;;  %v12115_v11 = vld [vmem:[#allocation18_spill] sm:$0xff]  ;;  %v7521_v52 = vrot.slane %v6367_v44, 9  ;;  %v5950_v1 = vld [vmem:[#allocation2 + $0xa8] sm:$0xf]  ;;  %v11426_v3 = vpop.f32.mrf.mxu0  ;;  %v6033_v26 = vsel %vm9087_vm3, %v6028_v60, %v6032_v24  ;;  %v11433_v19 = vrot.slane %v6041_v16, 4 }
 0x16b   : > { %8706 = vmatpush3.bf16.msra.mxu0 %v8954_v9  ;;  %v11424_v27 = vadd.f32 %v12115_v11, %v10930_v50  ;;  %12117 = vst [vmem:[#allocation48_spill] sm:$0xff] %v11426_v3  ;;  %v6023_v9 = vsel %vm9087_vm3, %v6018_v62, %v11368_v0  ;;  %v11435_v35 = vld [vmem:[#allocation2 + $0xb0] sm:$0x1]  ;;  %v6425_v5 = vrot.slane %v11405_v54, 5  ;;  %v11438_v50 = vld [vmem:[#allocation2 + $0xb4] sm:$0xe]  ;;  %v12118_v44 = vcombine.low %v11230_v51, %v11244_v36  ;;  %v11454_v16 = vpop.f32.mrf.mxu1 }
 0x16c   : > { %8707 = vmatprep.subr.bf16.mxu0 %v8957_v38  ;;  %8688 = vmatmul.mubr.bf16.gmra.mxu1 %v8949_v46  ;;  %v11443_v11 = vcombine.low %v5999_v37, %v6009_v20  ;;  %v12119_v0 = vrot.slane %v11339_v30, 9  ;;  %v6051_v24 = vor.u32 %v6050_v31, %v11403_v43  ;;  %v11452_v60 = vpop.f32.mrf.mxu0  ;;  %12121 = vst [vmem:[#allocation50_spill] sm:$0xff] %v11454_v16  ;;  %v8956_v51 = vld [vmem:[%s11999_s3 + $0x208] sm:$0xff]   ;;  %v11463_v30 = vrot.slane %v6054_v7, 5 }
 0x16d   : > { %12116 = vst [vmem:[#allocation18_spill] sm:$0xff] %v11424_v27  ;;  %12120 = vst [vmem:[#allocation49_spill] sm:$0xff] %v11452_v60  ;;  %8736 = vmatpush3.bf16.msra.mxu1 %v8950_v28  ;;  %8691 = vmatprep.mubr.bf16.mxu1 %v8953_v29  ;;  %v11461_v36 = vsel %vm9241_vm6, %v6420_v45, %v6421_v48  ;;  %v6062_v37 = vshll.u32 %v5950_v1, 16  ;;  %v7503_v31 = vcombine.low %v6023_v9, %v6033_v26  ;;  %v11470_v29 = vld [vmem:[#allocation2 + $0xb8] sm:$0xf] }
 0x16e   : > { %8660 = vmatmul.mubr.bf16.gmra.mxu0 %v12118_v44  ;;  %v11449_v62 = vsel %vm9241_vm6, %v12119_v0, %v6418_v40  ;;  %v6059_v40 = vshrl.u32 %v5950_v1, 16  ;;  %8737 = vmatprep.subr.bf16.mxu1 %v8952_v13  ;;  %v11467_v46 = vsel %vm9241_vm6, %v7521_v52, %v6425_v5  ;;  %v6428_v28 = vrot.slane %v11435_v35, 5  ;;  %v5953_v44 = vld [vmem:[#allocation2 + $0xb4] sm:$0xf]  ;;  %v11473_v45 = vpop.f32.mrf.mxu0  ;;  %v8955_v52 = vld [vmem:[#allocation2 + $0xcc] sm:$0xff]  }
 0x16f   : > { %8708 = vmatpush3.bf16.msra.mxu0 %v8957_v38  ;;  %12122 = vst [vmem:[#allocation51_spill] sm:$0xff] %v11473_v45  ;;  %8711 = vmatprep.mubr.bf16.mxu0 %v7501_v63  ;;  %v6427_v48 = vrot.slane %v6425_v5, 4  ;;  %v6064_v26 = vrot.slane %v6062_v37, 5  ;;  %v11479_v1 = vrot.slane %v6051_v24, 4  ;;  %v6068_v9 = vshll.u32 %v11405_v54, 16  ;;  %v11486_v63 = vpop.f32.mrf.mxu1  ;;  %v8958_v5 = vld [vmem:[%s11999_s3 + $0x200] sm:$0xff]  }
 0x170   : > { %8709 = vmatprep.subr.bf16.mxu0 %v8959_v56  ;;  %v6061_v7 = vrot.slane %v6059_v40, 4  ;;  %v6072_v0 = vshrl.u32 %v11405_v54, 16  ;;  %v6078_v20 = vshll.u32 %v11435_v35, 16  ;;  %v11484_v16 = vpop.f32.mrf.mxu0  ;;  %12124 = vst [vmem:[#allocation53_spill] sm:$0xff] %v11486_v63  ;;  %v6432_v40 = vrot.slane %v11470_v29, 5 }
 0x171   : > { %12123 = vst [vmem:[#allocation52_spill] sm:$0xff] %v11484_v16  ;;  %8738 = vmatpush3.bf16.msra.mxu1 %v8952_v13  ;;  %v1987_v24 = vadd.f32 %v10825_v55, %v11022_v15  ;;  %v6083_v38 = vshrl.u32 %v5953_v44, 16  ;;  %v5955_v54 = vld [vmem:[#allocation2 + $0xbc] sm:$0x1]  ;;  %v6070_v35 = vrot.slane %v6068_v9, 5  ;;  %v6086_v45 = vshll.u32 %v5953_v44, 16  ;;  %v11501_v27 = vpop.f32.mrf.mxu1 }
 0x172   : > { %v6065_v37 = vor.u32 %v6064_v26, %v6061_v7  ;;  %8739 = vmatprep.subr.bf16.mxu1 %v8956_v51  ;;  %v6074_v53 = vrot.slane %v6072_v0, 4  ;;  %v6080_v16 = vrot.slane %v6078_v20, 5  ;;  %v11494_v63 = vpop.f32.mrf.mxu0  ;;  %v6092_v7 = vshll.u32 %v11470_v29, 16 }
 0x173   : > { %8710 = vmatpush3.bf16.msra.mxu0 %v8959_v56  ;;  %v11497_v60 = vadd.f32 %v11285_v10, %v1987_v24  ;;  %v6085_v3 = vrot.slane %v6083_v38, 4  ;;  %v6088_v55 = vrot.slane %v6086_v45, 5  ;;  %v6096_v15 = vshrl.u32 %v11470_v29, 16  ;;  %v6369_v45 = vld [vmem:[#allocation2 + $0xc0] sm:$0xe]  ;;  %v11530_v24 = vpop.f32.mrf.mxu1 }
 0x174   : > { %v6066_v13 = vrot.slane %v6065_v37, 4  ;;  %8692 = vmatmul.mubr.bf16.gmra.mxu1 %v8955_v52  ;;  %v6075_v26 = vor.u32 %v6074_v53, %v6070_v35  ;;  %v6102_v56 = vshll.u32 %v5955_v54, 16  ;;  %v11503_v9 = vpop.f32.mrf.mxu0  ;;  %v12125_v20 = vcombine.low %v11259_v22, %v11263_v12  ;;  %v5956_v37 = vld [vmem:[#allocation2 + $0xc0] sm:$0xf] }
 0x175   : > { %8740 = vmatpush3.bf16.msra.mxu1 %v8956_v51  ;;  %v11510_v10 = vsel %vm9241_vm6, %v6427_v48, %v6428_v28  ;;  %v6435_v44 = vrot.slane %v5955_v54, 5  ;;  %v6094_v38 = vrot.slane %v6092_v7, 5  ;;  %v1985_v53 = vadd.f32 %v10851_v14, %v11027_v2  ;;  %v5957_v2 = vld [vmem:[#allocation2 + $0xc4] sm:$0xf] }
 0x176   : > { %8743 = vmatprep.mubr.bf16.mxu1 %v12125_v20  ;;  %8741 = vmatprep.subr.bf16.mxu1 %v8958_v5  ;;  %v6057_v51 = vsel %vm9087_vm3, %v11479_v1, %v11463_v30  ;;  %v6076_v29 = vrot.slane %v6075_v26, 4  ;;  %v6089_v22 = vor.u32 %v6088_v55, %v6085_v3  ;;  %v6098_v12 = vrot.slane %v6096_v15, 4  ;;  %v11519_v52 = vpop.f32.mrf.mxu0 }
 0x177   : > { %8712 = vmatmul.mubr.bf16.vlgmr.msra.gmra.mxu0 %v11443_v11  ;;  %v6434_v28 = vrot.slane %v6432_v40, 4  ;;  %v6071_v48 = vsel %vm9087_vm3, %v6066_v13, %v6070_v35  ;;  %v11524_v14 = vadd.f32 %v11313_v57, %v1985_v53  ;;  %v1988_v11 = vadd.f32 %v10877_v42, %v11030_v39  ;;  %v11538_v35 = vld [vmem:[#allocation2 + $0xc8] sm:$0x1]  ;;  %v5959_v53 = vld [vmem:[#allocation2 + $0xcc] sm:$0xf] }
 0x178   : > { %8715 = vmatprep.mubr.bf16.mxu0 %v7503_v31  ;;  %v6081_v30 = vsel %vm9087_vm3, %v6076_v29, %v6080_v16  ;;  %v6090_v3 = vrot.slane %v6089_v22, 4  ;;  %v6099_v1 = vor.u32 %v6098_v12, %v6094_v38  ;;  %v6104_v0 = vrot.slane %v6102_v56, 5  ;;  %v11532_v31 = vpop.f32.mrf.mxu0  ;;  %v11584_v22 = vld [vmem:[#allocation2 + $0xd0] sm:$0xf] }
 0x179   : > { %8742 = vmatpush3.bf16.msra.mxu1 %v8958_v5  ;;  %v7544_v57 = vcombine.low %v11449_v62, %v11461_v36  ;;  %v7545_v54 = vcombine.low %v11467_v46, %v11510_v10  ;;  %v7523_v42 = vrot.slane %v6369_v45, 9  ;;  %v11541_v39 = vadd.f32 %v11335_v4, %v1988_v11 }
 0x17a   : > { %v12126_v16 = vsel %vm9087_vm3, %v11433_v19, %v11403_v43  ;;  %v12127_v5 = vrot.slane %v11438_v50, 9  ;;  %v6100_v36 = vrot.slane %v6099_v1, 4  ;;  %v6439_v7 = vrot.slane %v5957_v2, 5  ;;  %v11554_v26 = vpop.f32.mrf.mxu0 }
 0x17b   : > { %v7504_v13 = vcombine.low %v12126_v16, %v6057_v51  ;;  %v7505_v55 = vcombine.low %v6071_v48, %v6081_v30  ;;  %v1986_v4 = vadd.f32 %v10901_v41, %v11151_v58  ;;  %v6107_v15 = vshrl.u32 %v5956_v37, 16  ;;  %v11570_v41 = vpop.f32.mrf.mxu1 }
 0x17c   : > { %v11552_v62 = vsel %vm9241_vm6, %v12127_v5, %v6432_v40  ;;  %v6110_v56 = vshll.u32 %v5956_v37, 16  ;;  %v12128_v43 = vcombine.low %v11280_v23, %v11294_v18  ;;  %v11563_v19 = vsel %vm9241_vm6, %v6434_v28, %v6435_v44  ;;  %v11572_v58 = vpop.f32.mrf.mxu0 }
 0x17d   : > { %v6095_v50 = vsel %vm9087_vm3, %v6090_v3, %v6094_v38  ;;  %v6105_v40 = vsel %vm9087_vm3, %v6100_v36, %v6104_v0  ;;  %v6442_v20 = vrot.slane %v11538_v35, 5  ;;  %v12129_v23 = vcombine.low %v11395_v6, %v11399_v47  ;;  %v11591_v37 = vpop.f32.mrf.mxu1 }
 0x17e   : > { %8744 = vmatmul.mubr.bf16.vlgmr.msra.gmra.mxu1 %v12128_v43  ;;  %v11579_v18 = vsel %vm9241_vm6, %v7523_v42, %v6439_v7  ;;  %v11582_v44 = vadd.f32 %v11358_v21, %v1986_v4  ;;  %v6109_v38 = vrot.slane %v6107_v15, 4  ;;  %v6112_v51 = vrot.slane %v6110_v56, 5  ;;  %v11587_v48 = vpop.f32.mrf.mxu0  ;;  %v12130_v56 = vld [vmem:[#allocation9_spill] sm:$0xff] }
 0x17f   : > { %8747 = vmatprep.mubr.bf16.mxu1 %v12129_v23  ;;  %8716 = vmatmul.mubr.bf16.gmra.mxu0 %v7504_v13  ;;  %v6441_v29 = vrot.slane %v6439_v7, 4  ;;  %v6116_v12 = vshll.u32 %v5957_v2, 16  ;;  %v6120_v45 = vshrl.u32 %v5957_v2, 16  ;;  %v6126_v28 = vshll.u32 %v11538_v35, 16  ;;  %v5961_v2 = vld [vmem:[#allocation2 + $0xd4] sm:$0x1] }
 0x180   : > { %8719 = vmatprep.mubr.bf16.mxu0 %v7505_v55  ;;  %v7506_v6 = vcombine.low %v6095_v50, %v6105_v40  ;;  %v6113_v47 = vor.u32 %v6112_v51, %v6109_v38  ;;  %v1991_v11 = vadd.f32 %v10922_v17, %v11055_v25  ;;  %v6131_v21 = vshrl.u32 %v5959_v53, 16  ;;  %v11593_v42 = vpop.f32.mrf.mxu0  ;;  %v11609_v38 = vpop.f32.mrf.mxu1  ;;  %v12132_v51 = vld [vmem:[#allocation39_spill] sm:$0xff] }
 0x181   : > { %v6118_v30 = vrot.slane %v6116_v12, 5  ;;  %v6122_v3 = vrot.slane %v6120_v45, 4  ;;  %v6128_v1 = vrot.slane %v6126_v28, 5  ;;  %v6134_v0 = vshll.u32 %v5959_v53, 16  ;;  %v6370_v45 = vld [vmem:[#allocation2 + $0xcc] sm:$0xe] }
 0x182   : > { %v6114_v16 = vrot.slane %v6113_v47, 4  ;;  %v11596_v35 = vadd.f32 %v11370_v32, %v1991_v11  ;;  %v6133_v13 = vrot.slane %v6131_v21, 4  ;;  %v6140_v5 = vshll.u32 %v11584_v22, 16  ;;  %v11605_v50 = vpop.f32.mrf.mxu0  ;;  %v12135_v11 = vld [vmem:[#allocation17_spill] sm:$0xff]  ;;  %v12137_v21 = vld [vmem:[#allocation28_spill] sm:$0xff] }
 0x183   : > { %v6123_v36 = vor.u32 %v6122_v3, %v6118_v30  ;;  %v6136_v7 = vrot.slane %v6134_v0, 5  ;;  %v6144_v17 = vshrl.u32 %v11584_v22, 16  ;;  %v6150_v25 = vshll.u32 %v5961_v2, 16 }
 0x184   : > { %v6446_v55 = vrot.slane %v11584_v22, 5  ;;  %v6142_v4 = vrot.slane %v6140_v5, 5  ;;  %v1989_v15 = vadd.f32 %v10948_v34, %v11058_v59  ;;  %v1992_v43 = vadd.f32 %v12130_v56, %v11096_v61  ;;  %v12131_v59 = vld [vmem:[#allocation45_spill] sm:$0xff]  ;;  %v12133_v22 = vld [vmem:[#allocation26_spill] sm:$0xff] }
 0x185   : > { %v6119_v32 = vsel %vm9087_vm3, %v6114_v16, %v6118_v30  ;;  %v6124_v40 = vrot.slane %v6123_v36, 4  ;;  %v6137_v53 = vor.u32 %v6136_v7, %v6133_v13  ;;  %v6146_v23 = vrot.slane %v6144_v17, 4  ;;  %v12140_v13 = vld [vmem:[#allocation20_spill] sm:$0xff]  ;;  %v11641_v17 = vpop.f32.mrf.mxu1 }
 0x186   : > { %8748 = vmatmul.mubr.bf16.gmra.mxu1 %v7544_v57  ;;  %v6443_v34 = vsel %vm9241_vm6, %v6441_v29, %v6442_v20  ;;  %v11617_v61 = vadd.f32 %v12131_v59, %v1989_v15  ;;  %v11620_v57 = vadd.f32 %v11407_v8, %v1992_v43  ;;  %v1990_v12 = vadd.f32 %v12133_v22, %v12132_v51  ;;  %v12136_v29 = vld [vmem:[#allocation18_spill] sm:$0xff]  ;;  %v12138_v8 = vld [vmem:[#allocation48_spill] sm:$0xff]  ;;  %v11633_v16 = vpop.f32.mrf.mxu0 }
 0x187   : > { %8751 = vmatprep.mubr.bf16.mxu1 %v7545_v54  ;;  %8720 = vmatmul.mubr.bf16.gmra.mxu0 %v7506_v6  ;;  %v6129_v28 = vsel %vm9087_vm3, %v6124_v40, %v6128_v1  ;;  %v6138_v47 = vrot.slane %v6137_v53, 4  ;;  %v6147_v46 = vor.u32 %v6146_v23, %v6142_v4  ;;  %v6152_v10 = vrot.slane %v6150_v25, 5  ;;  %v12134_v54 = vld [vmem:[#allocation16_spill] sm:$0xff]  ;;  %v12139_v6 = vld [vmem:[#allocation14_spill] sm:$0xff] }
 0x188   : > { %v2403_v20 = vadd.f32 %v12135_v11, %v12134_v54  ;;  %v2406_v30 = vadd.f32 %v12137_v21, %v12136_v29  ;;  %v7507_v3 = vcombine.low %v6119_v32, %v6129_v28  ;;  %v11631_v0 = vadd.f32 %v12138_v8, %v1990_v12  ;;  %v11644_v32 = vpop.f32.mrf.mxu0  ;;  %v12141_v40 = vld [vmem:[#allocation30_spill] sm:$0xff]  ;;  %v12146_v12 = vld [vmem:[#allocation11_spill] sm:$0xff]  ;;  %v12149_v29 = vld [vmem:[#allocation49_spill] sm:$0xff] }
 0x189   : > { %v1978_v5 = vadd.f32 %v12140_v13, %v12139_v6  ;;  %v7546_v1 = vcombine.low %v11552_v62, %v11563_v19  ;;  %v6143_v36 = vsel %vm9087_vm3, %v6138_v47, %v6142_v4  ;;  %v6148_v7 = vrot.slane %v6147_v46, 4  ;;  %v12142_v62 = vld [vmem:[#allocation6_spill] sm:$0xff]  ;;  %v12143_v19 = vld [vmem:[#allocation5_spill] sm:$0xff]  ;;  %v11657_v47 = vpop.f32.mrf.mxu1  ;;  %v12148_v46 = vld [vmem:[#allocation7_spill] sm:$0xff] }
 0x18a   : > { %v7547_v25 = vcombine.low %v11579_v18, %v6443_v34  ;;  %v7524_v15 = vrot.slane %v6370_v45, 9  ;;  %v6448_v56 = vrot.slane %v6446_v55, 4  ;;  %v6449_v43 = vrot.slane %v5961_v2, 5  ;;  %8723 = vmatprep.mubr.bf16.mxu0 %v7507_v3  ;;  %v11651_v51 = vpop.f32.mrf.mxu0  ;;  %v12144_v22 = vld [vmem:[#allocation42_spill] sm:$0xff]  ;;  %v12147_v45 = vld [vmem:[#allocation8_spill] sm:$0xff]  ;;  %v12150_v3 = vld [vmem:[#allocation51_spill] sm:$0xff] }
 0x18b   : > { %v2404_v53 = vadd.f32 %v12141_v40, %v1978_v5  ;;  %v6153_v23 = vsel %vm9087_vm3, %v6148_v7, %v6152_v10  ;;  %v1415_v59 = vadd.f32 %v12143_v19, %v12142_v62  ;;  %v12145_v18 = vld [vmem:[#allocation10_spill] sm:$0xff]  ;;  %v2701_v2 = vadd.f32 %v12146_v12, %v2403_v20  ;;  %v12151_v8 = vld [vmem:[#allocation52_spill] sm:$0xff]  ;;  %v12152_v6 = vld [vmem:[#allocation23_spill] sm:$0xff] }
 0x18c   : > { %v7508_v4 = vcombine.low %v6143_v36, %v6153_v23  ;;  %v2703_v34 = vadd.f32 %v12145_v18, %v12144_v22  ;;  %v2704_v28 = vadd.f32 %v12147_v45, %v2406_v30  ;;  %v6447_v33 = vsel %vm9241_vm6, %v7524_v15, %v6446_v55  ;;  %v11664_v11 = vpop.f32.mrf.mxu0  ;;  %v12153_v5 = vld [vmem:[#allocation4_spill] sm:$0xff]  ;;  %v12157_v40 = vld [vmem:[#allocation33_spill] sm:$0xff]  ;;  %v12158_v62 = vld [vmem:[#allocation3_spill] sm:$0xff] }
 0x18d   : > { %v1740_v54 = vadd.f32 %v12148_v46, %v1415_v59  ;;  %v6450_v10 = vsel %vm9241_vm6, %v6448_v56, %v6449_v43  ;;  %v2944_v20 = vadd.f32 %v12150_v3, %v2701_v2  ;;  %v2702_v13 = vadd.f32 %v12152_v6, %v2404_v53  ;;  %v12155_v15 = vld [vmem:[#allocation12_spill] sm:$0xff]  ;;  %v12156_v56 = vld [vmem:[#allocation21_spill] sm:$0xff]  ;;  %v12162_v12 = vld [vmem:[#allocation46_spill] sm:$0xff] }
 0x18e   : > { %8752 = vmatmul.mubr.bf16.gmra.mxu1 %v7546_v1  ;;  %v2946_v21 = vadd.f32 %v12149_v29, %v2703_v34  ;;  %v2947_v30 = vadd.f32 %v12151_v8, %v2704_v28  ;;  %v12154_v1 = vld [vmem:[#allocation22_spill] sm:$0xff]  ;;  %v8457_v7 = vpop.f32.mrf.mxu0  ;;  %v1983_v43 = vadd.f32 %v12156_v56, %v12155_v15  ;;  %v12159_v19 = vld [vmem:[#allocation24_spill] sm:$0xff]  ;;  %v12163_v45 = vld [vmem:[#allocation47_spill] sm:$0xff] }
 0x18f   : > { %8755 = vmatprep.mubr.bf16.mxu1 %v7547_v25  ;;  %8724 = vmatmul.mubr.bf16.gmra.mxu0 %v7508_v4  ;;  %v1981_v36 = vadd.f32 %v12154_v1, %v12153_v5  ;;  %v7548_v25 = vcombine.low %v6447_v33, %v6450_v10  ;;  %v2945_v55 = vadd.f32 %v11494_v63, %v2702_v13  ;;  %v12160_v4 = vld [vmem:[#allocation25_spill] sm:$0xff]  ;;  %v12161_v18 = vld [vmem:[#allocation44_spill] sm:$0xff]  ;;  %v12164_v28 = vld [vmem:[#allocation15_spill] sm:$0xff] }
 0x190   : > { %v11673_v49 = vpop.f32.mrf.mxu1  ;;  %v1984_v59 = vadd.f32 %v12159_v19, %v12158_v62  ;;  %v1982_v22 = vadd.f32 %v12160_v4, %v1740_v54  ;;  %v3605_v53 = vpop.f32.mrf.mxu0  ;;  %v3372_v34 = vadd.f32 %v12161_v18, %v2946_v21  ;;  %v3370_v2 = vadd.f32 %v12162_v12, %v2944_v20  ;;  %v12165_v33 = vld [vmem:[#allocation35_spill] sm:$0xff]  ;;  %v12166_v29 = vld [vmem:[#allocation37_spill] sm:$0xff]  ;;  %v12167_v1 = vld [vmem:[#allocation50_spill] sm:$0xff] }
 0x191   : > { %v2407_v23 = vadd.f32 %v12157_v40, %v1981_v36  ;;  %v3373_v63 = vadd.f32 %v12163_v45, %v2947_v30  ;;  %v2409_v46 = vadd.f32 %v12164_v28, %v1983_v43  ;;  %v3371_v36 = vadd.f32 %v12167_v1, %v2945_v55  ;;  %v12168_v21 = vld [vmem:[#allocation19_spill] sm:$0xff]  ;;  %v12171_v55 = vld [vmem:[#allocation29_spill] sm:$0xff] }
 0x192   : > { %v2410_v10 = vadd.f32 %v12165_v33, %v1984_v59  ;;  %v2408_v3 = vadd.f32 %v12166_v29, %v1982_v22  ;;  %v8458_v8 = vpop.f32.mrf.mxu0  ;;  %v11687_v6 = vpop.f32.mrf.mxu1  ;;  %v3670_v13 = vadd.f32 %v8457_v7, %v3372_v34  ;;  %v3668_v54 = vadd.f32 %v3605_v53, %v3370_v2  ;;  %v12170_v40 = vld [vmem:[#allocation27_spill] sm:$0xff] }
 0x193   : > { %v3671_v5 = vadd.f32 %v8458_v8, %v3373_v63  ;;  %v2705_v15 = vadd.f32 %v12168_v21, %v2407_v23  ;;  %v12172_v8 = vld [vmem:[#allocation53_spill] sm:$0xff] }
 0x194   : > { %v3608_v20 = vpop.f32.mrf.mxu0  ;;  %v2708_v62 = vadd.f32 %v12170_v40, %v2410_v10  ;;  %v2706_v19 = vadd.f32 %v12171_v55, %v2408_v3  ;;  %v11702_v23 = vpop.f32.mrf.mxu1  ;;  %v3706_v59 = vmul.f32 %v3668_v54, %v3668_v54  ;;  %v3708_v2 = vmul.f32 %v3670_v13, %v3670_v13 }
 0x195   : > { %v7785_v30 = vpack.c.bf16 %v3671_v5, %v3670_v13  ;;  %v3669_v56 = vadd.f32 %v3608_v20, %v3371_v36  ;;  %v2948_v7 = vadd.f32 %v11519_v52, %v2705_v15  ;;  %v3709_v33 = vmul.f32 %v3671_v5, %v3671_v5 }
 0x196   : > { %8756 = vmatmul.mubr.bf16.gmra.mxu1 %v7548_v25  ;;  %v12169_v25 = vld [vmem:[#allocation13_spill] sm:$0xff]  ;;  %v2951_v34 = vadd.f32 %v11532_v31, %v2708_v62  ;;  %v2949_v12 = vadd.f32 %v11554_v26, %v2706_v19 }
 0x197   : > { %v2707_v43 = vadd.f32 %v12169_v25, %v2409_v46  ;;  %7880 = vst [vmem:[%s11696_s6 + $0x8] sm:$0xff] %v7785_v30   ;;  %v3684_v4 = vadd.f32 %v3669_v56, %v3668_v54  ;;  %v3707_v22 = vmul.f32 %v3669_v56, %v3669_v56  ;;  %v7780_v53 = vpack.c.bf16 %v3669_v56, %v3668_v54  ;;  %v11710_v46 = vpop.f32.mrf.mxu1 }
 0x198   : > { %v3374_v28 = vadd.f32 %v11501_v27, %v2948_v7  ;;  %v3377_v31 = vadd.f32 %v11530_v24, %v2951_v34 }
 0x199   : > { %v2950_v18 = vadd.f32 %v11503_v9, %v2707_v43  ;;  %v3685_v45 = vadd.f32 %v3684_v4, %v3670_v13  ;;  %v3722_v52 = vadd.f32 %v3707_v22, %v3706_v59  ;;  %7781 = vst [vmem:[%s11696_s6] sm:$0xff] %v7780_v53   ;;  %v3375_v13 = vadd.f32 %v11570_v41, %v2949_v12  ;;  %v11715_v20 = vpop.f32.mrf.mxu1  ;;  %v12173_v53 = vld [vmem:[#allocation32_spill] sm:$0xff]  ;;  %v12174_v12 = vld [vmem:[#allocation31_spill] sm:$0xff] }
 0x19a   : > { %v8461_v63 = vpop.f32.mrf.mxu0 }
 0x19b   : > { %v3723_v10 = vadd.f32 %v3722_v52, %v3708_v2  ;;  %v3686_v3 = vadd.f32 %v3685_v45, %v3671_v5  ;;  %v3376_v9 = vadd.f32 %v12172_v8, %v2950_v18  ;;  %v11718_v24 = vpop.f32.mrf.mxu1  ;;  %v2709_v18 = vadd.f32 %v12173_v53, %v11524_v14  ;;  %v12175_v52 = vld [vmem:[#allocation34_spill] sm:$0xff] }
 0x19c   : > { %v3621_v29 = vpop.f32.mrf.mxu0  ;;  %v2711_v2 = vadd.f32 %v12174_v12, %v11497_v60 }
 0x19d   : > { %v3672_v54 = vadd.f32 %v3621_v29, %v3374_v28  ;;  %v3724_v26 = vadd.f32 %v3723_v10, %v3709_v33  ;;  %v3674_v36 = vadd.f32 %v8461_v63, %v3376_v9  ;;  %v11721_v22 = vpop.f32.mrf.mxu1  ;;  %v2952_v45 = vadd.f32 %v11587_v48, %v2709_v18  ;;  %v12176_v28 = vld [vmem:[#allocation36_spill] sm:$0xff] }
 0x19e   : > { %v8462_v1 = vpop.f32.mrf.mxu0  ;;  %v2712_v63 = vadd.f32 %v12175_v52, %v11541_v39  ;;  %v2710_v33 = vadd.f32 %v12176_v28, %v11582_v44  ;;  %v2954_v29 = vadd.f32 %v11572_v58, %v2711_v2 }
 0x19f   : > { %v3687_v21 = vadd.f32 %v3686_v3, %v3672_v54  ;;  %v3710_v27 = vmul.f32 %v3672_v54, %v3672_v54  ;;  %v3675_v15 = vadd.f32 %v8462_v1, %v3377_v31  ;;  %v3712_v62 = vmul.f32 %v3674_v36, %v3674_v36  ;;  %v11732_v10 = vpop.f32.mrf.mxu1 }
 0x1a0   : > { %v3624_v30 = vpop.f32.mrf.mxu0  ;;  %v2955_v3 = vadd.f32 %v11593_v42, %v2712_v63  ;;  %v2953_v14 = vadd.f32 %v11605_v50, %v2710_v33  ;;  %v3378_v9 = vadd.f32 %v11609_v38, %v2952_v45  ;;  %v3380_v39 = vadd.f32 %v11591_v37, %v2954_v29 }
 0x1a1   : > { %v3725_v56 = vadd.f32 %v3724_v26, %v3710_v27  ;;  %v7795_v5 = vpack.c.bf16 %v3675_v15, %v3674_v36  ;;  %v3673_v25 = vadd.f32 %v3624_v30, %v3375_v13  ;;  %v3713_v19 = vmul.f32 %v3675_v15, %v3675_v15 }
 0x1a2   : > { %v3381_v44 = vadd.f32 %v11641_v17, %v2955_v3  ;;  %v3379_v26 = vadd.f32 %v11657_v47, %v2953_v14 }
 0x1a3   : > { %7882 = vst [vmem:[%s11696_s6 + $0x18] sm:$0xff] %v7795_v5   ;;  %v3688_v43 = vadd.f32 %v3687_v21, %v3673_v25  ;;  %v3711_v7 = vmul.f32 %v3673_v25, %v3673_v25  ;;  %v7790_v40 = vpack.c.bf16 %v3673_v25, %v3672_v54  ;;  %v12177_v25 = vld [vmem:[#allocation40_spill] sm:$0xff] }
 0x1a5   : > { %v3689_v55 = vadd.f32 %v3688_v43, %v3674_v36  ;;  %v3726_v41 = vadd.f32 %v3725_v56, %v3711_v7  ;;  %7881 = vst [vmem:[%s11696_s6 + $0x10] sm:$0xff] %v7790_v40   ;;  %v2713_v43 = vadd.f32 %v12177_v25, %v11617_v61 }
 0x1a7   : > { %v3727_v59 = vadd.f32 %v3726_v41, %v3712_v62  ;;  %v3690_v4 = vadd.f32 %v3689_v55, %v3675_v15  ;;  %v12178_v41 = vld [vmem:[#allocation38_spill] sm:$0xff] }
 0x1a8   : > { %v11738_v60 = vpop.f32.mrf.mxu1 }
 0x1a9   : > { %v3728_v34 = vadd.f32 %v3727_v59, %v3713_v19  ;;  %v2715_v19 = vadd.f32 %v12178_v41, %v11596_v35  ;;  %v2956_v59 = vadd.f32 %v11644_v32, %v2713_v43 }
 0x1aa   : > { %v11743_v13 = vpop.f32.mrf.mxu1 }
 0x1ab   : > { %v2958_v2 = vadd.f32 %v11633_v16, %v2715_v19  ;;  %v3382_v28 = vadd.f32 %v11687_v6, %v2956_v59 }
 0x1ac   : > { %v11746_v56 = vpop.f32.mrf.mxu1 }
 0x1ad   : > { %v3384_v32 = vadd.f32 %v11673_v49, %v2958_v2 }
 0x1ae   : > { %v8465_v8 = vpop.f32.mrf.mxu0  ;;  %v4206_v55 = vpop.f32.mrf.mxu1 }
 0x1af   : > { %v3678_v58 = vadd.f32 %v8465_v8, %v3380_v39 }
 0x1b0   : > { %v3637_v48 = vpop.f32.mrf.mxu0 }
 0x1b1   : > { %v3676_v54 = vadd.f32 %v3637_v48, %v3378_v9  ;;  %v3716_v17 = vmul.f32 %v3678_v58, %v3678_v58 }
 0x1b2   : > { %v8466_v31 = vpop.f32.mrf.mxu0 }
 0x1b3   : > { %v3691_v1 = vadd.f32 %v3690_v4, %v3676_v54  ;;  %v3714_v42 = vmul.f32 %v3676_v54, %v3676_v54  ;;  %v3679_v50 = vadd.f32 %v8466_v31, %v3381_v44  ;;  %v12179_v4 = vld [vmem:[#allocation41_spill] sm:$0xff] }
 0x1b4   : > { %v3640_v38 = vpop.f32.mrf.mxu0  ;;  %v2716_v53 = vadd.f32 %v12179_v4, %v11620_v57 }
 0x1b5   : > { %v3729_v36 = vadd.f32 %v3728_v34, %v3714_v42  ;;  %v7805_v21 = vpack.c.bf16 %v3679_v50, %v3678_v58  ;;  %v3677_v27 = vadd.f32 %v3640_v38, %v3379_v26  ;;  %v3717_v7 = vmul.f32 %v3679_v50, %v3679_v50  ;;  %v12180_v34 = vld [vmem:[#allocation43_spill] sm:$0xff] }
 0x1b6   : > { %v2714_v12 = vadd.f32 %v12180_v34, %v11631_v0  ;;  %v2959_v61 = vadd.f32 %v11651_v51, %v2716_v53 }
 0x1b7   : > { %7884 = vst [vmem:[%s11696_s6 + $0x28] sm:$0xff] %v7805_v21   ;;  %v3692_v15 = vadd.f32 %v3691_v1, %v3677_v27  ;;  %v3715_v37 = vmul.f32 %v3677_v27, %v3677_v27  ;;  %v7800_v30 = vpack.c.bf16 %v3677_v27, %v3676_v54 }
 0x1b8   : > { %v2957_v45 = vadd.f32 %v11664_v11, %v2714_v12  ;;  %v3385_v57 = vadd.f32 %v11702_v23, %v2959_v61 }
 0x1b9   : > { %v3693_v5 = vadd.f32 %v3692_v15, %v3678_v58  ;;  %v3730_v47 = vadd.f32 %v3729_v36, %v3715_v37  ;;  %7883 = vst [vmem:[%s11696_s6 + $0x20] sm:$0xff] %v7800_v30  }
 0x1ba   : > { %v3383_v0 = vadd.f32 %v11710_v46, %v2957_v45 }
 0x1bb   : > { %v3731_v40 = vadd.f32 %v3730_v47, %v3716_v17  ;;  %v3694_v62 = vadd.f32 %v3693_v5, %v3679_v50 }
 0x1bd   : > { %v3732_v18 = vadd.f32 %v3731_v40, %v3717_v7  ;;  %v8497_v52 = vpop.f32.mrf.mxu1 }
 0x1bf   : > { %v4219_v29 = vpop.f32.mrf.mxu1 }
 0x1c0   : > { %v8469_v63 = vpop.f32.mrf.mxu0 }
 0x1c1   : > { %v3682_v16 = vadd.f32 %v8469_v63, %v3384_v32  ;;  %v8498_v39 = vpop.f32.mrf.mxu1 }
 0x1c2   : > { %v3653_v35 = vpop.f32.mrf.mxu0 }
 0x1c3   : > { %v3680_v33 = vadd.f32 %v3653_v35, %v3382_v28  ;;  %v3720_v58 = vmul.f32 %v3682_v16, %v3682_v16  ;;  %v4222_v50 = vpop.f32.mrf.mxu1 }
 0x1c4   : > { %v8470_v3 = vpop.f32.mrf.mxu0 }
 0x1c5   : > { %v3695_v14 = vadd.f32 %v3694_v62, %v3680_v33  ;;  %v3718_v51 = vmul.f32 %v3680_v33, %v3680_v33  ;;  %v3683_v8 = vadd.f32 %v8470_v3, %v3385_v57 }
 0x1c6   : > { %v3656_v11 = vpop.f32.mrf.mxu0 }
 0x1c7   : > { %v3733_v9 = vadd.f32 %v3732_v18, %v3718_v51  ;;  %v7815_v48 = vpack.c.bf16 %v3683_v8, %v3682_v16  ;;  %v3681_v6 = vadd.f32 %v3656_v11, %v3383_v0  ;;  %v3721_v36 = vmul.f32 %v3683_v8, %v3683_v8 }
 0x1c8   : > { %v8521_v54 = vpop.f32.mrf.mxu0 }
 0x1c9   : > { %7886 = vst [vmem:[%s11696_s6 + $0x38] sm:$0xff] %v7815_v48   ;;  %v3696_v49 = vadd.f32 %v3695_v14, %v3681_v6  ;;  %v3719_v44 = vmul.f32 %v3681_v6, %v3681_v6  ;;  %v7810_v31 = vpack.c.bf16 %v3681_v6, %v3680_v33  ;;  %v4389_v23 = vadd.f32 %v8521_v54, %v11715_v20 }
 0x1ca   : > { %v4380_v26 = vpop.f32.mrf.mxu0 }
 0x1cb   : > { %v3697_v46 = vadd.f32 %v3696_v49, %v3682_v16  ;;  %v3734_v1 = vadd.f32 %v3733_v9, %v3719_v44  ;;  %7885 = vst [vmem:[%s11696_s6 + $0x30] sm:$0xff] %v7810_v31   ;;  %v4381_v42 = vadd.f32 %v4380_v26, %v11718_v24 }
 0x1cc   : > { %v8522_v38 = vpop.f32.mrf.mxu0 }
 0x1cd   : > { %v11769_v21 = vadd.f32 %v3697_v46, %v3683_v8  ;;  %v3735_v27 = vadd.f32 %v3734_v1, %v3720_v58  ;;  %v4392_v15 = vadd.f32 %v8522_v38, %v11721_v22 }
 0x1ce   : > { %v4383_v37 = vpop.f32.mrf.mxu0 }
 0x1cf   : > { %12181 = vst [vmem:[#allocation9_spill] sm:$0xff] %v11769_v21  ;;  %v11772_v30 = vadd.f32 %v3735_v27, %v3721_v36  ;;  %v4384_v20 = vadd.f32 %v4383_v37, %v11732_v10  ;;  %v8501_v17 = vpop.f32.mrf.mxu1 }
 0x1d0   : > { %v8525_v5 = vpop.f32.mrf.mxu0 }
 0x1d1   : > { %12182 = vst [vmem:[#allocation45_spill] sm:$0xff] %v11772_v30  ;;  %v4405_v47 = vadd.f32 %v8525_v5, %v11738_v60  ;;  %v4235_v25 = vpop.f32.mrf.mxu1 }
 0x1d2   : > { %v4396_v43 = vpop.f32.mrf.mxu0 }
 0x1d3   : > { %v4397_v24 = vadd.f32 %v4396_v43, %v11743_v13  ;;  %v8502_v7 = vpop.f32.mrf.mxu1 }
 0x1d4   : > { %v8526_v40 = vpop.f32.mrf.mxu0 }
 0x1d5   : > { %v4408_v62 = vadd.f32 %v8526_v40, %v11746_v56  ;;  %v4238_v41 = vpop.f32.mrf.mxu1 }
 0x1d6   : > { %v4399_v19 = vpop.f32.mrf.mxu0 }
 0x1d7   : > { %v4400_v22 = vadd.f32 %v4399_v19, %v4206_v55  ;;  %v8553_v59 = vpop.f32.mrf.mxu1 }
 0x1d8   : > { %v8529_v4 = vpop.f32.mrf.mxu0  ;;  %v11778_v18 = vadd.f32 %v8553_v59, %v4389_v23 }
 0x1d9   : > { %v4421_v53 = vadd.f32 %v8529_v4, %v8497_v52  ;;  %v4653_v10 = vpop.f32.mrf.mxu1 }
 0x1da   : > { %v4412_v34 = vpop.f32.mrf.mxu0  ;;  %v11780_v60 = vadd.f32 %v4653_v10, %v4381_v42 }
 0x1db   : > { %v4413_v12 = vadd.f32 %v4412_v34, %v4219_v29  ;;  %v8554_v2 = vpop.f32.mrf.mxu1 }
 0x1dc   : > { %v8530_v61 = vpop.f32.mrf.mxu0  ;;  %v11782_v45 = vadd.f32 %v8554_v2, %v4392_v15 }
 0x1dd   : > { %v4424_v13 = vadd.f32 %v8530_v61, %v8498_v39  ;;  %v4656_v63 = vpop.f32.mrf.mxu1 }
 0x1de   : > { %v4415_v56 = vpop.f32.mrf.mxu0  ;;  %v11784_v35 = vadd.f32 %v4656_v63, %v4384_v20 }
 0x1df   : > { %v4416_v28 = vadd.f32 %v4415_v56, %v4222_v50  ;;  %v8557_v55 = vpop.f32.mrf.mxu1 }
 0x1e0   : > { %v8533_v32 = vpop.f32.mrf.mxu0  ;;  %v11786_v33 = vadd.f32 %v8557_v55, %v4405_v47 }
 0x1e1   : > { %v4437_v52 = vadd.f32 %v8533_v32, %v8501_v17  ;;  %v4669_v57 = vpop.f32.mrf.mxu1 }
 0x1e2   : > { %v4428_v3 = vpop.f32.mrf.mxu0  ;;  %v11788_v0 = vadd.f32 %v4669_v57, %v4397_v24 }
 0x1e3   : > { %v4429_v29 = vadd.f32 %v4428_v3, %v4235_v25  ;;  %v8558_v16 = vpop.f32.mrf.mxu1 }
 0x1e4   : > { %v8534_v14 = vpop.f32.mrf.mxu0  ;;  %v11790_v8 = vadd.f32 %v8558_v16, %v4408_v62 }
 0x1e5   : > { %v4440_v51 = vadd.f32 %v8534_v14, %v8502_v7  ;;  %v4672_v11 = vpop.f32.mrf.mxu1 }
 0x1e6   : > { %v4431_v9 = vpop.f32.mrf.mxu0  ;;  %v11792_v6 = vadd.f32 %v4672_v11, %v4400_v22 }
 0x1e7   : > { %v4432_v48 = vadd.f32 %v4431_v9, %v4238_v41  ;;  %v8561_v39 = vpop.f32.mrf.mxu1 }
 0x1e8   : > { %v11794_v54 = vadd.f32 %v8561_v39, %v4421_v53 }
 0x1e9   : > { %v4685_v49 = vpop.f32.mrf.mxu1  ;;  %v11796_v44 = vpop.f32.mrf.mxu0 }
 0x1ea   : > { %v11798_v31 = vadd.f32 %v4685_v49, %v4413_v12 }
 0x1eb   : > { %v8562_v23 = vpop.f32.mrf.mxu1  ;;  %v11800_v26 = vpop.f32.mrf.mxu0 }
 0x1ec   : > { %v11802_v58 = vadd.f32 %v8562_v23, %v4424_v13 }
 0x1ed   : > { %v4688_v46 = vpop.f32.mrf.mxu1  ;;  %v11804_v1 = vpop.f32.mrf.mxu0 }
 0x1ee   : > { %v11806_v42 = vadd.f32 %v4688_v46, %v4416_v28 }
 0x1ef   : > { %v8565_v50 = vpop.f32.mrf.mxu1  ;;  %v11808_v38 = vpop.f32.mrf.mxu0 }
 0x1f0   : > { %v11810_v36 = vadd.f32 %v8565_v50, %v4437_v52 }
 0x1f1   : > { %v4701_v27 = vpop.f32.mrf.mxu1  ;;  %v11812_v15 = vpop.f32.mrf.mxu0 }
 0x1f2   : > { %v11814_v37 = vadd.f32 %v4701_v27, %v4429_v29 }
 0x1f3   : > { %v8566_v20 = vpop.f32.mrf.mxu1  ;;  %v11816_v17 = vpop.f32.mrf.mxu0 }
 0x1f4   : > { %v11818_v5 = vadd.f32 %v8566_v20, %v4440_v51 }
 0x1f5   : > { %v4704_v47 = vpop.f32.mrf.mxu1  ;;  %v11820_v25 = vpop.f32.mrf.mxu0 }
 0x1f6   : > { %v11822_v43 = vadd.f32 %v4704_v47, %v4432_v48 }
 0x1f7   : > { %v8617_v24 = vpop.f32.mrf.mxu1  ;;  %v11824_v7 = vpop.f32.mrf.mxu0 }
 0x1f8   : > { %12183 = vst [vmem:[#allocation39_spill] sm:$0xff] %v11822_v43 }
 0x1f9   : > { %v5320_v40 = vpop.f32.mrf.mxu1  ;;  %v11826_v41 = vpop.f32.mrf.mxu0 }
 0x1fb   : > { %v8618_v62 = vpop.f32.mrf.mxu1  ;;  %v11830_v59 = vpop.f32.mrf.mxu0 }
 0x1fd   : > { %v5323_v19 = vpop.f32.mrf.mxu1  ;;  %v11836_v10 = vpop.f32.mrf.mxu0 }
 0x1ff   : > { %v11828_v22 = vpop.f32.mrf.mxu1  ;;  %v11842_v2 = vpop.f32.mrf.mxu0 }
 0x201   : > { %v11832_v4 = vpop.f32.mrf.mxu1 }
 0x203   : > { %v11834_v53 = vpop.f32.mrf.mxu1 }
 0x205   : > { %v11838_v34 = vpop.f32.mrf.mxu1 }
 0x207   : > { %v11840_v12 = vpop.f32.mrf.mxu1 }
 0x209   : > { %v11844_v61 = vpop.f32.mrf.mxu1 }
 0x20a   : > { %v11848_v63 = vpop.f32.mrf.mxu0 }
 0x20b   : > { %v11846_v13 = vpop.f32.mrf.mxu1 }
 0x20c   : > { %v11850_v56 = vpop.f32.mrf.mxu0 }
 0x20d   : > { %v11852_v28 = vpop.f32.mrf.mxu1 }
 0x20e   : > { %12184 = vst [vmem:[#allocation26_spill] sm:$0xff] %v11852_v28  ;;  %v11854_v55 = vpop.f32.mrf.mxu0 }
 0x210   : > { %v11856_v32 = vpop.f32.mrf.mxu0 }
 0x211   : > { %12185 = vst [vmem:[#allocation16_spill] sm:$0xff] %v11856_v32 }
 0x212   : > { %v8649_v57 = vpop.f32.mrf.mxu0 }
 0x214   : > { %v11858_v52 = vpop.f32.mrf.mxu1  ;;  %v5617_v29 = vpop.f32.mrf.mxu0 }
 0x215   : > { %12186 = vst [vmem:[#allocation17_spill] sm:$0xff] %v11858_v52 }
 0x216   : > { %v11860_v3 = vpop.f32.mrf.mxu1  ;;  %v8650_v14 = vpop.f32.mrf.mxu0 }
 0x217   : > { %12187 = vst [vmem:[#allocation18_spill] sm:$0xff] %v11860_v3 }
 0x218   : > { %v11862_v16 = vpop.f32.mrf.mxu1  ;;  %v5620_v11 = vpop.f32.mrf.mxu0 }
 0x219   : > { %12188 = vst [vmem:[#allocation28_spill] sm:$0xff] %v11862_v16 }
 0x21a   : > { %v11864_v51 = vpop.f32.mrf.mxu1 }
 0x21b   : > { %12189 = vst [vmem:[#allocation48_spill] sm:$0xff] %v11864_v51 }
 0x21c   : > { %v8681_v9 = vpop.f32.mrf.mxu1 }
 0x21e   : > { %v11866_v48 = vpop.f32.mrf.mxu0  ;;  %v5859_v39 = vpop.f32.mrf.mxu1 }
 0x220   : > { %v5633_v49 = vpop.f32.mrf.mxu0  ;;  %v8682_v23 = vpop.f32.mrf.mxu1 }
 0x222   : > { %v8654_v46 = vpop.f32.mrf.mxu0  ;;  %v5862_v50 = vpop.f32.mrf.mxu1 }
 0x224   : > { %v11868_v27 = vpop.f32.mrf.mxu0  ;;  %v11870_v20 = vpop.f32.mrf.mxu1 }
 0x225   : > { %12190 = vst [vmem:[#allocation14_spill] sm:$0xff] %v11868_v27  ;;  %12191 = vst [vmem:[#allocation20_spill] sm:$0xff] %v11870_v20 }
 0x226   : > { %v11872_v47 = vpop.f32.mrf.mxu0  ;;  %v11874_v30 = vpop.f32.mrf.mxu1 }
 0x227   : > { %12192 = vst [vmem:[#allocation30_spill] sm:$0xff] %v11872_v47  ;;  %v4958_v47 = vadd.f32 %v11800_v26, %v11780_v60 }
 0x228   : > { %v11876_v21 = vpop.f32.mrf.mxu0  ;;  %v11878_v51 = vpop.f32.mrf.mxu1 }
 0x229   : > { %12193 = vst [vmem:[#allocation6_spill] sm:$0xff] %v11876_v21  ;;  %12194 = vst [vmem:[#allocation5_spill] sm:$0xff] %v11878_v51 }
 0x22a   : > { %v11880_v16 = vpop.f32.mrf.mxu0  ;;  %v11882_v3 = vpop.f32.mrf.mxu1 }
 0x22b   : > { %12195 = vst [vmem:[#allocation42_spill] sm:$0xff] %v11880_v16  ;;  %12196 = vst [vmem:[#allocation10_spill] sm:$0xff] %v11882_v3  ;;  %v4960_v3 = vadd.f32 %v11796_v44, %v11778_v18  ;;  %v4962_v18 = vadd.f32 %v11816_v17, %v11788_v0 }
 0x22c   : > { %v11884_v52 = vpop.f32.mrf.mxu0  ;;  %v11886_v32 = vpop.f32.mrf.mxu1 }
 0x22d   : > { %12197 = vst [vmem:[#allocation11_spill] sm:$0xff] %v11884_v52  ;;  %12198 = vst [vmem:[#allocation8_spill] sm:$0xff] %v11886_v32  ;;  %v4961_v52 = vadd.f32 %v11804_v1, %v11782_v45  ;;  %v5385_v60 = vadd.f32 %v8617_v24, %v4960_v3 }
 0x22e   : > { %v11888_v43 = vpop.f32.mrf.mxu0  ;;  %v11890_v28 = vpop.f32.mrf.mxu1 }
 0x22f   : > { %12199 = vst [vmem:[#allocation7_spill] sm:$0xff] %v11888_v43  ;;  %12200 = vst [vmem:[#allocation49_spill] sm:$0xff] %v11890_v28  ;;  %v5383_v28 = vadd.f32 %v5320_v40, %v4958_v47  ;;  %v5386_v26 = vadd.f32 %v8618_v62, %v4961_v52  ;;  %v5682_v45 = vadd.f32 %v8649_v57, %v5385_v60 }
 0x230   : > { %v11892_v20 = vpop.f32.mrf.mxu0  ;;  %v11896_v21 = vpop.f32.mrf.mxu1  ;;  %v4963_v62 = vadd.f32 %v11824_v7, %v11792_v6  ;;  %v4969_v52 = vadd.f32 %v11836_v10, %v11802_v58 }
 0x231   : > { %12201 = vst [vmem:[#allocation51_spill] sm:$0xff] %v11892_v20  ;;  %12202 = vst [vmem:[#allocation52_spill] sm:$0xff] %v11896_v21  ;;  %v4959_v20 = vadd.f32 %v11808_v38, %v11784_v35  ;;  %v5680_v21 = vadd.f32 %v5617_v29, %v5383_v28  ;;  %v5683_v44 = vadd.f32 %v8650_v14, %v5386_v26 }
 0x232   : > { %v11898_v51 = vpop.f32.mrf.mxu0  ;;  %v11904_v32 = vpop.f32.mrf.mxu1  ;;  %v4965_v35 = vadd.f32 %v11820_v25, %v11790_v8  ;;  %v4968_v28 = vadd.f32 %v11826_v41, %v11794_v54  ;;  %v5924_v8 = vadd.f32 %v8681_v9, %v5682_v45  ;;  %v5388_v58 = vadd.f32 %v11838_v34, %v4963_v62  ;;  %v12209_v45 = vld [vmem:[#allocation39_spill] sm:$0xff] }
 0x233   : > { %12203 = vst [vmem:[#allocation23_spill] sm:$0xff] %v11898_v51  ;;  %v5384_v1 = vadd.f32 %v5323_v19, %v4959_v20  ;;  %v5922_v17 = vadd.f32 %v5859_v39, %v5680_v21  ;;  %v5925_v25 = vadd.f32 %v8682_v23, %v5683_v44  ;;  %v5394_v39 = vadd.f32 %v11846_v13, %v4969_v52  ;;  %v12207_v13 = vld [vmem:[#allocation20_spill] sm:$0xff]  ;;  %v12214_v52 = vld [vmem:[#allocation42_spill] sm:$0xff] }
 0x234   : > { %v11906_v43 = vpop.f32.mrf.mxu0  ;;  %v11910_v16 = vpop.f32.mrf.mxu1  ;;  %v5390_v6 = vadd.f32 %v11834_v53, %v4965_v35  ;;  %v4972_v53 = vadd.f32 %v11848_v63, %v11810_v36  ;;  %v12206_v63 = vld [vmem:[#allocation26_spill] sm:$0xff]  ;;  %v12210_v44 = vld [vmem:[#allocation16_spill] sm:$0xff] }
 0x235   : > { %12204 = vst [vmem:[#allocation4_spill] sm:$0xff] %v11906_v43  ;;  %v4964_v43 = vadd.f32 %v11812_v15, %v11786_v33  ;;  %v5681_v40 = vadd.f32 %v5620_v11, %v5384_v1  ;;  %v4966_v33 = vadd.f32 %v11830_v59, %v11798_v31  ;;  %v5387_v15 = vadd.f32 %v11832_v4, %v4962_v18  ;;  %v12211_v1 = vld [vmem:[#allocation17_spill] sm:$0xff] }
 0x236   : > { %v11912_v51 = vpop.f32.mrf.mxu1  ;;  %v4967_v31 = vadd.f32 %v11842_v2, %v11806_v42  ;;  %v5687_v9 = vadd.f32 %v8654_v46, %v5390_v6  ;;  %v4970_v2 = vadd.f32 %v11850_v56, %v11814_v37  ;;  %v12208_v37 = vld [vmem:[#allocation5_spill] sm:$0xff]  ;;  %v5397_v35 = vadd.f32 %v12211_v1, %v4972_v53 }
 0x237   : > { %v8713_v27 = vpop.f32.mrf.mxu0  ;;  %v5389_v57 = vadd.f32 %v11828_v22, %v4964_v43  ;;  %v5684_v3 = vadd.f32 %v5633_v49, %v5387_v15  ;;  %v5923_v14 = vadd.f32 %v5862_v50, %v5681_v40  ;;  %v5393_v43 = vadd.f32 %v11840_v12, %v4968_v28  ;;  %v12205_v50 = vld [vmem:[#allocation14_spill] sm:$0xff] }
 0x238   : > { %v11920_v38 = vpop.f32.mrf.mxu1  ;;  %v6349_v21 = vadd.f32 %v8713_v27, %v5924_v8  ;;  %v5391_v10 = vadd.f32 %v11844_v61, %v4966_v33  ;;  %v4973_v12 = vadd.f32 %v11854_v55, %v11818_v5  ;;  %v5685_v36 = vadd.f32 %v12205_v50, %v5388_v58  ;;  %v12212_v33 = vld [vmem:[#allocation30_spill] sm:$0xff]  ;;  %v12219_v50 = vld [vmem:[#allocation8_spill] sm:$0xff] }
 0x239   : > { %v6284_v24 = vpop.f32.mrf.mxu0  ;;  %v5686_v59 = vadd.f32 %v11866_v48, %v5389_v57  ;;  %v5926_v34 = vadd.f32 %v11874_v30, %v5684_v3  ;;  %v5392_v61 = vadd.f32 %v12206_v63, %v4967_v31  ;;  %v5929_v56 = vadd.f32 %v12208_v37, %v5687_v9  ;;  %v12213_v8 = vld [vmem:[#allocation6_spill] sm:$0xff]  ;;  %v12216_v31 = vld [vmem:[#allocation11_spill] sm:$0xff]  ;;  %v12223_v37 = vld [vmem:[#allocation48_spill] sm:$0xff] }
 0x23a   : > { %v11926_v0 = vpop.f32.mrf.mxu1  ;;  %v6347_v54 = vadd.f32 %v6284_v24, %v5922_v17  ;;  %v4971_v30 = vadd.f32 %v12210_v44, %v12209_v45  ;;  %v5690_v15 = vadd.f32 %v12212_v33, %v5393_v43  ;;  %v5691_v57 = vadd.f32 %v12214_v52, %v5394_v39 }
 0x23b   : > { %v8714_v19 = vpop.f32.mrf.mxu0  ;;  %v5928_v20 = vadd.f32 %v12207_v13, %v5686_v59  ;;  %v5689_v59 = vadd.f32 %v12216_v31, %v5392_v61 }
 0x23c   : > { %v6350_v29 = vadd.f32 %v8714_v19, %v5925_v25  ;;  %v5688_v25 = vadd.f32 %v12213_v8, %v5391_v10  ;;  %v12226_v8 = vld [vmem:[#allocation4_spill] sm:$0xff] }
 0x23d   : > { %v6287_v41 = vpop.f32.mrf.mxu0 }
 0x23e   : > { %v8745_v7 = vpop.f32.mrf.mxu1  ;;  %v6348_v22 = vadd.f32 %v6287_v41, %v5923_v14 }
 0x23f   : > { %v8717_v11 = vpop.f32.mrf.mxu0  ;;  %v6646_v48 = vadd.f32 %v8745_v7, %v6349_v21  ;;  %v12215_v7 = vld [vmem:[#allocation10_spill] sm:$0xff] }
 0x240   : > { %v6581_v4 = vpop.f32.mrf.mxu1  ;;  %v6353_v24 = vadd.f32 %v8717_v11, %v5928_v20 }
 0x241   : > { %v6644_v23 = vadd.f32 %v6581_v4, %v6347_v54  ;;  %v6300_v42 = vpop.f32.mrf.mxu0  ;;  %v5927_v54 = vadd.f32 %v12215_v7, %v5685_v36  ;;  %v6684_v3 = vmul.f32 %v6646_v48, %v6646_v48  ;;  %v12217_v4 = vld [vmem:[#allocation18_spill] sm:$0xff]  ;;  %v12220_v36 = vld [vmem:[#allocation49_spill] sm:$0xff] }
 0x242   : > { %v8746_v49 = vpop.f32.mrf.mxu1  ;;  %v6351_v18 = vadd.f32 %v6300_v42, %v5926_v34  ;;  %v5395_v11 = vadd.f32 %v12217_v4, %v4970_v2  ;;  %v5930_v63 = vadd.f32 %v12220_v36, %v5688_v25 }
 0x243   : > { %v6647_v46 = vadd.f32 %v8746_v49, %v6350_v29  ;;  %v8718_v47 = vpop.f32.mrf.mxu0  ;;  %v6682_v5 = vmul.f32 %v6644_v23, %v6644_v23 }
 0x244   : > { %v6584_v27 = vpop.f32.mrf.mxu1  ;;  %v6354_v19 = vadd.f32 %v8718_v47, %v5929_v56 }
 0x245   : > { %v7825_v60 = vpack.c.bf16 %v6647_v46, %v6646_v48  ;;  %v6645_v26 = vadd.f32 %v6584_v27, %v6348_v22  ;;  %v6303_v40 = vpop.f32.mrf.mxu0  ;;  %v6685_v9 = vmul.f32 %v6647_v46, %v6647_v46  ;;  %v12221_v27 = vld [vmem:[#allocation52_spill] sm:$0xff] }
 0x246   : > { %v8749_v55 = vpop.f32.mrf.mxu1  ;;  %v6352_v43 = vadd.f32 %v6303_v40, %v5927_v54  ;;  %v5933_v61 = vadd.f32 %v12221_v27, %v5691_v57  ;;  %v12224_v40 = vld [vmem:[#allocation51_spill] sm:$0xff] }
 0x247   : > { %7888 = vst [vmem:[%s11696_s6 + $0x48] sm:$0xff] %v7825_v60   ;;  %v6660_v62 = vadd.f32 %v6645_v26, %v6644_v23  ;;  %v6683_v28 = vmul.f32 %v6645_v26, %v6645_v26  ;;  %v7820_v17 = vpack.c.bf16 %v6645_v26, %v6644_v23  ;;  %v8721_v41 = vpop.f32.mrf.mxu0  ;;  %v6650_v10 = vadd.f32 %v8749_v55, %v6353_v24  ;;  %v12218_v23 = vld [vmem:[#allocation28_spill] sm:$0xff]  ;;  %v12222_v26 = vld [vmem:[#allocation7_spill] sm:$0xff] }
 0x248   : > { %v6597_v6 = vpop.f32.mrf.mxu1  ;;  %v5398_v42 = vadd.f32 %v12218_v23, %v4973_v12  ;;  %v5931_v24 = vadd.f32 %v11904_v32, %v5689_v59 }
 0x249   : > { %v6661_v21 = vadd.f32 %v6660_v62, %v6646_v48  ;;  %v6698_v29 = vadd.f32 %v6683_v28, %v6682_v5  ;;  %7887 = vst [vmem:[%s11696_s6 + $0x40] sm:$0xff] %v7820_v17   ;;  %v6648_v14 = vadd.f32 %v6597_v6, %v6351_v18  ;;  %v6316_v22 = vpop.f32.mrf.mxu0  ;;  %v5932_v48 = vadd.f32 %v12219_v50, %v5690_v15  ;;  %v12225_v15 = vld [vmem:[#allocation23_spill] sm:$0xff] }
 0x24a   : > { %v8750_v58 = vpop.f32.mrf.mxu1  ;;  %v5694_v18 = vadd.f32 %v12222_v26, %v5397_v35  ;;  %v6355_v12 = vadd.f32 %v6316_v22, %v5930_v63  ;;  %v5692_v62 = vadd.f32 %v12224_v40, %v5395_v11  ;;  %v6688_v57 = vmul.f32 %v6650_v10, %v6650_v10  ;;  %v12227_v26 = vld [vmem:[#allocation9_spill] sm:$0xff] }
 0x24b   : > { %v6699_v53 = vadd.f32 %v6698_v29, %v6684_v3  ;;  %v6662_v39 = vadd.f32 %v6661_v21, %v6647_v46  ;;  %v6651_v49 = vadd.f32 %v8750_v58, %v6354_v19  ;;  %v8722_v13 = vpop.f32.mrf.mxu0  ;;  %v6686_v20 = vmul.f32 %v6648_v14, %v6648_v14 }
 0x24c   : > { %v6600_v34 = vpop.f32.mrf.mxu1  ;;  %v5396_v46 = vadd.f32 %v12223_v37, %v4971_v30  ;;  %v6357_v5 = vadd.f32 %v8721_v41, %v5932_v48  ;;  %v6358_v55 = vadd.f32 %v8722_v13, %v5933_v61  ;;  %v5695_v30 = vadd.f32 %v12225_v15, %v5398_v42 }
 0x24d   : > { %v6663_v2 = vadd.f32 %v6662_v39, %v6648_v14  ;;  %v6700_v47 = vadd.f32 %v6699_v53, %v6685_v9  ;;  %v7835_v60 = vpack.c.bf16 %v6651_v49, %v6650_v10  ;;  %v6649_v45 = vadd.f32 %v6600_v34, %v6352_v43  ;;  %v6319_v44 = vpop.f32.mrf.mxu0 }
 0x24e   : > { %v8753_v56 = vpop.f32.mrf.mxu1  ;;  %v5693_v25 = vadd.f32 %v12226_v8, %v5396_v46  ;;  %v6356_v52 = vadd.f32 %v6319_v44, %v5931_v24  ;;  %v5936_v29 = vadd.f32 %v11910_v16, %v5694_v18  ;;  %v6689_v31 = vmul.f32 %v6651_v49, %v6651_v49 }
 0x24f   : > { %v6701_v1 = vadd.f32 %v6700_v47, %v6686_v20  ;;  %7890 = vst [vmem:[%s11696_s6 + $0x58] sm:$0xff] %v7835_v60   ;;  %v6664_v28 = vadd.f32 %v6663_v2, %v6649_v45  ;;  %v6687_v17 = vmul.f32 %v6649_v45, %v6649_v45  ;;  %v7830_v19 = vpack.c.bf16 %v6649_v45, %v6648_v14  ;;  %v8725_v35 = vpop.f32.mrf.mxu0 }
 0x250   : > { %v6613_v33 = vpop.f32.mrf.mxu1  ;;  %v6654_v32 = vadd.f32 %v8753_v56, %v6357_v5  ;;  %v5934_v11 = vadd.f32 %v11912_v51, %v5692_v62  ;;  %v5937_v22 = vadd.f32 %v11920_v38, %v5695_v30  ;;  %v5935_v53 = vadd.f32 %v11926_v0, %v5693_v25 }
 0x251   : > { %v6665_v6 = vadd.f32 %v6664_v28, %v6650_v10  ;;  %v6702_v7 = vadd.f32 %v6701_v1, %v6687_v17  ;;  %7889 = vst [vmem:[%s11696_s6 + $0x50] sm:$0xff] %v7830_v19   ;;  %v6652_v41 = vadd.f32 %v6613_v33, %v6355_v12  ;;  %v6332_v3 = vpop.f32.mrf.mxu0  ;;  %v6361_v48 = vadd.f32 %v8725_v35, %v5936_v29  ;;  %v12228_v1 = vld [vmem:[#allocation45_spill] sm:$0xff] }
 0x252   : > { %v8754_v54 = vpop.f32.mrf.mxu1  ;;  %v6359_v16 = vadd.f32 %v6332_v3, %v5934_v11  ;;  %v6692_v38 = vmul.f32 %v6654_v32, %v6654_v32  ;;  %v3699_v18 = vrot.slane %v12227_v26, 4  ;;  %v3737_v5 = vrot.slane %v12228_v1, 4 }
 0x253   : > { %v6655_v21 = vadd.f32 %v8754_v54, %v6358_v55  ;;  %v6703_v14 = vadd.f32 %v6702_v7, %v6688_v57  ;;  %v6666_v59 = vadd.f32 %v6665_v6, %v6651_v49  ;;  %v8726_v9 = vpop.f32.mrf.mxu0  ;;  %v6690_v39 = vmul.f32 %v6652_v41, %v6652_v41 }
 0x254   : > { %v6616_v4 = vpop.f32.mrf.mxu1  ;;  %v6362_v36 = vadd.f32 %v8726_v9, %v5937_v22  ;;  %v3700_v17 = vadd.f32 %v3699_v18, %v12227_v26  ;;  %v3738_v35 = vadd.f32 %v3737_v5, %v12228_v1 }
 0x255   : > { %v7845_v58 = vpack.c.bf16 %v6655_v21, %v6654_v32  ;;  %v6653_v43 = vadd.f32 %v6616_v4, %v6356_v52  ;;  %v6667_v10 = vadd.f32 %v6666_v59, %v6652_v41  ;;  %v6704_v23 = vadd.f32 %v6703_v14, %v6689_v31  ;;  %v6335_v34 = vpop.f32.mrf.mxu0 }
 0x256   : > { %v8757_v42 = vpop.f32.mrf.mxu1  ;;  %v6360_v61 = vadd.f32 %v6335_v34, %v5935_v53  ;;  %v6693_v37 = vmul.f32 %v6655_v21, %v6655_v21  ;;  %v3701_v25 = vrot.slane %v3700_v17, 2  ;;  %v3739_v7 = vrot.slane %v3738_v35, 2 }
 0x257   : > { %7892 = vst [vmem:[%s11696_s6 + $0x68] sm:$0xff] %v7845_v58   ;;  %v6691_v50 = vmul.f32 %v6653_v43, %v6653_v43  ;;  %v7840_v49 = vpack.c.bf16 %v6653_v43, %v6652_v41  ;;  %v6705_v51 = vadd.f32 %v6704_v23, %v6690_v39  ;;  %v6668_v63 = vadd.f32 %v6667_v10, %v6653_v43 }
 0x258   : > { %v6629_v27 = vpop.f32.mrf.mxu1  ;;  %v6658_v47 = vadd.f32 %v8757_v42, %v6361_v48  ;;  %v3702_v3 = vadd.f32 %v3701_v25, %v3700_v17  ;;  %v3740_v29 = vadd.f32 %v3739_v7, %v3738_v35 }
 0x259   : > { %7891 = vst [vmem:[%s11696_s6 + $0x60] sm:$0xff] %v7840_v49   ;;  %v6669_v13 = vadd.f32 %v6668_v63, %v6654_v32  ;;  %v6706_v2 = vadd.f32 %v6705_v51, %v6691_v50  ;;  %v6656_v20 = vadd.f32 %v6629_v27, %v6359_v16 }
 0x25a   : > { %v8758_v0 = vpop.f32.mrf.mxu1  ;;  %v6696_v15 = vmul.f32 %v6658_v47, %v6658_v47  ;;  %v3703_v59 = vrot.slane %v3702_v3, 1  ;;  %v3741_v9 = vrot.slane %v3740_v29, 1 }
 0x25b   : > { %v6659_v60 = vadd.f32 %v8758_v0, %v6362_v36  ;;  %v6707_v46 = vadd.f32 %v6706_v2, %v6692_v38  ;;  %v6670_v56 = vadd.f32 %v6669_v13, %v6655_v21  ;;  %v6694_v24 = vmul.f32 %v6656_v20, %v6656_v20 }
 0x25c   : > { %v6632_v45 = vpop.f32.mrf.mxu1  ;;  %v3704_v22 = vadd.f32 %v3703_v59, %v3702_v3  ;;  %v3742_v39 = vadd.f32 %v3741_v9, %v3740_v29 }
 0x25d   : > { %v7855_v12 = vpack.c.bf16 %v6659_v60, %v6658_v47  ;;  %v6657_v44 = vadd.f32 %v6632_v45, %v6360_v61  ;;  %v6671_v55 = vadd.f32 %v6670_v56, %v6656_v20  ;;  %v6708_v40 = vadd.f32 %v6707_v46, %v6693_v37 }
 0x25e   : > { %v6697_v52 = vmul.f32 %v6659_v60, %v6659_v60 }
 0x25f   : > { %7894 = vst [vmem:[%s11696_s6 + $0x78] sm:$0xff] %v7855_v12   ;;  %v6695_v62 = vmul.f32 %v6657_v44, %v6657_v44  ;;  %v7850_v28 = vpack.c.bf16 %v6657_v44, %v6656_v20  ;;  %v6709_v19 = vadd.f32 %v6708_v40, %v6694_v24  ;;  %v6672_v33 = vadd.f32 %v6671_v55, %v6657_v44 }
 0x261   : > { %7893 = vst [vmem:[%s11696_s6 + $0x70] sm:$0xff] %v7850_v28   ;;  %v6673_v30 = vadd.f32 %v6672_v33, %v6658_v47  ;;  %v6710_v8 = vadd.f32 %v6709_v19, %v6695_v62 }
 0x263   : > { %v6674_v57 = vadd.f32 %v6673_v30, %v6659_v60  ;;  %v6711_v6 = vadd.f32 %v6710_v8, %v6696_v15 }
 0x265   : > { %v6675_v54 = vrot.slane %v6674_v57, 4  ;;  %v6712_v41 = vadd.f32 %v6711_v6, %v6697_v52 }
 0x267   : > { %v6676_v32 = vadd.f32 %v6675_v54, %v6674_v57  ;;  %v6713_v21 = vrot.slane %v6712_v41, 4 }
 0x269   : > { %v6677_v31 = vrot.slane %v6676_v32, 2  ;;  %v6714_v14 = vadd.f32 %v6713_v21, %v6712_v41 }
 0x26b   : > { %v6678_v4 = vadd.f32 %v6677_v31, %v6676_v32  ;;  %v6715_v11 = vrot.slane %v6714_v14, 2 }
 0x26d   : > { %v6679_v58 = vrot.slane %v6678_v4, 1  ;;  %v6716_v43 = vadd.f32 %v6715_v11, %v6714_v14 }
 0x26f   : > { %v6680_v53 = vadd.f32 %v6679_v58, %v6678_v4  ;;  %v6717_v10 = vrot.slane %v6716_v43, 1 }
 0x271   : > { %v6681_v23 = vadd.f32 %v6680_v53, %v3704_v22  ;;  %v6718_v42 = vadd.f32 %v6717_v10, %v6716_v43 }
 0x273   : > { %v6719_v16 = vadd.f32 %v6718_v42, %v3742_v39 }
 0x275   : > { %v6801_v34 = vsel %vm450_vm0, %v6681_v23, %v6719_v16 }
 0x276   : > { %6802 = vst [vmem:[%s235_s9] sm:$0x3] %v6801_v34 }
 0x277 PF: > { %s16_s18 = sadd.s32 1, %s8973_s18  }
 0x278   : > { %p13_p4 = scmp.ge.s32.totalorder %s16_s18, 4  }
 0x27a   :  { %15 = sbr.rel (!%p13_p4) target bundleno = 1 (0x1), region = 93 }

// kernel: residual_block_forward.3
= control target key start
LH: loop header
LB: loop body
LE: loop exit
PB: predicated region body
PF: predicated region fallthrough
CT: control target
= control target key end

     0   :  { %s9845_s21 = smov 0   ;;  %s12633_s0 = inlined_call_operand.vmem [shape: bf16[2,18,18,128], index: 0, kind: input, shape index: {}]   ;;  %s12634_s1 = inlined_call_operand.vmem [shape: bf16[3,3,128,128], index: 1, kind: input, shape index: {}]   ;;  %s12635_s2 = inlined_call_operand.vmem [shape: bf16[128,128], index: 2, kind: input, shape index: {}]   ;;  %s12636_s3 = inlined_call_operand.vmem [shape: bf16[2,16,16,128], index: 3, kind: output, shape index: {0}]   ;;  %s12637_s4 = inlined_call_operand.vmem [shape: bf16[2,16,16,128], index: 4, kind: output, shape index: {1}]   ;;  %s12638_s5 = inlined_call_operand.vmem [shape: f32[2,2,128], index: 5, kind: output, shape index: {2}]   ;;  %s12639_s6 = inlined_call_operand.vmem [shape: f32[2,2,128], index: 6, kind: output, shape index: {3}]  }
   0x1 LB: > { %s7396_s22 = sadd.s32 4294967295, %s9808_s21   ;;  %p7400_p0 = scmp.ge.s32.totalorder %s9808_s21, 1  ;;  %s9808_s21 = sphi %s9845_s21, %s17_s21  }
   0x2   : > { %p219_p1 = scmp.lt.s32.totalorder %s9808_s21, 3 }
   0x4   : > { %p220_p2 = pnand %p7400_p0, %p219_p1 }
   0x6   : > { %223 = sbr.rel (%p220_p2) target bundleno = 668 (0x29c), region = 32 }
   0xb   : > { %v9579_v0 = vld [vmem:[%s12634_s1 + $0x78] sm:$0xff]   ;;  %p262_p3 = scmp.lt.s32.totalorder %s7396_s22, 1  ;;  %v9581_v2 = vld [vmem:[%s12634_s1 + $0x70] sm:$0xff]   ;;  %v9583_v4 = vld [vmem:[%s12634_s1 + $0x68] sm:$0xff]   ;;  %vm932_vm0 = vcmask 1042432   ;;  %vm933_vm1 = vcmask 1046532  }
   0xc   : > { %v9580_v1 = vld [vmem:[%s12634_s1 + $0xb8] sm:$0xff]   ;;  %8946 = vmatprep.subr.bf16.mxu1 %v9579_v0  ;;  %v9582_v3 = vld [vmem:[%s12634_s1 + $0xb0] sm:$0xff]   ;;  %v9584_v5 = vld [vmem:[%s12634_s1 + $0xa8] sm:$0xff]   ;;  %vm326_vm2 = vsmask.f32 3328  ;;  %v12642_v22 = vmov 0 }
   0xd   : > { %9010 = vmatprep.subr.bf16.mxu0 %v9580_v1  ;;  %8947 = vmatpush3.bf16.msra.mxu1 %v9579_v0  ;;  %s12874_s22 = smov (!%p262_p3, %s7396_s22), 1  ;;  %v9585_v6 = vld [vmem:[%s12634_s1 + $0x60] sm:$0xff]   ;;  %v9587_v8 = vld [vmem:[%s12634_s1 + $0x58] sm:$0xff]   ;;  %v9589_v10 = vld [vmem:[%s12634_s1 + $0x50] sm:$0xff]   ;;  %vm327_vm3 = vsmask.f32 7440 }
   0xe   : > { %9011 = vmatpush3.bf16.msra.mxu0 %v9580_v1  ;;  %8948 = vmatprep.subr.bf16.mxu1 %v9581_v2  ;;  %v9586_v7 = vld [vmem:[%s12634_s1 + $0xa0] sm:$0xff]   ;;  %s9570_s15 = smul.u32 216, %s12874_s22  ;;  %v9588_v9 = vld [vmem:[%s12634_s1 + $0x98] sm:$0xff]   ;;  %v9590_v11 = vld [vmem:[%s12634_s1 + $0x90] sm:$0xff]   ;;  %s7406_s18 = sshll.u32 %s12874_s22, 1  ;;  %vm6252_vm6 = vcmask 1040384  }
   0xf   : > { %9012 = vmatprep.subr.bf16.mxu0 %v9582_v3  ;;  %v9591_v17 = vld [vmem:[%s12634_s1 + $0x48] sm:$0xff]   ;;  %vm9914_vm4 = vmor %vm932_vm0, %vm933_vm1  ;;  %v9593_v40 = vld [vmem:[%s12634_s1 + $0x40] sm:$0xff]   ;;  %s280_s23 = scalar_lea.vmem %s12638_s5, %s7406_s18  ;;  %s284_s27 = scalar_lea.vmem %s12639_s6, %s7406_s18 }
  0x10   : > { %s9889_s24 = scalar_lea.vmem %s12633_s0, %s9570_s15  ;;  %v12643_v22 = vsel %vm9914_vm4, 4294967295, %v12642_v22  ;;  %v9592_v24 = vld [vmem:[%s12634_s1 + $0x88] sm:$0xff]   ;;  %vm9938_vm5 = vmor %vm326_vm2, %vm327_vm3  ;;  %v9594_v46 = vld [vmem:[%s12634_s1 + $0x80] sm:$0xff]  }
  0x11   : > { %8949 = vmatpush3.bf16.msra.mxu1 %v9581_v2  ;;  %v9898_v12 = vld [vmem:[%s9889_s24] sm:$0xf]  ;;  %v9901_v13 = vld [vmem:[%s9889_s24 + $0x4] sm:$0xf]  ;;  %v318_v14 = vld [vmem:[%s9889_s24 + $0x8] sm:$0x1] }
  0x12   : > { %9013 = vmatpush3.bf16.msra.mxu0 %v9582_v3  ;;  %8950 = vmatprep.subr.bf16.mxu1 %v9583_v4  ;;  %v330_v15 = vshrl.u32 %v9898_v12, 16  ;;  %v333_v16 = vshll.u32 %v9898_v12, 16  ;;  %v339_v18 = vshll.u32 %v9901_v13, 16  ;;  %v343_v19 = vshrl.u32 %v9901_v13, 16  ;;  %v908_v21 = vld [vmem:[%s9889_s24] sm:$0xe] }
  0x13   : > { %9014 = vmatprep.subr.bf16.mxu0 %v9584_v5  ;;  %v349_v20 = vshll.u32 %v318_v14, 16  ;;  %12644 = vst [vmem:[#allocation2_spill] sm:$0xff] %v12643_v22  ;;  %v937_v23 = vrot.slane %v9901_v13, 5  ;;  %v7456_v27 = vrot.slane %v908_v21, 9  ;;  %v940_v28 = vrot.slane %v318_v14, 5  ;;  %v9595_v2 = vld [vmem:[%s12634_s1 + $0x38] sm:$0xff]  }
  0x14   : > { %v332_v25 = vrot.slane %v330_v15, 4  ;;  %v335_v26 = vrot.slane %v333_v16, 5  ;;  %v9923_v29 = vld [vmem:[%s9889_s24 + $0xc] sm:$0xf]  ;;  %v341_v30 = vrot.slane %v339_v18, 5  ;;  %v345_v31 = vrot.slane %v343_v19, 4 }
  0x15   : > { %8951 = vmatpush3.bf16.msra.mxu1 %v9583_v4  ;;  %v351_v32 = vrot.slane %v349_v20, 5  ;;  %v939_v33 = vrot.slane %v937_v23, 4  ;;  %v9926_v34 = vld [vmem:[%s9889_s24 + $0x10] sm:$0xf]  ;;  %v938_v36 = vsel %vm9914_vm4, %v7456_v27, %v937_v23  ;;  %v319_v37 = vld [vmem:[%s9889_s24 + $0x14] sm:$0x1] }
  0x16   : > { %9015 = vmatpush3.bf16.msra.mxu0 %v9584_v5  ;;  %8952 = vmatprep.subr.bf16.mxu1 %v9585_v6  ;;  %v336_v35 = vor.u32 %v335_v26, %v332_v25  ;;  %v354_v38 = vshrl.u32 %v9923_v29, 16  ;;  %v357_v39 = vshll.u32 %v9923_v29, 16  ;;  %v346_v42 = vor.u32 %v345_v31, %v341_v30  ;;  %v909_v51 = vld [vmem:[%s9889_s24 + $0xc] sm:$0xe]  ;;  %v320_v14 = vld [vmem:[%s9889_s24 + $0x20] sm:$0x1] }
  0x17   : > { %9016 = vmatprep.subr.bf16.mxu0 %v9586_v7  ;;  %v941_v43 = vsel %vm9914_vm4, %v939_v33, %v940_v28  ;;  %v363_v44 = vshll.u32 %v9926_v34, 16  ;;  %v367_v45 = vshrl.u32 %v9926_v34, 16  ;;  %v373_v55 = vshll.u32 %v319_v37, 16  ;;  %v9984_v23 = vld [vmem:[%s9889_s24 + $0x24] sm:$0xf]  ;;  %v9597_v26 = vld [vmem:[%s12634_s1 + $0x30] sm:$0xff]  }
  0x18   : > { %v337_v47 = vrot.slane %v336_v35, 4  ;;  %v7480_v48 = vcombine.low %v938_v36, %v941_v43  ;;  %v356_v49 = vrot.slane %v354_v38, 4  ;;  %v359_v50 = vrot.slane %v357_v39, 5  ;;  %v9993_v31 = vld [vmem:[%s9889_s24 + $0x2c] sm:$0x1] }
  0x19   : > { %8953 = vmatpush3.bf16.msra.mxu1 %v9585_v6  ;;  %v347_v52 = vrot.slane %v346_v42, 4  ;;  %v365_v53 = vrot.slane %v363_v44, 5  ;;  %v369_v54 = vrot.slane %v367_v45, 4  ;;  %v7457_v58 = vrot.slane %v909_v51, 9  ;;  %v9596_v6 = vld [vmem:[%s12634_s1 + $0x138] sm:$0xff]  }
  0x1a   : > { %9017 = vmatpush3.bf16.msra.mxu0 %v9586_v7  ;;  %8954 = vmatprep.subr.bf16.mxu1 %v9587_v8  ;;  %v342_v56 = vsel %vm9938_vm5, %v337_v47, %v341_v30  ;;  %v360_v57 = vor.u32 %v359_v50, %v356_v49  ;;  %v944_v59 = vrot.slane %v9926_v34, 5  ;;  %v375_v62 = vrot.slane %v373_v55, 5  ;;  %v9964_v7 = vld [vmem:[%s9889_s24 + $0x18] sm:$0xf]  ;;  %v9599_v47 = vld [vmem:[%s12634_s1 + $0x28] sm:$0xff]  }
  0x1b   : > { %9018 = vmatprep.subr.bf16.mxu0 %v9588_v9  ;;  %9026 = vmatprep.mubr.bf16.mxu0 %v7480_v48  ;;  %v352_v60 = vsel %vm9938_vm5, %v347_v52, %v351_v32  ;;  %v370_v61 = vor.u32 %v369_v54, %v365_v53  ;;  %v947_v63 = vrot.slane %v319_v37, 5  ;;  %v378_v15 = vshrl.u32 %v9964_v7, 16  ;;  %v9598_v37 = vld [vmem:[%s12634_s1 + $0x130] sm:$0xff]   ;;  %v911_v48 = vld [vmem:[%s9889_s24 + $0x24] sm:$0xe] }
  0x1c   : > { %v7424_v0 = vcombine.low %v342_v56, %v352_v60  ;;  %v361_v1 = vrot.slane %v360_v57, 4  ;;  %v945_v3 = vsel %vm9914_vm4, %v7457_v58, %v944_v59  ;;  %v946_v4 = vrot.slane %v944_v59, 4  ;;  %v9600_v57 = vld [vmem:[%s12634_s1 + $0x128] sm:$0xff]  }
  0x1d   : > { %8955 = vmatpush3.bf16.msra.mxu1 %v9587_v8  ;;  %v371_v5 = vrot.slane %v370_v61, 4  ;;  %v9967_v8 = vld [vmem:[%s9889_s24 + $0x1c] sm:$0xf]  ;;  %v381_v16 = vshll.u32 %v9964_v7, 16  ;;  %v380_v27 = vrot.slane %v378_v15, 4  ;;  %v397_v30 = vshll.u32 %v320_v14, 16 }
  0x1e   : > { %9019 = vmatpush3.bf16.msra.mxu0 %v9588_v9  ;;  %8956 = vmatprep.subr.bf16.mxu1 %v9589_v10  ;;  %v7440_v9 = vcombine.low %v9898_v12, %v9901_v13  ;;  %v387_v20 = vshll.u32 %v9967_v8, 16  ;;  %v391_v21 = vshrl.u32 %v9967_v8, 16  ;;  %v951_v36 = vrot.slane %v9967_v8, 5  ;;  %v322_v15 = vld [vmem:[%s9889_s24 + $0x38] sm:$0x1] }
  0x1f   : > { %9020 = vmatprep.subr.bf16.mxu0 %v9590_v11  ;;  %8962 = vmatprep.mubr.bf16.mxu1 %v7424_v0  ;;  %v376_v18 = vsel %vm9938_vm5, %v371_v5, %v375_v62  ;;  %v383_v28 = vrot.slane %v381_v16, 5  ;;  %v399_v39 = vrot.slane %v397_v30, 5  ;;  %v402_v42 = vshrl.u32 %v9984_v23, 16 }
  0x20   : > { %v389_v32 = vrot.slane %v387_v20, 5  ;;  %v393_v33 = vrot.slane %v391_v21, 4  ;;  %v953_v45 = vrot.slane %v951_v36, 4  ;;  %v421_v56 = vshll.u32 %v9993_v31, 16 }
  0x21   : > { %8957 = vmatpush3.bf16.msra.mxu1 %v9589_v10  ;;  %v366_v10 = vsel %vm9938_vm5, %v361_v1, %v365_v53  ;;  %v384_v38 = vor.u32 %v383_v28, %v380_v27  ;;  %v404_v50 = vrot.slane %v402_v42, 4  ;;  %v7459_v1 = vrot.slane %v911_v48, 9  ;;  %v912_v27 = vld [vmem:[%s9889_s24 + $0x30] sm:$0xe] }
  0x22   : > { %9021 = vmatpush3.bf16.msra.mxu0 %v9590_v11  ;;  %8958 = vmatprep.subr.bf16.mxu1 %v9591_v17  ;;  %v948_v11 = vsel %vm9914_vm4, %v946_v4, %v947_v63  ;;  %v7425_v25 = vcombine.low %v366_v10, %v376_v18  ;;  %v394_v43 = vor.u32 %v393_v33, %v389_v32  ;;  %v423_v0 = vrot.slane %v421_v56, 5  ;;  %v9601_v10 = vld [vmem:[%s12634_s1 + $0x20] sm:$0xff]   ;;  %v10044_v33 = vld [vmem:[%s9889_s24 + $0x3c] sm:$0xf] }
  0x23   : > { %9022 = vmatprep.subr.bf16.mxu0 %v9592_v24  ;;  %v7481_v19 = vcombine.low %v945_v3, %v948_v11  ;;  %v385_v49 = vrot.slane %v384_v38, 4  ;;  %v10028_v11 = vld [vmem:[%s9889_s24 + $0x34] sm:$0xf]  ;;  %v445_v38 = vshll.u32 %v322_v15, 16 }
  0x24   : > { %v395_v53 = vrot.slane %v394_v43, 4  ;;  %v435_v18 = vshll.u32 %v10028_v11, 16 }
  0x25   : > { %8959 = vmatpush3.bf16.msra.mxu1 %v9591_v17  ;;  %v910_v17 = vld [vmem:[%s9889_s24 + $0x18] sm:$0xe]  ;;  %v390_v58 = vsel %vm9938_vm5, %v385_v49, %v389_v32  ;;  %v965_v49 = vrot.slane %v10028_v11, 5 }
  0x26   : > { %9023 = vmatpush3.bf16.msra.mxu0 %v9592_v24  ;;  %8960 = vmatprep.subr.bf16.mxu1 %v9593_v40  ;;  %v9987_v24 = vld [vmem:[%s9889_s24 + $0x28] sm:$0xf]  ;;  %v7458_v35 = vrot.slane %v910_v17, 9  ;;  %v400_v62 = vsel %vm9938_vm5, %v395_v53, %v399_v39  ;;  %v437_v32 = vrot.slane %v435_v18, 5  ;;  %v10051_v39 = vld [vmem:[%s9889_s24 + $0x40] sm:$0xf] }
  0x27   : > { %9024 = vmatprep.subr.bf16.mxu0 %v9594_v46  ;;  %v411_v51 = vshll.u32 %v9987_v24, 16  ;;  %v415_v52 = vshrl.u32 %v9987_v24, 16  ;;  %v7426_v3 = vcombine.low %v390_v58, %v400_v62  ;;  %v958_v5 = vrot.slane %v9987_v24, 5  ;;  %v10084_v18 = vld [vmem:[%s9889_s24 + $0x48] sm:$0xf] }
  0x28   : > { %v952_v44 = vsel %vm9914_vm4, %v7458_v35, %v951_v36  ;;  %v459_v56 = vshll.u32 %v10051_v39, 16 }
  0x29   : > { %8961 = vmatpush3.bf16.msra.mxu1 %v9593_v40  ;;  %v954_v40 = vrot.slane %v320_v14, 5  ;;  %v413_v60 = vrot.slane %v411_v51, 5  ;;  %v417_v61 = vrot.slane %v415_v52, 4  ;;  %v959_v20 = vsel %vm9914_vm4, %v7459_v1, %v958_v5  ;;  %v913_v51 = vld [vmem:[%s9889_s24 + $0x3c] sm:$0xe]  ;;  %v9605_v1 = vld [vmem:[%s12634_s1 + $0x10] sm:$0xff]  }
  0x2a   : > { %9025 = vmatpush3.bf16.msra.mxu0 %v9594_v46  ;;  %8978 = vmatprep.subr.bf16.mxu1 %v9595_v2  ;;  %v405_v46 = vshll.u32 %v9984_v23, 16  ;;  %v960_v21 = vrot.slane %v958_v5, 4  ;;  %v9604_v52 = vld [vmem:[%s12634_s1 + $0x118] sm:$0xff]  }
  0x2b   : > { %9074 = vmatprep.subr.bf16.mxu0 %v9596_v6  ;;  %v955_v54 = vsel %vm9914_vm4, %v953_v45, %v954_v40  ;;  %v418_v4 = vor.u32 %v417_v61, %v413_v60  ;;  %v10054_v45 = vld [vmem:[%s9889_s24 + $0x44] sm:$0x1] }
  0x2c   : > { %8963 = vmatmul.mubr.bf16.vlgmr.msra.gmra.mxu1 %v7425_v25  ;;  %v407_v55 = vrot.slane %v405_v46, 5  ;;  %v7482_v59 = vcombine.low %v952_v44, %v955_v54  ;;  %v9602_v25 = vld [vmem:[%s12634_s1 + $0x120] sm:$0xff]   ;;  %v7460_v44 = vrot.slane %v912_v27, 9  ;;  %v9603_v46 = vld [vmem:[%s12634_s1 + $0x18] sm:$0xff]   ;;  %v450_v54 = vshrl.u32 %v10044_v33, 16  ;;  %v9607_v27 = vld [vmem:[%s12634_s1 + $0x8] sm:$0xff]  }
  0x2d   : > { %9027 = vmatmul.mubr.bf16.vlgmr.msra.gmra.mxu0 %v7481_v19  ;;  %8979 = vmatpush3.bf16.msra.mxu1 %v9595_v2  ;;  %v10020_v2 = vld [vmem:[%s9889_s24 + $0x30] sm:$0xf]  ;;  %v419_v19 = vrot.slane %v418_v4, 4 }
  0x2e   : > { %9075 = vmatpush3.bf16.msra.mxu0 %v9596_v6  ;;  %8980 = vmatprep.subr.bf16.mxu1 %v9597_v26  ;;  %v408_v63 = vor.u32 %v407_v55, %v404_v50  ;;  %v961_v6 = vrot.slane %v9993_v31, 5  ;;  %v426_v16 = vshrl.u32 %v10020_v2, 16  ;;  %v429_v17 = vshll.u32 %v10020_v2, 16 }
  0x2f   : > { %9076 = vmatprep.subr.bf16.mxu0 %v9598_v37  ;;  %9030 = vmatprep.mubr.bf16.mxu0 %v7482_v59  ;;  %v424_v35 = vsel %vm9938_vm5, %v419_v19, %v423_v0  ;;  %v968_v50 = vrot.slane %v322_v15, 5  ;;  %v453_v55 = vshll.u32 %v10044_v33, 16  ;;  %v966_v58 = vsel %vm9914_vm4, %v7460_v44, %v965_v49  ;;  %v10087_v19 = vld [vmem:[%s9889_s24 + $0x4c] sm:$0xf] }
  0x30   : > { %v409_v14 = vrot.slane %v408_v63, 4  ;;  %8966 = vmatprep.mubr.bf16.mxu1 %v7426_v3  ;;  %v428_v30 = vrot.slane %v426_v16, 4  ;;  %v431_v31 = vrot.slane %v429_v17, 5  ;;  %v962_v36 = vsel %vm9914_vm4, %v960_v21, %v961_v6  ;;  %v9606_v17 = vld [vmem:[%s12634_s1 + $0x110] sm:$0xff]  }
  0x31   : > { %8981 = vmatpush3.bf16.msra.mxu1 %v9597_v26  ;;  %v439_v26 = vshrl.u32 %v10028_v11, 16  ;;  %v7483_v42 = vcombine.low %v959_v20, %v962_v36  ;;  %v967_v59 = vrot.slane %v965_v49, 4  ;;  %v452_v62 = vrot.slane %v450_v54, 4 }
  0x32   : > { %9077 = vmatpush3.bf16.msra.mxu0 %v9598_v37  ;;  %8982 = vmatprep.subr.bf16.mxu1 %v9599_v47  ;;  %v414_v28 = vsel %vm9938_vm5, %v409_v14, %v413_v60  ;;  %v432_v43 = vor.u32 %v431_v31, %v428_v30  ;;  %v463_v60 = vshrl.u32 %v10051_v39, 16  ;;  %v455_v63 = vrot.slane %v453_v55, 5  ;;  %v324_v30 = vld [vmem:[%s9889_s24 + $0x50] sm:$0x1] }
  0x33   : > { %9078 = vmatprep.subr.bf16.mxu0 %v9600_v57  ;;  %v441_v37 = vrot.slane %v439_v26, 4  ;;  %v7427_v40 = vcombine.low %v414_v28, %v424_v35  ;;  %v461_v0 = vrot.slane %v459_v56, 5  ;;  %v969_v4 = vsel %vm9914_vm4, %v967_v59, %v968_v50  ;;  %v9609_v59 = vld [vmem:[%s12634_s1] sm:$0xff]  }
  0x34   : > { %v433_v53 = vrot.slane %v432_v43, 4  ;;  %v465_v5 = vrot.slane %v463_v60, 4  ;;  %v469_v6 = vshll.u32 %v10054_v45, 16  ;;  %v7484_v14 = vcombine.low %v966_v58, %v969_v4  ;;  %v10118_v58 = vld [vmem:[%s9889_s24 + $0x5c] sm:$0x1] }
  0x35   : > { %8983 = vmatpush3.bf16.msra.mxu1 %v9599_v47  ;;  %v442_v48 = vor.u32 %v441_v37, %v437_v32  ;;  %v447_v47 = vrot.slane %v445_v38, 5  ;;  %9031 = vmatmul.mubr.bf16.gmra.mxu0 %v7483_v42  ;;  %v456_v15 = vor.u32 %v455_v63, %v452_v62  ;;  %v7461_v16 = vrot.slane %v913_v51, 9  ;;  %v914_v42 = vld [vmem:[%s9889_s24 + $0x48] sm:$0xe] }
  0x36   : > { %9079 = vmatpush3.bf16.msra.mxu0 %v9600_v57  ;;  %8984 = vmatprep.subr.bf16.mxu1 %v9601_v10  ;;  %v438_v61 = vsel %vm9938_vm5, %v433_v53, %v437_v32  ;;  %v466_v20 = vor.u32 %v465_v5, %v461_v0  ;;  %v471_v21 = vrot.slane %v469_v6, 5  ;;  %v975_v26 = vrot.slane %v10054_v45, 5  ;;  %v10115_v53 = vld [vmem:[%s9889_s24 + $0x58] sm:$0xf] }
  0x37   : > { %9080 = vmatprep.subr.bf16.mxu0 %v9602_v25  ;;  %8967 = vmatmul.mubr.bf16.gmra.mxu1 %v7427_v40  ;;  %v443_v57 = vrot.slane %v442_v48, 4  ;;  %v457_v28 = vrot.slane %v456_v15, 4  ;;  %v474_v31 = vshrl.u32 %v10084_v18, 16  ;;  %v477_v32 = vshll.u32 %v10084_v18, 16  ;;  %v10105_v48 = vld [vmem:[%s9889_s24 + $0x54] sm:$0xf] }
  0x38   : > { %9034 = vmatprep.mubr.bf16.mxu0 %v7484_v14  ;;  %v483_v35 = vshll.u32 %v10087_v19, 16  ;;  %v467_v36 = vrot.slane %v466_v20, 4  ;;  %v487_v40 = vshrl.u32 %v10087_v19, 16  ;;  %v979_v62 = vrot.slane %v10087_v19, 5 }
  0x39   : > { %8985 = vmatpush3.bf16.msra.mxu1 %v9601_v10  ;;  %v448_v3 = vsel %vm9938_vm5, %v443_v57, %v447_v47  ;;  %v462_v43 = vsel %vm9938_vm5, %v457_v28, %v461_v0  ;;  %v476_v44 = vrot.slane %v474_v31, 4  ;;  %v479_v45 = vrot.slane %v477_v32, 5  ;;  %v9608_v47 = vld [vmem:[%s12634_s1 + $0x108] sm:$0xff]   ;;  %v915_v0 = vld [vmem:[%s9889_s24 + $0x54] sm:$0xe] }
  0x3a   : > { %9081 = vmatpush3.bf16.msra.mxu0 %v9602_v25  ;;  %8986 = vmatprep.subr.bf16.mxu1 %v9603_v46  ;;  %v7428_v10 = vcombine.low %v438_v61, %v448_v3  ;;  %v972_v25 = vrot.slane %v10051_v39, 5  ;;  %v472_v49 = vsel %vm9938_vm5, %v467_v36, %v471_v21  ;;  %v489_v51 = vrot.slane %v487_v40, 4  ;;  %v10148_v40 = vld [vmem:[%s9889_s24 + $0x10] sm:$0xf] }
  0x3b   : > { %9082 = vmatprep.subr.bf16.mxu0 %v9604_v52  ;;  %v7429_v54 = vcombine.low %v462_v43, %v472_v49  ;;  %v480_v56 = vor.u32 %v479_v45, %v476_v44  ;;  %v7462_v57 = vrot.slane %v914_v42, 9  ;;  %v982_v63 = vrot.slane %v324_v30, 5  ;;  %v10153_v42 = vld [vmem:[%s12634_s1 + $0x1b8] sm:$0xff]  }
  0x3c   : > { %8970 = vmatprep.mubr.bf16.mxu1 %v7428_v10  ;;  %v973_v37 = vsel %vm9914_vm4, %v7461_v16, %v972_v25  ;;  %v974_v38 = vrot.slane %v972_v25, 4  ;;  %v498_v4 = vshrl.u32 %v10105_v48, 16  ;;  %v501_v5 = vshll.u32 %v10105_v48, 16 }
  0x3d   : > { %8987 = vmatpush3.bf16.msra.mxu1 %v9603_v46  ;;  %v485_v46 = vrot.slane %v483_v35, 5  ;;  %v481_v3 = vrot.slane %v480_v56, 4  ;;  %v507_v6 = vshll.u32 %v10115_v53, 16  ;;  %v980_v14 = vsel %vm9914_vm4, %v7462_v57, %v979_v62 }
  0x3e   : > { %9083 = vmatpush3.bf16.msra.mxu0 %v9604_v52  ;;  %8988 = vmatprep.subr.bf16.mxu1 %v9605_v1  ;;  %v976_v50 = vsel %vm9914_vm4, %v974_v38, %v975_v26  ;;  %v493_v52 = vshll.u32 %v324_v30, 16  ;;  %v981_v15 = vrot.slane %v979_v62, 4  ;;  %v511_v16 = vshrl.u32 %v10115_v53, 16  ;;  %v10139_v26 = vld [vmem:[%s12634_s1 + $0xf8] sm:$0xff]   ;;  %v7544_v38 = vld [vmem:[%s9889_s24 + $0xc] sm:$0xf] }
  0x3f   : > { %9084 = vmatprep.subr.bf16.mxu0 %v9606_v17  ;;  %v7485_v55 = vcombine.low %v973_v37, %v976_v50  ;;  %v490_v60 = vor.u32 %v489_v51, %v485_v46  ;;  %8971 = vmatmul.mubr.bf16.gmra.mxu1 %v7429_v54  ;;  %v500_v20 = vrot.slane %v498_v4, 4  ;;  %v503_v21 = vrot.slane %v501_v5, 5  ;;  %v7547_v62 = vld [vmem:[%s9889_s24 + $0x18] sm:$0xf]  ;;  %v10175_v4 = vld [vmem:[%s9889_s24 + $0x1c] sm:$0xf] }
  0x40   : > { %v495_v61 = vrot.slane %v493_v52, 5  ;;  %v509_v25 = vrot.slane %v507_v6, 5  ;;  %v513_v30 = vrot.slane %v511_v16, 4  ;;  %v517_v31 = vshll.u32 %v10118_v58, 16  ;;  %v10178_v5 = vld [vmem:[%s9889_s24 + $0x20] sm:$0x1] }
  0x41   : > { %8989 = vmatpush3.bf16.msra.mxu1 %v9605_v1  ;;  %v9610_v1 = vld [vmem:[%s12634_s1 + $0x100] sm:$0xff]   ;;  %9035 = vmatmul.mubr.bf16.gmra.mxu0 %v7485_v55  ;;  %v491_v10 = vrot.slane %v490_v60, 4  ;;  %v504_v36 = vor.u32 %v503_v21, %v500_v20  ;;  %v7463_v37 = vrot.slane %v915_v0, 9  ;;  %v986_v45 = vrot.slane %v10115_v53, 5 }
  0x42   : > { %8990 = vmatprep.subr.bf16.mxu1 %v9607_v27  ;;  %9085 = vmatpush3.bf16.msra.mxu0 %v9606_v17  ;;  %v486_v17 = vsel %vm9938_vm5, %v481_v3, %v485_v46  ;;  %v514_v43 = vor.u32 %v513_v30, %v509_v25  ;;  %v519_v44 = vrot.slane %v517_v31, 5  ;;  %v989_v46 = vrot.slane %v10118_v58, 5 }
  0x43   : > { %9086 = vmatprep.subr.bf16.mxu0 %v9608_v47  ;;  %v496_v28 = vsel %vm9938_vm5, %v491_v10, %v495_v61  ;;  %v505_v49 = vrot.slane %v504_v36, 4  ;;  %v1469_v50 = vshrl.u32 %v7544_v38, 16  ;;  %v1472_v51 = vshll.u32 %v7544_v38, 16 }
  0x44   : > { %v7430_v32 = vcombine.low %v486_v17, %v496_v28  ;;  %v1478_v52 = vshll.u32 %v10148_v40, 16  ;;  %v515_v54 = vrot.slane %v514_v43, 4  ;;  %v987_v55 = vsel %vm9914_vm4, %v7463_v37, %v986_v45 }
  0x45   : > { %8991 = vmatpush3.bf16.msra.mxu1 %v9607_v27  ;;  %v983_v27 = vsel %vm9914_vm4, %v981_v15, %v982_v63  ;;  %v988_v56 = vrot.slane %v986_v45, 4  ;;  %v1482_v57 = vshrl.u32 %v10148_v40, 16  ;;  %v510_v58 = vsel %vm9938_vm5, %v505_v49, %v509_v25  ;;  %v7550_v45 = vld [vmem:[%s9889_s24 + $0x24] sm:$0xf] }
  0x46   : > { %8992 = vmatprep.subr.bf16.mxu1 %v9609_v59  ;;  %9087 = vmatpush3.bf16.msra.mxu0 %v9608_v47  ;;  %v7486_v35 = vcombine.low %v980_v14, %v983_v27  ;;  %v10158_v47 = vld [vmem:[%s9889_s24 + $0x14] sm:$0x1]  ;;  %v1474_v60 = vrot.slane %v1472_v51, 5  ;;  %v1480_v61 = vrot.slane %v1478_v52, 5  ;;  %v520_v63 = vsel %vm9938_vm5, %v515_v54, %v519_v44 }
  0x47   : > { %9088 = vmatprep.subr.bf16.mxu0 %v9610_v1  ;;  %8974 = vmatprep.mubr.bf16.mxu1 %v7430_v32  ;;  %v990_v0 = vsel %vm9914_vm4, %v988_v56, %v989_v46  ;;  %v1488_v3 = vshll.u32 %v10158_v47, 16  ;;  %v7431_v6 = vcombine.low %v510_v58, %v520_v63  ;;  %v1493_v15 = vshrl.u32 %v7547_v62, 16  ;;  %v10199_v46 = vld [vmem:[%s9889_s24 + $0x2c] sm:$0x1]  ;;  %v9615_v51 = vld [vmem:[%s12634_s1 + $0xf0] sm:$0xff]  }
  0x48   : > { %9038 = vmatprep.mubr.bf16.mxu0 %v7486_v35  ;;  %v7487_v10 = vcombine.low %v987_v55, %v990_v0  ;;  %v1496_v20 = vshll.u32 %v7547_v62, 16  ;;  %v1502_v21 = vshll.u32 %v10175_v4, 16  ;;  %v1506_v27 = vshrl.u32 %v10175_v4, 16 }
  0x49   : > { %8993 = vmatpush3.bf16.msra.mxu1 %v9609_v59  ;;  %v1471_v59 = vrot.slane %v1469_v50, 4  ;;  %v1490_v17 = vrot.slane %v1488_v3, 5  ;;  %v1495_v28 = vrot.slane %v1493_v15, 4  ;;  %v1512_v30 = vshll.u32 %v10178_v5, 16  ;;  %v10214_v3 = vld [vmem:[%s9889_s24 + $0x38] sm:$0x1] }
  0x4a   : > { %9089 = vmatpush3.bf16.msra.mxu0 %v9610_v1  ;;  %9042 = vmatprep.subr.bf16.mxu1 %v10139_v26  ;;  %v1484_v1 = vrot.slane %v1482_v57, 4  ;;  %v7441_v32 = vcombine.low %v9923_v29, %v9926_v34  ;;  %v1498_v35 = vrot.slane %v1496_v20, 5  ;;  %v1504_v36 = vrot.slane %v1502_v21, 5  ;;  %v7553_v57 = vld [vmem:[%s9889_s24 + $0x30] sm:$0xf] }
  0x4b   : > { %9138 = vmatprep.subr.bf16.mxu0 %v10153_v42  ;;  %v1475_v14 = vor.u32 %v1474_v60, %v1471_v59  ;;  %8975 = vmatmul.mubr.bf16.gmra.mxu1 %v7431_v6  ;;  %v1508_v38 = vrot.slane %v1506_v27, 4  ;;  %v1514_v43 = vrot.slane %v1512_v30, 5  ;;  %v7442_v44 = vcombine.low %v9964_v7, %v9967_v8  ;;  %v9616_v20 = vld [vmem:[%s12634_s1 + $0x1b0] sm:$0xff]   ;;  %v9619_v30 = vld [vmem:[%s12634_s1 + $0xe8] sm:$0xff]  }
  0x4c   : > { %v1485_v16 = vor.u32 %v1484_v1, %v1480_v61  ;;  %9039 = vmatmul.mubr.bf16.gmra.mxu0 %v7487_v10  ;;  %8994 = vmatprep.mubr.bf16.mxu1 %v7440_v9  ;;  %v1499_v13 = vor.u32 %v1498_v35, %v1495_v28  ;;  %v10196_v9 = vld [vmem:[%s9889_s24 + $0x28] sm:$0xf]  ;;  %v1517_v29 = vshrl.u32 %v7550_v45, 16  ;;  %v1520_v34 = vshll.u32 %v7550_v45, 16 }
  0x4d   : > { %v1476_v25 = vrot.slane %v1475_v14, 4  ;;  %v1509_v50 = vor.u32 %v1508_v38, %v1504_v36  ;;  %v1526_v7 = vshll.u32 %v10196_v9, 16  ;;  %v1530_v8 = vshrl.u32 %v10196_v9, 16  ;;  %v9620_v38 = vld [vmem:[%s12634_s1 + $0x1a8] sm:$0xff]  }
  0x4e   : > { %v1486_v31 = vrot.slane %v1485_v16, 4  ;;  %v1500_v52 = vrot.slane %v1499_v13, 4  ;;  %v1519_v54 = vrot.slane %v1517_v29, 4  ;;  %v1522_v55 = vrot.slane %v1520_v34, 5  ;;  %v10248_v13 = vld [vmem:[%s9889_s24 + $0x44] sm:$0x1] }
  0x4f   : > { %v1481_v37 = vsel %vm9938_vm5, %v1476_v25, %v1480_v61  ;;  %v1536_v56 = vshll.u32 %v10199_v46, 16  ;;  %v1510_v58 = vrot.slane %v1509_v50, 4  ;;  %v1528_v59 = vrot.slane %v1526_v7, 5  ;;  %v10209_v61 = vld [vmem:[%s9889_s24 + $0x34] sm:$0xf] }
  0x50   : > { %v1491_v12 = vsel %vm9938_vm5, %v1486_v31, %v1490_v17  ;;  %v1532_v60 = vrot.slane %v1530_v8, 4  ;;  %v1541_v62 = vshrl.u32 %v7553_v57, 16  ;;  %v1505_v63 = vsel %vm9938_vm5, %v1500_v52, %v1504_v36 }
  0x51   : > { %v7584_v49 = vcombine.low %v1481_v37, %v1491_v12  ;;  %v1523_v0 = vor.u32 %v1522_v55, %v1519_v54  ;;  %v1538_v1 = vrot.slane %v1536_v56, 5  ;;  %v1544_v6 = vshll.u32 %v7553_v57, 16  ;;  %v9621_v12 = vld [vmem:[%s12634_s1 + $0xe0] sm:$0xff]   ;;  %v10259_v57 = vld [vmem:[%s9889_s24 + $0x4c] sm:$0xf] }
  0x52   : > { %v1515_v10 = vsel %vm9938_vm5, %v1510_v58, %v1514_v43  ;;  %v1533_v14 = vor.u32 %v1532_v60, %v1528_v59  ;;  %v1543_v15 = vrot.slane %v1541_v62, 4  ;;  %v1550_v16 = vshll.u32 %v10209_v61, 16  ;;  %v7556_v43 = vld [vmem:[%s9889_s24 + $0x3c] sm:$0xf]  ;;  %v10262_v58 = vld [vmem:[%s9889_s24 + $0x50] sm:$0x1] }
  0x53   : > { %9090 = vmatprep.mubr.bf16.mxu0 %v7584_v49  ;;  %8995 = vmatmul.mubr.bf16.vlgmr.msra.gmra.mxu1 %v7441_v32  ;;  %v7585_v17 = vcombine.low %v1505_v63, %v1515_v10  ;;  %v1524_v21 = vrot.slane %v1523_v0, 4  ;;  %v1546_v25 = vrot.slane %v1544_v6, 5  ;;  %v1554_v28 = vshrl.u32 %v10209_v61, 16  ;;  %v9625_v0 = vld [vmem:[%s12634_s1 + $0xd8] sm:$0xff]  }
  0x54   : > { %9043 = vmatpush3.bf16.msra.mxu1 %v10139_v26  ;;  %8998 = vmatprep.mubr.bf16.mxu1 %v7442_v44  ;;  %v1534_v27 = vrot.slane %v1533_v14, 4  ;;  %v1552_v31 = vrot.slane %v1550_v16, 5  ;;  %v1560_v26 = vshll.u32 %v10214_v3, 16  ;;  %v7443_v35 = vcombine.low %v9984_v23, %v9987_v24  ;;  %v10245_v24 = vld [vmem:[%s9889_s24 + $0x40] sm:$0xf] }
  0x55   : > { %9044 = vmatprep.subr.bf16.mxu1 %v9615_v51  ;;  %9091 = vmatmul.mubr.bf16.vlgmr.msra.gmra.mxu0 %v7585_v17  ;;  %v1529_v32 = vsel %vm9938_vm5, %v1524_v21, %v1528_v59  ;;  %v1547_v36 = vor.u32 %v1546_v25, %v1543_v15  ;;  %v1556_v37 = vrot.slane %v1554_v28, 4  ;;  %v7444_v23 = vcombine.low %v10020_v2, %v10028_v11  ;;  %v7559_v11 = vld [vmem:[%s9889_s24 + $0x48] sm:$0xf]  ;;  %v9622_v59 = vld [vmem:[%s12634_s1 + $0x1a0] sm:$0xff]  }
  0x56   : > { %9139 = vmatpush3.bf16.msra.mxu0 %v10153_v42  ;;  %v1539_v44 = vsel %vm9938_vm5, %v1534_v27, %v1538_v1  ;;  %v1562_v45 = vrot.slane %v1560_v26, 5  ;;  %v1565_v29 = vshrl.u32 %v7556_v43, 16  ;;  %v1568_v50 = vshll.u32 %v7556_v43, 16 }
  0x57   : > { %9140 = vmatprep.subr.bf16.mxu0 %v9616_v20  ;;  %v7586_v42 = vcombine.low %v1529_v32, %v1539_v44  ;;  %v1548_v34 = vrot.slane %v1547_v36, 4  ;;  %v1557_v49 = vor.u32 %v1556_v37, %v1552_v31  ;;  %v1574_v8 = vshll.u32 %v10245_v24, 16  ;;  %v7562_v32 = vld [vmem:[%s9889_s24 + $0x54] sm:$0xf] }
  0x58   : > { %9045 = vmatpush3.bf16.msra.mxu1 %v9615_v51  ;;  %v1567_v7 = vrot.slane %v1565_v29, 4  ;;  %v1578_v52 = vshrl.u32 %v10245_v24, 16  ;;  %v1584_v2 = vshll.u32 %v10248_v13, 16  ;;  %v1570_v55 = vrot.slane %v1568_v50, 5 }
  0x59   : > { %9046 = vmatprep.subr.bf16.mxu1 %v9619_v30  ;;  %9094 = vmatprep.mubr.bf16.mxu0 %v7586_v42  ;;  %v1553_v54 = vsel %vm9938_vm5, %v1548_v34, %v1552_v31  ;;  %v1558_v51 = vrot.slane %v1557_v49, 4  ;;  %v7445_v56 = vcombine.low %v10044_v33, %v10051_v39  ;;  %v1576_v60 = vrot.slane %v1574_v8, 5  ;;  %v9626_v31 = vld [vmem:[%s12634_s1 + $0x198] sm:$0xff]   ;;  %v9627_v49 = vld [vmem:[%s12634_s1 + $0xd0] sm:$0xff]   ;;  %v10300_v8 = vld [vmem:[%s9889_s24 + $0x64] sm:$0xf] }
  0x5a   : > { %9141 = vmatpush3.bf16.msra.mxu0 %v9616_v20  ;;  %v1580_v62 = vrot.slane %v1578_v52, 4  ;;  %v1586_v63 = vrot.slane %v1584_v2, 5  ;;  %v1589_v1 = vshrl.u32 %v7559_v11, 16  ;;  %v1571_v39 = vor.u32 %v1570_v55, %v1567_v7 }
  0x5b   : > { %8999 = vmatmul.mubr.bf16.gmra.mxu1 %v7443_v35  ;;  %v1563_v33 = vsel %vm9938_vm5, %v1558_v51, %v1562_v45  ;;  %9142 = vmatprep.subr.bf16.mxu0 %v9620_v38  ;;  %v1592_v6 = vshll.u32 %v7559_v11, 16  ;;  %v1598_v10 = vshll.u32 %v10259_v57, 16  ;;  %v1602_v17 = vshrl.u32 %v10259_v57, 16  ;;  %v10282_v35 = vld [vmem:[%s9889_s24 + $0x58] sm:$0xf] }
  0x5c   : > { %9047 = vmatpush3.bf16.msra.mxu1 %v9619_v30  ;;  %v7587_v14 = vcombine.low %v1553_v54, %v1563_v33  ;;  %9002 = vmatprep.mubr.bf16.mxu1 %v7444_v23  ;;  %v1581_v15 = vor.u32 %v1580_v62, %v1576_v60  ;;  %v1591_v16 = vrot.slane %v1589_v1, 4  ;;  %v1572_v20 = vrot.slane %v1571_v39, 4  ;;  %v10289_v45 = vld [vmem:[%s9889_s24 + $0x5c] sm:$0x1]  ;;  %v10304_v51 = vld [vmem:[%s9889_s24 + $0x68] sm:$0x1] }
  0x5d   : > { %9048 = vmatprep.subr.bf16.mxu1 %v9621_v12  ;;  %v1594_v21 = vrot.slane %v1592_v6, 5  ;;  %v1600_v25 = vrot.slane %v1598_v10, 5  ;;  %v1608_v28 = vshll.u32 %v10262_v58, 16  ;;  %v1604_v30 = vrot.slane %v1602_v17, 4 }
  0x5e   : > { %9095 = vmatmul.mubr.bf16.gmra.mxu0 %v7587_v14  ;;  %v1582_v27 = vrot.slane %v1581_v15, 4  ;;  %v7446_v26 = vcombine.low %v10084_v18, %v10087_v19  ;;  %v7447_v36 = vcombine.low %v10105_v48, %v10115_v53  ;;  %v1577_v37 = vsel %vm9938_vm5, %v1572_v20, %v1576_v60  ;;  %v9628_v60 = vld [vmem:[%s12634_s1 + $0x190] sm:$0xff]   ;;  %v9636_v53 = vld [vmem:[%s9889_s24 + $0x18] sm:$0xff]  }
  0x5f   : > { %9143 = vmatpush3.bf16.msra.mxu0 %v9620_v38  ;;  %v1595_v43 = vor.u32 %v1594_v21, %v1591_v16  ;;  %v1610_v44 = vrot.slane %v1608_v28, 5  ;;  %v1613_v23 = vshrl.u32 %v7562_v32, 16  ;;  %v1605_v19 = vor.u32 %v1604_v30, %v1600_v25  ;;  %v9635_v30 = vld [vmem:[%s9889_s24 + $0xc] sm:$0xff]  }
  0x60   : > { %9049 = vmatpush3.bf16.msra.mxu1 %v9621_v12  ;;  %9144 = vmatprep.subr.bf16.mxu0 %v9622_v59  ;;  %v1587_v18 = vsel %vm9938_vm5, %v1582_v27, %v1586_v63  ;;  %v1616_v29 = vshll.u32 %v7562_v32, 16  ;;  %v1622_v38 = vshll.u32 %v10282_v35, 16  ;;  %v7565_v12 = vld [vmem:[%s9889_s24 + $0x60] sm:$0xf]  ;;  %v1626_v7 = vshrl.u32 %v10282_v35, 16  ;;  %v9632_v27 = vld [vmem:[%s12634_s1 + $0x188] sm:$0xff]  }
  0x61   : > { %9050 = vmatprep.subr.bf16.mxu1 %v9625_v0  ;;  %v7588_v42 = vcombine.low %v1577_v37, %v1587_v18  ;;  %v1596_v34 = vrot.slane %v1595_v43, 4  ;;  %v1615_v50 = vrot.slane %v1613_v23, 4  ;;  %v1606_v52 = vrot.slane %v1605_v19, 4  ;;  %v9633_v37 = vld [vmem:[%s12634_s1 + $0xc0] sm:$0xff]  }
  0x62   : > { %v1618_v2 = vrot.slane %v1616_v29, 5  ;;  %v1624_v11 = vrot.slane %v1622_v38, 5  ;;  %v1632_v54 = vshll.u32 %v10289_v45, 16  ;;  %v1628_v62 = vrot.slane %v1626_v7, 4  ;;  %v9634_v38 = vld [vmem:[%s12634_s1 + $0x180] sm:$0xff]  }
  0x63   : > { %9003 = vmatmul.mubr.bf16.gmra.mxu1 %v7445_v56  ;;  %9145 = vmatpush3.bf16.msra.mxu0 %v9622_v59  ;;  %v1601_v55 = vsel %vm9938_vm5, %v1596_v34, %v1600_v25  ;;  %v9631_v56 = vld [vmem:[%s12634_s1 + $0xc8] sm:$0xff]   ;;  %v1637_v63 = vshrl.u32 %v7565_v12, 16  ;;  %v1640_v1 = vshll.u32 %v7565_v12, 16  ;;  %v1611_v33 = vsel %vm9938_vm5, %v1606_v52, %v1610_v44  ;;  %v9638_v34 = vld [vmem:[%s12634_s1 + $0x178] sm:$0xff]  }
  0x64   : > { %9098 = vmatprep.mubr.bf16.mxu0 %v7588_v42  ;;  %9146 = vmatprep.subr.bf16.mxu0 %v9626_v31  ;;  %v1619_v59 = vor.u32 %v1618_v2, %v1615_v50  ;;  %v1634_v39 = vrot.slane %v1632_v54, 5  ;;  %v1646_v6 = vshll.u32 %v10300_v8, 16  ;;  %v7589_v10 = vcombine.low %v1601_v55, %v1611_v33  ;;  %v9637_v50 = vld [vmem:[%s9889_s24 + $0x18] sm:$0xff]   ;;  %v9641_v55 = vld [vmem:[%s12634_s1 + $0x170] sm:$0xff]  }
  0x65   : > { %9051 = vmatpush3.bf16.msra.mxu1 %v9625_v0  ;;  %9006 = vmatprep.mubr.bf16.mxu1 %v7446_v26  ;;  %v1629_v14 = vor.u32 %v1628_v62, %v1624_v11  ;;  %v1639_v15 = vrot.slane %v1637_v63, 4  ;;  %v1642_v16 = vrot.slane %v1640_v1, 5  ;;  %v1650_v21 = vshrl.u32 %v10300_v8, 16  ;;  %v9640_v52 = vld [vmem:[%s12634_s1 + $0x238] sm:$0xff]   ;;  %v9642_v1 = vld [vmem:[%s12634_s1 + $0x230] sm:$0xff]  }
  0x66   : > { %9052 = vmatprep.subr.bf16.mxu1 %v9627_v49  ;;  %v1620_v17 = vrot.slane %v1619_v59, 4  ;;  %v1648_v20 = vrot.slane %v1646_v6, 5  ;;  %v1656_v25 = vshll.u32 %v10304_v51, 16  ;;  %9099 = vmatmul.mubr.bf16.gmra.mxu0 %v7589_v10  ;;  %v1904_v12 = vrot.slane %v10148_v40, 5  ;;  %v9644_v59 = vld [vmem:[%s9889_s24 + $0x30] sm:$0xff]   ;;  %v9646_v6 = vld [vmem:[%s12634_s1 + $0x168] sm:$0xff]  }
  0x67   : > { %v1630_v28 = vrot.slane %v1629_v14, 4  ;;  %v1643_v0 = vor.u32 %v1642_v16, %v1639_v15  ;;  %9147 = vmatpush3.bf16.msra.mxu0 %v9626_v31  ;;  %v1652_v32 = vrot.slane %v1650_v21, 4  ;;  %v1911_v7 = vrot.slane %v10175_v4, 5  ;;  %v9645_v14 = vld [vmem:[%s9889_s24 + $0x30] sm:$0xff]   ;;  %v9648_v15 = vld [vmem:[%s12634_s1 + $0x228] sm:$0xff]   ;;  %v9647_v21 = vld [vmem:[%s9889_s24 + $0x3c] sm:$0xff]  }
  0x68   : > { %v1625_v26 = vsel %vm9938_vm5, %v1620_v17, %v1624_v11  ;;  %9148 = vmatprep.subr.bf16.mxu0 %v9628_v60  ;;  %v1658_v23 = vrot.slane %v1656_v25, 5  ;;  %v1914_v2 = vrot.slane %v10178_v5, 5  ;;  %v9643_v11 = vld [vmem:[%s9889_s24 + $0x24] sm:$0xff]   ;;  %v1921_v5 = vrot.slane %v10199_v46, 5  ;;  %v9651_v17 = vld [vmem:[%s9889_s24 + $0x3c] sm:$0xff]  }
  0x69   : > { %9053 = vmatpush3.bf16.msra.mxu1 %v9627_v49  ;;  %v1635_v43 = vsel %vm9938_vm5, %v1630_v28, %v1634_v39  ;;  %v1644_v44 = vrot.slane %v1643_v0, 4  ;;  %v1653_v31 = vor.u32 %v1652_v32, %v1648_v20  ;;  %v1906_v49 = vrot.slane %v1904_v12, 4  ;;  %v9650_v28 = vld [vmem:[%s12634_s1 + $0x220] sm:$0xff]   ;;  %v9653_v32 = vld [vmem:[%s9889_s24 + $0x48] sm:$0xff]  }
  0x6a   : > { %9054 = vmatprep.subr.bf16.mxu1 %v9631_v56  ;;  %v7590_v18 = vcombine.low %v1625_v26, %v1635_v43  ;;  %v1913_v54 = vrot.slane %v1911_v7, 4  ;;  %v1925_v33 = vrot.slane %v10209_v61, 5  ;;  %v1928_v39 = vrot.slane %v10214_v3, 5  ;;  %v9649_v3 = vld [vmem:[%s12634_s1 + $0x160] sm:$0xff]   ;;  %v9670_v61 = vld [vmem:[%s12634_s1 + $0x30] sm:$0xff]  }
  0x6b   : > { %9007 = vmatmul.mubr.bf16.gmra.mxu1 %v7447_v36  ;;  %9149 = vmatpush3.bf16.msra.mxu0 %v9628_v60  ;;  %v1649_v19 = vsel %vm9938_vm5, %v1644_v44, %v1648_v20  ;;  %v1654_v29 = vrot.slane %v1653_v31, 4  ;;  %v1907_v36 = vrot.slane %v10158_v47, 5  ;;  %v1918_v60 = vrot.slane %v10196_v9, 5  ;;  %v9655_v44 = vld [vmem:[%s9889_s24 + $0x54] sm:$0xff]   ;;  %v9665_v40 = vld [vmem:[%s12634_s1 + $0x140] sm:$0xff]  }
  0x6c   : > { %9058 = vmatprep.mubr.bf16.mxu1 %v9635_v30  ;;  %9102 = vmatprep.mubr.bf16.mxu0 %v7590_v18  ;;  %v10367_v62 = vsel %vm9914_vm4, %v1913_v54, %v1914_v2  ;;  %v1927_v10 = vrot.slane %v1925_v33, 4  ;;  %v1939_v20 = vrot.slane %v10259_v57, 5  ;;  %v1942_v25 = vrot.slane %v10262_v58, 5  ;;  %v9654_v30 = vld [vmem:[%s12634_s1 + $0x158] sm:$0xff]  }
  0x6d   : > { %9150 = vmatprep.subr.bf16.mxu0 %v9632_v27  ;;  %9055 = vmatpush3.bf16.msra.mxu1 %v9631_v56  ;;  %v1659_v48 = vsel %vm9938_vm5, %v1654_v29, %v1658_v23  ;;  %v10355_v47 = vsel %vm9914_vm4, %v1906_v49, %v1907_v36  ;;  %v9639_v56 = vld [vmem:[%s9889_s24 + $0x24] sm:$0xff]   ;;  %v1920_v63 = vrot.slane %v1918_v60, 4  ;;  %v1932_v58 = vrot.slane %v10245_v24, 5  ;;  %v9657_v23 = vld [vmem:[%s12634_s1 + $0x150] sm:$0xff]   ;;  %v7600_v36 = vld [vmem:[%s9889_s24 + $0xc] sm:$0xe] }
  0x6e   : > { %9056 = vmatprep.subr.bf16.mxu1 %v9633_v37  ;;  %v7591_v42 = vcombine.low %v1649_v19, %v1659_v48  ;;  %v10394_v16 = vsel %vm9914_vm4, %v1927_v10, %v1928_v39  ;;  %v1941_v0 = vrot.slane %v1939_v20, 4  ;;  %v1946_v43 = vrot.slane %v10282_v35, 5  ;;  %v9659_v31 = vld [vmem:[%s9889_s24 + $0x54] sm:$0xff]   ;;  %v9661_v49 = vld [vmem:[%s9889_s24 + $0x60] sm:$0xff]   ;;  %v10466_v10 = vld [vmem:[%s9889_s24 + $0x28] sm:$0xf] }
  0x6f   : > { %9151 = vmatpush3.bf16.msra.mxu0 %v9632_v27  ;;  %v10380_v46 = vsel %vm9914_vm4, %v1920_v63, %v1921_v5  ;;  %v9652_v27 = vld [vmem:[%s9889_s24 + $0x48] sm:$0xff]   ;;  %v1935_v18 = vrot.slane %v10248_v13, 5  ;;  %v10430_v19 = vrot.slane %v1932_v58, 4  ;;  %v9658_v29 = vld [vmem:[%s12634_s1 + $0x210] sm:$0xff]   ;;  %v1949_v48 = vrot.slane %v10289_v45, 5 }
  0x70   : > { %9103 = vmatmul.mubr.bf16.gmra.mxu0 %v7591_v42  ;;  %9152 = vmatprep.subr.bf16.mxu0 %v9634_v38  ;;  %v10415_v26 = vsel %vm9914_vm4, %v1941_v0, %v1942_v25  ;;  %v10442_v42 = vld [vmem:[%s9889_s24 + $0x1c] sm:$0xf]  ;;  %v7752_v2 = vld [vmem:[%s9889_s24 + $0x18] sm:$0xe]  ;;  %v1953_v39 = vrot.slane %v10300_v8, 5 }
  0x71   : > { %9057 = vmatpush3.bf16.msra.mxu1 %v9633_v37  ;;  %9154 = vmatprep.mubr.bf16.mxu0 %v9636_v53  ;;  %v9656_v37 = vld [vmem:[%s12634_s1 + $0x218] sm:$0xff]   ;;  %v9662_v53 = vld [vmem:[%s12634_s1 + $0x148] sm:$0xff]   ;;  %v7760_v54 = vrot.slane %v7752_v2, 9  ;;  %v10509_v2 = vld [vmem:[%s9889_s24 + $0x40] sm:$0xf]  ;;  %v2449_v8 = vshrl.u32 %v10442_v42, 16 }
  0x72   : > { %9106 = vmatprep.subr.bf16.mxu1 %v9638_v34  ;;  %v7601_v5 = vld [vmem:[%s9889_s24 + $0x18] sm:$0xe]  ;;  %v1955_v24 = vrot.slane %v1953_v39, 4 }
  0x73   : > { %9153 = vmatpush3.bf16.msra.mxu0 %v9634_v38  ;;  %v9660_v38 = vld [vmem:[%s9889_s24 + $0x60] sm:$0xff]  }
  0x74   : > { %9059 = vmatmul.mubr.bf16.vlgmr.msra.gmra.mxu1 %v9637_v50  ;;  %9202 = vmatprep.subr.bf16.mxu0 %v9640_v52  ;;  %v7608_v50 = vrot.slane %v7600_v36, 9 }
  0x75   : > { %9107 = vmatpush3.bf16.msra.mxu1 %v9638_v34  ;;  %9062 = vmatprep.mubr.bf16.mxu1 %v9643_v11  ;;  %v10446_v34 = vrot.slane %v1946_v43, 4  ;;  %v2871_v11 = vrot.slane %v10442_v42, 5 }
  0x76   : > { %9108 = vmatprep.subr.bf16.mxu1 %v9641_v55  ;;  %v1905_v63 = vsel %vm9914_vm4, %v7608_v50, %v1904_v12 }
  0x78   : > { %9155 = vmatmul.mubr.bf16.vlgmr.msra.gmra.mxu0 %v9639_v56  ;;  %v9664_v56 = vld [vmem:[%s12634_s1 + $0x208] sm:$0xff]  }
  0x79   : > { %9203 = vmatpush3.bf16.msra.mxu0 %v9640_v52  ;;  %9109 = vmatpush3.bf16.msra.mxu1 %v9641_v55  ;;  %v10450_v52 = vld [vmem:[%s9889_s24 + $0x20] sm:$0x1] }
  0x7a   : > { %9204 = vmatprep.subr.bf16.mxu0 %v9642_v1  ;;  %9158 = vmatprep.mubr.bf16.mxu0 %v9644_v59  ;;  %v2874_v55 = vrot.slane %v10450_v52, 5  ;;  %v7609_v59 = vrot.slane %v7601_v5, 9  ;;  %v10520_v5 = vld [vmem:[%s9889_s24 + $0x44] sm:$0x1] }
  0x7b   : > { %9110 = vmatprep.subr.bf16.mxu1 %v9646_v6 }
  0x7c   : > { %9063 = vmatmul.mubr.bf16.gmra.mxu1 %v9645_v14  ;;  %v10469_v14 = vld [vmem:[%s9889_s24 + $0x2c] sm:$0x1]  ;;  %v1912_v12 = vsel %vm9914_vm4, %v7609_v59, %v1911_v7  ;;  %v7602_v7 = vld [vmem:[%s9889_s24 + $0x24] sm:$0xe]  ;;  %v1956_v59 = vrot.slane %v10304_v51, 5  ;;  %v9678_v51 = vld [vmem:[%s12634_s1 + $0x10] sm:$0xff]  }
  0x7d   : > { %9205 = vmatpush3.bf16.msra.mxu0 %v9642_v1  ;;  %9111 = vmatpush3.bf16.msra.mxu1 %v9646_v6  ;;  %v2873_v1 = vrot.slane %v2871_v11, 4  ;;  %v7632_v6 = vcombine.low %v1905_v63, %v10355_v47  ;;  %v2878_v47 = vrot.slane %v10466_v10, 5  ;;  %v7633_v25 = vcombine.low %v1912_v12, %v10367_v62  ;;  %v9666_v62 = vld [vmem:[%s12634_s1 + $0x200] sm:$0xff]  }
  0x7e   : > { %9206 = vmatprep.subr.bf16.mxu0 %v9648_v15  ;;  %9112 = vmatprep.subr.bf16.mxu1 %v9649_v3  ;;  %v2881_v0 = vrot.slane %v10469_v14, 5  ;;  %v2892_v63 = vrot.slane %v10509_v2, 5  ;;  %v2895_v12 = vrot.slane %v10520_v5, 5 }
  0x7f   : > { %9066 = vmatprep.mubr.bf16.mxu1 %v9651_v17  ;;  %v2872_v17 = vsel %vm9914_vm4, %v7760_v54, %v2871_v11  ;;  %v2880_v4 = vrot.slane %v2878_v47, 4 }
  0x80   : > { %9159 = vmatmul.mubr.bf16.gmra.mxu0 %v9647_v21  ;;  %v2875_v21 = vsel %vm9914_vm4, %v2873_v1, %v2874_v55  ;;  %v9668_v55 = vld [vmem:[%s12634_s1 + $0x38] sm:$0xff]  }
  0x81   : > { %9207 = vmatpush3.bf16.msra.mxu0 %v9648_v15  ;;  %9113 = vmatpush3.bf16.msra.mxu1 %v9649_v3  ;;  %v7753_v15 = vld [vmem:[%s9889_s24 + $0x24] sm:$0xe]  ;;  %v9663_v3 = vld [vmem:[%s9889_s24 + $0x6c] sm:$0xff]   ;;  %v2882_v54 = vsel %vm9914_vm4, %v2880_v4, %v2881_v0  ;;  %v7756_v4 = vld [vmem:[%s9889_s24 + $0x48] sm:$0xe] }
  0x82   : > { %9208 = vmatprep.subr.bf16.mxu0 %v9650_v28  ;;  %9162 = vmatprep.mubr.bf16.mxu0 %v9652_v27  ;;  %v10489_v27 = vld [vmem:[%s9889_s24 + $0x34] sm:$0xf] }
  0x83   : > { %9114 = vmatprep.subr.bf16.mxu1 %v9654_v30 }
  0x84   : > { %9067 = vmatmul.mubr.bf16.gmra.mxu1 %v9653_v32  ;;  %v7784_v32 = vcombine.low %v2872_v17, %v2875_v21  ;;  %v2894_v17 = vrot.slane %v2892_v63, 4  ;;  %v10546_v21 = vld [vmem:[%s9889_s24 + $0x4c] sm:$0xf] }
  0x85   : > { %9209 = vmatpush3.bf16.msra.mxu0 %v9650_v28  ;;  %9115 = vmatpush3.bf16.msra.mxu1 %v9654_v30  ;;  %v7761_v28 = vrot.slane %v7753_v15, 9  ;;  %v10492_v30 = vld [vmem:[%s9889_s24 + $0x38] sm:$0x1]  ;;  %v2899_v0 = vrot.slane %v10546_v21, 5 }
  0x86   : > { %9210 = vmatprep.subr.bf16.mxu0 %v9656_v37  ;;  %9116 = vmatprep.subr.bf16.mxu1 %v9657_v23 }
  0x87   : > { %9070 = vmatprep.mubr.bf16.mxu1 %v9659_v31  ;;  %v2885_v31 = vrot.slane %v10489_v27, 5  ;;  %v2879_v11 = vsel %vm9914_vm4, %v7761_v28, %v2878_v47  ;;  %v10549_v28 = vld [vmem:[%s9889_s24 + $0x50] sm:$0x1] }
  0x88   : > { %9163 = vmatmul.mubr.bf16.gmra.mxu0 %v9655_v44  ;;  %v7610_v44 = vrot.slane %v7602_v7, 9  ;;  %v7785_v47 = vcombine.low %v2879_v11, %v2882_v54  ;;  %v2902_v7 = vrot.slane %v10549_v28, 5 }
  0x89   : > { %9211 = vmatpush3.bf16.msra.mxu0 %v9656_v37  ;;  %9117 = vmatpush3.bf16.msra.mxu1 %v9657_v23  ;;  %v9667_v37 = vld [vmem:[%s12634_s1 + $0x1f8] sm:$0xff]   ;;  %v7754_v23 = vld [vmem:[%s9889_s24 + $0x30] sm:$0xe] }
  0x8a   : > { %9212 = vmatprep.subr.bf16.mxu0 %v9658_v29  ;;  %9166 = vmatprep.mubr.bf16.mxu0 %v9660_v38  ;;  %v2888_v38 = vrot.slane %v10492_v30, 5  ;;  %v1919_v36 = vsel %vm9914_vm4, %v7610_v44, %v1918_v60  ;;  %v7755_v60 = vld [vmem:[%s9889_s24 + $0x3c] sm:$0xe]  ;;  %v7764_v44 = vrot.slane %v7756_v4, 9 }
  0x8b   : > { %9118 = vmatprep.subr.bf16.mxu1 %v9662_v53  ;;  %v7634_v9 = vcombine.low %v1919_v36, %v10380_v46  ;;  %v9676_v4 = vld [vmem:[%s12634_s1 + $0x18] sm:$0xff]  }
  0x8c   : > { %9071 = vmatmul.mubr.bf16.gmra.mxu1 %v9661_v49  ;;  %v2887_v49 = vrot.slane %v2885_v31, 4 }
  0x8d   : > { %9213 = vmatpush3.bf16.msra.mxu0 %v9658_v29  ;;  %9119 = vmatpush3.bf16.msra.mxu1 %v9662_v53  ;;  %v7762_v29 = vrot.slane %v7754_v23, 9  ;;  %v7603_v53 = vld [vmem:[%s9889_s24 + $0x30] sm:$0xe] }
  0x8e   : > { %9214 = vmatprep.subr.bf16.mxu0 %v9664_v56  ;;  %9120 = vmatprep.subr.bf16.mxu1 %v9665_v40  ;;  %v7611_v50 = vrot.slane %v7603_v53, 9  ;;  %v7757_v53 = vld [vmem:[%s9889_s24 + $0x54] sm:$0xe] }
  0x8f   : > { %9122 = vmatprep.mubr.bf16.mxu1 %v7632_v6  ;;  %v2886_v1 = vsel %vm9914_vm4, %v7762_v29, %v2885_v31  ;;  %v2889_v6 = vsel %vm9914_vm4, %v2887_v49, %v2888_v38  ;;  %v2901_v31 = vrot.slane %v2899_v0, 4  ;;  %v10565_v29 = vld [vmem:[%s9889_s24 + $0x58] sm:$0xf]  ;;  %v10568_v38 = vld [vmem:[%s9889_s24 + $0x5c] sm:$0x1]  ;;  %v9673_v49 = vld [vmem:[%s12634_s1 + $0x1e0] sm:$0xff]  }
  0x90   : > { %9167 = vmatmul.mubr.bf16.gmra.mxu0 %v9663_v3  ;;  %v1926_v46 = vsel %vm9914_vm4, %v7611_v50, %v1925_v33  ;;  %v7604_v33 = vld [vmem:[%s9889_s24 + $0x3c] sm:$0xe]  ;;  %v9671_v3 = vld [vmem:[%s12634_s1 + $0x1e8] sm:$0xff]   ;;  %v2906_v36 = vrot.slane %v10565_v29, 5  ;;  %v2909_v57 = vrot.slane %v10568_v38, 5 }
  0x91   : > { %9215 = vmatpush3.bf16.msra.mxu0 %v9664_v56  ;;  %9121 = vmatpush3.bf16.msra.mxu1 %v9665_v40  ;;  %v9669_v56 = vld [vmem:[%s12634_s1 + $0x1f0] sm:$0xff]   ;;  %v7635_v15 = vcombine.low %v1926_v46, %v10394_v16  ;;  %v7763_v40 = vrot.slane %v7755_v60, 9  ;;  %v7612_v16 = vrot.slane %v7604_v33, 9  ;;  %v2903_v54 = vsel %vm9914_vm4, %v2901_v31, %v2902_v7  ;;  %v10602_v46 = vld [vmem:[%s9889_s24 + $0x68] sm:$0x1] }
  0x92   : > { %9216 = vmatprep.subr.bf16.mxu0 %v9666_v62  ;;  %9218 = vmatprep.mubr.bf16.mxu0 %v7784_v32  ;;  %v7607_v33 = vld [vmem:[%s9889_s24 + $0x60] sm:$0xe]  ;;  %v1950_v7 = vsel %vm9914_vm4, %v10446_v34, %v1949_v48  ;;  %v9677_v34 = vld [vmem:[%s12634_s1 + $0x1d0] sm:$0xff]  }
  0x93   : > { %9170 = vmatprep.subr.bf16.mxu1 %v9667_v37  ;;  %v1933_v32 = vsel %vm9914_vm4, %v7612_v16, %v1932_v58  ;;  %v2893_v13 = vsel %vm9914_vm4, %v7763_v40, %v2892_v63  ;;  %v2896_v58 = vsel %vm9914_vm4, %v2894_v17, %v2895_v12  ;;  %v9674_v63 = vld [vmem:[%s12634_s1 + $0x20] sm:$0xff]  }
  0x94   : > { %9123 = vmatmul.mubr.bf16.vlgmr.msra.gmra.mxu1 %v7633_v25  ;;  %v7786_v25 = vcombine.low %v2886_v1, %v2889_v6  ;;  %v7787_v60 = vcombine.low %v2893_v13, %v2896_v58  ;;  %v7758_v6 = vld [vmem:[%s9889_s24 + $0x60] sm:$0xe] }
  0x95   : > { %9217 = vmatpush3.bf16.msra.mxu0 %v9666_v62  ;;  %9171 = vmatpush3.bf16.msra.mxu1 %v9667_v37  ;;  %v7605_v62 = vld [vmem:[%s9889_s24 + $0x48] sm:$0xe]  ;;  %v1936_v37 = vsel %vm9914_vm4, %v10430_v19, %v1935_v18  ;;  %v7766_v12 = vrot.slane %v7758_v6, 9 }
  0x96   : > { %9266 = vmatprep.subr.bf16.mxu0 %v9668_v55  ;;  %9172 = vmatprep.subr.bf16.mxu1 %v9669_v56  ;;  %v7613_v23 = vrot.slane %v7605_v62, 9  ;;  %v9672_v18 = vld [vmem:[%s12634_s1 + $0x28] sm:$0xff]   ;;  %v7636_v50 = vcombine.low %v1933_v32, %v1936_v37  ;;  %v10628_v62 = vld [vmem:[%s9889_s24 + $0x70] sm:$0xf]  ;;  %v10631_v32 = vld [vmem:[%s9889_s24 + $0x74] sm:$0x1] }
  0x97   : > { %9126 = vmatprep.mubr.bf16.mxu1 %v7634_v9  ;;  %v2908_v9 = vrot.slane %v2906_v36, 4  ;;  %v7759_v37 = vld [vmem:[%s9889_s24 + $0x6c] sm:$0xe]  ;;  %v2920_v45 = vrot.slane %v10628_v62, 5  ;;  %v2923_v31 = vrot.slane %v10631_v32, 5 }
  0x98   : > { %9219 = vmatmul.mubr.bf16.vlgmr.msra.gmra.mxu0 %v7785_v47  ;;  %v1940_v19 = vsel %vm9914_vm4, %v7613_v23, %v1939_v20  ;;  %v2900_v20 = vsel %vm9914_vm4, %v7764_v44, %v2899_v0  ;;  %v2916_v47 = vrot.slane %v10602_v46, 5  ;;  %v1957_v23 = vsel %vm9914_vm4, %v1955_v24, %v1956_v59  ;;  %v7696_v24 = vld [vmem:[%s9889_s24 + $0x18] sm:$0xf] }
  0x99   : > { %9267 = vmatpush3.bf16.msra.mxu0 %v9668_v55  ;;  %9173 = vmatpush3.bf16.msra.mxu1 %v9669_v56  ;;  %v7637_v11 = vcombine.low %v1940_v19, %v10415_v26  ;;  %v7765_v55 = vrot.slane %v7757_v53, 9  ;;  %v7606_v26 = vld [vmem:[%s9889_s24 + $0x54] sm:$0xe]  ;;  %v10599_v56 = vld [vmem:[%s9889_s24 + $0x64] sm:$0xf]  ;;  %v2910_v17 = vsel %vm9914_vm4, %v2908_v9, %v2909_v57  ;;  %v2922_v19 = vrot.slane %v2920_v45, 4 }
  0x9a   : > { %9268 = vmatprep.subr.bf16.mxu0 %v9670_v61  ;;  %9222 = vmatprep.mubr.bf16.mxu0 %v7786_v25  ;;  %v7614_v1 = vrot.slane %v7606_v26, 9  ;;  %v2913_v40 = vrot.slane %v10599_v56, 5  ;;  %v7615_v25 = vrot.slane %v7607_v33, 9  ;;  %v2445_v53 = vshll.u32 %v10442_v42, 16  ;;  %v10670_v57 = vld [vmem:[%s9889_s24 + $0x60] sm:$0xf] }
  0x9b   : > { %9174 = vmatprep.subr.bf16.mxu1 %v9671_v3  ;;  %v2469_v42 = vshll.u32 %v10466_v10, 16  ;;  %v10676_v9 = vld [vmem:[%s9889_s24 + $0x64] sm:$0xf]  ;;  %v3320_v6 = vshll.u32 %v10670_v57, 16 }
  0x9c   : > { %9127 = vmatmul.mubr.bf16.gmra.mxu1 %v7635_v15  ;;  %v7788_v15 = vcombine.low %v2900_v20, %v2903_v54  ;;  %v2915_v16 = vrot.slane %v2913_v40, 4  ;;  %v1947_v0 = vsel %vm9914_vm4, %v7614_v1, %v1946_v43  ;;  %v2914_v44 = vsel %vm9914_vm4, %v7766_v12, %v2913_v40  ;;  %v9680_v40 = vld [vmem:[%s12634_s1 + $0x8] sm:$0xff]  }
  0x9d   : > { %9269 = vmatpush3.bf16.msra.mxu0 %v9670_v61  ;;  %9175 = vmatpush3.bf16.msra.mxu1 %v9671_v3  ;;  %v9675_v61 = vld [vmem:[%s12634_s1 + $0x1d8] sm:$0xff]   ;;  %v2907_v3 = vsel %vm9914_vm4, %v7765_v55, %v2906_v36  ;;  %v7767_v43 = vrot.slane %v7759_v37, 9  ;;  %v7638_v13 = vcombine.low %v1947_v0, %v1950_v7  ;;  %v1954_v58 = vsel %vm9914_vm4, %v7615_v25, %v1953_v39  ;;  %v9679_v36 = vld [vmem:[%s12634_s1 + $0x1c8] sm:$0xff]  }
  0x9e   : > { %9270 = vmatprep.subr.bf16.mxu0 %v9672_v18  ;;  %9176 = vmatprep.subr.bf16.mxu1 %v9673_v49  ;;  %v2917_v35 = vsel %vm9914_vm4, %v2915_v16, %v2916_v47  ;;  %v7789_v48 = vcombine.low %v2907_v3, %v2910_v17  ;;  %v2455_v39 = vshll.u32 %v10450_v52, 16  ;;  %v7639_v52 = vcombine.low %v1954_v58, %v1957_v23  ;;  %v10693_v0 = vld [vmem:[%s9889_s24 + $0x6c] sm:$0xf] }
  0x9f   : > { %9130 = vmatprep.mubr.bf16.mxu1 %v7636_v50  ;;  %v7790_v59 = vcombine.low %v2914_v44, %v2917_v35  ;;  %v2436_v50 = vshrl.u32 %v7696_v24, 16  ;;  %v2447_v54 = vrot.slane %v2445_v53, 5  ;;  %v2451_v55 = vrot.slane %v2449_v8, 4 }
  0xa0   : > { %9223 = vmatmul.mubr.bf16.gmra.mxu0 %v7787_v60  ;;  %v7699_v60 = vld [vmem:[%s9889_s24 + $0x24] sm:$0xf]  ;;  %v3317_v1 = vshrl.u32 %v10670_v57, 16  ;;  %v2457_v12 = vrot.slane %v2455_v39, 5  ;;  %v3330_v47 = vshrl.u32 %v10676_v9, 16  ;;  %v10690_v16 = vrot.slane %v3320_v6, 5 }
  0xa1   : > { %9271 = vmatpush3.bf16.msra.mxu0 %v9672_v18  ;;  %9177 = vmatpush3.bf16.msra.mxu1 %v9673_v49  ;;  %v10653_v18 = vsel %vm9914_vm4, %v7767_v43, %v2920_v45  ;;  %v10667_v49 = vsel %vm9914_vm4, %v2922_v19, %v2923_v31  ;;  %v2460_v33 = vshrl.u32 %v7699_v60, 16  ;;  %v2463_v25 = vshll.u32 %v7699_v60, 16 }
  0xa2   : > { %9272 = vmatprep.subr.bf16.mxu0 %v9674_v63  ;;  %9226 = vmatprep.mubr.bf16.mxu0 %v7788_v15  ;;  %v7791_v20 = vcombine.low %v10653_v18, %v10667_v49  ;;  %v2452_v15 = vor.u32 %v2451_v55, %v2447_v54  ;;  %v10688_v17 = vrot.slane %v3317_v1, 4  ;;  %v2471_v44 = vrot.slane %v2469_v42, 5  ;;  %v7820_v42 = vld [vmem:[%s9889_s24 + $0x78] sm:$0xf] }
  0xa3   : > { %9178 = vmatprep.subr.bf16.mxu1 %v9675_v61  ;;  %v2462_v37 = vrot.slane %v2460_v33, 4  ;;  %v2465_v43 = vrot.slane %v2463_v25, 5  ;;  %v2479_v45 = vshll.u32 %v10469_v14, 16  ;;  %v7872_v31 = vcombine.low %v10670_v57, %v10676_v9 }
  0xa4   : > { %9131 = vmatmul.mubr.bf16.gmra.mxu1 %v7637_v11  ;;  %v2439_v11 = vshll.u32 %v7696_v24, 16  ;;  %v2453_v7 = vrot.slane %v2452_v15, 4  ;;  %v3344_v58 = vshll.u32 %v10693_v0, 16  ;;  %v2493_v57 = vshll.u32 %v10489_v27, 16  ;;  %v7705_v15 = vld [vmem:[%s9889_s24 + $0x3c] sm:$0xf] }
  0xa5   : > { %9273 = vmatpush3.bf16.msra.mxu0 %v9674_v63  ;;  %9179 = vmatpush3.bf16.msra.mxu1 %v9675_v61  ;;  %v2438_v63 = vrot.slane %v2436_v50, 4  ;;  %v9681_v61 = vld [vmem:[%s12634_s1 + $0x1c0] sm:$0xff]   ;;  %v2466_v18 = vor.u32 %v2465_v43, %v2462_v37  ;;  %v2481_v19 = vrot.slane %v2479_v45, 5  ;;  %v2503_v55 = vshll.u32 %v10492_v30, 16  ;;  %v9688_v45 = vld [vmem:[%s12634_s1 + $0xf0] sm:$0xff]  }
  0xa6   : > { %9274 = vmatprep.subr.bf16.mxu0 %v9676_v4  ;;  %9180 = vmatprep.subr.bf16.mxu1 %v9677_v34  ;;  %v2441_v26 = vrot.slane %v2439_v11, 5  ;;  %v2458_v23 = vsel %vm9938_vm5, %v2453_v7, %v2457_v12  ;;  %v3365_v60 = vshrl.u32 %v7820_v42, 16  ;;  %v10733_v12 = vld [vmem:[%s9889_s24 + $0x7c] sm:$0xf]  ;;  %v3368_v7 = vshll.u32 %v7820_v42, 16 }
  0xa7   : > { %9134 = vmatprep.mubr.bf16.mxu1 %v7638_v13  ;;  %v2467_v49 = vrot.slane %v2466_v18, 4  ;;  %v10743_v43 = vld [vmem:[%s9889_s24 + $0x84] sm:$0xf] }
  0xa8   : > { %9227 = vmatmul.mubr.bf16.gmra.mxu0 %v7789_v48  ;;  %v2442_v3 = vor.u32 %v2441_v26, %v2438_v63  ;;  %v3341_v48 = vshrl.u32 %v10693_v0, 16  ;;  %v9686_v26 = vld [vmem:[%s12634_s1 + $0xf8] sm:$0xff]   ;;  %v10738_v25 = vrot.slane %v3365_v60, 4 }
  0xa9   : > { %9275 = vmatpush3.bf16.msra.mxu0 %v9676_v4  ;;  %9181 = vmatpush3.bf16.msra.mxu1 %v9677_v34  ;;  %v2473_v4 = vshrl.u32 %v10466_v10, 16  ;;  %v9682_v34 = vld [vmem:[%s12634_s1] sm:$0xff]   ;;  %v10706_v10 = vld [vmem:[%s9889_s24 + $0x70] sm:$0xf]  ;;  %v2472_v63 = vsel %vm9938_vm5, %v2467_v49, %v2471_v44  ;;  %v10763_v49 = vrot.slane %v3368_v7, 5  ;;  %v2551_v7 = vshll.u32 %v10549_v28, 16 }
  0xaa   : > { %9276 = vmatprep.subr.bf16.mxu0 %v9678_v51  ;;  %9230 = vmatprep.mubr.bf16.mxu0 %v7790_v59  ;;  %v2443_v35 = vrot.slane %v2442_v3, 4  ;;  %v9684_v59 = vld [vmem:[%s12634_s1 + $0x78] sm:$0xff]   ;;  %v3354_v24 = vshrl.u32 %v10706_v10, 16  ;;  %v10715_v39 = vrot.slane %v3341_v48, 4  ;;  %v7873_v37 = vcombine.low %v10693_v0, %v10706_v10  ;;  %v9694_v28 = vld [vmem:[%s12634_s1 + $0xe0] sm:$0xff]  }
  0xab   : > { %9182 = vmatprep.subr.bf16.mxu1 %v9679_v36  ;;  %v2475_v13 = vrot.slane %v2473_v4, 4  ;;  %v2508_v4 = vshrl.u32 %v7705_v15, 16 }
  0xac   : > { %9135 = vmatmul.mubr.bf16.gmra.mxu1 %v7639_v52  ;;  %v2448_v14 = vsel %vm9938_vm5, %v2443_v35, %v2447_v54  ;;  %v2497_v54 = vshrl.u32 %v10489_v27, 16  ;;  %v2511_v35 = vshll.u32 %v7705_v15, 16 }
  0xad   : > { %9277 = vmatpush3.bf16.msra.mxu0 %v9678_v51  ;;  %9183 = vmatpush3.bf16.msra.mxu1 %v9679_v36  ;;  %v7736_v53 = vcombine.low %v2448_v14, %v2458_v23  ;;  %v2476_v8 = vor.u32 %v2475_v13, %v2471_v44  ;;  %v10717_v51 = vrot.slane %v3344_v58, 5  ;;  %v7702_v36 = vld [vmem:[%s9889_s24 + $0x30] sm:$0xf]  ;;  %v7874_v23 = vcombine.low %v7820_v42, %v10733_v12  ;;  %v10752_v58 = vld [vmem:[%s9889_s24 + $0x88] sm:$0xf] }
  0xae   : > { %9278 = vmatprep.subr.bf16.mxu0 %v9680_v40  ;;  %9184 = vmatprep.subr.bf16.mxu1 %v9681_v61  ;;  %v2484_v50 = vshrl.u32 %v7702_v36, 16  ;;  %v2487_v11 = vshll.u32 %v7702_v36, 16  ;;  %v2499_v30 = vrot.slane %v2497_v54, 4  ;;  %v2521_v13 = vshrl.u32 %v10509_v2, 16  ;;  %v9692_v54 = vld [vmem:[%s12634_s1 + $0xe8] sm:$0xff]  }
  0xaf   : > { %9186 = vmatprep.mubr.bf16.mxu1 %v7736_v53  ;;  %v2477_v52 = vrot.slane %v2476_v8, 4  ;;  %v2510_v14 = vrot.slane %v2508_v4, 4  ;;  %v2513_v18 = vrot.slane %v2511_v35, 5  ;;  %v3389_v36 = vshrl.u32 %v10743_v43, 16 }
  0xb0   : > { %9231 = vmatmul.mubr.bf16.gmra.mxu0 %v7791_v20  ;;  %v2486_v1 = vrot.slane %v2484_v50, 4  ;;  %v2489_v6 = vrot.slane %v2487_v11, 5  ;;  %v2495_v20 = vrot.slane %v2493_v57, 5  ;;  %v2523_v8 = vrot.slane %v2521_v13, 4 }
  0xb1   : > { %9279 = vmatpush3.bf16.msra.mxu0 %v9680_v40  ;;  %9185 = vmatpush3.bf16.msra.mxu1 %v9681_v61  ;;  %v2482_v27 = vsel %vm9938_vm5, %v2477_v52, %v2481_v19  ;;  %v2505_v40 = vrot.slane %v2503_v55, 5  ;;  %v9687_v61 = vld [vmem:[%s12634_s1 + $0x70] sm:$0xff]   ;;  %v2514_v50 = vor.u32 %v2513_v18, %v2510_v14  ;;  %v3392_v52 = vshll.u32 %v10743_v43, 16  ;;  %v7708_v55 = vld [vmem:[%s9889_s24 + $0x48] sm:$0xf] }
  0xb2   : > { %9280 = vmatprep.subr.bf16.mxu0 %v9682_v34  ;;  %9282 = vmatprep.mubr.bf16.mxu0 %v7872_v31  ;;  %v7737_v33 = vcombine.low %v2472_v63, %v2482_v27  ;;  %v2490_v3 = vor.u32 %v2489_v6, %v2486_v1  ;;  %v2500_v44 = vor.u32 %v2499_v30, %v2495_v20  ;;  %v2517_v31 = vshll.u32 %v10509_v2, 16  ;;  %v9690_v2 = vld [vmem:[%s12634_s1 + $0x68] sm:$0xff]   ;;  %v9693_v1 = vld [vmem:[%s12634_s1 + $0x60] sm:$0xff]  }
  0xb3   : > { %9234 = vmatprep.subr.bf16.mxu1 %v9684_v59  ;;  %v2515_v60 = vrot.slane %v2514_v50, 4  ;;  %v10771_v63 = vrot.slane %v3389_v36, 4  ;;  %v2532_v6 = vshrl.u32 %v7708_v55, 16  ;;  %v2535_v27 = vshll.u32 %v7708_v55, 16  ;;  %v9698_v50 = vld [vmem:[%s12634_s1 + $0xd8] sm:$0xff]  }
  0xb4   : > { %9187 = vmatmul.mubr.bf16.vlgmr.msra.gmra.mxu1 %v7737_v33  ;;  %v2491_v48 = vrot.slane %v2490_v3, 4  ;;  %v2501_v0 = vrot.slane %v2500_v44, 4  ;;  %v2519_v53 = vrot.slane %v2517_v31, 5  ;;  %v2541_v30 = vshll.u32 %v10546_v21, 16  ;;  %v10782_v33 = vld [vmem:[%s9889_s24 + $0x94] sm:$0xf] }
  0xb5   : > { %9281 = vmatpush3.bf16.msra.mxu0 %v9682_v34  ;;  %9235 = vmatpush3.bf16.msra.mxu1 %v9684_v59  ;;  %v2527_v34 = vshll.u32 %v10520_v5, 16  ;;  %v3378_v5 = vshrl.u32 %v10733_v12, 16  ;;  %v2534_v3 = vrot.slane %v2532_v6, 4  ;;  %v7711_v44 = vld [vmem:[%s9889_s24 + $0x54] sm:$0xf]  ;;  %v2537_v35 = vrot.slane %v2535_v27, 5 }
  0xb6   : > { %9330 = vmatprep.subr.bf16.mxu0 %v9686_v26  ;;  %9236 = vmatprep.subr.bf16.mxu1 %v9687_v61  ;;  %v2496_v19 = vsel %vm9938_vm5, %v2491_v48, %v2495_v20  ;;  %v2506_v59 = vsel %vm9938_vm5, %v2501_v0, %v2505_v40  ;;  %v2524_v57 = vor.u32 %v2523_v8, %v2519_v53  ;;  %v7824_v20 = vld [vmem:[%s9889_s24 + $0x90] sm:$0xf]  ;;  %v2545_v40 = vshrl.u32 %v10546_v21, 16 }
  0xb7   : > { %v7738_v11 = vcombine.low %v2496_v19, %v2506_v59  ;;  %v2529_v42 = vrot.slane %v2527_v34, 5  ;;  %v10790_v21 = vrot.slane %v3392_v52, 5  ;;  %v3402_v31 = vshrl.u32 %v10752_v58, 16  ;;  %v9696_v34 = vld [vmem:[%s12634_s1 + $0x58] sm:$0xff]   ;;  %v10805_v59 = vld [vmem:[%s9889_s24 + $0xa0] sm:$0xf] }
  0xb8   : > { %9283 = vmatmul.mubr.bf16.vlgmr.msra.gmra.mxu0 %v7873_v37  ;;  %v2525_v15 = vrot.slane %v2524_v57, 4  ;;  %v3413_v37 = vshrl.u32 %v7824_v20, 16  ;;  %v2547_v48 = vrot.slane %v2545_v40, 4  ;;  %v2538_v13 = vor.u32 %v2537_v35, %v2534_v3  ;;  %v7826_v19 = vld [vmem:[%s9889_s24 + $0x9c] sm:$0xf] }
  0xb9   : > { %9331 = vmatpush3.bf16.msra.mxu0 %v9686_v26  ;;  %9286 = vmatprep.mubr.bf16.mxu0 %v7874_v23  ;;  %v7875_v26 = vcombine.low %v10743_v43, %v10752_v58  ;;  %v2543_v43 = vrot.slane %v2541_v30, 5  ;;  %v7876_v18 = vcombine.low %v7824_v20, %v10782_v33  ;;  %v2556_v8 = vshrl.u32 %v7711_v44, 16  ;;  %v7828_v35 = vld [vmem:[%s9889_s24 + $0xa8] sm:$0xf] }
  0xba   : > { %9332 = vmatprep.subr.bf16.mxu0 %v9688_v45  ;;  %9237 = vmatpush3.bf16.msra.mxu1 %v9687_v61  ;;  %v2520_v61 = vsel %vm9938_vm5, %v2515_v60, %v2519_v53  ;;  %v2530_v4 = vsel %vm9938_vm5, %v2525_v15, %v2529_v42  ;;  %v10796_v14 = vrot.slane %v3413_v37, 4  ;;  %v3416_v53 = vshll.u32 %v7824_v20, 16  ;;  %v9699_v20 = vld [vmem:[%s12634_s1 + $0x50] sm:$0xff]  }
  0xbb   : > { %9190 = vmatprep.mubr.bf16.mxu1 %v7738_v11  ;;  %9238 = vmatprep.subr.bf16.mxu1 %v9690_v2  ;;  %v7739_v23 = vcombine.low %v2520_v61, %v2530_v4  ;;  %v2548_v0 = vor.u32 %v2547_v48, %v2543_v43  ;;  %v2565_v36 = vshll.u32 %v10565_v29, 16  ;;  %v2539_v11 = vrot.slane %v2538_v13, 4  ;;  %v7714_v61 = vld [vmem:[%s9889_s24 + $0x60] sm:$0xf]  ;;  %v10832_v13 = vld [vmem:[%s9889_s24 + $0xac] sm:$0xf] }
  0xbc   : > { %v2569_v42 = vshrl.u32 %v10565_v29, 16  ;;  %v2575_v52 = vshll.u32 %v10568_v38, 16  ;;  %v2558_v55 = vrot.slane %v2556_v8, 4  ;;  %v3437_v6 = vshrl.u32 %v7826_v19, 16 }
  0xbd   : > { %9333 = vmatpush3.bf16.msra.mxu0 %v9688_v45  ;;  %v2553_v45 = vrot.slane %v2551_v7, 5  ;;  %9191 = vmatmul.mubr.bf16.gmra.mxu1 %v7739_v23  ;;  %v2549_v57 = vrot.slane %v2548_v0, 4  ;;  %v3426_v38 = vshrl.u32 %v10782_v33, 16  ;;  %v10820_v27 = vrot.slane %v3416_v53, 5 }
  0xbe   : > { %9334 = vmatprep.subr.bf16.mxu0 %v9692_v54  ;;  %9239 = vmatpush3.bf16.msra.mxu1 %v9690_v2  ;;  %v2559_v2 = vshll.u32 %v7711_v44, 16  ;;  %v2571_v15 = vrot.slane %v2569_v42, 4  ;;  %v2577_v40 = vrot.slane %v2575_v52, 5  ;;  %v3440_v7 = vshll.u32 %v7826_v19, 16  ;;  %v9700_v44 = vld [vmem:[%s12634_s1 + $0xd0] sm:$0xff]   ;;  %v9704_v52 = vld [vmem:[%s12634_s1 + $0xc8] sm:$0xff]  }
  0xbf   : > { %9240 = vmatprep.subr.bf16.mxu1 %v9693_v1  ;;  %v2554_v29 = vsel %vm9938_vm5, %v2549_v57, %v2553_v45  ;;  %v7877_v37 = vcombine.low %v7826_v19, %v10805_v59  ;;  %v2580_v4 = vshrl.u32 %v7714_v61, 16  ;;  %v10828_v48 = vrot.slane %v3437_v6, 4  ;;  %v9702_v57 = vld [vmem:[%s12634_s1 + $0x48] sm:$0xff]  }
  0xc0   : > { %9287 = vmatmul.mubr.bf16.gmra.mxu0 %v7875_v26  ;;  %v2561_v60 = vrot.slane %v2559_v2, 5  ;;  %v2567_v26 = vrot.slane %v2565_v36, 5  ;;  %v2583_v23 = vshll.u32 %v7714_v61, 16  ;;  %v2589_v45 = vshll.u32 %v10599_v56, 16 }
  0xc1   : > { %9335 = vmatpush3.bf16.msra.mxu0 %v9692_v54  ;;  %9290 = vmatprep.mubr.bf16.mxu0 %v7876_v18  ;;  %v2544_v54 = vsel %vm9938_vm5, %v2539_v11, %v2543_v43  ;;  %v2582_v18 = vrot.slane %v2580_v4, 4  ;;  %v2593_v19 = vshrl.u32 %v10599_v56, 16  ;;  %v2599_v53 = vshll.u32 %v10602_v46, 16 }
  0xc2   : > { %9336 = vmatprep.subr.bf16.mxu0 %v9694_v28  ;;  %9241 = vmatpush3.bf16.msra.mxu1 %v9693_v1  ;;  %v7740_v1 = vcombine.low %v2544_v54, %v2554_v29  ;;  %v2562_v30 = vor.u32 %v2561_v60, %v2558_v55  ;;  %v2572_v3 = vor.u32 %v2571_v15, %v2567_v26  ;;  %v2585_v2 = vrot.slane %v2583_v23, 5  ;;  %v10851_v54 = vld [vmem:[%s9889_s24 + $0xb4] sm:$0xf]  ;;  %v9705_v29 = vld [vmem:[%s12634_s1 + $0x40] sm:$0xff]  }
  0xc3   : > { %9242 = vmatprep.subr.bf16.mxu1 %v9696_v34  ;;  %v2591_v36 = vrot.slane %v2589_v45, 5  ;;  %v3461_v11 = vshrl.u32 %v7828_v35, 16  ;;  %v10844_v42 = vrot.slane %v3440_v7, 5  ;;  %v3450_v56 = vshrl.u32 %v10805_v59, 16 }
  0xc4   : > { %9194 = vmatprep.mubr.bf16.mxu1 %v7740_v1  ;;  %v2563_v43 = vrot.slane %v2562_v30, 4  ;;  %v2573_v0 = vrot.slane %v2572_v3, 4  ;;  %v2595_v46 = vrot.slane %v2593_v19, 4  ;;  %v2586_v60 = vor.u32 %v2585_v2, %v2582_v18 }
  0xc5   : > { %9337 = vmatpush3.bf16.msra.mxu0 %v9694_v28  ;;  %v7717_v28 = vld [vmem:[%s9889_s24 + $0x6c] sm:$0xf]  ;;  %v3464_v6 = vshll.u32 %v7828_v35, 16  ;;  %v7878_v1 = vcombine.low %v7828_v35, %v10832_v13  ;;  %v2613_v3 = vshll.u32 %v10628_v62, 16  ;;  %v2617_v7 = vshrl.u32 %v10628_v62, 16  ;;  %v9706_v62 = vld [vmem:[%s12634_s1 + $0xc0] sm:$0xff]  }
  0xc6   : > { %9338 = vmatprep.subr.bf16.mxu0 %v9698_v50  ;;  %9243 = vmatpush3.bf16.msra.mxu1 %v9696_v34  ;;  %v2568_v8 = vsel %vm9938_vm5, %v2563_v43, %v2567_v26  ;;  %v2578_v34 = vsel %vm9938_vm5, %v2573_v0, %v2577_v40  ;;  %v2601_v26 = vrot.slane %v2599_v53, 5  ;;  %v2596_v15 = vor.u32 %v2595_v46, %v2591_v36  ;;  %v10877_v53 = vld [vmem:[%s9889_s24 + $0x68] sm:$0x1]  ;;  %v10885_v46 = vld [vmem:[%s12634_s1 + $0xb8] sm:$0xff]  }
  0xc7   : > { %9244 = vmatprep.subr.bf16.mxu1 %v9699_v20  ;;  %v7741_v55 = vcombine.low %v2568_v8, %v2578_v34  ;;  %v2604_v30 = vshrl.u32 %v7717_v28, 16  ;;  %v2587_v40 = vrot.slane %v2586_v60, 4  ;;  %v2607_v61 = vshll.u32 %v7717_v28, 16  ;;  %v9707_v8 = vld [vmem:[%s9889_s24 + $0x6c] sm:$0xff]  }
  0xc8   : > { %9291 = vmatmul.mubr.bf16.gmra.mxu0 %v7877_v37  ;;  %v10862_v37 = vld [vmem:[%s9889_s24 + $0xb8] sm:$0xf]  ;;  %v2597_v4 = vrot.slane %v2596_v15, 4  ;;  %v2623_v43 = vshll.u32 %v10631_v32, 16  ;;  %v3485_v35 = vshrl.u32 %v10851_v54, 16  ;;  %v2615_v28 = vrot.slane %v2613_v3, 5 }
  0xc9   : > { %9339 = vmatpush3.bf16.msra.mxu0 %v9698_v50  ;;  %v10856_v50 = vrot.slane %v3461_v11, 4  ;;  %9195 = vmatmul.mubr.bf16.gmra.mxu1 %v7741_v55  ;;  %v2592_v23 = vsel %vm9938_vm5, %v2587_v40, %v2591_v36  ;;  %v2609_v45 = vrot.slane %v2607_v61, 5  ;;  %v2619_v0 = vrot.slane %v2617_v7, 4  ;;  %v9710_v61 = vld [vmem:[%s12634_s1 + $0x178] sm:$0xff]  }
  0xca   : > { %9340 = vmatprep.subr.bf16.mxu0 %v9700_v44  ;;  %9245 = vmatpush3.bf16.msra.mxu1 %v9699_v20  ;;  %v2606_v20 = vrot.slane %v2604_v30, 4  ;;  %v10873_v18 = vrot.slane %v3464_v6, 5  ;;  %v3474_v32 = vshrl.u32 %v10832_v13, 16  ;;  %v2625_v19 = vrot.slane %v2623_v43, 5  ;;  %v10894_v6 = vld [vmem:[%s9889_s24 + $0x74] sm:$0x1] }
  0xcb   : > { %9246 = vmatprep.subr.bf16.mxu1 %v9702_v57  ;;  %9294 = vmatprep.mubr.bf16.mxu0 %v7878_v1  ;;  %v2620_v11 = vor.u32 %v2619_v0, %v2615_v28  ;;  %v10880_v34 = vrot.slane %v3485_v35, 4  ;;  %v3488_v55 = vshll.u32 %v10851_v54, 16  ;;  %v7879_v60 = vcombine.low %v10851_v54, %v10862_v37 }
  0xcc   : > { %v2610_v36 = vor.u32 %v2609_v45, %v2606_v20  ;;  %v3332_v30 = vrot.slane %v3330_v47, 4  ;;  %v3336_v40 = vshll.u32 %v10877_v53, 16  ;;  %v3356_v3 = vrot.slane %v3354_v24, 4  ;;  %v9709_v20 = vld [vmem:[%s9889_s24 + $0x78] sm:$0xff]   ;;  %v10920_v45 = vld [vmem:[%s9889_s24 + $0x80] sm:$0x1] }
  0xcd   : > { %9341 = vmatpush3.bf16.msra.mxu0 %v9700_v44  ;;  %v2602_v44 = vsel %vm9938_vm5, %v2597_v4, %v2601_v26  ;;  %v3326_v26 = vshll.u32 %v10676_v9, 16  ;;  %v2621_v1 = vrot.slane %v2620_v11, 4  ;;  %v3360_v35 = vshll.u32 %v10894_v6, 16  ;;  %v9713_v11 = vld [vmem:[%s9889_s24 + $0x84] sm:$0xff]  }
  0xce   : > { %9342 = vmatprep.subr.bf16.mxu0 %v9704_v52  ;;  %9247 = vmatpush3.bf16.msra.mxu1 %v9702_v57  ;;  %v7742_v2 = vcombine.low %v2592_v23, %v2602_v44  ;;  %v3323_v57 = vor.u32 %v10690_v16, %v10688_v17  ;;  %v2611_v15 = vrot.slane %v2610_v36, 4  ;;  %v3347_v17 = vor.u32 %v10717_v51, %v10715_v39  ;;  %v9712_v44 = vld [vmem:[%s12634_s1 + $0x170] sm:$0xff]  }
  0xcf   : > { %9248 = vmatprep.subr.bf16.mxu1 %v9705_v29  ;;  %v3350_v16 = vshll.u32 %v10706_v10, 16  ;;  %v2626_v47 = vsel %vm9938_vm5, %v2621_v1, %v2625_v19  ;;  %v3338_v7 = vrot.slane %v3336_v40, 5  ;;  %v10915_v23 = vrot.slane %v3488_v55, 5  ;;  %v10939_v55 = vld [vmem:[%s9889_s24 + $0x8c] sm:$0x1] }
  0xd0   : > { %9198 = vmatprep.mubr.bf16.mxu1 %v7742_v2  ;;  %9295 = vmatmul.mubr.bf16.gmra.mxu0 %v7879_v60  ;;  %v3324_v54 = vrot.slane %v3323_v57, 4  ;;  %v2616_v9 = vsel %vm9938_vm5, %v2611_v15, %v2615_v28  ;;  %v3348_v4 = vrot.slane %v3347_v17, 4  ;;  %v3371_v28 = vor.u32 %v10763_v49, %v10738_v25 }
  0xd1   : > { %9343 = vmatpush3.bf16.msra.mxu0 %v9704_v52  ;;  %v3328_v52 = vrot.slane %v3326_v26, 5  ;;  %9346 = vmatprep.mubr.bf16.mxu0 %v9707_v8  ;;  %v7743_v39 = vcombine.low %v2616_v9, %v2626_v47  ;;  %v3352_v43 = vrot.slane %v3350_v16, 5  ;;  %v3395_v19 = vor.u32 %v10790_v21, %v10771_v63  ;;  %v9715_v16 = vld [vmem:[%s9889_s24 + $0x90] sm:$0xff]   ;;  %v9714_v47 = vld [vmem:[%s12634_s1 + $0xa8] sm:$0xff]  }
  0xd2   : > { %9344 = vmatprep.subr.bf16.mxu0 %v9706_v62  ;;  %9249 = vmatpush3.bf16.msra.mxu1 %v9705_v29  ;;  %v3498_v29 = vshrl.u32 %v10862_v37, 16  ;;  %v3419_v8 = vor.u32 %v10820_v27, %v10796_v14  ;;  %v3374_v36 = vshll.u32 %v10733_v12, 16  ;;  %v3380_v25 = vrot.slane %v3378_v5, 4  ;;  %v9711_v27 = vld [vmem:[%s12634_s1 + $0xb0] sm:$0xff]  }
  0xd3   : > { %9298 = vmatprep.subr.bf16.mxu1 %v10885_v46  ;;  %v3333_v51 = vor.u32 %v3332_v30, %v3328_v52  ;;  %9199 = vmatmul.mubr.bf16.gmra.mxu1 %v7743_v39  ;;  %v3329_v10 = vsel %vm9938_vm5, %v3324_v54, %v3328_v52  ;;  %v3357_v0 = vor.u32 %v3356_v3, %v3352_v43  ;;  %v3384_v49 = vshll.u32 %v10920_v45, 16 }
  0xd4   : > { %v3353_v63 = vsel %vm9938_vm5, %v3348_v4, %v3352_v43  ;;  %v3398_v14 = vshll.u32 %v10752_v58, 16  ;;  %v3372_v57 = vrot.slane %v3371_v28, 4  ;;  %v3376_v12 = vrot.slane %v3374_v36, 5  ;;  %v9716_v58 = vld [vmem:[%s12634_s1 + $0x168] sm:$0xff]   ;;  %v9718_v4 = vld [vmem:[%s12634_s1 + $0x160] sm:$0xff]  }
  0xd5   : > { %9345 = vmatpush3.bf16.msra.mxu0 %v9706_v62  ;;  %v3334_v24 = vrot.slane %v3333_v51, 4  ;;  %v3362_v62 = vrot.slane %v3360_v35, 5  ;;  %v3358_v21 = vrot.slane %v3357_v0, 4  ;;  %v3404_v5 = vrot.slane %v3402_v31, 4  ;;  %v10982_v0 = vld [vmem:[%s9889_s24 + $0xa4] sm:$0x1] }
  0xd6   : > { %9394 = vmatprep.subr.bf16.mxu0 %v9710_v61  ;;  %v3408_v26 = vshll.u32 %v10939_v55, 16  ;;  %v3396_v1 = vrot.slane %v3395_v19, 4  ;;  %v3400_v30 = vrot.slane %v3398_v14, 5  ;;  %v3381_v54 = vor.u32 %v3380_v25, %v3376_v12  ;;  %v9717_v25 = vld [vmem:[%s12634_s1 + $0xa0] sm:$0xff]  }
  0xd7   : > { %v3339_v2 = vsel %vm9938_vm5, %v3334_v24, %v3338_v7  ;;  %v3363_v15 = vsel %vm9938_vm5, %v3358_v21, %v3362_v62  ;;  %v3386_v52 = vrot.slane %v3384_v49, 5  ;;  %v3377_v9 = vsel %vm9938_vm5, %v3372_v57, %v3376_v12  ;;  %v9722_v21 = vld [vmem:[%s12634_s1 + $0x158] sm:$0xff]  }
  0xd8   : > { %v7856_v60 = vcombine.low %v3329_v10, %v3339_v2  ;;  %9347 = vmatmul.mubr.bf16.vlgmr.msra.gmra.mxu0 %v9709_v20  ;;  %v7857_v40 = vcombine.low %v3353_v63, %v3363_v15  ;;  %v3405_v31 = vor.u32 %v3404_v5, %v3400_v30  ;;  %v3410_v17 = vrot.slane %v3408_v26, 5  ;;  %v10970_v20 = vld [vmem:[%s9889_s24 + $0x98] sm:$0x1]  ;;  %v11015_v15 = vld [vmem:[%s9889_s24 + $0xb0] sm:$0x1] }
  0xd9   : > { %9395 = vmatpush3.bf16.msra.mxu0 %v9710_v61  ;;  %9350 = vmatprep.mubr.bf16.mxu0 %v9713_v11  ;;  %v3382_v61 = vrot.slane %v3381_v54, 4  ;;  %v3420_v3 = vrot.slane %v3419_v8, 4  ;;  %v3443_v39 = vor.u32 %v10844_v42, %v10828_v48  ;;  %v3401_v51 = vsel %vm9938_vm5, %v3396_v1, %v3400_v30 }
  0xda   : > { %9250 = vmatprep.mubr.bf16.mxu1 %v7856_v60  ;;  %9396 = vmatprep.subr.bf16.mxu0 %v9712_v44  ;;  %v3406_v7 = vrot.slane %v3405_v31, 4  ;;  %v3422_v43 = vshll.u32 %v10782_v33, 16  ;;  %v3428_v35 = vrot.slane %v3426_v38, 4  ;;  %v3432_v42 = vshll.u32 %v10970_v20, 16 }
  0xdb   : > { %9251 = vmatmul.mubr.bf16.vlgmr.msra.gmra.mxu1 %v7857_v40  ;;  %v3387_v48 = vsel %vm9938_vm5, %v3382_v61, %v3386_v52  ;;  %v3446_v62 = vshll.u32 %v10805_v59, 16  ;;  %v3444_v33 = vrot.slane %v3443_v39, 4  ;;  %v3452_v38 = vrot.slane %v3450_v56, 4  ;;  %v9725_v40 = vld [vmem:[%s9889_s24 + $0xb4] sm:$0xff]  }
  0xdc   : > { %9299 = vmatpush3.bf16.msra.mxu1 %v10885_v46  ;;  %v9719_v46 = vld [vmem:[%s9889_s24 + $0x9c] sm:$0xff]   ;;  %v7858_v10 = vcombine.low %v3377_v9, %v3387_v48  ;;  %v3411_v24 = vsel %vm9938_vm5, %v3406_v7, %v3410_v17  ;;  %v3424_v28 = vrot.slane %v3422_v43, 5  ;;  %v3456_v19 = vshll.u32 %v10982_v0, 16 }
  0xdd   : > { %9397 = vmatpush3.bf16.msra.mxu0 %v9712_v44  ;;  %9300 = vmatprep.subr.bf16.mxu1 %v9711_v27  ;;  %v7859_v44 = vcombine.low %v3401_v51, %v3411_v24  ;;  %v3434_v2 = vrot.slane %v3432_v42, 5  ;;  %v3448_v36 = vrot.slane %v3446_v62, 5  ;;  %v3467_v11 = vor.u32 %v10873_v18, %v10856_v50  ;;  %v9720_v18 = vld [vmem:[%s12634_s1 + $0x98] sm:$0xff]   ;;  %v9728_v24 = vld [vmem:[%s12634_s1 + $0x148] sm:$0xff]   ;;  %v9727_v62 = vld [vmem:[%s9889_s24 + $0xc0] sm:$0xff]  }
  0xde   : > { %9398 = vmatprep.subr.bf16.mxu0 %v9716_v58  ;;  %9254 = vmatprep.mubr.bf16.mxu1 %v7858_v10  ;;  %v3429_v8 = vor.u32 %v3428_v35, %v3424_v28  ;;  %v3458_v49 = vrot.slane %v3456_v19, 5  ;;  %v3425_v56 = vsel %vm9938_vm5, %v3420_v3, %v3424_v28  ;;  %v3491_v57 = vor.u32 %v10915_v23, %v10880_v34  ;;  %v11032_v17 = vld [vmem:[%s9889_s24 + $0xbc] sm:$0x1]  ;;  %v9726_v28 = vld [vmem:[%s12634_s1 + $0x88] sm:$0xff]  }
  0xdf   : > { %v3453_v63 = vor.u32 %v3452_v38, %v3448_v36  ;;  %v3449_v50 = vsel %vm9938_vm5, %v3444_v33, %v3448_v36  ;;  %v3470_v1 = vshll.u32 %v10832_v13, 16  ;;  %v3476_v30 = vrot.slane %v3474_v32, 4  ;;  %v9724_v13 = vld [vmem:[%s12634_s1 + $0x150] sm:$0xff]  }
  0xe0   : > { %9351 = vmatmul.mubr.bf16.gmra.mxu0 %v9715_v16  ;;  %9301 = vmatpush3.bf16.msra.mxu1 %v9711_v27  ;;  %v3430_v60 = vrot.slane %v3429_v8, 4  ;;  %v9721_v27 = vld [vmem:[%s9889_s24 + $0xa8] sm:$0xff]   ;;  %v3468_v23 = vrot.slane %v3467_v11, 4  ;;  %v3480_v52 = vshll.u32 %v11015_v15, 16  ;;  %v3494_v16 = vshll.u32 %v10862_v37, 16 }
  0xe1   : > { %9302 = vmatprep.subr.bf16.mxu1 %v9714_v47  ;;  %9399 = vmatpush3.bf16.msra.mxu0 %v9716_v58  ;;  %v3454_v26 = vrot.slane %v3453_v63, 4  ;;  %v3472_v32 = vrot.slane %v3470_v1, 5  ;;  %v3500_v9 = vrot.slane %v3498_v29, 4  ;;  %v3492_v3 = vrot.slane %v3491_v57, 4  ;;  %v9723_v29 = vld [vmem:[%s12634_s1 + $0x90] sm:$0xff]  }
  0xe2   : > { %9400 = vmatprep.subr.bf16.mxu0 %v9718_v4  ;;  %9354 = vmatprep.mubr.bf16.mxu0 %v9719_v46  ;;  %v3435_v5 = vsel %vm9938_vm5, %v3430_v60, %v3434_v2  ;;  %v3504_v39 = vshll.u32 %v11032_v17, 16  ;;  %v3482_v7 = vrot.slane %v3480_v52, 5  ;;  %v7888_v2 = vld [vmem:[%s9889_s24 + $0x60] sm:$0xe]  ;;  %v3923_v36 = vrot.slane %v10877_v53, 5 }
  0xe3   : > { %9255 = vmatmul.mubr.bf16.gmra.mxu1 %v7859_v44  ;;  %v7860_v34 = vcombine.low %v3425_v56, %v3435_v5  ;;  %v3459_v31 = vsel %vm9938_vm5, %v3454_v26, %v3458_v49  ;;  %v3477_v51 = vor.u32 %v3476_v30, %v3472_v32  ;;  %v3473_v42 = vsel %vm9938_vm5, %v3468_v23, %v3472_v32  ;;  %v9779_v44 = vld [vmem:[%s9889_s24 + $0x64] sm:$0xf]  ;;  %v11067_v60 = vld [vmem:[%s9889_s24 + $0x74] sm:$0x1]  ;;  %v8040_v63 = vld [vmem:[%s9889_s24 + $0x6c] sm:$0xe] }
  0xe4   : > { %9303 = vmatpush3.bf16.msra.mxu1 %v9714_v47  ;;  %v7861_v47 = vcombine.low %v3449_v50, %v3459_v31  ;;  %v3506_v43 = vrot.slane %v3504_v39, 5  ;;  %v3920_v33 = vrot.slane %v9779_v44, 5  ;;  %v7896_v11 = vrot.slane %v7888_v2, 9  ;;  %v9730_v53 = vld [vmem:[%s12634_s1 + $0x140] sm:$0xff]   ;;  %v7889_v26 = vld [vmem:[%s9889_s24 + $0x6c] sm:$0xe] }
  0xe5   : > { %9304 = vmatprep.subr.bf16.mxu1 %v9717_v25  ;;  %9401 = vmatpush3.bf16.msra.mxu0 %v9718_v4  ;;  %v3496_v4 = vrot.slane %v3494_v16, 5  ;;  %v3478_v46 = vrot.slane %v3477_v51, 4  ;;  %v4887_v5 = vrot.slane %v11067_v60, 5  ;;  %v9729_v30 = vld [vmem:[%s12634_s1 + $0x80] sm:$0xff]   ;;  %v7897_v23 = vrot.slane %v7889_v26, 9  ;;  %v9731_v44 = vld [vmem:[%s12634_s1 + $0x138] sm:$0xff]  }
  0xe6   : > { %9402 = vmatprep.subr.bf16.mxu0 %v9722_v21  ;;  %9258 = vmatprep.mubr.bf16.mxu1 %v7860_v34  ;;  %v3922_v56 = vrot.slane %v3920_v33, 4  ;;  %v11098_v39 = vld [vmem:[%s9889_s24 + $0x80] sm:$0x1]  ;;  %v3930_v51 = vrot.slane %v10894_v6, 5  ;;  %v11137_v26 = vld [vmem:[%s9889_s24 + $0x88] sm:$0xf] }
  0xe7   : > { %v3501_v10 = vor.u32 %v3500_v9, %v3496_v4  ;;  %v3483_v38 = vsel %vm9938_vm5, %v3478_v46, %v3482_v7  ;;  %v3497_v19 = vsel %vm9938_vm5, %v3492_v3, %v3496_v4  ;;  %v9780_v9 = vld [vmem:[%s9889_s24 + $0x70] sm:$0xf]  ;;  %v7988_v3 = vld [vmem:[%s9889_s24 + $0x7c] sm:$0xf] }
  0xe8   : > { %9355 = vmatmul.mubr.bf16.gmra.mxu0 %v9721_v27  ;;  %9305 = vmatpush3.bf16.msra.mxu1 %v9717_v25  ;;  %v11064_v25 = vld [vmem:[%s9889_s24 + $0x70] sm:$0xf]  ;;  %v7862_v49 = vcombine.low %v3473_v42, %v3483_v38  ;;  %v8048_v27 = vrot.slane %v8040_v63, 9  ;;  %v3924_v34 = vsel %vm9914_vm4, %v3922_v56, %v3923_v36  ;;  %v4483_v7 = vshll.u32 %v7988_v3, 16  ;;  %v9781_v56 = vld [vmem:[%s9889_s24 + $0x7c] sm:$0xf] }
  0xe9   : > { %9358 = vmatprep.mubr.bf16.mxu0 %v9725_v40  ;;  %9306 = vmatprep.subr.bf16.mxu1 %v9720_v18  ;;  %v3502_v8 = vrot.slane %v3501_v10, 4  ;;  %v4884_v57 = vrot.slane %v11064_v25, 5  ;;  %v3921_v40 = vsel %vm9914_vm4, %v7896_v11, %v3920_v33  ;;  %v4487_v4 = vshrl.u32 %v7988_v3, 16  ;;  %v7890_v11 = vld [vmem:[%s9889_s24 + $0x78] sm:$0xe] }
  0xea   : > { %9403 = vmatpush3.bf16.msra.mxu0 %v9722_v21  ;;  %v11116_v33 = vrot.slane %v4483_v7, 5  ;;  %v4493_v38 = vshll.u32 %v11098_v39, 16  ;;  %v4891_v2 = vrot.slane %v7988_v3, 5  ;;  %v4894_v36 = vrot.slane %v11098_v39, 5  ;;  %v7891_v39 = vld [vmem:[%s9889_s24 + $0x84] sm:$0xe] }
  0xeb   : > { %9404 = vmatprep.subr.bf16.mxu0 %v9724_v13  ;;  %9259 = vmatmul.mubr.bf16.gmra.mxu1 %v7861_v47  ;;  %v4885_v32 = vsel %vm9914_vm4, %v8048_v27, %v4884_v57  ;;  %v4886_v16 = vrot.slane %v4884_v57, 4  ;;  %v3927_v47 = vrot.slane %v9780_v9, 5 }
  0xec   : > { %v10993_v59 = vpop.f32.mrf.mxu1  ;;  %9307 = vmatpush3.bf16.msra.mxu1 %v9720_v18  ;;  %v3507_v18 = vsel %vm9938_vm5, %v3502_v8, %v3506_v43  ;;  %9262 = vmatprep.mubr.bf16.mxu1 %v7862_v49  ;;  %v8041_v43 = vld [vmem:[%s9889_s24 + $0x78] sm:$0xe]  ;;  %v11124_v49 = vrot.slane %v4487_v4, 4  ;;  %v4893_v57 = vrot.slane %v4891_v2, 4 }
  0xed   : > { %v11000_v14 = vpop.f32.mrf.mxu0  ;;  %9308 = vmatprep.subr.bf16.mxu1 %v9723_v29  ;;  %v7863_v1 = vcombine.low %v3497_v19, %v3507_v18  ;;  %v4888_v10 = vsel %vm9914_vm4, %v4886_v16, %v4887_v5  ;;  %v3928_v19 = vsel %vm9914_vm4, %v7897_v23, %v3927_v47  ;;  %v3937_v5 = vrot.slane %v10920_v45, 5 }
  0xee   : > { %12647 = vst [vmem:[#allocation3_spill] sm:$0xff] %v11000_v14  ;;  %v11010_v12 = vpop.f32.mrf.mxu1  ;;  %9405 = vmatpush3.bf16.msra.mxu0 %v9724_v13  ;;  %v7920_v13 = vcombine.low %v3921_v40, %v3924_v34  ;;  %v8072_v6 = vcombine.low %v4885_v32, %v4888_v10  ;;  %v9733_v40 = vld [vmem:[%s12634_s1 + $0x130] sm:$0xff]   ;;  %v8042_v32 = vld [vmem:[%s9889_s24 + $0x84] sm:$0xe]  ;;  %v4898_v16 = vrot.slane %v11137_v26, 5  ;;  %v4895_v45 = vsel %vm9914_vm4, %v4893_v57, %v4894_v36 }
  0xef   : > { %v11021_v54 = vpop.f32.mrf.mxu0  ;;  %9406 = vmatprep.subr.bf16.mxu0 %v9728_v24  ;;  %v9734_v34 = vld [vmem:[%s12634_s1 + $0x1f0] sm:$0xff]   ;;  %v7995_v36 = vld [vmem:[%s9889_s24 + $0x98] sm:$0x1]  ;;  %v8139_v14 = vld [vmem:[%s9889_s24 + $0x84] sm:$0xf] }
  0xf0   : > { %12648 = vst [vmem:[#allocation4_spill] sm:$0xff] %v11021_v54  ;;  %v11024_v58 = vpop.f32.mrf.mxu1  ;;  %9359 = vmatmul.mubr.bf16.gmra.mxu0 %v9727_v62  ;;  %9309 = vmatpush3.bf16.msra.mxu1 %v9723_v29  ;;  %v11105_v29 = vld [vmem:[%s12634_s1 + $0x1f8] sm:$0xff]   ;;  %v3929_v62 = vrot.slane %v3927_v47, 4  ;;  %v8050_v47 = vrot.slane %v8042_v32, 9  ;;  %v4900_v4 = vrot.slane %v4898_v16, 4  ;;  %v9735_v32 = vld [vmem:[%s12634_s1 + $0x128] sm:$0xff]  }
  0xf1   : > { %v11037_v61 = vpop.f32.mrf.mxu0  ;;  %9310 = vmatprep.subr.bf16.mxu1 %v9726_v28  ;;  %9410 = vmatprep.mubr.bf16.mxu0 %v8072_v6 }
  0xf2   : > { %12649 = vst [vmem:[#allocation5_spill] sm:$0xff] %v11037_v61  ;;  %v11043_v35 = vpop.f32.mrf.mxu1  ;;  %9407 = vmatpush3.bf16.msra.mxu0 %v9728_v24  ;;  %v8049_v24 = vrot.slane %v8041_v43, 9  ;;  %v3931_v8 = vsel %vm9914_vm4, %v3929_v62, %v3930_v51  ;;  %v11159_v43 = vld [vmem:[%s9889_s24 + $0x94] sm:$0xf]  ;;  %v4899_v6 = vsel %vm9914_vm4, %v8050_v47, %v4898_v16  ;;  %v4541_v16 = vshll.u32 %v7995_v36, 16 }
  0xf3   : > { %v11045_v48 = vpop.f32.mrf.mxu0  ;;  %9408 = vmatprep.subr.bf16.mxu0 %v9730_v53  ;;  %9263 = vmatmul.mubr.bf16.gmra.mxu1 %v7863_v1  ;;  %v7921_v1 = vcombine.low %v3928_v19, %v3931_v8  ;;  %v9782_v19 = vld [vmem:[%s9889_s24 + $0x88] sm:$0xf] }
  0xf4   : > { %12650 = vst [vmem:[#allocation6_spill] sm:$0xff] %v11045_v48  ;;  %9311 = vmatpush3.bf16.msra.mxu1 %v9726_v28  ;;  %9314 = vmatprep.mubr.bf16.mxu1 %v7920_v13  ;;  %v3934_v28 = vrot.slane %v9781_v56, 5  ;;  %v4892_v27 = vsel %vm9914_vm4, %v8049_v24, %v4891_v2  ;;  %v11146_v13 = vld [vmem:[%s9889_s24 + $0x8c] sm:$0x1]  ;;  %v3941_v8 = vrot.slane %v9782_v19, 5  ;;  %v3944_v2 = vrot.slane %v10939_v55, 5 }
  0xf5   : > { %v11072_v50 = vpop.f32.mrf.mxu0  ;;  %9312 = vmatprep.subr.bf16.mxu1 %v9729_v30  ;;  %v4901_v3 = vrot.slane %v11146_v13, 5  ;;  %v8073_v51 = vcombine.low %v4892_v27, %v4895_v45  ;;  %v11171_v56 = vrot.slane %v4493_v38, 5  ;;  %v4535_v27 = vshrl.u32 %v11159_v43, 16 }
  0xf6   : > { %12651 = vst [vmem:[#allocation7_spill] sm:$0xff] %v11072_v50  ;;  %9409 = vmatpush3.bf16.msra.mxu0 %v9730_v53  ;;  %v7898_v53 = vrot.slane %v7890_v11, 9  ;;  %v3936_v23 = vrot.slane %v3934_v28, 4  ;;  %v8043_v11 = vld [vmem:[%s9889_s24 + $0x90] sm:$0xe]  ;;  %v3943_v38 = vrot.slane %v3941_v8, 4 }
  0xf7   : > { %v11070_v21 = vpop.f32.mrf.mxu1  ;;  %v11091_v31 = vpop.f32.mrf.mxu0  ;;  %9458 = vmatprep.subr.bf16.mxu0 %v11105_v29  ;;  %v8051_v57 = vrot.slane %v8043_v11, 9  ;;  %v4908_v45 = vrot.slane %v7995_v36, 5  ;;  %v3951_v19 = vrot.slane %v10970_v20, 5  ;;  %v11214_v11 = vld [vmem:[%s9889_s24 + $0xa4] sm:$0x1] }
  0xf8   : > { %12652 = vst [vmem:[#allocation8_spill] sm:$0xff] %v11091_v31  ;;  %9313 = vmatpush3.bf16.msra.mxu1 %v9729_v30  ;;  %v3935_v9 = vsel %vm9914_vm4, %v7898_v53, %v3934_v28  ;;  %v3938_v7 = vsel %vm9914_vm4, %v3936_v23, %v3937_v5  ;;  %v7899_v30 = vrot.slane %v7891_v39, 9  ;;  %v4902_v28 = vsel %vm9914_vm4, %v4900_v4, %v4901_v3  ;;  %v11203_v4 = vld [vmem:[%s12634_s1 + $0x120] sm:$0xff]  }
  0xf9   : > { %v11089_v52 = vpop.f32.mrf.mxu1  ;;  %v11109_v46 = vpop.f32.mrf.mxu0  ;;  %9362 = vmatprep.subr.bf16.mxu1 %v9731_v44  ;;  %v7922_v24 = vcombine.low %v3935_v9, %v3938_v7  ;;  %9411 = vmatmul.mubr.bf16.vlgmr.msra.gmra.mxu0 %v8073_v51  ;;  %v8074_v55 = vcombine.low %v4899_v6, %v4902_v28  ;;  %v4905_v23 = vrot.slane %v11159_v43, 5  ;;  %v3945_v47 = vsel %vm9914_vm4, %v3943_v38, %v3944_v2  ;;  %v8044_v28 = vld [vmem:[%s9889_s24 + $0x9c] sm:$0xe]  ;;  %v9738_v20 = vld [vmem:[%s12634_s1 + $0x1e0] sm:$0xff]  }
  0xfa   : > { %12653 = vst [vmem:[#allocation9_spill] sm:$0xff] %v11109_v46  ;;  %9459 = vmatpush3.bf16.msra.mxu0 %v11105_v29  ;;  %v9736_v29 = vld [vmem:[%s12634_s1 + $0x1e8] sm:$0xff]   ;;  %v11196_v3 = vrot.slane %v4535_v27, 4 }
  0xfb   : > { %v11107_v42 = vpop.f32.mrf.mxu1  ;;  %v11130_v18 = vpop.f32.mrf.mxu0  ;;  %9315 = vmatmul.mubr.bf16.vlgmr.msra.gmra.mxu1 %v7921_v1  ;;  %v3942_v1 = vsel %vm9914_vm4, %v7899_v30, %v3941_v8  ;;  %9460 = vmatprep.subr.bf16.mxu0 %v9734_v34  ;;  %v4906_v39 = vsel %vm9914_vm4, %v8051_v57, %v4905_v23  ;;  %v4907_v51 = vrot.slane %v4905_v23, 4  ;;  %v7892_v30 = vld [vmem:[%s9889_s24 + $0x90] sm:$0xe]  ;;  %v11209_v8 = vld [vmem:[%s9889_s24 + $0xa0] sm:$0xf] }
  0xfc   : > { %12654 = vst [vmem:[#allocation10_spill] sm:$0xff] %v11130_v18  ;;  %9363 = vmatpush3.bf16.msra.mxu1 %v9731_v44  ;;  %9318 = vmatprep.mubr.bf16.mxu1 %v7922_v24  ;;  %v7923_v7 = vcombine.low %v3942_v1, %v3945_v47  ;;  %v9783_v24 = vld [vmem:[%s9889_s24 + $0x94] sm:$0xf]  ;;  %v7900_v36 = vrot.slane %v7892_v30, 9  ;;  %v4912_v27 = vrot.slane %v11209_v8, 5 }
  0xfd   : > { %v11128_v63 = vpop.f32.mrf.mxu1  ;;  %9364 = vmatprep.subr.bf16.mxu1 %v9733_v40  ;;  %9414 = vmatprep.mubr.bf16.mxu0 %v8074_v55  ;;  %v3948_v6 = vrot.slane %v9783_v24, 5  ;;  %v4909_v2 = vsel %vm9914_vm4, %v4907_v51, %v4908_v45  ;;  %v7893_v1 = vld [vmem:[%s9889_s24 + $0x9c] sm:$0xe]  ;;  %v9784_v51 = vld [vmem:[%s9889_s24 + $0xa0] sm:$0xf]  ;;  %v11230_v24 = vrot.slane %v4541_v16, 5 }
  0xfe   : > { %9461 = vmatpush3.bf16.msra.mxu0 %v9734_v34  ;;  %v8075_v57 = vcombine.low %v4906_v39, %v4909_v2  ;;  %v4915_v34 = vrot.slane %v11214_v11, 5  ;;  %v4914_v47 = vrot.slane %v4912_v27, 4  ;;  %v7901_v39 = vrot.slane %v7893_v1, 9 }
  0xff   : > { %v11161_v10 = vpop.f32.mrf.mxu1  ;;  %9462 = vmatprep.subr.bf16.mxu0 %v9736_v29  ;;  %v3950_v55 = vrot.slane %v3948_v6, 4  ;;  %v3949_v45 = vsel %vm9914_vm4, %v7900_v36, %v3948_v6  ;;  %v3955_v30 = vrot.slane %v9784_v51, 5 }
 0x100   : > { %9365 = vmatpush3.bf16.msra.mxu1 %v9733_v40  ;;  %v8052_v40 = vrot.slane %v8044_v28, 9  ;;  %v4916_v36 = vsel %vm9914_vm4, %v4914_v47, %v4915_v34 }
 0x101   : > { %v11163_v62 = vpop.f32.mrf.mxu0  ;;  %v11176_v53 = vpop.f32.mrf.mxu1  ;;  %9366 = vmatprep.subr.bf16.mxu1 %v9735_v32  ;;  %9415 = vmatmul.mubr.bf16.gmra.mxu0 %v8075_v57  ;;  %v3952_v2 = vsel %vm9914_vm4, %v3950_v55, %v3951_v19  ;;  %v3956_v16 = vsel %vm9914_vm4, %v7901_v39, %v3955_v30  ;;  %v9739_v19 = vld [vmem:[%s12634_s1 + $0x118] sm:$0xff]   ;;  %v8001_v57 = vld [vmem:[%s9889_s24 + $0xb0] sm:$0x1] }
 0x102   : > { %12655 = vst [vmem:[#allocation11_spill] sm:$0xff] %v11163_v62  ;;  %v4913_v28 = vsel %vm9914_vm4, %v8052_v40, %v4912_v27  ;;  %9463 = vmatpush3.bf16.msra.mxu0 %v9736_v29  ;;  %v7924_v6 = vcombine.low %v3949_v45, %v3952_v2  ;;  %v8045_v27 = vld [vmem:[%s9889_s24 + $0xa8] sm:$0xe]  ;;  %v4589_v29 = vshll.u32 %v8001_v57, 16  ;;  %v9740_v40 = vld [vmem:[%s12634_s1 + $0x1d8] sm:$0xff]   ;;  %v4922_v39 = vrot.slane %v8001_v57, 5 }
 0x103   : > { %v11178_v5 = vpop.f32.mrf.mxu0  ;;  %v11190_v44 = vpop.f32.mrf.mxu1  ;;  %9319 = vmatmul.mubr.bf16.gmra.mxu1 %v7923_v7  ;;  %v3957_v7 = vrot.slane %v3955_v30, 4  ;;  %9464 = vmatprep.subr.bf16.mxu0 %v9738_v20  ;;  %v8053_v55 = vrot.slane %v8045_v27, 9  ;;  %v9785_v57 = vld [vmem:[%s9889_s24 + $0xac] sm:$0xf] }
 0x104   : > { %12656 = vst [vmem:[#allocation12_spill] sm:$0xff] %v11178_v5  ;;  %9367 = vmatpush3.bf16.msra.mxu1 %v9735_v32  ;;  %9322 = vmatprep.mubr.bf16.mxu1 %v7924_v6  ;;  %v11263_v2 = vrot.slane %v4589_v29, 5  ;;  %v3962_v27 = vrot.slane %v9785_v57, 5  ;;  %v11279_v29 = vld [vmem:[%s9889_s24 + $0xb8] sm:$0xf] }
 0x105   : > { %v11192_v9 = vpop.f32.mrf.mxu0  ;;  %v11223_v38 = vpop.f32.mrf.mxu1  ;;  %9368 = vmatprep.subr.bf16.mxu1 %v11203_v4 }
 0x106   : > { %12657 = vst [vmem:[#allocation13_spill] sm:$0xff] %v11192_v9  ;;  %v11238_v9 = vld [vmem:[%s9889_s24 + $0xac] sm:$0xf]  ;;  %9465 = vmatpush3.bf16.msra.mxu0 %v9738_v20  ;;  %v3964_v57 = vrot.slane %v3962_v27, 4 }
 0x107   : > { %v11225_v23 = vpop.f32.mrf.mxu0  ;;  %v4583_v32 = vshrl.u32 %v11238_v9, 16  ;;  %v4919_v47 = vrot.slane %v11238_v9, 5  ;;  %9466 = vmatprep.subr.bf16.mxu0 %v9740_v40 }
 0x108   : > { %12658 = vst [vmem:[#allocation14_spill] sm:$0xff] %v11225_v23  ;;  %v3958_v23 = vrot.slane %v10982_v0, 5  ;;  %v8076_v0 = vcombine.low %v4913_v28, %v4916_v36  ;;  %v9741_v28 = vld [vmem:[%s12634_s1 + $0x110] sm:$0xff]   ;;  %9369 = vmatpush3.bf16.msra.mxu1 %v11203_v4 }
 0x109   : > { %v11261_v30 = vrot.slane %v4583_v32, 4  ;;  %9370 = vmatprep.subr.bf16.mxu1 %v9739_v19  ;;  %v3965_v32 = vrot.slane %v11015_v15, 5 }
 0x10a   : > { %v3959_v45 = vsel %vm9914_vm4, %v3957_v7, %v3958_v23  ;;  %9418 = vmatprep.mubr.bf16.mxu0 %v8076_v0  ;;  %v4920_v23 = vsel %vm9914_vm4, %v8053_v55, %v4919_v47  ;;  %v7894_v7 = vld [vmem:[%s9889_s24 + $0xa8] sm:$0xe]  ;;  %9467 = vmatpush3.bf16.msra.mxu0 %v9740_v40 }
 0x10b   : > { %v11254_v34 = vpop.f32.mrf.mxu1  ;;  %v7925_v51 = vcombine.low %v3956_v16, %v3959_v45  ;;  %v4921_v16 = vrot.slane %v4919_v47, 4  ;;  %v7902_v0 = vrot.slane %v7894_v7, 9  ;;  %v11282_v45 = vld [vmem:[%s9889_s24 + $0xbc] sm:$0x1]  ;;  %v9742_v47 = vld [vmem:[%s12634_s1 + $0x1d0] sm:$0xff]   ;;  %v3966_v18 = vsel %vm9914_vm4, %v3964_v57, %v3965_v32 }
 0x10c   : > { %v11256_v1 = vpop.f32.mrf.mxu0  ;;  %v8046_v7 = vld [vmem:[%s9889_s24 + $0xb4] sm:$0xe]  ;;  %v4929_v15 = vrot.slane %v11282_v45, 5  ;;  %9371 = vmatpush3.bf16.msra.mxu1 %v9739_v19  ;;  %v8007_v32 = vld [vmem:[%s9889_s24 + $0xc8] sm:$0x1]  ;;  %9468 = vmatprep.subr.bf16.mxu0 %v9742_v47 }
 0x10d   : > { %12659 = vst [vmem:[#allocation15_spill] sm:$0xff] %v11256_v1  ;;  %v11268_v6 = vpop.f32.mrf.mxu1  ;;  %v4923_v55 = vsel %vm9914_vm4, %v4921_v16, %v4922_v39  ;;  %9323 = vmatmul.mubr.bf16.gmra.mxu1 %v7925_v51  ;;  %v3963_v5 = vsel %vm9914_vm4, %v7902_v0, %v3962_v27  ;;  %v8054_v62 = vrot.slane %v8046_v7, 9  ;;  %v3969_v39 = vrot.slane %v10862_v37, 5  ;;  %9372 = vmatprep.subr.bf16.mxu1 %v9741_v28  ;;  %v11313_v0 = vld [vmem:[%s9889_s24 + $0xc4] sm:$0xf] }
 0x10e   : > { %v11270_v36 = vpop.f32.mrf.mxu0  ;;  %v8077_v1 = vcombine.low %v4920_v23, %v4923_v55  ;;  %v3972_v51 = vrot.slane %v11032_v17, 5  ;;  %v9743_v23 = vld [vmem:[%s12634_s1 + $0x108] sm:$0xff]   ;;  %v7926_v37 = vcombine.low %v3963_v5, %v3966_v18  ;;  %v4637_v5 = vshll.u32 %v8007_v32, 16  ;;  %v9745_v55 = vld [vmem:[%s12634_s1 + $0x100] sm:$0xff]   ;;  %9469 = vmatpush3.bf16.msra.mxu0 %v9742_v47 }
 0x10f   : > { %12660 = vst [vmem:[#allocation16_spill] sm:$0xff] %v11270_v36  ;;  %v11284_v4 = vpop.f32.mrf.mxu1  ;;  %v4926_v36 = vrot.slane %v11279_v29, 5  ;;  %v3971_v40 = vrot.slane %v3969_v39, 4  ;;  %v9744_v17 = vld [vmem:[%s12634_s1 + $0x1c8] sm:$0xff]   ;;  %v4933_v50 = vrot.slane %v11313_v0, 5  ;;  %v4459_v47 = vshll.u32 %v11064_v25, 16 }
 0x110   : > { %v11286_v20 = vpop.f32.mrf.mxu0  ;;  %9419 = vmatmul.mubr.bf16.gmra.mxu0 %v8077_v1  ;;  %9326 = vmatprep.mubr.bf16.mxu1 %v7926_v37  ;;  %v4936_v37 = vrot.slane %v8007_v32, 5  ;;  %v7984_v32 = vld [vmem:[%s9889_s24 + $0x6c] sm:$0xf] }
 0x111   : > { %12661 = vst [vmem:[#allocation17_spill] sm:$0xff] %v11286_v20  ;;  %v7895_v20 = vld [vmem:[%s9889_s24 + $0xb4] sm:$0xe]  ;;  %v11300_v16 = vpop.f32.mrf.mxu1  ;;  %v4928_v46 = vrot.slane %v4926_v36, 4  ;;  %v4927_v19 = vsel %vm9914_vm4, %v8054_v62, %v4926_v36  ;;  %v4631_v62 = vshrl.u32 %v11313_v0, 16  ;;  %v3973_v7 = vsel %vm9914_vm4, %v3971_v40, %v3972_v51  ;;  %9373 = vmatpush3.bf16.msra.mxu1 %v9741_v28  ;;  %v9746_v51 = vld [vmem:[%s12634_s1 + $0x1c0] sm:$0xff]   ;;  %9470 = vmatprep.subr.bf16.mxu0 %v9744_v17 }
 0x112   : > { %v7903_v31 = vrot.slane %v7895_v20, 9  ;;  %v11308_v27 = vpop.f32.mrf.mxu0  ;;  %v8047_v36 = vld [vmem:[%s9889_s24 + $0xc0] sm:$0xe]  ;;  %9374 = vmatprep.subr.bf16.mxu1 %v9743_v23  ;;  %v4935_v40 = vrot.slane %v4933_v50, 4  ;;  %9471 = vmatpush3.bf16.msra.mxu0 %v9744_v17 }
 0x113   : > { %12662 = vst [vmem:[#allocation18_spill] sm:$0xff] %v11308_v27  ;;  %v8996_v20 = vpop.f32.mrf.mxu1  ;;  %v4930_v1 = vsel %vm9914_vm4, %v4928_v46, %v4929_v15  ;;  %v8055_v27 = vrot.slane %v8047_v36, 9  ;;  %v11333_v15 = vrot.slane %v4631_v62, 4  ;;  %v4463_v62 = vshrl.u32 %v11064_v25, 16  ;;  %v8136_v36 = vld [vmem:[%s9889_s24 + $0x78] sm:$0xf]  ;;  %9472 = vmatprep.subr.bf16.mxu0 %v9746_v51 }
 0x114   : > { %v3970_v18 = vsel %vm9914_vm4, %v7903_v31, %v3969_v39  ;;  %v8078_v57 = vcombine.low %v4927_v19, %v4930_v1  ;;  %v11335_v39 = vrot.slane %v4637_v5, 5  ;;  %v11346_v1 = vadd.f32 %v8996_v20, %v10993_v59  ;;  %v8137_v25 = vld [vmem:[%s9889_s24 + $0x7c] sm:$0xf] }
 0x115   : > { %v845_v46 = vpop.f32.mrf.mxu1  ;;  %v7927_v31 = vcombine.low %v3970_v18, %v3973_v7  ;;  %v11340_v19 = vpop.f32.mrf.mxu0  ;;  %v4934_v28 = vsel %vm9914_vm4, %v8055_v27, %v4933_v50  ;;  %v4469_v5 = vshll.u32 %v11067_v60, 16  ;;  %v4937_v59 = vsel %vm9914_vm4, %v4935_v40, %v4936_v37  ;;  %v11366_v60 = vld [vmem:[%s12634_s1 + $0x1b8] sm:$0xff]   ;;  %9375 = vmatpush3.bf16.msra.mxu1 %v9743_v23 }
 0x116   : > { %12663 = vst [vmem:[#allocation19_spill] sm:$0xff] %v11340_v19  ;;  %9422 = vmatprep.mubr.bf16.mxu0 %v8078_v57  ;;  %12664 = vst [vmem:[#allocation20_spill] sm:$0xff] %v11346_v1  ;;  %v11353_v57 = vadd.f32 %v845_v46, %v11010_v12  ;;  %v4450_v20 = vshrl.u32 %v7984_v32, 16  ;;  %v4453_v7 = vshll.u32 %v7984_v32, 16  ;;  %v4461_v19 = vrot.slane %v4459_v47, 5  ;;  %v11374_v37 = vld [vmem:[%s12635_s2 + $0x38] sm:$0xff]   ;;  %9376 = vmatprep.subr.bf16.mxu1 %v9745_v55 }
 0x117   : > { %v8997_v18 = vpop.f32.mrf.mxu1  ;;  %v11355_v27 = vpop.f32.mrf.mxu0  ;;  %9327 = vmatmul.mubr.bf16.gmra.mxu1 %v7927_v31  ;;  %v8079_v46 = vcombine.low %v4934_v28, %v4937_v59  ;;  %v4471_v31 = vrot.slane %v4469_v5, 5  ;;  %v5417_v22 = vshll.u32 %v8136_v36, 16  ;;  %v5423_v48 = vshll.u32 %v8137_v25, 16  ;;  %v7987_v28 = vld [vmem:[%s9889_s24 + $0x78] sm:$0xf]  ;;  %9473 = vmatpush3.bf16.msra.mxu0 %v9746_v51 }
 0x118   : > { %12665 = vst [vmem:[#allocation21_spill] sm:$0xff] %v11353_v57  ;;  %12666 = vst [vmem:[#allocation22_spill] sm:$0xff] %v11355_v27  ;;  %v11358_v50 = vadd.f32 %v8997_v18, %v11024_v58  ;;  %v4465_v58 = vrot.slane %v4463_v62, 4  ;;  %v8138_v18 = vld [vmem:[%s9889_s24 + $0x80] sm:$0x1]  ;;  %v5414_v27 = vshrl.u32 %v8136_v36, 16  ;;  %9522 = vmatprep.subr.bf16.mxu0 %v11374_v37 }
 0x119   : > { %v11368_v12 = vpop.f32.mrf.mxu1  ;;  %v11376_v40 = vpop.f32.mrf.mxu0  ;;  %v4452_v47 = vrot.slane %v4450_v20, 4  ;;  %v4455_v32 = vrot.slane %v4453_v7, 5  ;;  %9423 = vmatmul.mubr.bf16.gmra.mxu0 %v8079_v46  ;;  %v5427_v5 = vshrl.u32 %v8137_v25, 16  ;;  %v5433_v59 = vshll.u32 %v8138_v18, 16  ;;  %9377 = vmatpush3.bf16.msra.mxu1 %v9745_v55 }
 0x11a   : > { %12667 = vst [vmem:[#allocation23_spill] sm:$0xff] %v11358_v50  ;;  %12668 = vst [vmem:[#allocation24_spill] sm:$0xff] %v11376_v40  ;;  %v4466_v17 = vor.u32 %v4465_v58, %v4461_v19  ;;  %v5416_v62 = vrot.slane %v5414_v27, 4  ;;  %v5419_v54 = vrot.slane %v5417_v22, 5  ;;  %v5425_v40 = vrot.slane %v5423_v48, 5  ;;  %9426 = vmatprep.subr.bf16.mxu1 %v11366_v60 }
 0x11b   : > { %v11379_v23 = vpop.f32.mrf.mxu1  ;;  %v11381_v61 = vpop.f32.mrf.mxu0  ;;  %v4456_v50 = vor.u32 %v4455_v32, %v4452_v47  ;;  %v4474_v57 = vshrl.u32 %v7987_v28, 16  ;;  %v5429_v7 = vrot.slane %v5427_v5, 4  ;;  %v5435_v46 = vrot.slane %v5433_v59, 5  ;;  %v8140_v48 = vld [vmem:[%s9889_s24 + $0x88] sm:$0xf] }
 0x11c   : > { %12669 = vst [vmem:[#allocation25_spill] sm:$0xff] %v11381_v61  ;;  %v4467_v36 = vrot.slane %v4466_v17, 4  ;;  %v4477_v58 = vshll.u32 %v7987_v28, 16  ;;  %v5420_v25 = vor.u32 %v5419_v54, %v5416_v62  ;;  %v12670_v47 = vor.u32 %v11124_v49, %v11116_v33  ;;  %v8141_v54 = vld [vmem:[%s9889_s24 + $0x8c] sm:$0x1] }
 0x11d   : > { %v11383_v20 = vpop.f32.mrf.mxu1  ;;  %v4457_v27 = vrot.slane %v4456_v50, 4  ;;  %v4476_v18 = vrot.slane %v4474_v57, 4  ;;  %v5430_v28 = vor.u32 %v5429_v7, %v5425_v40  ;;  %v5438_v57 = vshrl.u32 %v8139_v14, 16 }
 0x11e   : > { %v4491_v22 = vrot.slane %v12670_v47, 4  ;;  %v11392_v55 = vpop.f32.mrf.mxu0  ;;  %v4472_v32 = vsel %vm9938_vm5, %v4467_v36, %v4471_v31  ;;  %v4479_v50 = vrot.slane %v4477_v58, 5  ;;  %v5421_v17 = vrot.slane %v5420_v25, 4 }
 0x11f   : > { %12671 = vst [vmem:[#allocation26_spill] sm:$0xff] %v11392_v55  ;;  %v11394_v51 = vpop.f32.mrf.mxu1  ;;  %v4462_v49 = vsel %vm9938_vm5, %v4457_v27, %v4461_v19  ;;  %v5441_v5 = vshll.u32 %v8139_v14, 16  ;;  %v5431_v31 = vrot.slane %v5430_v28, 4  ;;  %v5440_v7 = vrot.slane %v5438_v57, 4 }
 0x120   : > { %v4496_v62 = vsel %vm9938_vm5, %v4491_v22, %v11171_v56  ;;  %v11404_v59 = vpop.f32.mrf.mxu0  ;;  %v8024_v55 = vcombine.low %v4462_v49, %v4472_v32  ;;  %v4480_v36 = vor.u32 %v4479_v50, %v4476_v18  ;;  %v5426_v58 = vsel %vm9938_vm5, %v5421_v17, %v5425_v40  ;;  %v7990_v32 = vld [vmem:[%s9889_s24 + $0x84] sm:$0xf]  ;;  %v8142_v17 = vld [vmem:[%s9889_s24 + $0x90] sm:$0xf] }
 0x121   : > { %12672 = vst [vmem:[#allocation27_spill] sm:$0xff] %v11404_v59  ;;  %v11406_v47 = vpop.f32.mrf.mxu1  ;;  %v5443_v61 = vrot.slane %v5441_v5, 5  ;;  %v5447_v19 = vshll.u32 %v8140_v48, 16  ;;  %v5451_v27 = vshrl.u32 %v8140_v48, 16  ;;  %v5436_v14 = vsel %vm9938_vm5, %v5431_v31, %v5435_v46 }
 0x122   : > { %v11410_v25 = vpop.f32.mrf.mxu0  ;;  %9378 = vmatprep.mubr.bf16.mxu1 %v8024_v55  ;;  %v4481_v56 = vrot.slane %v4480_v36, 4  ;;  %v5457_v22 = vshll.u32 %v8141_v54, 16  ;;  %v11418_v18 = vadd.f32 %v11368_v12, %v11043_v35  ;;  %v8176_v40 = vcombine.low %v5426_v58, %v5436_v14  ;;  %v9749_v35 = vld [vmem:[%s12634_s1 + $0x1b0] sm:$0xff]  }
 0x123   : > { %12673 = vst [vmem:[#allocation28_spill] sm:$0xff] %v11410_v25  ;;  %v11412_v1 = vpop.f32.mrf.mxu1  ;;  %v5444_v28 = vor.u32 %v5443_v61, %v5440_v7  ;;  %v5449_v50 = vrot.slane %v5447_v19, 5  ;;  %v5453_v48 = vrot.slane %v5451_v27, 4  ;;  %v4498_v12 = vshrl.u32 %v7990_v32, 16  ;;  %v8143_v14 = vld [vmem:[%s9889_s24 + $0x94] sm:$0xf] }
 0x124   : > { %v11421_v57 = vpop.f32.mrf.mxu0  ;;  %v4486_v46 = vsel %vm9938_vm5, %v4481_v56, %v11116_v33  ;;  %v5459_v55 = vrot.slane %v5457_v22, 5  ;;  %v4501_v54 = vshll.u32 %v7990_v32, 16  ;;  %9474 = vmatprep.mubr.bf16.mxu0 %v8176_v40  ;;  %v4507_v36 = vshll.u32 %v11137_v26, 16  ;;  %v8144_v40 = vld [vmem:[%s9889_s24 + $0x98] sm:$0x1] }
 0x125   : > { %12674 = vst [vmem:[#allocation29_spill] sm:$0xff] %v11421_v57  ;;  %v11423_v49 = vpop.f32.mrf.mxu1  ;;  %v8025_v61 = vcombine.low %v4486_v46, %v4496_v62  ;;  %v5445_v5 = vrot.slane %v5444_v28, 4  ;;  %v5454_v31 = vor.u32 %v5453_v48, %v5449_v50  ;;  %v4500_v58 = vrot.slane %v4498_v12, 4  ;;  %v8145_v57 = vld [vmem:[%s9889_s24 + $0x9c] sm:$0xf] }
 0x126   : > { %v4503_v33 = vrot.slane %v4501_v54, 5  ;;  %v4511_v19 = vshrl.u32 %v11137_v26, 16  ;;  %v4517_v27 = vshll.u32 %v11146_v13, 16  ;;  %v11438_v56 = vpop.f32.mrf.mxu0  ;;  %v4509_v32 = vrot.slane %v4507_v36, 5  ;;  %v9750_v26 = vld [vmem:[%s12635_s2 + $0x30] sm:$0xff]  }
 0x127   : > { %v11433_v7 = vpop.f32.mrf.mxu1  ;;  %12675 = vst [vmem:[#allocation30_spill] sm:$0xff] %v11438_v56  ;;  %9379 = vmatmul.mubr.bf16.vlgmr.msra.gmra.mxu1 %v8025_v61  ;;  %v5450_v62 = vsel %vm9938_vm5, %v5445_v5, %v5449_v50  ;;  %v5455_v22 = vrot.slane %v5454_v31, 4  ;;  %v5462_v28 = vshrl.u32 %v8142_v17, 16  ;;  %v5465_v54 = vshll.u32 %v8142_v17, 16  ;;  %v7993_v61 = vld [vmem:[%s9889_s24 + $0x90] sm:$0xf] }
 0x128   : > { %9427 = vmatpush3.bf16.msra.mxu1 %v11366_v60  ;;  %v4504_v13 = vor.u32 %v4503_v33, %v4500_v58  ;;  %v4513_v46 = vrot.slane %v4511_v19, 4  ;;  %v4519_v12 = vrot.slane %v4517_v27, 5  ;;  %v11450_v56 = vpop.f32.mrf.mxu0  ;;  %v5471_v31 = vshll.u32 %v8143_v14, 16  ;;  %v9751_v60 = vld [vmem:[%s12634_s1 + $0x1a8] sm:$0xff]  }
 0x129   : > { %v11443_v48 = vpop.f32.mrf.mxu1  ;;  %12676 = vst [vmem:[#allocation31_spill] sm:$0xff] %v11450_v56  ;;  %v5460_v50 = vsel %vm9938_vm5, %v5455_v22, %v5459_v55  ;;  %9428 = vmatprep.subr.bf16.mxu1 %v9749_v35  ;;  %v5464_v5 = vrot.slane %v5462_v28, 4  ;;  %v5475_v36 = vshrl.u32 %v8143_v14, 16  ;;  %v5467_v19 = vrot.slane %v5465_v54, 5 }
 0x12a   : > { %v8177_v58 = vcombine.low %v5450_v62, %v5460_v50  ;;  %v4505_v33 = vrot.slane %v4504_v13, 4  ;;  %v4514_v17 = vor.u32 %v4513_v46, %v4509_v32  ;;  %v11460_v27 = vpop.f32.mrf.mxu0  ;;  %v5473_v56 = vrot.slane %v5471_v31, 5 }
 0x12b   : > { %v11458_v25 = vpop.f32.mrf.mxu1  ;;  %12677 = vst [vmem:[#allocation32_spill] sm:$0xff] %v11460_v27  ;;  %v5477_v59 = vrot.slane %v5475_v36, 4  ;;  %v5481_v55 = vshll.u32 %v8144_v40, 16  ;;  %v11464_v14 = vadd.f32 %v11379_v23, %v11070_v21  ;;  %v5468_v13 = vor.u32 %v5467_v19, %v5464_v5  ;;  %v8146_v23 = vld [vmem:[%s9889_s24 + $0xa0] sm:$0xf] }
 0x12c   : > { %9475 = vmatmul.mubr.bf16.vlgmr.msra.gmra.mxu0 %v8177_v58  ;;  %9429 = vmatpush3.bf16.msra.mxu1 %v9749_v35  ;;  %v4510_v62 = vsel %vm9938_vm5, %v4505_v33, %v4509_v32  ;;  %v4515_v28 = vrot.slane %v4514_v17, 4  ;;  %v4522_v46 = vshrl.u32 %v7993_v61, 16  ;;  %v11470_v54 = vpop.f32.mrf.mxu0  ;;  %v4525_v31 = vshll.u32 %v7993_v61, 16  ;;  %v8147_v19 = vld [vmem:[%s9889_s24 + $0xa4] sm:$0x1] }
 0x12d   : > { %v11466_v22 = vpop.f32.mrf.mxu1  ;;  %12678 = vst [vmem:[#allocation33_spill] sm:$0xff] %v11470_v54  ;;  %9523 = vmatpush3.bf16.msra.mxu0 %v11374_v37  ;;  %v5478_v40 = vor.u32 %v5477_v59, %v5473_v56  ;;  %v5483_v50 = vrot.slane %v5481_v55, 5  ;;  %v4531_v21 = vshll.u32 %v11159_v43, 16  ;;  %9430 = vmatprep.subr.bf16.mxu1 %v9751_v60  ;;  %v5469_v32 = vrot.slane %v5468_v13, 4  ;;  %v9752_v37 = vld [vmem:[%s12635_s2 + $0x28] sm:$0xff]   ;;  %v9753_v59 = vld [vmem:[%s12634_s1 + $0x1a0] sm:$0xff]  }
 0x12e   : > { %9524 = vmatprep.subr.bf16.mxu0 %v9750_v26  ;;  %v4520_v35 = vsel %vm9938_vm5, %v4515_v28, %v4519_v12  ;;  %v4524_v5 = vrot.slane %v4522_v46, 4  ;;  %v5486_v58 = vshrl.u32 %v8145_v57, 16  ;;  %v4527_v33 = vrot.slane %v4525_v31, 5 }
 0x12f   : > { %v11475_v36 = vpop.f32.mrf.mxu1  ;;  %v8026_v43 = vcombine.low %v4510_v62, %v4520_v35  ;;  %v5479_v61 = vrot.slane %v5478_v40, 4  ;;  %v4533_v17 = vrot.slane %v4531_v21, 5  ;;  %v5474_v12 = vsel %vm9938_vm5, %v5469_v32, %v5473_v56  ;;  %v7996_v35 = vld [vmem:[%s9889_s24 + $0x9c] sm:$0xf] }
 0x130   : > { %v5488_v55 = vrot.slane %v5486_v58, 4  ;;  %v5489_v28 = vshll.u32 %v8145_v57, 16  ;;  %v5495_v13 = vshll.u32 %v8146_v23, 16  ;;  %9431 = vmatpush3.bf16.msra.mxu1 %v9751_v60  ;;  %v11488_v46 = vpop.f32.mrf.mxu0  ;;  %v4528_v40 = vor.u32 %v4527_v33, %v4524_v5  ;;  %v9755_v57 = vld [vmem:[%s12634_s1 + $0x198] sm:$0xff]  }
 0x131   : > { %12679 = vst [vmem:[#allocation34_spill] sm:$0xff] %v11488_v46  ;;  %v11490_v54 = vpop.f32.mrf.mxu1  ;;  %9525 = vmatpush3.bf16.msra.mxu0 %v9750_v26  ;;  %9382 = vmatprep.mubr.bf16.mxu1 %v8026_v43  ;;  %v5484_v62 = vsel %vm9938_vm5, %v5479_v61, %v5483_v50  ;;  %v4538_v31 = vor.u32 %v11196_v3, %v4533_v17  ;;  %v5499_v21 = vshrl.u32 %v8146_v23, 16  ;;  %v5505_v58 = vshll.u32 %v8147_v19, 16  ;;  %v9754_v26 = vld [vmem:[%s12635_s2 + $0x20] sm:$0xff]  }
 0x132   : > { %v8178_v56 = vcombine.low %v5474_v12, %v5484_v62  ;;  %v5491_v60 = vrot.slane %v5489_v28, 5  ;;  %v5497_v32 = vrot.slane %v5495_v13, 5  ;;  %9526 = vmatprep.subr.bf16.mxu0 %v9752_v37  ;;  %9432 = vmatprep.subr.bf16.mxu1 %v9753_v59  ;;  %v11502_v50 = vpop.f32.mrf.mxu0  ;;  %v4529_v3 = vrot.slane %v4528_v40, 4  ;;  %v8148_v28 = vld [vmem:[%s9889_s24 + $0xa8] sm:$0xf] }
 0x133   : > { %12680 = vst [vmem:[#allocation35_spill] sm:$0xff] %v11502_v50  ;;  %v4539_v23 = vrot.slane %v4538_v31, 4  ;;  %v5501_v5 = vrot.slane %v5499_v21, 4  ;;  %v11506_v43 = vadd.f32 %v11383_v20, %v11089_v52  ;;  %v5507_v33 = vrot.slane %v5505_v58, 5  ;;  %v8150_v31 = vld [vmem:[%s9889_s24 + $0xb0] sm:$0x1] }
 0x134   : > { %9478 = vmatprep.mubr.bf16.mxu0 %v8178_v56  ;;  %v5492_v61 = vor.u32 %v5491_v60, %v5488_v55  ;;  %v11510_v19 = vadd.f32 %v11394_v51, %v11107_v42  ;;  %9433 = vmatpush3.bf16.msra.mxu1 %v9753_v59  ;;  %v11514_v12 = vadd.f32 %v11406_v47, %v11128_v63  ;;  %v11517_v13 = vpop.f32.mrf.mxu0  ;;  %v11519_v62 = vpop.f32.mrf.mxu1  ;;  %v4546_v51 = vshrl.u32 %v7996_v35, 16  ;;  %v8149_v59 = vld [vmem:[%s9889_s24 + $0xac] sm:$0xf]  ;;  %v9756_v63 = vld [vmem:[%s12635_s2 + $0x18] sm:$0xff]  }
 0x135   : > { %12681 = vst [vmem:[#allocation36_spill] sm:$0xff] %v11517_v13  ;;  %v4534_v52 = vsel %vm9938_vm5, %v4529_v3, %v4533_v17  ;;  %v4544_v20 = vsel %vm9938_vm5, %v4539_v23, %v11230_v24  ;;  %v5502_v42 = vor.u32 %v5501_v5, %v5497_v32  ;;  %9527 = vmatpush3.bf16.msra.mxu0 %v9752_v37  ;;  %v4549_v40 = vshll.u32 %v7996_v35, 16  ;;  %v9757_v24 = vld [vmem:[%s12634_s1 + $0x190] sm:$0xff]   ;;  %v7999_v23 = vld [vmem:[%s9889_s24 + $0xa8] sm:$0xf] }
 0x136   : > { %9434 = vmatprep.subr.bf16.mxu1 %v9755_v57  ;;  %v8027_v47 = vcombine.low %v4534_v52, %v4544_v20  ;;  %v5493_v55 = vrot.slane %v5492_v61, 4  ;;  %9528 = vmatprep.subr.bf16.mxu0 %v9754_v26  ;;  %v4555_v17 = vshll.u32 %v11209_v8, 16  ;;  %v11535_v37 = vpop.f32.mrf.mxu0  ;;  %v11537_v21 = vpop.f32.mrf.mxu1  ;;  %v4548_v60 = vrot.slane %v4546_v51, 4 }
 0x137   : > { %12682 = vst [vmem:[#allocation37_spill] sm:$0xff] %v11535_v37  ;;  %v5503_v56 = vrot.slane %v5502_v42, 4  ;;  %v4559_v58 = vshrl.u32 %v11209_v8, 16  ;;  %v4565_v3 = vshll.u32 %v11214_v11, 16  ;;  %v4551_v5 = vrot.slane %v4549_v40, 5 }
 0x138   : > { %9383 = vmatmul.mubr.bf16.gmra.mxu1 %v8027_v47  ;;  %v5498_v35 = vsel %vm9938_vm5, %v5493_v55, %v5497_v32  ;;  %v4557_v61 = vrot.slane %v4555_v17, 5  ;;  %v5510_v52 = vshrl.u32 %v8148_v28, 16  ;;  %v11544_v20 = vpop.f32.mrf.mxu0  ;;  %v11546_v13 = vpop.f32.mrf.mxu1  ;;  %v5513_v37 = vshll.u32 %v8148_v28, 16  ;;  %v9758_v32 = vld [vmem:[%s12635_s2 + $0x10] sm:$0xff]  }
 0x139   : > { %12683 = vst [vmem:[#allocation38_spill] sm:$0xff] %v11544_v20  ;;  %v5508_v42 = vsel %vm9938_vm5, %v5503_v56, %v5507_v33  ;;  %9529 = vmatpush3.bf16.msra.mxu0 %v9754_v26  ;;  %v4561_v51 = vrot.slane %v4559_v58, 4  ;;  %v4567_v8 = vrot.slane %v4565_v3, 5  ;;  %9435 = vmatpush3.bf16.msra.mxu1 %v9755_v57  ;;  %v4552_v47 = vor.u32 %v4551_v5, %v4548_v60  ;;  %v9759_v33 = vld [vmem:[%s12634_s1 + $0x188] sm:$0xff]  }
 0x13a   : > { %v8179_v11 = vcombine.low %v5498_v35, %v5508_v42  ;;  %v5512_v50 = vrot.slane %v5510_v52, 4  ;;  %v5519_v46 = vshll.u32 %v8149_v59, 16  ;;  %9530 = vmatprep.subr.bf16.mxu0 %v9756_v63  ;;  %9436 = vmatprep.subr.bf16.mxu1 %v9757_v24  ;;  %v11556_v26 = vpop.f32.mrf.mxu0  ;;  %v11558_v55 = vpop.f32.mrf.mxu1  ;;  %v5515_v28 = vrot.slane %v5513_v37, 5  ;;  %v8151_v35 = vld [vmem:[%s9889_s24 + $0xb4] sm:$0xf] }
 0x13b   : > { %12684 = vst [vmem:[#allocation39_spill] sm:$0xff] %v11556_v26  ;;  %v4562_v57 = vor.u32 %v4561_v51, %v4557_v61  ;;  %v5523_v40 = vshrl.u32 %v8149_v59, 16  ;;  %v5529_v17 = vshll.u32 %v8150_v31, 16  ;;  %v4553_v56 = vrot.slane %v4552_v47, 4  ;;  %v8152_v37 = vld [vmem:[%s9889_s24 + $0xb8] sm:$0xf] }
 0x13c   : > { %9479 = vmatmul.mubr.bf16.gmra.mxu0 %v8179_v11  ;;  %v5521_v60 = vrot.slane %v5519_v46, 5  ;;  %v11562_v58 = vadd.f32 %v11412_v1, %v11161_v10  ;;  %v4570_v3 = vshrl.u32 %v7999_v23, 16  ;;  %v11565_v5 = vpop.f32.mrf.mxu0  ;;  %v11567_v52 = vpop.f32.mrf.mxu1  ;;  %v5516_v26 = vor.u32 %v5515_v28, %v5512_v50  ;;  %v9760_v31 = vld [vmem:[%s12635_s2 + $0x8] sm:$0xff]  }
 0x13d   : > { %12685 = vst [vmem:[#allocation40_spill] sm:$0xff] %v11565_v5  ;;  %v4563_v42 = vrot.slane %v4562_v57, 4  ;;  %v5525_v51 = vrot.slane %v5523_v40, 4  ;;  %v5531_v20 = vrot.slane %v5529_v17, 5  ;;  %9531 = vmatpush3.bf16.msra.mxu0 %v9756_v63  ;;  %9437 = vmatpush3.bf16.msra.mxu1 %v9757_v24  ;;  %v4558_v46 = vsel %vm9938_vm5, %v4553_v56, %v4557_v61  ;;  %v8153_v40 = vld [vmem:[%s9889_s24 + $0xbc] sm:$0x1] }
 0x13e   : > { %v4572_v59 = vrot.slane %v4570_v3, 4  ;;  %v4573_v10 = vshll.u32 %v7999_v23, 16  ;;  %v4579_v1 = vshll.u32 %v11238_v9, 16  ;;  %9532 = vmatprep.subr.bf16.mxu0 %v9758_v32  ;;  %9438 = vmatprep.subr.bf16.mxu1 %v9759_v33  ;;  %v11576_v50 = vpop.f32.mrf.mxu0  ;;  %v11578_v11 = vpop.f32.mrf.mxu1  ;;  %v5517_v24 = vrot.slane %v5516_v26, 4  ;;  %v9761_v9 = vld [vmem:[%s12634_s1 + $0x180] sm:$0xff]  }
 0x13f   : > { %12686 = vst [vmem:[#allocation41_spill] sm:$0xff] %v11576_v50  ;;  %v4568_v63 = vsel %vm9938_vm5, %v4563_v42, %v4567_v8  ;;  %v5526_v61 = vor.u32 %v5525_v51, %v5521_v60  ;;  %v5534_v47 = vshrl.u32 %v8151_v35, 16  ;;  %v5537_v17 = vshll.u32 %v8151_v35, 16  ;;  %v9762_v56 = vld [vmem:[%s12635_s2] sm:$0xff]   ;;  %v11599_v35 = vld [vmem:[%s12634_s1 + $0x238] sm:$0xff]  }
 0x140   : > { %v8028_v23 = vcombine.low %v4558_v46, %v4568_v63  ;;  %v4575_v57 = vrot.slane %v4573_v10, 5  ;;  %v4581_v28 = vrot.slane %v4579_v1, 5  ;;  %v11589_v3 = vpop.f32.mrf.mxu0  ;;  %v11591_v8 = vpop.f32.mrf.mxu1  ;;  %v5522_v26 = vsel %vm9938_vm5, %v5517_v24, %v5521_v60  ;;  %v8002_v46 = vld [vmem:[%s9889_s24 + $0xb4] sm:$0xf] }
 0x141   : > { %12687 = vst [vmem:[#allocation42_spill] sm:$0xff] %v11589_v3  ;;  %v5527_v42 = vrot.slane %v5526_v61, 4  ;;  %v5536_v51 = vrot.slane %v5534_v47, 4  ;;  %v5543_v50 = vshll.u32 %v8152_v37, 16  ;;  %9533 = vmatpush3.bf16.msra.mxu0 %v9758_v32  ;;  %9439 = vmatpush3.bf16.msra.mxu1 %v9759_v33  ;;  %v5539_v63 = vrot.slane %v5537_v17, 5 }
 0x142   : > { %9386 = vmatprep.mubr.bf16.mxu1 %v8028_v23  ;;  %v4576_v10 = vor.u32 %v4575_v57, %v4572_v59  ;;  %v4586_v1 = vor.u32 %v11261_v30, %v4581_v28  ;;  %v5547_v3 = vshrl.u32 %v8152_v37, 16  ;;  %9534 = vmatprep.subr.bf16.mxu0 %v9760_v31  ;;  %v11602_v5 = vpop.f32.mrf.mxu0  ;;  %v11604_v60 = vpop.f32.mrf.mxu1  ;;  %v5553_v24 = vshll.u32 %v8153_v40, 16 }
 0x143   : > { %12688 = vst [vmem:[#allocation43_spill] sm:$0xff] %v11602_v5  ;;  %v5532_v32 = vsel %vm9938_vm5, %v5527_v42, %v5531_v20  ;;  %v5545_v33 = vrot.slane %v5543_v50, 5  ;;  %v11610_v61 = vadd.f32 %v11423_v49, %v11176_v53  ;;  %9440 = vmatprep.subr.bf16.mxu1 %v9761_v9  ;;  %v5540_v37 = vor.u32 %v5539_v63, %v5536_v51  ;;  %v8155_v42 = vld [vmem:[%s9889_s24 + $0xc4] sm:$0xf] }
 0x144   : > { %v8180_v59 = vcombine.low %v5522_v26, %v5532_v32  ;;  %v4577_v47 = vrot.slane %v4576_v10, 4  ;;  %v4587_v30 = vrot.slane %v4586_v1, 4  ;;  %v11612_v23 = vpop.f32.mrf.mxu0  ;;  %v11614_v57 = vpop.f32.mrf.mxu1  ;;  %v5549_v17 = vrot.slane %v5547_v3, 4  ;;  %v8156_v1 = vld [vmem:[%s9889_s24 + $0xc8] sm:$0x1] }
 0x145   : > { %12689 = vst [vmem:[#allocation44_spill] sm:$0xff] %v11612_v23  ;;  %v5555_v5 = vrot.slane %v5553_v24, 5  ;;  %v11618_v20 = vadd.f32 %v11433_v7, %v11190_v44  ;;  %v11622_v53 = vadd.f32 %v11443_v48, %v11223_v38  ;;  %9535 = vmatpush3.bf16.msra.mxu0 %v9760_v31  ;;  %9441 = vmatpush3.bf16.msra.mxu1 %v9761_v9  ;;  %v5541_v40 = vrot.slane %v5540_v37, 4  ;;  %v8154_v44 = vld [vmem:[%s9889_s24 + $0xc0] sm:$0xf] }
 0x146   : > { %9482 = vmatprep.mubr.bf16.mxu0 %v8180_v59  ;;  %v4582_v49 = vsel %vm9938_vm5, %v4577_v47, %v4581_v28  ;;  %v4592_v50 = vsel %vm9938_vm5, %v4587_v30, %v11263_v2  ;;  %v4594_v3 = vshrl.u32 %v8002_v46, 16  ;;  %9536 = vmatprep.subr.bf16.mxu0 %v9762_v56  ;;  %v11630_v7 = vpop.f32.mrf.mxu0  ;;  %v11632_v38 = vpop.f32.mrf.mxu1  ;;  %v5550_v31 = vor.u32 %v5549_v17, %v5545_v33 }
 0x147   : > { %12690 = vst [vmem:[#allocation45_spill] sm:$0xff] %v11630_v7  ;;  %v8029_v48 = vcombine.low %v4582_v49, %v4592_v50  ;;  %v4597_v9 = vshll.u32 %v8002_v46, 16  ;;  %v4603_v26 = vshll.u32 %v11279_v29, 16  ;;  %9490 = vmatprep.subr.bf16.mxu1 %v11599_v35  ;;  %v5546_v2 = vsel %vm9938_vm5, %v5541_v40, %v5545_v33 }
 0x148   : > { %v4596_v28 = vrot.slane %v4594_v3, 4  ;;  %v4607_v51 = vshrl.u32 %v11279_v29, 16  ;;  %v4613_v10 = vshll.u32 %v11282_v45, 16  ;;  %v11642_v63 = vpop.f32.mrf.mxu0  ;;  %v11644_v32 = vpop.f32.mrf.mxu1  ;;  %v5551_v46 = vrot.slane %v5550_v31, 4 }
 0x149   : > { %12691 = vst [vmem:[#allocation46_spill] sm:$0xff] %v11642_v63  ;;  %9387 = vmatmul.mubr.bf16.gmra.mxu1 %v8029_v48  ;;  %v4599_v24 = vrot.slane %v4597_v9, 5  ;;  %v4605_v59 = vrot.slane %v4603_v26, 5  ;;  %v5558_v47 = vshrl.u32 %v8154_v44, 16  ;;  %9537 = vmatpush3.bf16.msra.mxu0 %v9762_v56  ;;  %v5561_v37 = vshll.u32 %v8154_v44, 16 }
 0x14a   : > { %v4609_v30 = vrot.slane %v4607_v51, 4  ;;  %v4615_v33 = vrot.slane %v4613_v10, 5  ;;  %v5567_v17 = vshll.u32 %v8155_v42, 16  ;;  %v11646_v29 = vpop.f32.mrf.mxu0  ;;  %v11648_v45 = vpop.f32.mrf.mxu1  ;;  %v5556_v49 = vsel %vm9938_vm5, %v5551_v46, %v5555_v5  ;;  %v8005_v48 = vld [vmem:[%s9889_s24 + $0xc0] sm:$0xf] }
 0x14b   : > { %12692 = vst [vmem:[#allocation47_spill] sm:$0xff] %v11646_v29  ;;  %v4600_v50 = vor.u32 %v4599_v24, %v4596_v28  ;;  %v5560_v40 = vrot.slane %v5558_v47, 4  ;;  %v5571_v3 = vshrl.u32 %v8155_v42, 16  ;;  %v8181_v31 = vcombine.low %v5546_v2, %v5556_v49  ;;  %v8157_v63 = vld [vmem:[%s9889_s24 + $0xcc] sm:$0xf] }
 0x14c   : > { %v4610_v9 = vor.u32 %v4609_v30, %v4605_v59  ;;  %v5563_v26 = vrot.slane %v5561_v37, 5  ;;  %v5569_v56 = vrot.slane %v5567_v17, 5  ;;  %v11654_v51 = vpop.f32.mrf.mxu0  ;;  %v11656_v44 = vpop.f32.mrf.mxu1  ;;  %v5577_v7 = vshll.u32 %v8156_v1, 16  ;;  %v8158_v49 = vld [vmem:[%s9889_s24 + $0xd0] sm:$0xf] }
 0x14d   : > { %12693 = vst [vmem:[#allocation48_spill] sm:$0xff] %v11654_v51  ;;  %v4601_v10 = vrot.slane %v4600_v50, 4  ;;  %v5573_v29 = vrot.slane %v5571_v3, 4  ;;  %v11660_v5 = vadd.f32 %v11458_v25, %v11254_v34  ;;  %9483 = vmatmul.mubr.bf16.gmra.mxu0 %v8181_v31  ;;  %v4618_v2 = vshrl.u32 %v8005_v48, 16 }
 0x14e   : > { %v4611_v42 = vrot.slane %v4610_v9, 4  ;;  %v5564_v28 = vor.u32 %v5563_v26, %v5560_v40  ;;  %v4621_v46 = vshll.u32 %v8005_v48, 16  ;;  %v11662_v24 = vpop.f32.mrf.mxu0  ;;  %v11664_v47 = vpop.f32.mrf.mxu1  ;;  %v5579_v17 = vrot.slane %v5577_v7, 5 }
 0x14f   : > { %12694 = vst [vmem:[#allocation49_spill] sm:$0xff] %v11662_v24  ;;  %v4606_v30 = vsel %vm9938_vm5, %v4601_v10, %v4605_v59  ;;  %v5574_v37 = vor.u32 %v5573_v29, %v5569_v56  ;;  %v4627_v1 = vshll.u32 %v11313_v0, 16  ;;  %v4620_v50 = vrot.slane %v4618_v2, 4  ;;  %v8159_v24 = vld [vmem:[%s9889_s24 + $0xd4] sm:$0x1] }
 0x150   : > { %v4616_v34 = vsel %vm9938_vm5, %v4611_v42, %v4615_v33  ;;  %v5565_v25 = vrot.slane %v5564_v28, 4  ;;  %v4623_v40 = vrot.slane %v4621_v46, 5  ;;  %v11672_v3 = vpop.f32.mrf.mxu0  ;;  %v11674_v48 = vpop.f32.mrf.mxu1  ;;  %v5582_v59 = vshrl.u32 %v8157_v63, 16 }
 0x151   : > { %12695 = vst [vmem:[#allocation50_spill] sm:$0xff] %v11672_v3  ;;  %v8030_v31 = vcombine.low %v4606_v30, %v4616_v34  ;;  %v5575_v9 = vrot.slane %v5574_v37, 4  ;;  %v4629_v26 = vrot.slane %v4627_v1, 5  ;;  %v5585_v29 = vshll.u32 %v8157_v63, 16  ;;  %v8272_v34 = vld [vmem:[%s9889_s24 + $0xc] sm:$0xf] }
 0x152   : > { %v5570_v0 = vsel %vm9938_vm5, %v5565_v25, %v5569_v56  ;;  %v4624_v7 = vor.u32 %v4623_v40, %v4620_v50  ;;  %v5591_v10 = vshll.u32 %v8158_v49, 16  ;;  %v11679_v33 = vpop.f32.mrf.mxu0  ;;  %v11681_v42 = vpop.f32.mrf.mxu1  ;;  %v5584_v46 = vrot.slane %v5582_v59, 4 }
 0x153   : > { %12696 = vst [vmem:[#allocation51_spill] sm:$0xff] %v11679_v33  ;;  %9390 = vmatprep.mubr.bf16.mxu1 %v8030_v31  ;;  %v5580_v28 = vsel %vm9938_vm5, %v5575_v9, %v5579_v17  ;;  %v4634_v2 = vor.u32 %v11333_v15, %v4629_v26  ;;  %v5595_v30 = vshrl.u32 %v8158_v49, 16  ;;  %v5587_v56 = vrot.slane %v5585_v29, 5  ;;  %v9763_v15 = vld [vmem:[%s9889_s24 + $0x78] sm:$0xff]   ;;  %v8273_v9 = vld [vmem:[%s9889_s24 + $0x10] sm:$0xf] }
 0x154   : > { %v8182_v37 = vcombine.low %v5570_v0, %v5580_v28  ;;  %v4625_v1 = vrot.slane %v4624_v7, 4  ;;  %v5593_v63 = vrot.slane %v5591_v10, 5  ;;  %v11687_v25 = vpop.f32.mrf.mxu0  ;;  %v11689_v50 = vpop.f32.mrf.mxu1  ;;  %v5601_v33 = vshll.u32 %v8159_v24, 16  ;;  %v8274_v24 = vld [vmem:[%s9889_s24 + $0x14] sm:$0x1] }
 0x155   : > { %12697 = vst [vmem:[#allocation52_spill] sm:$0xff] %v11687_v25  ;;  %v4635_v40 = vrot.slane %v4634_v2, 4  ;;  %v5597_v31 = vrot.slane %v5595_v30, 4  ;;  %v11693_v17 = vadd.f32 %v11466_v22, %v11268_v6  ;;  %v5588_v59 = vor.u32 %v5587_v56, %v5584_v46  ;;  %v8276_v25 = vld [vmem:[%s9889_s24 + $0x1c] sm:$0xf] }
 0x156   : > { %9486 = vmatprep.mubr.bf16.mxu0 %v8182_v37  ;;  %v4630_v49 = vsel %vm9938_vm5, %v4625_v1, %v4629_v26  ;;  %v11701_v0 = vadd.f32 %v11475_v36, %v11284_v4  ;;  %v11705_v7 = vadd.f32 %v11490_v54, %v11300_v16  ;;  %v11708_v29 = vpop.f32.mrf.mxu0  ;;  %v11710_v6 = vpop.f32.mrf.mxu1  ;;  %v5603_v10 = vrot.slane %v5601_v33, 5  ;;  %v8275_v16 = vld [vmem:[%s9889_s24 + $0x18] sm:$0xf] }
 0x157   : > { %12698 = vst [vmem:[#allocation53_spill] sm:$0xff] %v11708_v29  ;;  %v4640_v22 = vsel %vm9938_vm5, %v4635_v40, %v11335_v39  ;;  %v5598_v26 = vor.u32 %v5597_v31, %v5593_v63  ;;  %v6304_v28 = vshrl.u32 %v8272_v34, 16  ;;  %v5589_v4 = vrot.slane %v5588_v59, 4  ;;  %v12700_v31 = vld [vmem:[#allocation20_spill] sm:$0xff]  ;;  %v8277_v59 = vld [vmem:[%s9889_s24 + $0x20] sm:$0x1] }
 0x158   : > { %v8031_v2 = vcombine.low %v4630_v49, %v4640_v22  ;;  %v6307_v36 = vshll.u32 %v8272_v34, 16  ;;  %v6313_v46 = vshll.u32 %v8273_v9, 16  ;;  %v11716_v54 = vpop.f32.mrf.mxu0  ;;  %v11718_v30 = vpop.f32.mrf.mxu1  ;;  %v6317_v56 = vshrl.u32 %v8273_v9, 16  ;;  %v12701_v49 = vld [vmem:[#allocation3_spill] sm:$0xff] }
 0x159   : > { %12699 = vst [vmem:[#allocation54_spill] sm:$0xff] %v11716_v54  ;;  %v5599_v37 = vrot.slane %v5598_v26, 4  ;;  %v6306_v1 = vrot.slane %v6304_v28, 4  ;;  %v6323_v29 = vshll.u32 %v8274_v24, 16  ;;  %v5594_v39 = vsel %vm9938_vm5, %v5589_v4, %v5593_v63 }
 0x15a   : > { %9391 = vmatmul.mubr.bf16.gmra.mxu1 %v8031_v2  ;;  %v6309_v33 = vrot.slane %v6307_v36, 5  ;;  %v6315_v40 = vrot.slane %v6313_v46, 5  ;;  %v1187_v34 = vadd.f32 %v12701_v49, %v12700_v31  ;;  %v11726_v22 = vpop.f32.mrf.mxu0  ;;  %v11728_v3 = vpop.f32.mrf.mxu1  ;;  %v6319_v24 = vrot.slane %v6317_v56, 4 }
 0x15b   : > { %12702 = vst [vmem:[#allocation20_spill] sm:$0xff] %v11726_v22  ;;  %v5604_v9 = vsel %vm9938_vm5, %v5599_v37, %v5603_v10  ;;  %9442 = vmatprep.mubr.bf16.mxu1 %v9763_v15  ;;  %v6325_v26 = vrot.slane %v6323_v29, 5  ;;  %v6328_v28 = vshrl.u32 %v8275_v16, 16  ;;  %v6331_v36 = vshll.u32 %v8275_v16, 16  ;;  %v8278_v10 = vld [vmem:[%s9889_s24 + $0x24] sm:$0xf] }
 0x15c   : > { %v8183_v63 = vcombine.low %v5594_v39, %v5604_v9  ;;  %v6310_v2 = vor.u32 %v6309_v33, %v6306_v1  ;;  %v11733_v4 = vadd.f32 %v11519_v62, %v1187_v34  ;;  %v11735_v46 = vpop.f32.mrf.mxu0  ;;  %v11737_v31 = vpop.f32.mrf.mxu1  ;;  %v6320_v49 = vor.u32 %v6319_v24, %v6315_v40  ;;  %v9764_v37 = vld [vmem:[%s9889_s24 + $0x84] sm:$0xff]   ;;  %v12704_v39 = vld [vmem:[#allocation21_spill] sm:$0xff]  ;;  %v12705_v62 = vld [vmem:[#allocation4_spill] sm:$0xff] }
 0x15d   : > { %12703 = vst [vmem:[#allocation3_spill] sm:$0xff] %v11735_v46  ;;  %v6330_v51 = vrot.slane %v6328_v28, 4  ;;  %v6337_v23 = vshll.u32 %v8276_v25, 16  ;;  %v6341_v15 = vshrl.u32 %v8276_v25, 16  ;;  %v6333_v1 = vrot.slane %v6331_v36, 5  ;;  %v12707_v25 = vld [vmem:[#allocation23_spill] sm:$0xff] }
 0x15e   : > { %9487 = vmatmul.mubr.bf16.gmra.mxu0 %v8183_v63  ;;  %v6311_v29 = vrot.slane %v6310_v2, 4  ;;  %v6347_v56 = vshll.u32 %v8277_v59, 16  ;;  %v1185_v33 = vadd.f32 %v12705_v62, %v12704_v39  ;;  %v8279_v16 = vld [vmem:[%s9889_s24 + $0x28] sm:$0xf]  ;;  %v11744_v34 = vpop.f32.mrf.mxu0  ;;  %v11746_v9 = vpop.f32.mrf.mxu1  ;;  %v6321_v24 = vrot.slane %v6320_v49, 4  ;;  %v12708_v22 = vld [vmem:[#allocation5_spill] sm:$0xff] }
 0x15f   : > { %12706 = vst [vmem:[#allocation21_spill] sm:$0xff] %v11744_v34  ;;  %v6339_v28 = vrot.slane %v6337_v23, 5  ;;  %v6343_v46 = vrot.slane %v6341_v15, 4  ;;  %v1188_v54 = vadd.f32 %v12708_v22, %v12707_v25  ;;  %v9767_v63 = vld [vmem:[%s9889_s24 + $0x90] sm:$0xff]   ;;  %v8280_v2 = vld [vmem:[%s9889_s24 + $0x2c] sm:$0x1]  ;;  %v6334_v36 = vor.u32 %v6333_v1, %v6330_v51 }
 0x160   : > { %v6316_v59 = vsel %vm9938_vm5, %v6311_v29, %v6315_v40  ;;  %v6349_v39 = vrot.slane %v6347_v56, 5  ;;  %v11755_v62 = vadd.f32 %v11537_v21, %v1185_v33  ;;  %v9766_v23 = vld [vmem:[%s12634_s1 + $0x230] sm:$0xff]   ;;  %v11760_v49 = vpop.f32.mrf.mxu0  ;;  %v11762_v15 = vpop.f32.mrf.mxu1  ;;  %v6326_v22 = vsel %vm9938_vm5, %v6321_v24, %v6325_v26  ;;  %v12711_v51 = vld [vmem:[#allocation6_spill] sm:$0xff] }
 0x161   : > { %12709 = vst [vmem:[#allocation4_spill] sm:$0xff] %v11760_v49  ;;  %12710 = vst [vmem:[#allocation23_spill] sm:$0xff] %v11762_v15  ;;  %v6344_v25 = vor.u32 %v6343_v46, %v6339_v28  ;;  %v11767_v40 = vadd.f32 %v11546_v13, %v1188_v54  ;;  %v1186_v29 = vadd.f32 %v12711_v51, %v11418_v18  ;;  %v8281_v21 = vld [vmem:[%s9889_s24 + $0x30] sm:$0xf]  ;;  %v6335_v56 = vrot.slane %v6334_v36, 4 }
 0x162   : > { %v8320_v1 = vcombine.low %v6316_v59, %v6326_v22  ;;  %9443 = vmatmul.mubr.bf16.vlgmr.msra.gmra.mxu1 %v9764_v37  ;;  %v6352_v33 = vshrl.u32 %v8278_v10, 16  ;;  %v6355_v34 = vshll.u32 %v8278_v10, 16  ;;  %v8282_v49 = vld [vmem:[%s9889_s24 + $0x34] sm:$0xf]  ;;  %v11773_v27 = vpop.f32.mrf.mxu0  ;;  %v11775_v15 = vpop.f32.mrf.mxu1  ;;  %v6361_v18 = vshll.u32 %v8279_v16, 16 }
 0x163   : > { %12712 = vst [vmem:[#allocation5_spill] sm:$0xff] %v11773_v27  ;;  %v6345_v26 = vrot.slane %v6344_v25, 4  ;;  %9491 = vmatpush3.bf16.msra.mxu1 %v11599_v35  ;;  %v11779_v13 = vadd.f32 %v11558_v55, %v1186_v29  ;;  %9446 = vmatprep.mubr.bf16.mxu1 %v9767_v63  ;;  %v6365_v54 = vshrl.u32 %v8279_v16, 16  ;;  %v8283_v46 = vld [vmem:[%s9889_s24 + $0x38] sm:$0x1]  ;;  %v6340_v10 = vsel %vm9938_vm5, %v6335_v56, %v6339_v28  ;;  %v9769_v35 = vld [vmem:[%s12634_s1 + $0x228] sm:$0xff]  }
 0x164   : > { %9538 = vmatprep.mubr.bf16.mxu0 %v8320_v1  ;;  %9492 = vmatprep.subr.bf16.mxu1 %v9766_v23  ;;  %v6354_v37 = vrot.slane %v6352_v33, 4  ;;  %v6357_v24 = vrot.slane %v6355_v34, 5  ;;  %v6371_v59 = vshll.u32 %v8280_v2, 16  ;;  %v11787_v36 = vpop.f32.mrf.mxu0  ;;  %v11789_v55 = vpop.f32.mrf.mxu1  ;;  %v6363_v63 = vrot.slane %v6361_v18, 5  ;;  %v12714_v28 = vld [vmem:[#allocation7_spill] sm:$0xff]  ;;  %v9768_v29 = vld [vmem:[%s9889_s24 + $0x9c] sm:$0xff]  }
 0x165   : > { %12713 = vst [vmem:[#allocation6_spill] sm:$0xff] %v11787_v36  ;;  %v6350_v16 = vsel %vm9938_vm5, %v6345_v26, %v6349_v39  ;;  %v6367_v22 = vrot.slane %v6365_v54, 4  ;;  %v1191_v25 = vadd.f32 %v12714_v28, %v11464_v14  ;;  %v6376_v1 = vshrl.u32 %v8281_v21, 16  ;;  %v9770_v14 = vld [vmem:[%s12634_s1 + $0x220] sm:$0xff]   ;;  %v9771_v54 = vld [vmem:[%s9889_s24 + $0xa8] sm:$0xff]   ;;  %v12804_v41 = vld [vmem:[#allocation20_spill] sm:$0xff] }
 0x166   : > { %v8321_v34 = vcombine.low %v6340_v10, %v6350_v16  ;;  %v6358_v2 = vor.u32 %v6357_v24, %v6354_v37  ;;  %v6373_v51 = vrot.slane %v6371_v59, 5  ;;  %v11796_v56 = vpop.f32.mrf.mxu0  ;;  %v11798_v33 = vpop.f32.mrf.mxu1  ;;  %v6379_v26 = vshll.u32 %v8281_v21, 16  ;;  %v8284_v10 = vld [vmem:[%s9889_s24 + $0x3c] sm:$0xf] }
 0x167   : > { %12715 = vst [vmem:[#allocation7_spill] sm:$0xff] %v11796_v56  ;;  %9493 = vmatpush3.bf16.msra.mxu1 %v9766_v23  ;;  %v6368_v36 = vor.u32 %v6367_v22, %v6363_v63  ;;  %v11801_v39 = vadd.f32 %v11567_v52, %v1191_v25  ;;  %v6385_v18 = vshll.u32 %v8282_v49, 16  ;;  %v6378_v24 = vrot.slane %v6376_v1, 4  ;;  %v12718_v25 = vld [vmem:[#allocation8_spill] sm:$0xff]  ;;  %v8285_v1 = vld [vmem:[%s9889_s24 + $0x40] sm:$0xf] }
 0x168   : > { %9539 = vmatmul.mubr.bf16.vlgmr.msra.gmra.mxu0 %v8321_v34  ;;  %v6359_v37 = vrot.slane %v6358_v2, 4  ;;  %9494 = vmatprep.subr.bf16.mxu1 %v9769_v35  ;;  %v6389_v59 = vshrl.u32 %v8282_v49, 16  ;;  %v6395_v16 = vshll.u32 %v8283_v46, 16  ;;  %v11808_v23 = vpop.f32.mrf.mxu0  ;;  %v11810_v22 = vpop.f32.mrf.mxu1  ;;  %v6381_v21 = vrot.slane %v6379_v26, 5  ;;  %v12719_v49 = vld [vmem:[#allocation9_spill] sm:$0xff] }
 0x169   : > { %12716 = vst [vmem:[#allocation55_spill] sm:$0xff] %v11808_v23  ;;  %12717 = vst [vmem:[#allocation56_spill] sm:$0xff] %v11810_v22  ;;  %v6369_v52 = vrot.slane %v6368_v36, 4  ;;  %v6387_v28 = vrot.slane %v6385_v18, 5  ;;  %v1189_v56 = vadd.f32 %v12718_v25, %v11506_v43  ;;  %v1192_v46 = vadd.f32 %v12719_v49, %v11510_v19  ;;  %v8286_v18 = vld [vmem:[%s9889_s24 + $0x44] sm:$0x1] }
 0x16a   : > { %v6364_v34 = vsel %vm9938_vm5, %v6359_v37, %v6363_v63  ;;  %9447 = vmatmul.mubr.bf16.gmra.mxu1 %v9768_v29  ;;  %v6391_v2 = vrot.slane %v6389_v59, 4  ;;  %v6397_v27 = vrot.slane %v6395_v16, 5  ;;  %v11819_v23 = vpop.f32.mrf.mxu0  ;;  %v11821_v22 = vpop.f32.mrf.mxu1  ;;  %v6382_v26 = vor.u32 %v6381_v21, %v6378_v24  ;;  %v12721_v63 = vld [vmem:[#allocation10_spill] sm:$0xff] }
 0x16b   : > { %12720 = vst [vmem:[#allocation8_spill] sm:$0xff] %v11819_v23  ;;  %v6374_v36 = vsel %vm9938_vm5, %v6369_v52, %v6373_v51  ;;  %9495 = vmatpush3.bf16.msra.mxu1 %v9769_v35  ;;  %v11826_v43 = vadd.f32 %v11578_v11, %v1189_v56  ;;  %v1190_v29 = vadd.f32 %v12721_v63, %v11514_v12  ;;  %v6400_v16 = vshrl.u32 %v8284_v10, 16  ;;  %v9773_v35 = vld [vmem:[%s12634_s1 + $0x218] sm:$0xff]   ;;  %v8287_v52 = vld [vmem:[%s9889_s24 + $0x48] sm:$0xf] }
 0x16c   : > { %v8322_v37 = vcombine.low %v6364_v34, %v6374_v36  ;;  %v6392_v19 = vor.u32 %v6391_v2, %v6387_v28  ;;  %v11832_v59 = vadd.f32 %v11591_v8, %v1192_v46  ;;  %9496 = vmatprep.subr.bf16.mxu1 %v9770_v14  ;;  %9450 = vmatprep.mubr.bf16.mxu1 %v9771_v54  ;;  %v11837_v11 = vpop.f32.mrf.mxu0  ;;  %v11839_v51 = vpop.f32.mrf.mxu1  ;;  %v6383_v56 = vrot.slane %v6382_v26, 4  ;;  %v9772_v2 = vld [vmem:[%s9889_s24 + $0xb4] sm:$0xff]   ;;  %v12725_v26 = vld [vmem:[#allocation11_spill] sm:$0xff] }
 0x16d   : > { %12722 = vst [vmem:[#allocation9_spill] sm:$0xff] %v11837_v11  ;;  %v11842_v12 = vadd.f32 %v11604_v60, %v1190_v29  ;;  %v6403_v24 = vshll.u32 %v8284_v10, 16  ;;  %v6409_v8 = vshll.u32 %v8285_v1, 16  ;;  %v6402_v54 = vrot.slane %v6400_v16, 4  ;;  %v8288_v29 = vld [vmem:[%s9889_s24 + $0x4c] sm:$0xf] }
 0x16e   : > { %9542 = vmatprep.mubr.bf16.mxu0 %v8322_v37  ;;  %v6393_v21 = vrot.slane %v6392_v19, 4  ;;  %v6413_v25 = vshrl.u32 %v8285_v1, 16  ;;  %v6419_v34 = vshll.u32 %v8286_v18, 16  ;;  %v11846_v49 = vpop.f32.mrf.mxu0  ;;  %v11848_v46 = vpop.f32.mrf.mxu1  ;;  %v6388_v60 = vsel %vm9938_vm5, %v6383_v56, %v6387_v28  ;;  %v9774_v1 = vld [vmem:[%s12634_s1 + $0x210] sm:$0xff]   ;;  %v9775_v28 = vld [vmem:[%s9889_s24 + $0xc0] sm:$0xff]  }
 0x16f   : > { %12723 = vst [vmem:[#allocation10_spill] sm:$0xff] %v11846_v49  ;;  %12724 = vst [vmem:[#allocation57_spill] sm:$0xff] %v11848_v46  ;;  %9497 = vmatpush3.bf16.msra.mxu1 %v9770_v14  ;;  %v6405_v10 = vrot.slane %v6403_v24, 5  ;;  %v6411_v36 = vrot.slane %v6409_v8, 5  ;;  %v1195_v63 = vadd.f32 %v12725_v26, %v11562_v58  ;;  %v8289_v16 = vld [vmem:[%s9889_s24 + $0x50] sm:$0x1] }
 0x170   : > { %v6398_v18 = vsel %vm9938_vm5, %v6393_v21, %v6397_v27  ;;  %v6415_v37 = vrot.slane %v6413_v25, 4  ;;  %v6421_v19 = vrot.slane %v6419_v34, 5  ;;  %9498 = vmatprep.subr.bf16.mxu1 %v9773_v35  ;;  %v6424_v49 = vshrl.u32 %v8287_v52, 16  ;;  %v11862_v14 = vpop.f32.mrf.mxu0  ;;  %v11864_v56 = vpop.f32.mrf.mxu1 }
 0x171   : > { %12726 = vst [vmem:[#allocation11_spill] sm:$0xff] %v11862_v14  ;;  %12727 = vst [vmem:[#allocation58_spill] sm:$0xff] %v11864_v56  ;;  %v8323_v24 = vcombine.low %v6388_v60, %v6398_v18  ;;  %v6406_v58 = vor.u32 %v6405_v10, %v6402_v54  ;;  %v11867_v8 = vadd.f32 %v11614_v57, %v1195_v63  ;;  %v6427_v26 = vshll.u32 %v8287_v52, 16  ;;  %v12728_v57 = vld [vmem:[#allocation12_spill] sm:$0xff] }
 0x172   : > { %v6416_v11 = vor.u32 %v6415_v37, %v6411_v36  ;;  %9451 = vmatmul.mubr.bf16.gmra.mxu1 %v9772_v2  ;;  %v6426_v23 = vrot.slane %v6424_v49, 4  ;;  %v6433_v27 = vshll.u32 %v8288_v29, 16  ;;  %v6437_v21 = vshrl.u32 %v8288_v29, 16  ;;  %v11869_v25 = vpop.f32.mrf.mxu0  ;;  %v11871_v34 = vpop.f32.mrf.mxu1  ;;  %v12729_v49 = vld [vmem:[#allocation13_spill] sm:$0xff]  ;;  %v8290_v63 = vld [vmem:[%s9889_s24 + $0x54] sm:$0xf] }
 0x173   : > { %9543 = vmatmul.mubr.bf16.gmra.mxu0 %v8323_v24  ;;  %v6407_v14 = vrot.slane %v6406_v58, 4  ;;  %v6429_v46 = vrot.slane %v6427_v26, 5  ;;  %v6443_v56 = vshll.u32 %v8289_v16, 16  ;;  %9499 = vmatpush3.bf16.msra.mxu1 %v9773_v35  ;;  %v1193_v54 = vadd.f32 %v12728_v57, %v11610_v61  ;;  %v9777_v29 = vld [vmem:[%s12634_s1 + $0x208] sm:$0xff]   ;;  %v12731_v26 = vld [vmem:[#allocation14_spill] sm:$0xff] }
 0x174   : > { %v6417_v52 = vrot.slane %v6416_v11, 4  ;;  %v6435_v60 = vrot.slane %v6433_v27, 5  ;;  %v6439_v2 = vrot.slane %v6437_v21, 4  ;;  %v1196_v10 = vadd.f32 %v12729_v49, %v11618_v20  ;;  %9500 = vmatprep.subr.bf16.mxu1 %v9774_v1  ;;  %9454 = vmatprep.mubr.bf16.mxu1 %v9775_v28  ;;  %v11881_v18 = vpop.f32.mrf.mxu0  ;;  %v8291_v20 = vld [vmem:[%s9889_s24 + $0x58] sm:$0xf]  ;;  %v11889_v16 = vpop.f32.mrf.mxu1 }
 0x175   : > { %12730 = vst [vmem:[#allocation12_spill] sm:$0xff] %v11881_v18  ;;  %v6412_v61 = vsel %vm9938_vm5, %v6407_v14, %v6411_v36  ;;  %v6430_v35 = vor.u32 %v6429_v46, %v6426_v23  ;;  %v6445_v11 = vrot.slane %v6443_v56, 5  ;;  %v11886_v37 = vadd.f32 %v11632_v38, %v1193_v54  ;;  %v8292_v36 = vld [vmem:[%s9889_s24 + $0x5c] sm:$0x1]  ;;  %v9776_v23 = vld [vmem:[%s9889_s24 + $0xcc] sm:$0xff]  }
 0x176   : > { %v6422_v28 = vsel %vm9938_vm5, %v6417_v52, %v6421_v19  ;;  %v6440_v24 = vor.u32 %v6439_v2, %v6435_v60  ;;  %v11894_v58 = vadd.f32 %v11644_v32, %v1196_v10  ;;  %v1194_v27 = vadd.f32 %v12731_v26, %v11622_v53  ;;  %v11900_v46 = vpop.f32.mrf.mxu0  ;;  %v11902_v57 = vpop.f32.mrf.mxu1  ;;  %v8293_v53 = vld [vmem:[%s9889_s24 + $0x60] sm:$0xf]  ;;  %v12734_v26 = vld [vmem:[#allocation15_spill] sm:$0xff] }
 0x177   : > { %12732 = vst [vmem:[#allocation13_spill] sm:$0xff] %v11900_v46  ;;  %v8324_v38 = vcombine.low %v6412_v61, %v6422_v28  ;;  %v6431_v14 = vrot.slane %v6430_v35, 4  ;;  %9501 = vmatpush3.bf16.msra.mxu1 %v9774_v1  ;;  %v6448_v56 = vshrl.u32 %v8290_v63, 16  ;;  %v6451_v21 = vshll.u32 %v8290_v63, 16  ;;  %v9778_v2 = vld [vmem:[%s12634_s1 + $0x200] sm:$0xff]  }
 0x178   : > { %v6441_v19 = vrot.slane %v6440_v24, 4  ;;  %v11905_v32 = vadd.f32 %v11648_v45, %v1194_v27  ;;  %v6457_v54 = vshll.u32 %v8291_v20, 16  ;;  %v6461_v52 = vshrl.u32 %v8291_v20, 16  ;;  %9502 = vmatprep.subr.bf16.mxu1 %v9777_v29  ;;  %v11911_v49 = vpop.f32.mrf.mxu0  ;;  %v8294_v45 = vld [vmem:[%s9889_s24 + $0x64] sm:$0xf]  ;;  %v11916_v35 = vpop.f32.mrf.mxu1 }
 0x179   : > { %12733 = vst [vmem:[#allocation14_spill] sm:$0xff] %v11911_v49  ;;  %9546 = vmatprep.mubr.bf16.mxu0 %v8324_v38  ;;  %v6436_v1 = vsel %vm9938_vm5, %v6431_v14, %v6435_v60  ;;  %v6450_v10 = vrot.slane %v6448_v56, 4  ;;  %v6453_v63 = vrot.slane %v6451_v21, 5  ;;  %v6467_v61 = vshll.u32 %v8292_v36, 16  ;;  %v8295_v46 = vld [vmem:[%s9889_s24 + $0x68] sm:$0x1] }
 0x17a   : > { %v6446_v20 = vsel %vm9938_vm5, %v6441_v19, %v6445_v11  ;;  %v6459_v28 = vrot.slane %v6457_v54, 5  ;;  %v6463_v24 = vrot.slane %v6461_v52, 4  ;;  %v1199_v27 = vadd.f32 %v12734_v26, %v11660_v5  ;;  %9455 = vmatmul.mubr.bf16.gmra.mxu1 %v9776_v23  ;;  %v11923_v38 = vpop.f32.mrf.mxu0  ;;  %v11930_v5 = vpop.f32.mrf.mxu1  ;;  %v9789_v49 = vld [vmem:[%s9889_s24 + $0x8c] sm:$0x1] }
 0x17b   : > { %12735 = vst [vmem:[#allocation15_spill] sm:$0xff] %v11923_v38  ;;  %v8325_v18 = vcombine.low %v6436_v1, %v6446_v20  ;;  %v6454_v60 = vor.u32 %v6453_v63, %v6450_v10  ;;  %v6469_v14 = vrot.slane %v6467_v61, 5  ;;  %v6472_v56 = vshrl.u32 %v8293_v53, 16  ;;  %9503 = vmatpush3.bf16.msra.mxu1 %v9777_v29 }
 0x17c   : > { %v6464_v36 = vor.u32 %v6463_v24, %v6459_v28  ;;  %v11926_v21 = vadd.f32 %v11656_v44, %v1199_v27  ;;  %v6475_v11 = vshll.u32 %v8293_v53, 16  ;;  %v6481_v19 = vshll.u32 %v8294_v45, 16  ;;  %9504 = vmatprep.subr.bf16.mxu1 %v9778_v2  ;;  %v11928_v54 = vpop.f32.mrf.mxu0  ;;  %v12737_v44 = vld [vmem:[#allocation16_spill] sm:$0xff]  ;;  %v8192_v53 = vld [vmem:[%s9889_s24 + $0x78] sm:$0xe] }
 0x17d   : > { %12736 = vst [vmem:[#allocation59_spill] sm:$0xff] %v11928_v54  ;;  %9547 = vmatmul.mubr.bf16.gmra.mxu0 %v8325_v18  ;;  %v6455_v23 = vrot.slane %v6454_v60, 4  ;;  %v6474_v52 = vrot.slane %v6472_v56, 4  ;;  %v6485_v1 = vshrl.u32 %v8294_v45, 16  ;;  %v6491_v10 = vshll.u32 %v8295_v46, 16  ;;  %v12739_v60 = vld [vmem:[#allocation17_spill] sm:$0xff] }
 0x17e   : > { %v6465_v63 = vrot.slane %v6464_v36, 4  ;;  %v6477_v29 = vrot.slane %v6475_v11, 5  ;;  %v6483_v61 = vrot.slane %v6481_v19, 5  ;;  %v1197_v20 = vadd.f32 %v12737_v44, %v11693_v17  ;;  %v11935_v24 = vpop.f32.mrf.mxu0  ;;  %v12740_v36 = vld [vmem:[#allocation18_spill] sm:$0xff]  ;;  %v8296_v19 = vld [vmem:[%s9889_s24 + $0x6c] sm:$0xf] }
 0x17f   : > { %12738 = vst [vmem:[#allocation16_spill] sm:$0xff] %v11935_v24  ;;  %v6460_v26 = vsel %vm9938_vm5, %v6455_v23, %v6459_v28  ;;  %v6487_v27 = vrot.slane %v6485_v1, 4  ;;  %v6493_v18 = vrot.slane %v6491_v10, 5  ;;  %v1200_v45 = vadd.f32 %v12739_v60, %v11701_v0  ;;  %9505 = vmatpush3.bf16.msra.mxu1 %v9778_v2  ;;  %v8297_v28 = vld [vmem:[%s9889_s24 + $0x70] sm:$0xf]  ;;  %v11950_v23 = vpop.f32.mrf.mxu1 }
 0x180   : > { %v6470_v46 = vsel %vm9938_vm5, %v6465_v63, %v6469_v14  ;;  %v6478_v56 = vor.u32 %v6477_v29, %v6474_v52  ;;  %v11944_v17 = vadd.f32 %v11664_v47, %v1197_v20  ;;  %v1198_v11 = vadd.f32 %v12740_v36, %v11705_v7  ;;  %v11952_v1 = vpop.f32.mrf.mxu0  ;;  %v9786_v63 = vld [vmem:[%s9889_s24 + $0x7c] sm:$0xf]  ;;  %v9787_v29 = vld [vmem:[%s9889_s24 + $0x80] sm:$0x1] }
 0x181   : > { %12741 = vst [vmem:[#allocation17_spill] sm:$0xff] %v11952_v1  ;;  %v8326_v0 = vcombine.low %v6460_v26, %v6470_v46  ;;  %v6488_v2 = vor.u32 %v6487_v27, %v6483_v61  ;;  %v11955_v10 = vadd.f32 %v11674_v48, %v1200_v45  ;;  %v8200_v14 = vrot.slane %v8192_v53, 9  ;;  %v11962_v20 = vpop.f32.mrf.mxu1  ;;  %v8298_v27 = vld [vmem:[%s9889_s24 + $0x74] sm:$0x1] }
 0x182   : > { %v6479_v52 = vrot.slane %v6478_v56, 4  ;;  %v11958_v47 = vadd.f32 %v11681_v42, %v1198_v11  ;;  %v5848_v7 = vrot.slane %v9786_v63, 5  ;;  %v5851_v44 = vrot.slane %v9787_v29, 5  ;;  %v11964_v60 = vpop.f32.mrf.mxu0  ;;  %v8193_v63 = vld [vmem:[%s9889_s24 + $0x84] sm:$0xe]  ;;  %v12793_v53 = vld [vmem:[#allocation36_spill] sm:$0xff] }
 0x183   : > { %12742 = vst [vmem:[#allocation18_spill] sm:$0xff] %v11964_v60  ;;  %9550 = vmatprep.mubr.bf16.mxu0 %v8326_v0  ;;  %v6489_v26 = vrot.slane %v6488_v2, 4  ;;  %v6496_v46 = vshrl.u32 %v8296_v19, 16  ;;  %v6499_v48 = vshll.u32 %v8296_v19, 16  ;;  %v6505_v45 = vshll.u32 %v8297_v28, 16  ;;  %v11972_v29 = vpop.f32.mrf.mxu1 }
 0x184   : > { %v6484_v42 = vsel %vm9938_vm5, %v6479_v52, %v6483_v61  ;;  %v5849_v56 = vsel %vm9914_vm4, %v8200_v14, %v5848_v7  ;;  %v5850_v36 = vrot.slane %v5848_v7, 4  ;;  %v6509_v11 = vshrl.u32 %v8297_v28, 16  ;;  %v11974_v60 = vpop.f32.mrf.mxu0  ;;  %v8299_v52 = vld [vmem:[%s9889_s24 + $0x78] sm:$0xf] }
 0x185   : > { %12744 = vst [vmem:[#allocation2_spill] sm:$0xff] %v11974_v60  ;;  %v6494_v0 = vsel %vm9938_vm5, %v6489_v26, %v6493_v18  ;;  %v6498_v19 = vrot.slane %v6496_v46, 4  ;;  %v6501_v2 = vrot.slane %v6499_v48, 5  ;;  %v6507_v1 = vrot.slane %v6505_v45, 5  ;;  %v12746_v60 = vld [vmem:[#allocation19_spill] sm:$0xff] }
 0x186   : > { %v8327_v24 = vcombine.low %v6484_v42, %v6494_v0  ;;  %v5852_v61 = vsel %vm9914_vm4, %v5850_v36, %v5851_v44  ;;  %v6511_v14 = vrot.slane %v6509_v11, 4  ;;  %v6515_v28 = vshll.u32 %v8298_v27, 16  ;;  %v11981_v7 = vpop.f32.mrf.mxu0  ;;  %v8300_v46 = vld [vmem:[%s9889_s24 + $0x7c] sm:$0xf]  ;;  %v9788_v42 = vld [vmem:[%s9889_s24 + $0x88] sm:$0xf]  ;;  %v11988_v36 = vpop.f32.mrf.mxu1 }
 0x187   : > { %12745 = vst [vmem:[#allocation60_spill] sm:$0xff] %v11981_v7  ;;  %v8224_v54 = vcombine.low %v5849_v56, %v5852_v61  ;;  %v6502_v38 = vor.u32 %v6501_v2, %v6498_v19  ;;  %v1856_v18 = vadd.f32 %v12746_v60, %v11733_v4  ;;  %v8201_v26 = vrot.slane %v8193_v63, 9  ;;  %v8301_v19 = vld [vmem:[%s9889_s24 + $0x80] sm:$0x1] }
 0x188   : > { %9551 = vmatmul.mubr.bf16.gmra.mxu0 %v8327_v24  ;;  %v6512_v48 = vor.u32 %v6511_v14, %v6507_v1  ;;  %v6517_v45 = vrot.slane %v6515_v28, 5  ;;  %v5855_v0 = vrot.slane %v9788_v42, 5  ;;  %v5858_v44 = vrot.slane %v9789_v49, 5  ;;  %v11990_v27 = vpop.f32.mrf.mxu0 }
 0x189   : > { %12747 = vst [vmem:[#allocation19_spill] sm:$0xff] %v11990_v27  ;;  %9506 = vmatprep.mubr.bf16.mxu1 %v8224_v54  ;;  %v6503_v56 = vrot.slane %v6502_v38, 4  ;;  %v11993_v11 = vadd.f32 %v11689_v50, %v1856_v18  ;;  %v6520_v4 = vshrl.u32 %v8299_v52, 16  ;;  %v6523_v60 = vshll.u32 %v8299_v52, 16  ;;  %v12007_v42 = vpop.f32.mrf.mxu1 }
 0x18a   : > { %v6513_v24 = vrot.slane %v6512_v48, 4  ;;  %v5856_v63 = vsel %vm9914_vm4, %v8201_v26, %v5855_v0  ;;  %v5857_v2 = vrot.slane %v5855_v0, 4  ;;  %v6529_v61 = vshll.u32 %v8300_v46, 16  ;;  %v11998_v49 = vpop.f32.mrf.mxu0  ;;  %v8194_v26 = vld [vmem:[%s9889_s24 + $0x90] sm:$0xe] }
 0x18b   : > { %12748 = vst [vmem:[#allocation61_spill] sm:$0xff] %v11998_v49  ;;  %v6508_v14 = vsel %vm9938_vm5, %v6503_v56, %v6507_v1  ;;  %v6522_v54 = vrot.slane %v6520_v4, 4  ;;  %v6525_v38 = vrot.slane %v6523_v60, 5  ;;  %v6533_v28 = vshrl.u32 %v8300_v46, 16  ;;  %v12750_v60 = vld [vmem:[#allocation22_spill] sm:$0xff] }
 0x18c   : > { %v6518_v50 = vsel %vm9938_vm5, %v6513_v24, %v6517_v45  ;;  %v5859_v52 = vsel %vm9914_vm4, %v5857_v2, %v5858_v44  ;;  %v6531_v18 = vrot.slane %v6529_v61, 5  ;;  %v6539_v48 = vshll.u32 %v8301_v19, 16  ;;  %v12009_v0 = vpop.f32.mrf.mxu0  ;;  %v12751_v24 = vld [vmem:[#allocation24_spill] sm:$0xff]  ;;  %v12752_v19 = vld [vmem:[#allocation25_spill] sm:$0xff]  ;;  %v8302_v61 = vld [vmem:[%s9889_s24 + $0x84] sm:$0xf] }
 0x18d   : > { %12749 = vst [vmem:[#allocation62_spill] sm:$0xff] %v12009_v0  ;;  %v8328_v49 = vcombine.low %v6508_v14, %v6518_v50  ;;  %v8225_v1 = vcombine.low %v5856_v63, %v5859_v52  ;;  %v6526_v56 = vor.u32 %v6525_v38, %v6522_v54  ;;  %v6535_v46 = vrot.slane %v6533_v28, 4  ;;  %v12018_v0 = vpop.f32.mrf.mxu1  ;;  %v9790_v38 = vld [vmem:[%s9889_s24 + $0x94] sm:$0xf]  ;;  %v8303_v50 = vld [vmem:[%s9889_s24 + $0x88] sm:$0xf] }
 0x18e   : > { %v6541_v4 = vrot.slane %v6539_v48, 5  ;;  %v1854_v45 = vadd.f32 %v12750_v60, %v11755_v62  ;;  %v1857_v44 = vadd.f32 %v12751_v24, %v11767_v40  ;;  %v1855_v2 = vadd.f32 %v12752_v19, %v11779_v13  ;;  %v12022_v62 = vpop.f32.mrf.mxu0  ;;  %v9791_v48 = vld [vmem:[%s9889_s24 + $0x98] sm:$0x1] }
 0x18f   : > { %9554 = vmatprep.mubr.bf16.mxu0 %v8328_v49  ;;  %9507 = vmatmul.mubr.bf16.vlgmr.msra.gmra.mxu1 %v8225_v1  ;;  %v6527_v63 = vrot.slane %v6526_v56, 4  ;;  %v6536_v14 = vor.u32 %v6535_v46, %v6531_v18  ;;  %v8202_v54 = vrot.slane %v8194_v26, 9  ;;  %v5862_v28 = vrot.slane %v9790_v38, 5  ;;  %12753 = vst [vmem:[#allocation22_spill] sm:$0xff] %v12022_v62  ;;  %v8304_v1 = vld [vmem:[%s9889_s24 + $0x8c] sm:$0x1]  ;;  %v12035_v56 = vpop.f32.mrf.mxu1 }
 0x190   : > { %v12025_v40 = vadd.f32 %v11710_v6, %v1854_v45  ;;  %v12028_v52 = vadd.f32 %v11718_v30, %v1857_v44  ;;  %v12031_v13 = vadd.f32 %v11728_v3, %v1855_v2  ;;  %v5865_v49 = vrot.slane %v9791_v48, 5  ;;  %v8305_v62 = vld [vmem:[%s9889_s24 + $0x90] sm:$0xf] }
 0x191   : > { %v6532_v26 = vsel %vm9938_vm5, %v6527_v63, %v6531_v18  ;;  %v6537_v46 = vrot.slane %v6536_v14, 4  ;;  %v5863_v6 = vsel %vm9914_vm4, %v8202_v54, %v5862_v28  ;;  %v5864_v60 = vrot.slane %v5862_v28, 4  ;;  %v12754_v18 = vld [vmem:[#allocation26_spill] sm:$0xff]  ;;  %v8195_v14 = vld [vmem:[%s9889_s24 + $0x9c] sm:$0xe]  ;;  %v12048_v38 = vpop.f32.mrf.mxu1  ;;  %v12050_v54 = vpop.f32.mrf.mxu0 }
 0x192   : > { %v6544_v30 = vshrl.u32 %v8302_v61, 16  ;;  %v6547_v45 = vshll.u32 %v8302_v61, 16  ;;  %v6553_v3 = vshll.u32 %v8303_v50, 16  ;;  %v6557_v24 = vshrl.u32 %v8303_v50, 16  ;;  %12755 = vst [vmem:[#allocation24_spill] sm:$0xff] %v12050_v54 }
 0x193   : > { %v6542_v44 = vsel %vm9938_vm5, %v6537_v46, %v6541_v4  ;;  %v5866_v19 = vsel %vm9914_vm4, %v5864_v60, %v5865_v49  ;;  %v6563_v2 = vshll.u32 %v8304_v1, 16  ;;  %v1860_v63 = vadd.f32 %v12754_v18, %v11801_v39  ;;  %v8306_v4 = vld [vmem:[%s9889_s24 + $0x94] sm:$0xf]  ;;  %v12057_v39 = vpop.f32.mrf.mxu0 }
 0x194   : > { %v8329_v28 = vcombine.low %v6532_v26, %v6542_v44  ;;  %v8226_v61 = vcombine.low %v5863_v6, %v5866_v19  ;;  %v6546_v50 = vrot.slane %v6544_v30, 4  ;;  %v6549_v48 = vrot.slane %v6547_v45, 5  ;;  %12756 = vst [vmem:[#allocation25_spill] sm:$0xff] %v12057_v39  ;;  %v9792_v26 = vld [vmem:[%s9889_s24 + $0xa0] sm:$0xf] }
 0x195   : > { %v6555_v46 = vrot.slane %v6553_v3, 5  ;;  %v6559_v49 = vrot.slane %v6557_v24, 4  ;;  %v6565_v1 = vrot.slane %v6563_v2, 5  ;;  %v12055_v60 = vadd.f32 %v11737_v31, %v1860_v63  ;;  %v9793_v44 = vld [vmem:[%s9889_s24 + $0xa4] sm:$0x1]  ;;  %v12062_v24 = vpop.f32.mrf.mxu1  ;;  %v12064_v31 = vpop.f32.mrf.mxu0 }
 0x196   : > { %9555 = vmatmul.mubr.bf16.gmra.mxu0 %v8329_v28  ;;  %9510 = vmatprep.mubr.bf16.mxu1 %v8226_v61  ;;  %v6550_v18 = vor.u32 %v6549_v48, %v6546_v50  ;;  %v8203_v54 = vrot.slane %v8195_v14, 9  ;;  %v5869_v6 = vrot.slane %v9792_v26, 5  ;;  %v5872_v30 = vrot.slane %v9793_v44, 5  ;;  %v8307_v19 = vld [vmem:[%s9889_s24 + $0x98] sm:$0x1]  ;;  %12757 = vst [vmem:[#allocation26_spill] sm:$0xff] %v12064_v31 }
 0x197   : > { %v6560_v45 = vor.u32 %v6559_v49, %v6555_v46  ;;  %v6568_v27 = vshrl.u32 %v8305_v62, 16  ;;  %v6571_v7 = vshll.u32 %v8305_v62, 16  ;;  %v6577_v3 = vshll.u32 %v8306_v4, 16  ;;  %v12068_v49 = vpop.f32.mrf.mxu1  ;;  %v12070_v44 = vpop.f32.mrf.mxu0 }
 0x198   : > { %v6551_v2 = vrot.slane %v6550_v18, 4  ;;  %v5870_v63 = vsel %vm9914_vm4, %v8203_v54, %v5869_v6  ;;  %v5871_v28 = vrot.slane %v5869_v6, 4  ;;  %v6581_v14 = vshrl.u32 %v8306_v4, 16  ;;  %12758 = vst [vmem:[#allocation63_spill] sm:$0xff] %v12070_v44  ;;  %v8196_v54 = vld [vmem:[%s9889_s24 + $0xa8] sm:$0xe] }
 0x199   : > { %v6561_v61 = vrot.slane %v6560_v45, 4  ;;  %v6570_v50 = vrot.slane %v6568_v27, 4  ;;  %v6573_v48 = vrot.slane %v6571_v7, 5  ;;  %v6579_v26 = vrot.slane %v6577_v3, 5  ;;  %v12759_v6 = vld [vmem:[#allocation27_spill] sm:$0xff]  ;;  %v12081_v3 = vpop.f32.mrf.mxu1  ;;  %v12083_v44 = vpop.f32.mrf.mxu0 }
 0x19a   : > { %v6556_v62 = vsel %vm9938_vm5, %v6551_v2, %v6555_v46  ;;  %v5873_v18 = vsel %vm9914_vm4, %v5871_v28, %v5872_v30  ;;  %v6583_v31 = vrot.slane %v6581_v14, 4  ;;  %v6587_v39 = vshll.u32 %v8307_v19, 16  ;;  %12760 = vst [vmem:[#allocation27_spill] sm:$0xff] %v12083_v44  ;;  %v12761_v19 = vld [vmem:[#allocation28_spill] sm:$0xff]  ;;  %v8308_v14 = vld [vmem:[%s9889_s24 + $0x9c] sm:$0xf] }
 0x19b   : > { %v6566_v4 = vsel %vm9938_vm5, %v6561_v61, %v6565_v1  ;;  %v8227_v7 = vcombine.low %v5870_v63, %v5873_v18  ;;  %v6574_v27 = vor.u32 %v6573_v48, %v6570_v50  ;;  %v1858_v45 = vadd.f32 %v12759_v6, %v11826_v43  ;;  %v12762_v43 = vld [vmem:[#allocation29_spill] sm:$0xff]  ;;  %v8309_v48 = vld [vmem:[%s9889_s24 + $0xa0] sm:$0xf]  ;;  %v12764_v18 = vld [vmem:[#allocation23_spill] sm:$0xff] }
 0x19c   : > { %v8330_v46 = vcombine.low %v6556_v62, %v6566_v4  ;;  %v6584_v2 = vor.u32 %v6583_v31, %v6579_v26  ;;  %v6589_v30 = vrot.slane %v6587_v39, 5  ;;  %v1861_v28 = vadd.f32 %v12761_v19, %v11832_v59  ;;  %v12094_v62 = vpop.f32.mrf.mxu1  ;;  %v12096_v31 = vpop.f32.mrf.mxu0  ;;  %v9794_v4 = vld [vmem:[%s9889_s24 + $0xac] sm:$0xf]  ;;  %v8311_v44 = vld [vmem:[%s9889_s24 + $0xa8] sm:$0xf] }
 0x19d   : > { %9511 = vmatmul.mubr.bf16.gmra.mxu1 %v8227_v7  ;;  %v6575_v1 = vrot.slane %v6574_v27, 4  ;;  %v12089_v63 = vadd.f32 %v11746_v9, %v1858_v45  ;;  %v1859_v61 = vadd.f32 %v12762_v43, %v11842_v12  ;;  %v8204_v50 = vrot.slane %v8196_v54, 9  ;;  %12763 = vst [vmem:[#allocation28_spill] sm:$0xff] %v12096_v31  ;;  %v9795_v27 = vld [vmem:[%s9889_s24 + $0xb0] sm:$0x1] }
 0x19e   : > { %9558 = vmatprep.mubr.bf16.mxu0 %v8330_v46  ;;  %v6585_v39 = vrot.slane %v6584_v2, 4  ;;  %v12099_v59 = vadd.f32 %v12764_v18, %v1861_v28  ;;  %v5876_v7 = vrot.slane %v9794_v4, 5  ;;  %v5879_v9 = vrot.slane %v9795_v27, 5  ;;  %v8310_v54 = vld [vmem:[%s9889_s24 + $0xa4] sm:$0x1]  ;;  %v12109_v43 = vpop.f32.mrf.mxu1  ;;  %v12111_v46 = vpop.f32.mrf.mxu0 }
 0x19f   : > { %v6580_v6 = vsel %vm9938_vm5, %v6575_v1, %v6579_v26  ;;  %v12106_v12 = vadd.f32 %v11775_v15, %v1859_v61  ;;  %v6592_v45 = vshrl.u32 %v8308_v14, 16  ;;  %v6595_v19 = vshll.u32 %v8308_v14, 16  ;;  %12765 = vst [vmem:[#allocation29_spill] sm:$0xff] %v12109_v43  ;;  %12766 = vst [vmem:[#allocation23_spill] sm:$0xff] %v12111_v46  ;;  %v8197_v26 = vld [vmem:[%s9889_s24 + $0xb4] sm:$0xe] }
 0x1a0   : > { %v6590_v2 = vsel %vm9938_vm5, %v6585_v39, %v6589_v30  ;;  %v5877_v28 = vsel %vm9914_vm4, %v8204_v50, %v5876_v7  ;;  %v5878_v18 = vrot.slane %v5876_v7, 4  ;;  %v6601_v4 = vshll.u32 %v8309_v48, 16  ;;  %v12118_v14 = vpop.f32.mrf.mxu1  ;;  %v12120_v31 = vpop.f32.mrf.mxu0  ;;  %v12769_v50 = vld [vmem:[#allocation30_spill] sm:$0xff] }
 0x1a1   : > { %v8331_v1 = vcombine.low %v6580_v6, %v6590_v2  ;;  %v6594_v15 = vrot.slane %v6592_v45, 4  ;;  %v6597_v61 = vrot.slane %v6595_v19, 5  ;;  %v6605_v27 = vshrl.u32 %v8309_v48, 16  ;;  %12767 = vst [vmem:[#allocation64_spill] sm:$0xff] %v12118_v14  ;;  %12768 = vst [vmem:[#allocation65_spill] sm:$0xff] %v12120_v31 }
 0x1a2   : > { %v5880_v46 = vsel %vm9914_vm4, %v5878_v18, %v5879_v9  ;;  %v6603_v30 = vrot.slane %v6601_v4, 5  ;;  %v6611_v39 = vshll.u32 %v8310_v54, 16  ;;  %v1864_v7 = vadd.f32 %v12769_v50, %v11867_v8  ;;  %v8312_v2 = vld [vmem:[%s9889_s24 + $0xac] sm:$0xf]  ;;  %v12128_v14 = vpop.f32.mrf.mxu1  ;;  %v12130_v31 = vpop.f32.mrf.mxu0  ;;  %v9796_v54 = vld [vmem:[%s9889_s24 + $0xb8] sm:$0xf] }
 0x1a3   : > { %9559 = vmatmul.mubr.bf16.gmra.mxu0 %v8331_v1  ;;  %v8228_v6 = vcombine.low %v5877_v28, %v5880_v46  ;;  %v6598_v45 = vor.u32 %v6597_v61, %v6594_v15  ;;  %v6607_v48 = vrot.slane %v6605_v27, 4  ;;  %v8205_v19 = vrot.slane %v8197_v26, 9  ;;  %12770 = vst [vmem:[#allocation30_spill] sm:$0xff] %v12130_v31  ;;  %v9797_v4 = vld [vmem:[%s9889_s24 + $0xbc] sm:$0x1] }
 0x1a4   : > { %v6613_v43 = vrot.slane %v6611_v39, 5  ;;  %v12133_v9 = vadd.f32 %v11789_v55, %v1864_v7  ;;  %v5883_v18 = vrot.slane %v9796_v54, 5  ;;  %v5886_v8 = vrot.slane %v9797_v4, 5  ;;  %v8313_v28 = vld [vmem:[%s9889_s24 + $0xb0] sm:$0x1]  ;;  %v12138_v26 = vpop.f32.mrf.mxu1  ;;  %v12140_v27 = vpop.f32.mrf.mxu0 }
 0x1a5   : > { %9514 = vmatprep.mubr.bf16.mxu1 %v8228_v6  ;;  %v6599_v1 = vrot.slane %v6598_v45, 4  ;;  %v6608_v46 = vor.u32 %v6607_v48, %v6603_v30  ;;  %v6616_v15 = vshrl.u32 %v8311_v44, 16  ;;  %v6619_v61 = vshll.u32 %v8311_v44, 16  ;;  %12771 = vst [vmem:[#allocation66_spill] sm:$0xff] %v12138_v26  ;;  %12772 = vst [vmem:[#allocation67_spill] sm:$0xff] %v12140_v27 }
 0x1a6   : > { %v5884_v39 = vsel %vm9914_vm4, %v8205_v19, %v5883_v18  ;;  %v5885_v55 = vrot.slane %v5883_v18, 4  ;;  %v6625_v50 = vshll.u32 %v8312_v2, 16  ;;  %v6629_v7 = vshrl.u32 %v8312_v2, 16  ;;  %v12146_v4 = vpop.f32.mrf.mxu1  ;;  %v12148_v44 = vpop.f32.mrf.mxu0  ;;  %v8198_v18 = vld [vmem:[%s9889_s24 + $0xc0] sm:$0xe] }
 0x1a7   : > { %v6604_v54 = vsel %vm9938_vm5, %v6599_v1, %v6603_v30  ;;  %v6609_v6 = vrot.slane %v6608_v46, 4  ;;  %v6618_v45 = vrot.slane %v6616_v15, 4  ;;  %v6621_v48 = vrot.slane %v6619_v61, 5  ;;  %12773 = vst [vmem:[#allocation68_spill] sm:$0xff] %v12146_v4  ;;  %12774 = vst [vmem:[#allocation69_spill] sm:$0xff] %v12148_v44  ;;  %v12775_v46 = vld [vmem:[#allocation31_spill] sm:$0xff] }
 0x1a8   : > { %v5887_v27 = vsel %vm9914_vm4, %v5885_v55, %v5886_v8  ;;  %v6627_v31 = vrot.slane %v6625_v50, 5  ;;  %v6631_v26 = vrot.slane %v6629_v7, 4  ;;  %v6635_v19 = vshll.u32 %v8313_v28, 16  ;;  %v12157_v61 = vpop.f32.mrf.mxu1  ;;  %v12159_v44 = vpop.f32.mrf.mxu0  ;;  %v12777_v28 = vld [vmem:[#allocation32_spill] sm:$0xff] }
 0x1a9   : > { %v6614_v2 = vsel %vm9938_vm5, %v6609_v6, %v6613_v43  ;;  %v8229_v30 = vcombine.low %v5884_v39, %v5887_v27  ;;  %v6622_v1 = vor.u32 %v6621_v48, %v6618_v45  ;;  %v1862_v15 = vadd.f32 %v12775_v46, %v11886_v37  ;;  %12776 = vst [vmem:[#allocation31_spill] sm:$0xff] %v12159_v44  ;;  %v8314_v7 = vld [vmem:[%s9889_s24 + $0xb4] sm:$0xf]  ;;  %v12778_v37 = vld [vmem:[#allocation33_spill] sm:$0xff]  ;;  %v8317_v44 = vld [vmem:[%s9889_s24 + $0xc0] sm:$0xf] }
 0x1aa   : > { %v8332_v4 = vcombine.low %v6604_v54, %v6614_v2  ;;  %v6632_v8 = vor.u32 %v6631_v26, %v6627_v31  ;;  %v6637_v55 = vrot.slane %v6635_v19, 5  ;;  %v1865_v50 = vadd.f32 %v12777_v28, %v11894_v58  ;;  %v8315_v45 = vld [vmem:[%s9889_s24 + $0xb8] sm:$0xf]  ;;  %v12170_v54 = vpop.f32.mrf.mxu1  ;;  %v12172_v26 = vpop.f32.mrf.mxu0  ;;  %v12780_v19 = vld [vmem:[#allocation56_spill] sm:$0xff]  ;;  %v9798_v2 = vld [vmem:[%s9889_s24 + $0xc4] sm:$0xf] }
 0x1ab   : > { %9515 = vmatmul.mubr.bf16.gmra.mxu1 %v8229_v30  ;;  %v6623_v43 = vrot.slane %v6622_v1, 4  ;;  %v12165_v27 = vadd.f32 %v11798_v33, %v1862_v15  ;;  %v1863_v39 = vadd.f32 %v12778_v37, %v11905_v32  ;;  %v8206_v6 = vrot.slane %v8198_v18, 9  ;;  %12779 = vst [vmem:[#allocation32_spill] sm:$0xff] %v12172_v26  ;;  %v9799_v1 = vld [vmem:[%s9889_s24 + $0xc8] sm:$0x1] }
 0x1ac   : > { %9562 = vmatprep.mubr.bf16.mxu0 %v8332_v4  ;;  %v6633_v48 = vrot.slane %v6632_v8, 4  ;;  %v12175_v58 = vadd.f32 %v12780_v19, %v1865_v50  ;;  %v5890_v30 = vrot.slane %v9798_v2, 5  ;;  %v5893_v33 = vrot.slane %v9799_v1, 5  ;;  %v8316_v18 = vld [vmem:[%s9889_s24 + $0xbc] sm:$0x1]  ;;  %v12185_v37 = vpop.f32.mrf.mxu1  ;;  %v12187_v4 = vpop.f32.mrf.mxu0 }
 0x1ad   : > { %v6628_v46 = vsel %vm9938_vm5, %v6623_v43, %v6627_v31  ;;  %v12182_v32 = vadd.f32 %v11821_v22, %v1863_v39  ;;  %v6640_v15 = vshrl.u32 %v8314_v7, 16  ;;  %v6643_v28 = vshll.u32 %v8314_v7, 16  ;;  %12781 = vst [vmem:[#allocation33_spill] sm:$0xff] %v12185_v37  ;;  %12782 = vst [vmem:[#allocation56_spill] sm:$0xff] %v12187_v4  ;;  %v8199_v31 = vld [vmem:[%s9889_s24 + $0xcc] sm:$0xe] }
 0x1ae   : > { %v6638_v8 = vsel %vm9938_vm5, %v6633_v48, %v6637_v55  ;;  %v5891_v50 = vsel %vm9914_vm4, %v8206_v6, %v5890_v30  ;;  %v5892_v19 = vrot.slane %v5890_v30, 4  ;;  %v6649_v2 = vshll.u32 %v8315_v45, 16  ;;  %v12194_v7 = vpop.f32.mrf.mxu1  ;;  %v12196_v26 = vpop.f32.mrf.mxu0  ;;  %v12785_v6 = vld [vmem:[#allocation34_spill] sm:$0xff] }
 0x1af   : > { %v8333_v43 = vcombine.low %v6628_v46, %v6638_v8  ;;  %v6642_v22 = vrot.slane %v6640_v15, 4  ;;  %v6645_v39 = vrot.slane %v6643_v28, 5  ;;  %v6653_v1 = vshrl.u32 %v8315_v45, 16  ;;  %12783 = vst [vmem:[#allocation70_spill] sm:$0xff] %v12194_v7  ;;  %12784 = vst [vmem:[#allocation71_spill] sm:$0xff] %v12196_v26 }
 0x1b0   : > { %v5894_v4 = vsel %vm9914_vm4, %v5892_v19, %v5893_v33  ;;  %v6651_v55 = vrot.slane %v6649_v2, 5  ;;  %v6659_v48 = vshll.u32 %v8316_v18, 16  ;;  %v1868_v30 = vadd.f32 %v12785_v6, %v11926_v21  ;;  %v8318_v8 = vld [vmem:[%s9889_s24 + $0xc4] sm:$0xf]  ;;  %v12204_v7 = vpop.f32.mrf.mxu1  ;;  %v12206_v26 = vpop.f32.mrf.mxu0  ;;  %v9800_v18 = vld [vmem:[%s9889_s24 + $0xd0] sm:$0xf] }
 0x1b1   : > { %9563 = vmatmul.mubr.bf16.gmra.mxu0 %v8333_v43  ;;  %v8230_v46 = vcombine.low %v5891_v50, %v5894_v4  ;;  %v6646_v15 = vor.u32 %v6645_v39, %v6642_v22  ;;  %v6655_v45 = vrot.slane %v6653_v1, 4  ;;  %v8207_v28 = vrot.slane %v8199_v31, 9  ;;  %12786 = vst [vmem:[#allocation34_spill] sm:$0xff] %v12204_v7  ;;  %12787 = vst [vmem:[#allocation72_spill] sm:$0xff] %v12206_v26  ;;  %v9801_v2 = vld [vmem:[%s9889_s24 + $0xd4] sm:$0x1] }
 0x1b2   : > { %v6661_v37 = vrot.slane %v6659_v48, 5  ;;  %v12209_v33 = vadd.f32 %v11839_v51, %v1868_v30  ;;  %v5897_v19 = vrot.slane %v9800_v18, 5  ;;  %v5900_v21 = vrot.slane %v9801_v2, 5  ;;  %v8319_v50 = vld [vmem:[%s9889_s24 + $0xc8] sm:$0x1]  ;;  %v12214_v31 = vpop.f32.mrf.mxu1  ;;  %v12216_v1 = vpop.f32.mrf.mxu0  ;;  %s8378_s24 = sshll.u32 %s12874_s22, 7 }
 0x1b3   : > { %9518 = vmatprep.mubr.bf16.mxu1 %v8230_v46  ;;  %v6647_v43 = vrot.slane %v6646_v15, 4  ;;  %v6656_v4 = vor.u32 %v6655_v45, %v6651_v55  ;;  %v6664_v22 = vshrl.u32 %v8317_v44, 16  ;;  %v6667_v39 = vshll.u32 %v8317_v44, 16  ;;  %12788 = vst [vmem:[#allocation73_spill] sm:$0xff] %v12214_v31  ;;  %12789 = vst [vmem:[#allocation74_spill] sm:$0xff] %v12216_v1  ;;  %s12289_s14 = scalar_lea.vmem %s12636_s3, %s8378_s24  ;;  %s12529_s17 = scalar_lea.vmem %s12637_s4, %s8378_s24 }
 0x1b4   : > { %v5898_v48 = vsel %vm9914_vm4, %v8207_v28, %v5897_v19  ;;  %v5899_v6 = vrot.slane %v5897_v19, 4  ;;  %v6673_v51 = vshll.u32 %v8318_v8, 16  ;;  %v6677_v30 = vshrl.u32 %v8318_v8, 16  ;;  %v12222_v45 = vpop.f32.mrf.mxu1  ;;  %v12224_v26 = vpop.f32.mrf.mxu0 }
 0x1b5   : > { %v6652_v18 = vsel %vm9938_vm5, %v6647_v43, %v6651_v55  ;;  %v6657_v2 = vrot.slane %v6656_v4, 4  ;;  %v6666_v46 = vrot.slane %v6664_v22, 4  ;;  %v6669_v15 = vrot.slane %v6667_v39, 5  ;;  %12790 = vst [vmem:[#allocation75_spill] sm:$0xff] %v12222_v45  ;;  %12791 = vst [vmem:[#allocation76_spill] sm:$0xff] %v12224_v26  ;;  %v12792_v55 = vld [vmem:[#allocation35_spill] sm:$0xff] }
 0x1b6   : > { %v5901_v44 = vsel %vm9914_vm4, %v5899_v6, %v5900_v21  ;;  %v6675_v1 = vrot.slane %v6673_v51, 5  ;;  %v6679_v31 = vrot.slane %v6677_v30, 4  ;;  %v6683_v7 = vshll.u32 %v8319_v50, 16  ;;  %v12232_v4 = vpop.f32.mrf.mxu1  ;;  %v12234_v22 = vpop.f32.mrf.mxu0  ;;  %v12794_v6 = vld [vmem:[#allocation57_spill] sm:$0xff] }
 0x1b7   : > { %v6662_v28 = vsel %vm9938_vm5, %v6657_v2, %v6661_v37  ;;  %v8231_v8 = vcombine.low %v5898_v48, %v5901_v44  ;;  %v6670_v19 = vor.u32 %v6669_v15, %v6666_v46  ;;  %v1866_v43 = vadd.f32 %v12792_v55, %v11944_v17  ;;  %v12795_v37 = vld [vmem:[#allocation37_spill] sm:$0xff]  ;;  %v12796_v17 = vld [vmem:[#allocation38_spill] sm:$0xff]  ;;  %v12799_v15 = vld [vmem:[#allocation40_spill] sm:$0xff] }
 0x1b8   : > { %v8334_v39 = vcombine.low %v6652_v18, %v6662_v28  ;;  %v6680_v26 = vor.u32 %v6679_v31, %v6675_v1  ;;  %v6685_v45 = vrot.slane %v6683_v7, 5  ;;  %v1869_v21 = vadd.f32 %v12793_v53, %v11955_v10  ;;  %v12245_v2 = vpop.f32.mrf.mxu1  ;;  %v12797_v7 = vld [vmem:[#allocation58_spill] sm:$0xff]  ;;  %v12798_v10 = vld [vmem:[#allocation39_spill] sm:$0xff]  ;;  %v12264_v55 = vpop.f32.mrf.mxu0 }
 0x1b9   : > { %9519 = vmatmul.mubr.bf16.gmra.mxu1 %v8231_v8  ;;  %v6671_v50 = vrot.slane %v6670_v19, 4  ;;  %v12239_v51 = vadd.f32 %v12794_v6, %v1866_v43  ;;  %v1867_v48 = vadd.f32 %v12795_v37, %v11958_v47  ;;  %v2397_v30 = vadd.f32 %v12796_v17, %v11993_v11  ;;  %v12800_v8 = vld [vmem:[#allocation41_spill] sm:$0xff]  ;;  %v12805_v37 = vld [vmem:[#allocation3_spill] sm:$0xff] }
 0x1ba   : > { %9566 = vmatprep.mubr.bf16.mxu0 %v8334_v39  ;;  %v6681_v31 = vrot.slane %v6680_v26, 4  ;;  %v12248_v18 = vadd.f32 %v12797_v7, %v1869_v21  ;;  %v2395_v46 = vadd.f32 %v12798_v10, %v12025_v40  ;;  %v2398_v44 = vadd.f32 %v12799_v15, %v12028_v52  ;;  %v12262_v19 = vpop.f32.mrf.mxu1  ;;  %v12802_v39 = vld [vmem:[#allocation54_spill] sm:$0xff]  ;;  %v12803_v21 = vld [vmem:[#allocation43_spill] sm:$0xff]  ;;  %v12297_v10 = vpop.f32.mrf.mxu0 }
 0x1bb   : > { %v6676_v47 = vsel %vm9938_vm5, %v6671_v50, %v6675_v1  ;;  %v12257_v28 = vadd.f32 %v11871_v34, %v1867_v48  ;;  %v2823_v11 = vadd.f32 %v11889_v16, %v2397_v30  ;;  %v2396_v26 = vadd.f32 %v12800_v8, %v12031_v13  ;;  %v12801_v34 = vld [vmem:[#allocation42_spill] sm:$0xff] }
 0x1bc   : > { %v6686_v40 = vsel %vm9938_vm5, %v6681_v31, %v6685_v45  ;;  %v2821_v52 = vadd.f32 %v11902_v57, %v2395_v46  ;;  %v2824_v1 = vadd.f32 %v11916_v35, %v2398_v44  ;;  %v2401_v43 = vadd.f32 %v12801_v34, %v12055_v60  ;;  %v12277_v6 = vpop.f32.mrf.mxu1  ;;  %v12806_v35 = vld [vmem:[#allocation44_spill] sm:$0xff]  ;;  %v12808_v31 = vld [vmem:[#allocation45_spill] sm:$0xff] }
 0x1bd   : > { %v8335_v16 = vcombine.low %v6676_v47, %v6686_v40  ;;  %v3121_v53 = vadd.f32 %v12802_v39, %v2823_v11  ;;  %v2822_v13 = vadd.f32 %v11930_v5, %v2396_v26  ;;  %v2399_v50 = vadd.f32 %v12803_v21, %v12089_v63  ;;  %v12807_v5 = vld [vmem:[#allocation21_spill] sm:$0xff]  ;;  %v12809_v44 = vld [vmem:[#allocation4_spill] sm:$0xff] }
 0x1be   : > { %v3119_v45 = vadd.f32 %v12804_v41, %v2821_v52  ;;  %v3122_v57 = vadd.f32 %v12805_v37, %v2824_v1  ;;  %v2827_v48 = vadd.f32 %v11950_v23, %v2401_v43  ;;  %v2402_v17 = vadd.f32 %v12806_v35, %v12099_v59  ;;  %v12295_v23 = vpop.f32.mrf.mxu1  ;;  %v12810_v40 = vld [vmem:[#allocation5_spill] sm:$0xff]  ;;  %v12812_v41 = vld [vmem:[#allocation47_spill] sm:$0xff]  ;;  %v12813_v35 = vld [vmem:[#allocation6_spill] sm:$0xff] }
 0x1bf   : > { %9567 = vmatmul.mubr.bf16.gmra.mxu0 %v8335_v16  ;;  %v3159_v60 = vmul.f32 %v3121_v53, %v3121_v53  ;;  %v3120_v63 = vadd.f32 %v12807_v5, %v2822_v13  ;;  %v2825_v30 = vadd.f32 %v11962_v20, %v2399_v50  ;;  %v2400_v7 = vadd.f32 %v12808_v31, %v12106_v12  ;;  %v12303_v20 = vpop.f32.mrf.mxu0  ;;  %v12811_v16 = vld [vmem:[#allocation46_spill] sm:$0xff] }
 0x1c0   : > { %v3157_v59 = vmul.f32 %v3119_v45, %v3119_v45  ;;  %v3160_v46 = vmul.f32 %v3122_v57, %v3122_v57  ;;  %v8452_v15 = vpack.c.bf16 %v3122_v57, %v3121_v53  ;;  %v3125_v47 = vadd.f32 %v12809_v44, %v2827_v48  ;;  %v12301_v1 = vpop.f32.mrf.mxu1 }
 0x1c1   : > { %v3135_v11 = vadd.f32 %v3120_v63, %v3119_v45  ;;  %v3158_v8 = vmul.f32 %v3120_v63, %v3120_v63  ;;  %v8447_v26 = vpack.c.bf16 %v3120_v63, %v3119_v45  ;;  %v3123_v52 = vadd.f32 %v12810_v40, %v2825_v30  ;;  %v12315_v48 = vpop.f32.mrf.mxu0  ;;  %v12814_v63 = vld [vmem:[#allocation7_spill] sm:$0xff] }
 0x1c2   : > { %8604 = vst [vmem:[%s12289_s14 + $0x8] sm:$0xff] %v8452_v15   ;;  %v3163_v12 = vmul.f32 %v3125_v47, %v3125_v47  ;;  %v2828_v34 = vadd.f32 %v11972_v29, %v2402_v17  ;;  %v2826_v43 = vadd.f32 %v11988_v36, %v2400_v7  ;;  %v2405_v39 = vadd.f32 %v12811_v16, %v12133_v9  ;;  %v12313_v37 = vpop.f32.mrf.mxu1  ;;  %v12815_v17 = vld [vmem:[#allocation48_spill] sm:$0xff] }
 0x1c3   : > { %v3136_v13 = vadd.f32 %v3135_v11, %v3121_v53  ;;  %v3173_v21 = vadd.f32 %v3158_v8, %v3157_v59  ;;  %8448 = vst [vmem:[%s12289_s14] sm:$0xff] %v8447_v26   ;;  %v3161_v50 = vmul.f32 %v3123_v52, %v3123_v52  ;;  %v2403_v45 = vadd.f32 %v12812_v41, %v12165_v27  ;;  %v12816_v27 = vld [vmem:[#allocation49_spill] sm:$0xff]  ;;  %v12327_v15 = vpop.f32.mrf.mxu0 }
 0x1c4   : > { %v3126_v5 = vadd.f32 %v12813_v35, %v2828_v34  ;;  %v3124_v29 = vadd.f32 %v12814_v63, %v2826_v43  ;;  %v2831_v36 = vadd.f32 %v12007_v42, %v2405_v39  ;;  %v2406_v9 = vadd.f32 %v12815_v17, %v12175_v58  ;;  %v12325_v59 = vpop.f32.mrf.mxu1  ;;  %v12817_v58 = vld [vmem:[#allocation55_spill] sm:$0xff]  ;;  %v12818_v34 = vld [vmem:[#allocation8_spill] sm:$0xff]  ;;  %v12819_v39 = vld [vmem:[#allocation50_spill] sm:$0xff] }
 0x1c5   : > { %v3174_v53 = vadd.f32 %v3173_v21, %v3159_v60  ;;  %v3137_v30 = vadd.f32 %v3136_v13, %v3122_v57  ;;  %v2829_v31 = vadd.f32 %v12018_v0, %v2403_v45  ;;  %v2404_v7 = vadd.f32 %v12816_v27, %v12182_v32  ;;  %v12333_v0 = vpop.f32.mrf.mxu0  ;;  %v12821_v17 = vld [vmem:[#allocation9_spill] sm:$0xff] }
 0x1c6   : > { %v3164_v44 = vmul.f32 %v3126_v5, %v3126_v5  ;;  %v8462_v11 = vpack.c.bf16 %v3126_v5, %v3125_v47  ;;  %v3162_v8 = vmul.f32 %v3124_v29, %v3124_v29  ;;  %v8457_v42 = vpack.c.bf16 %v3124_v29, %v3123_v52  ;;  %v12331_v43 = vpop.f32.mrf.mxu1 }
 0x1c7   : > { %v3138_v26 = vadd.f32 %v3137_v30, %v3123_v52  ;;  %v3175_v40 = vadd.f32 %v3174_v53, %v3160_v46  ;;  %v3129_v60 = vadd.f32 %v12817_v58, %v2831_v36  ;;  %v3127_v57 = vadd.f32 %v12818_v34, %v2829_v31  ;;  %v12820_v52 = vld [vmem:[#allocation51_spill] sm:$0xff]  ;;  %v12345_v36 = vpop.f32.mrf.mxu0  ;;  %v12822_v30 = vld [vmem:[#allocation10_spill] sm:$0xff] }
 0x1c8   : > { %8606 = vst [vmem:[%s12289_s14 + $0x18] sm:$0xff] %v8462_v11   ;;  %8605 = vst [vmem:[%s12289_s14 + $0x10] sm:$0xff] %v8457_v42   ;;  %v2832_v32 = vadd.f32 %v12035_v56, %v2406_v9  ;;  %v2830_v16 = vadd.f32 %v12048_v38, %v2404_v7  ;;  %v2409_v13 = vadd.f32 %v12819_v39, %v12209_v33  ;;  %v12343_v63 = vpop.f32.mrf.mxu1  ;;  %v12827_v39 = vld [vmem:[#allocation29_spill] sm:$0xff] }
 0x1c9   : > { %v2407_v46 = vadd.f32 %v12820_v52, %v12239_v51  ;;  %v3176_v21 = vadd.f32 %v3175_v40, %v3161_v50  ;;  %v3139_v41 = vadd.f32 %v3138_v26, %v3124_v29  ;;  %v3167_v45 = vmul.f32 %v3129_v60, %v3129_v60  ;;  %v12823_v51 = vld [vmem:[#allocation52_spill] sm:$0xff]  ;;  %v12824_v29 = vld [vmem:[#allocation53_spill] sm:$0xff]  ;;  %v12357_v11 = vpop.f32.mrf.mxu0 }
 0x1ca   : > { %v3165_v35 = vmul.f32 %v3127_v57, %v3127_v57  ;;  %v3130_v53 = vadd.f32 %v12821_v17, %v2832_v32  ;;  %v3128_v56 = vadd.f32 %v12822_v30, %v2830_v16  ;;  %v2835_v38 = vadd.f32 %v12062_v24, %v2409_v13  ;;  %v12355_v7 = vpop.f32.mrf.mxu1  ;;  %v12828_v13 = vld [vmem:[#allocation14_spill] sm:$0xff] }
 0x1cb   : > { %v2833_v9 = vadd.f32 %v12068_v49, %v2407_v46  ;;  %v3140_v33 = vadd.f32 %v3139_v41, %v3125_v47  ;;  %v3177_v31 = vadd.f32 %v3176_v21, %v3162_v8  ;;  %v2410_v50 = vadd.f32 %v12823_v51, %v12248_v18  ;;  %v12825_v47 = vld [vmem:[#allocation11_spill] sm:$0xff]  ;;  %v12363_v18 = vpop.f32.mrf.mxu0  ;;  %v12829_v46 = vld [vmem:[#allocation64_spill] sm:$0xff]  ;;  %v12834_v51 = vld [vmem:[#allocation66_spill] sm:$0xff] }
 0x1cc   : > { %v2408_v27 = vadd.f32 %v12824_v29, %v12257_v28  ;;  %v3168_v42 = vmul.f32 %v3130_v53, %v3130_v53  ;;  %v8472_v26 = vpack.c.bf16 %v3130_v53, %v3129_v60  ;;  %v3166_v40 = vmul.f32 %v3128_v56, %v3128_v56  ;;  %v4123_v32 = vpop.f32.mrf.mxu1  ;;  %12826 = vst [vmem:[#allocation35_spill] sm:$0xff] %v12363_v18 }
 0x1cd   : > { %v8467_v24 = vpack.c.bf16 %v3128_v56, %v3127_v57  ;;  %v3178_v58 = vadd.f32 %v3177_v31, %v3163_v12  ;;  %v3141_v49 = vadd.f32 %v3140_v33, %v3126_v5  ;;  %v12360_v34 = vadd.f32 %v12825_v47, %v2835_v38  ;;  %v12830_v12 = vld [vmem:[#allocation15_spill] sm:$0xff]  ;;  %v12831_v38 = vld [vmem:[#allocation12_spill] sm:$0xff] }
 0x1ce   : > { %v3131_v8 = vadd.f32 %v11869_v25, %v2833_v9  ;;  %8608 = vst [vmem:[%s12289_s14 + $0x28] sm:$0xff] %v8472_v26   ;;  %v2836_v28 = vadd.f32 %v12081_v3, %v2410_v50  ;;  %v2834_v16 = vadd.f32 %v12094_v62, %v2408_v27  ;;  %v3840_v52 = vadd.f32 %v12828_v13, %v12827_v39  ;;  %v9324_v30 = vpop.f32.mrf.mxu1  ;;  %v12832_v3 = vld [vmem:[#allocation13_spill] sm:$0xff]  ;;  %v12833_v62 = vld [vmem:[#allocation59_spill] sm:$0xff]  ;;  %v12835_v50 = vld [vmem:[#allocation16_spill] sm:$0xff] }
 0x1cf   : > { %8607 = vst [vmem:[%s12289_s14 + $0x20] sm:$0xff] %v8467_v24   ;;  %v3832_v5 = vadd.f32 %v12830_v12, %v12829_v46  ;;  %v3142_v21 = vadd.f32 %v3141_v49, %v3127_v57  ;;  %v3179_v41 = vadd.f32 %v3178_v58, %v3164_v44  ;;  %v12375_v25 = vmul.f32 %v12360_v34, %v12360_v34  ;;  %v12836_v57 = vld [vmem:[#allocation68_spill] sm:$0xff]  ;;  %v12837_v26 = vld [vmem:[#allocation17_spill] sm:$0xff]  ;;  %v12838_v58 = vld [vmem:[#allocation18_spill] sm:$0xff] }
 0x1d0   : > { %v3169_v17 = vmul.f32 %v3131_v8, %v3131_v8  ;;  %v12378_v9 = vadd.f32 %v12831_v38, %v2836_v28  ;;  %v3132_v33 = vadd.f32 %v12832_v3, %v2834_v16  ;;  %v3843_v31 = vadd.f32 %v12833_v62, %v12128_v14  ;;  %v12389_v47 = vpop.f32.mrf.mxu0  ;;  %v4136_v28 = vpop.f32.mrf.mxu1  ;;  %v12840_v46 = vld [vmem:[#allocation2_spill] sm:$0xff] }
 0x1d1   : > { %v3835_v29 = vadd.f32 %v12835_v50, %v12834_v51  ;;  %v3180_v27 = vadd.f32 %v3179_v41, %v3165_v35  ;;  %v3143_v44 = vadd.f32 %v3142_v21, %v3128_v56  ;;  %v3856_v24 = vadd.f32 %v12837_v26, %v12836_v57  ;;  %12839 = vst [vmem:[#allocation36_spill] sm:$0xff] %v12389_v47  ;;  %v12841_v21 = vld [vmem:[#allocation33_spill] sm:$0xff]  ;;  %v12842_v41 = vld [vmem:[#allocation60_spill] sm:$0xff]  ;;  %v12844_v62 = vld [vmem:[#allocation70_spill] sm:$0xff] }
 0x1d2   : > { %v3848_v49 = vadd.f32 %v12838_v58, %v12157_v61  ;;  %v12393_v16 = vmul.f32 %v12378_v9, %v12378_v9  ;;  %v8482_v14 = vpack.c.bf16 %v12378_v9, %v12360_v34  ;;  %v3170_v35 = vmul.f32 %v3132_v33, %v3132_v33  ;;  %v12401_v38 = vpop.f32.mrf.mxu0  ;;  %v9325_v3 = vpop.f32.mrf.mxu1  ;;  %v12845_v51 = vld [vmem:[#allocation19_spill] sm:$0xff]  ;;  %v12846_v57 = vld [vmem:[#allocation34_spill] sm:$0xff]  ;;  %v12847_v26 = vld [vmem:[#allocation61_spill] sm:$0xff] }
 0x1d3   : > { %v8477_v39 = vpack.c.bf16 %v3132_v33, %v3131_v8  ;;  %v3144_v56 = vadd.f32 %v3143_v44, %v3129_v60  ;;  %v3181_v13 = vadd.f32 %v3180_v27, %v3166_v40  ;;  %v3859_v12 = vadd.f32 %v12840_v46, %v12170_v54  ;;  %12843 = vst [vmem:[#allocation57_spill] sm:$0xff] %v12401_v38  ;;  %v12848_v47 = vld [vmem:[#allocation73_spill] sm:$0xff]  ;;  %v12849_v60 = vld [vmem:[#allocation62_spill] sm:$0xff]  ;;  %v12850_v27 = vld [vmem:[#allocation75_spill] sm:$0xff] }
 0x1d4   : > { %v3851_v61 = vadd.f32 %v12842_v41, %v12841_v21  ;;  %8610 = vst [vmem:[%s12289_s14 + $0x38] sm:$0xff] %v8482_v14   ;;  %v3872_v50 = vadd.f32 %v12845_v51, %v12844_v62  ;;  %v3864_v58 = vadd.f32 %v12847_v26, %v12846_v57  ;;  %v3875_v40 = vadd.f32 %v12849_v60, %v12848_v47  ;;  %v12851_v44 = vld [vmem:[#allocation22_spill] sm:$0xff]  ;;  %v12852_v21 = vld [vmem:[#allocation24_spill] sm:$0xff]  ;;  %v12853_v14 = vld [vmem:[#allocation25_spill] sm:$0xff]  ;;  %v4139_v38 = vpop.f32.mrf.mxu1 }
 0x1d5   : > { %8609 = vst [vmem:[%s12289_s14 + $0x30] sm:$0xff] %v8477_v39   ;;  %v3867_v54 = vadd.f32 %v12851_v44, %v12850_v27  ;;  %v3182_v46 = vadd.f32 %v3181_v13, %v3167_v45  ;;  %v3145_v18 = vadd.f32 %v3144_v56, %v3130_v53  ;;  %v3888_v41 = vadd.f32 %v12852_v21, %v12232_v4  ;;  %v12854_v62 = vld [vmem:[#allocation26_spill] sm:$0xff]  ;;  %v12855_v57 = vld [vmem:[#allocation63_spill] sm:$0xff]  ;;  %v12423_v27 = vpop.f32.mrf.mxu0 }
 0x1d6   : > { %v3880_v39 = vadd.f32 %v12853_v14, %v12245_v2  ;;  %v3891_v51 = vadd.f32 %v12854_v62, %v12262_v19  ;;  %v3883_v26 = vadd.f32 %v12855_v57, %v12277_v6  ;;  %v4169_v47 = vadd.f32 %v12295_v23, %v3840_v52 }
 0x1d7   : > { %v4167_v60 = vadd.f32 %v12301_v1, %v3832_v5  ;;  %v3146_v45 = vadd.f32 %v3145_v18, %v3131_v8  ;;  %v3183_v53 = vadd.f32 %v3182_v46, %v3168_v42  ;;  %v4170_v4 = vadd.f32 %v12313_v37, %v3843_v31  ;;  %v9328_v2 = vpop.f32.mrf.mxu1  ;;  %v12430_v42 = vpop.f32.mrf.mxu0  ;;  %v12863_v46 = vld [vmem:[#allocation31_spill] sm:$0xff] }
 0x1d8   : > { %v4168_v56 = vadd.f32 %v12325_v59, %v3835_v29  ;;  %v4173_v13 = vadd.f32 %v12331_v43, %v3856_v24  ;;  %v4171_v19 = vadd.f32 %v12343_v63, %v3848_v49  ;;  %v4174_v44 = vadd.f32 %v12355_v7, %v3859_v12  ;;  %v12856_v29 = vld [vmem:[#allocation27_spill] sm:$0xff]  ;;  %v12857_v24 = vld [vmem:[#allocation28_spill] sm:$0xff] }
 0x1d9   : > { %v4172_v6 = vadd.f32 %v4123_v32, %v3851_v61  ;;  %v3184_v21 = vadd.f32 %v3183_v53, %v3169_v17  ;;  %v3147_v23 = vadd.f32 %v3146_v45, %v3132_v33  ;;  %v4177_v52 = vadd.f32 %v9324_v30, %v3872_v50  ;;  %v4152_v5 = vpop.f32.mrf.mxu1  ;;  %v12858_v17 = vld [vmem:[#allocation23_spill] sm:$0xff]  ;;  %v12859_v30 = vld [vmem:[#allocation65_spill] sm:$0xff]  ;;  %v12868_v53 = vld [vmem:[#allocation74_spill] sm:$0xff] }
 0x1da   : > { %v4175_v1 = vadd.f32 %v4136_v28, %v3864_v58  ;;  %v4178_v14 = vadd.f32 %v9325_v3, %v3875_v40  ;;  %v4176_v8 = vadd.f32 %v4139_v38, %v3867_v54  ;;  %v4181_v37 = vadd.f32 %v9328_v2, %v3888_v41  ;;  %v12860_v28 = vld [vmem:[#allocation30_spill] sm:$0xff]  ;;  %v12862_v50 = vld [vmem:[#allocation69_spill] sm:$0xff]  ;;  %v12444_v40 = vpop.f32.mrf.mxu0 }
 0x1db   : > { %v4179_v18 = vadd.f32 %v4152_v5, %v3880_v39  ;;  %v3148_v59 = vadd.f32 %v3147_v23, %v12360_v34  ;;  %v3185_v31 = vadd.f32 %v3184_v21, %v3170_v35  ;;  %v9329_v43 = vpop.f32.mrf.mxu1  ;;  %v4411_v63 = vadd.f32 %v12856_v29, %v4169_v47  ;;  %v12861_v34 = vld [vmem:[#allocation67_spill] sm:$0xff]  ;;  %v12864_v39 = vld [vmem:[#allocation32_spill] sm:$0xff] }
 0x1dc   : > { %v4409_v7 = vadd.f32 %v12857_v24, %v4167_v60  ;;  %v4182_v32 = vadd.f32 %v9329_v43, %v3891_v51  ;;  %v4412_v33 = vadd.f32 %v12858_v17, %v4170_v4  ;;  %v4410_v49 = vadd.f32 %v12859_v30, %v4168_v56  ;;  %v12865_v51 = vld [vmem:[#allocation56_spill] sm:$0xff] }
 0x1dd   : > { %v4415_v12 = vadd.f32 %v12860_v28, %v4173_v13  ;;  %v12439_v61 = vadd.f32 %v3148_v59, %v12378_v9  ;;  %v3186_v38 = vadd.f32 %v3185_v31, %v12375_v25  ;;  %v4155_v3 = vpop.f32.mrf.mxu1  ;;  %v4413_v35 = vadd.f32 %v12861_v34, %v4171_v19  ;;  %v12866_v9 = vld [vmem:[#allocation71_spill] sm:$0xff]  ;;  %v12867_v25 = vld [vmem:[#allocation72_spill] sm:$0xff]  ;;  %v12458_v19 = vpop.f32.mrf.mxu0 }
 0x1de   : > { %v4416_v58 = vadd.f32 %v12862_v50, %v4174_v44  ;;  %v4180_v54 = vadd.f32 %v4155_v3, %v3883_v26  ;;  %v4414_v41 = vadd.f32 %v12863_v46, %v4172_v6  ;;  %v4419_v62 = vadd.f32 %v12864_v39, %v4177_v52  ;;  %v12869_v56 = vld [vmem:[#allocation76_spill] sm:$0xff]  ;;  %v12872_v39 = vld [vmem:[#allocation57_spill] sm:$0xff] }
 0x1df   : > { %v4417_v57 = vadd.f32 %v12865_v51, %v4175_v1  ;;  %v12450_v47 = vadd.f32 %v3186_v38, %v12393_v16  ;;  %v4420_v60 = vadd.f32 %v12866_v9, %v4178_v14  ;;  %v4418_v45 = vadd.f32 %v12867_v25, %v4176_v8  ;;  %v12460_v44 = vpop.f32.mrf.mxu0 }
 0x1e0   : > { %v4423_v4 = vadd.f32 %v12868_v53, %v4181_v37  ;;  %v4421_v2 = vadd.f32 %v12869_v56, %v4179_v18  ;;  %v4424_v13 = vadd.f32 %v12234_v22, %v4182_v32  ;;  %v4422_v26 = vadd.f32 %v12264_v55, %v4180_v54 }
 0x1e1   : > { %v5119_v23 = vpop.f32.mrf.mxu0 }
 0x1e7   : > { %v9380_v6 = vpop.f32.mrf.mxu1 }
 0x1e8   : > { %v4836_v21 = vadd.f32 %v9380_v6, %v4411_v63 }
 0x1e9   : > { %v4771_v16 = vpop.f32.mrf.mxu1 }
 0x1ea   : > { %v4834_v52 = vadd.f32 %v4771_v16, %v4409_v7  ;;  %v5133_v1 = vadd.f32 %v12297_v10, %v4836_v21 }
 0x1eb   : > { %v9381_v5 = vpop.f32.mrf.mxu1 }
 0x1ec   : > { %v4837_v14 = vadd.f32 %v9381_v5, %v4412_v33  ;;  %v5131_v8 = vadd.f32 %v12303_v20, %v4834_v52  ;;  %v9476_v18 = vpop.f32.mrf.mxu0 }
 0x1ed   : > { %v4774_v37 = vpop.f32.mrf.mxu1 }
 0x1ee   : > { %v4835_v22 = vadd.f32 %v4774_v37, %v4410_v49  ;;  %v5134_v55 = vadd.f32 %v12315_v48, %v4837_v14  ;;  %v5735_v31 = vpop.f32.mrf.mxu0 }
 0x1f0   : > { %v5132_v59 = vadd.f32 %v12327_v15, %v4835_v22  ;;  %v9477_v43 = vpop.f32.mrf.mxu0  ;;  %v12870_v15 = vld [vmem:[#allocation35_spill] sm:$0xff] }
 0x1f2   : > { %v5738_v24 = vpop.f32.mrf.mxu0 }
 0x1f8   : > { %v9384_v29 = vpop.f32.mrf.mxu1 }
 0x1f9   : > { %v4840_v63 = vadd.f32 %v9384_v29, %v4415_v12 }
 0x1fa   : > { %v4787_v32 = vpop.f32.mrf.mxu1 }
 0x1fb   : > { %v4838_v7 = vadd.f32 %v4787_v32, %v4413_v35  ;;  %v5137_v10 = vadd.f32 %v12333_v0, %v4840_v63 }
 0x1fc   : > { %v9385_v17 = vpop.f32.mrf.mxu1  ;;  %v9480_v30 = vpop.f32.mrf.mxu0 }
 0x1fd   : > { %v4841_v33 = vadd.f32 %v9385_v17, %v4416_v58  ;;  %v5135_v20 = vadd.f32 %v12345_v36, %v4838_v7  ;;  %v12871_v36 = vld [vmem:[#allocation36_spill] sm:$0xff] }
 0x1fe   : > { %v4790_v28 = vpop.f32.mrf.mxu1  ;;  %v12474_v3 = vpop.f32.mrf.mxu0 }
 0x1ff   : > { %v4839_v49 = vadd.f32 %v4790_v28, %v4414_v41  ;;  %v12469_v48 = vadd.f32 %v12357_v11, %v4841_v33 }
 0x200   : > { %v12476_v12 = vpop.f32.mrf.mxu0 }
 0x201   : > { %v12472_v38 = vadd.f32 %v12870_v15, %v4839_v49 }
 0x202   : > { %v12478_v35 = vpop.f32.mrf.mxu0 }
 0x209   : > { %v9388_v34 = vpop.f32.mrf.mxu1 }
 0x20a   : > { %v4844_v0 = vadd.f32 %v9388_v34, %v4419_v62 }
 0x20b   : > { %v4803_v50 = vpop.f32.mrf.mxu1 }
 0x20c   : > { %v4842_v58 = vadd.f32 %v4803_v50, %v4417_v57  ;;  %v12481_v54 = vadd.f32 %v12871_v36, %v4844_v0 }
 0x20d   : > { %v9389_v46 = vpop.f32.mrf.mxu1  ;;  %v12483_v41 = vpop.f32.mrf.mxu0 }
 0x20e   : > { %v4845_v11 = vadd.f32 %v9389_v46, %v4420_v60  ;;  %v12486_v51 = vadd.f32 %v12872_v39, %v4842_v58 }
 0x20f   : > { %v4806_v9 = vpop.f32.mrf.mxu1  ;;  %v12491_v56 = vpop.f32.mrf.mxu0 }
 0x210   : > { %v4843_v25 = vadd.f32 %v4806_v9, %v4418_v45  ;;  %v12489_v53 = vadd.f32 %v12423_v27, %v4845_v11 }
 0x211   : > { %v12496_v57 = vpop.f32.mrf.mxu0 }
 0x212   : > { %v12494_v62 = vadd.f32 %v12430_v42, %v4843_v25 }
 0x213   : > { %v12498_v6 = vpop.f32.mrf.mxu0 }
 0x21a   : > { %v9392_v21 = vpop.f32.mrf.mxu1 }
 0x21b   : > { %v12500_v16 = vadd.f32 %v9392_v21, %v4423_v4 }
 0x21c   : > { %v4819_v60 = vpop.f32.mrf.mxu1 }
 0x21d   : > { %v12502_v52 = vadd.f32 %v4819_v60, %v4421_v2 }
 0x21e   : > { %v12504_v5 = vpop.f32.mrf.mxu0  ;;  %v9393_v45 = vpop.f32.mrf.mxu1 }
 0x21f   : > { %v12506_v27 = vadd.f32 %v9393_v45, %v4424_v13 }
 0x220   : > { %v12508_v14 = vpop.f32.mrf.mxu0  ;;  %v4822_v37 = vpop.f32.mrf.mxu1 }
 0x221   : > { %v4847_v42 = vadd.f32 %v4822_v37, %v4422_v26 }
 0x222   : > { %v12510_v22 = vpop.f32.mrf.mxu0  ;;  %v9444_v29 = vpop.f32.mrf.mxu1 }
 0x223   : > { %v5375_v63 = vadd.f32 %v9444_v29, %v5133_v1  ;;  %v12512_v32 = vadd.f32 %v5119_v23, %v4847_v42 }
 0x224   : > { %v12514_v4 = vpop.f32.mrf.mxu0  ;;  %v5310_v2 = vpop.f32.mrf.mxu1 }
 0x225   : > { %v5373_v7 = vadd.f32 %v5310_v2, %v5131_v8  ;;  %v12516_v17 = vadd.f32 %v9476_v18, %v5375_v63 }
 0x226   : > { %v9445_v33 = vpop.f32.mrf.mxu1 }
 0x227   : > { %v5376_v13 = vadd.f32 %v9445_v33, %v5134_v55  ;;  %v12518_v28 = vadd.f32 %v5735_v31, %v5373_v7 }
 0x228   : > { %v9540_v49 = vpop.f32.mrf.mxu0  ;;  %v5313_v15 = vpop.f32.mrf.mxu1 }
 0x229   : > { %v5374_v26 = vadd.f32 %v5313_v15, %v5132_v59  ;;  %v12520_v34 = vadd.f32 %v9477_v43, %v5376_v13  ;;  %v7016_v39 = vmul.f32 %v9540_v49, %v9540_v49 }
 0x22a   : > { %v6849_v0 = vpop.f32.mrf.mxu0  ;;  %v9448_v1 = vpop.f32.mrf.mxu1 }
 0x22b   : > { %v5379_v23 = vadd.f32 %v9448_v1, %v5137_v10  ;;  %v12522_v50 = vadd.f32 %v5738_v24, %v5374_v26  ;;  %v7014_v43 = vmul.f32 %v6849_v0, %v6849_v0 }
 0x22c   : > { %v9541_v8 = vpop.f32.mrf.mxu0  ;;  %v5326_v18 = vpop.f32.mrf.mxu1 }
 0x22d   : > { %v8532_v55 = vpack.c.bf16 %v9541_v8, %v9540_v49  ;;  %v5377_v31 = vadd.f32 %v5326_v18, %v5135_v20  ;;  %v12531_v59 = vadd.f32 %v9480_v30, %v5379_v23  ;;  %v7017_v45 = vmul.f32 %v9541_v8, %v9541_v8 }
 0x22e   : > { %v6852_v58 = vpop.f32.mrf.mxu0  ;;  %v9449_v36 = vpop.f32.mrf.mxu1 }
 0x22f   : > { %8619 = vst [vmem:[%s12529_s17 + $0x8] sm:$0xff] %v8532_v55   ;;  %v6976_v24 = vadd.f32 %v6852_v58, %v6849_v0  ;;  %v7015_v10 = vmul.f32 %v6852_v58, %v6852_v58  ;;  %v8527_v46 = vpack.c.bf16 %v6852_v58, %v6849_v0  ;;  %v5380_v11 = vadd.f32 %v9449_v36, %v12469_v48 }
 0x230   : > { %v5329_v9 = vpop.f32.mrf.mxu1  ;;  %v12536_v25 = vadd.f32 %v12474_v3, %v5377_v31  ;;  %v5143_v58 = vadd.f32 %v12458_v19, %v12502_v52 }
 0x231   : > { %v6977_v21 = vadd.f32 %v9540_v49, %v6976_v24  ;;  %v7046_v60 = vadd.f32 %v7015_v10, %v7014_v43  ;;  %8528 = vst [vmem:[%s12529_s17] sm:$0xff] %v8527_v46   ;;  %v5378_v20 = vadd.f32 %v5329_v9, %v12472_v38  ;;  %v12541_v30 = vadd.f32 %v12476_v12, %v5380_v11 }
 0x232   : > { %v9452_v37 = vpop.f32.mrf.mxu1  ;;  %v5146_v46 = vadd.f32 %v12460_v44, %v12506_v27 }
 0x233   : > { %v7047_v42 = vadd.f32 %v7046_v60, %v7016_v39  ;;  %v9544_v29 = vpop.f32.mrf.mxu0  ;;  %v6978_v63 = vadd.f32 %v9541_v8, %v6977_v21  ;;  %v5383_v48 = vadd.f32 %v9452_v37, %v12481_v54  ;;  %v12545_v2 = vadd.f32 %v12478_v35, %v5378_v20 }
 0x234   : > { %v5342_v3 = vpop.f32.mrf.mxu1  ;;  %v7020_v24 = vmul.f32 %v9544_v29, %v9544_v29 }
 0x235   : > { %v6865_v7 = vpop.f32.mrf.mxu0  ;;  %v7048_v33 = vadd.f32 %v7047_v42, %v7017_v45  ;;  %v5381_v13 = vadd.f32 %v5342_v3, %v12486_v51  ;;  %v12549_v38 = vadd.f32 %v12483_v41, %v5383_v48  ;;  %v5145_v41 = vadd.f32 %v12444_v40, %v12500_v16 }
 0x236   : > { %v6979_v12 = vadd.f32 %v6978_v63, %v6865_v7  ;;  %v7018_v49 = vmul.f32 %v6865_v7, %v6865_v7  ;;  %v9453_v15 = vpop.f32.mrf.mxu1 }
 0x237   : > { %v9545_v26 = vpop.f32.mrf.mxu0  ;;  %v5384_v0 = vadd.f32 %v9453_v15, %v12489_v53  ;;  %v12553_v54 = vadd.f32 %v12491_v56, %v5381_v13 }
 0x238   : > { %v7049_v35 = vadd.f32 %v7048_v33, %v7018_v49  ;;  %v8542_v1 = vpack.c.bf16 %v9545_v26, %v9544_v29  ;;  %v5345_v23 = vpop.f32.mrf.mxu1  ;;  %v7021_v39 = vmul.f32 %v9545_v26, %v9545_v26 }
 0x239   : > { %v6868_v8 = vpop.f32.mrf.mxu0  ;;  %v5382_v18 = vadd.f32 %v5345_v23, %v12494_v62  ;;  %v12559_v51 = vadd.f32 %v12496_v57, %v5384_v0 }
 0x23a   : > { %8621 = vst [vmem:[%s12529_s17 + $0x18] sm:$0xff] %v8542_v1   ;;  %v6980_v55 = vadd.f32 %v6979_v12, %v6868_v8  ;;  %v7019_v31 = vmul.f32 %v6868_v8, %v6868_v8  ;;  %v8537_v53 = vpack.c.bf16 %v6868_v8, %v6865_v7  ;;  %v9456_v43 = vpop.f32.mrf.mxu1 }
 0x23b   : > { %v5387_v56 = vadd.f32 %v9456_v43, %v5145_v41  ;;  %v12565_v36 = vadd.f32 %v12498_v6, %v5382_v18 }
 0x23c   : > { %v6981_v62 = vadd.f32 %v9544_v29, %v6980_v55  ;;  %v7050_v10 = vadd.f32 %v7049_v35, %v7019_v31  ;;  %8620 = vst [vmem:[%s12529_s17 + $0x10] sm:$0xff] %v8537_v53   ;;  %v5358_v40 = vpop.f32.mrf.mxu1 }
 0x23d   : > { %v9548_v16 = vpop.f32.mrf.mxu0  ;;  %v5385_v57 = vadd.f32 %v5358_v40, %v5143_v58  ;;  %v12571_v11 = vadd.f32 %v12504_v5, %v5387_v56 }
 0x23e   : > { %v7051_v9 = vadd.f32 %v7050_v10, %v7020_v24  ;;  %v6982_v21 = vadd.f32 %v9545_v26, %v6981_v62  ;;  %v9457_v19 = vpop.f32.mrf.mxu1  ;;  %v7024_v13 = vmul.f32 %v9548_v16, %v9548_v16 }
 0x23f   : > { %v6881_v6 = vpop.f32.mrf.mxu0  ;;  %v5388_v52 = vadd.f32 %v9457_v19, %v5146_v46  ;;  %v12574_v60 = vadd.f32 %v12508_v14, %v5385_v57 }
 0x240   : > { %v6983_v20 = vadd.f32 %v6982_v21, %v6881_v6  ;;  %v7022_v45 = vmul.f32 %v6881_v6, %v6881_v6  ;;  %v7052_v37 = vadd.f32 %v7051_v9, %v7021_v39  ;;  %v5361_v42 = vpop.f32.mrf.mxu1 }
 0x241   : > { %v9549_v29 = vpop.f32.mrf.mxu0  ;;  %v5386_v44 = vadd.f32 %v5361_v42, %v12512_v32  ;;  %v12578_v5 = vadd.f32 %v12510_v22, %v5388_v52 }
 0x242   : > { %v7053_v27 = vadd.f32 %v7052_v37, %v7022_v45  ;;  %v8552_v63 = vpack.c.bf16 %v9549_v29, %v9548_v16  ;;  %v7025_v15 = vmul.f32 %v9549_v29, %v9549_v29 }
 0x243   : > { %v6884_v48 = vpop.f32.mrf.mxu0  ;;  %v12581_v3 = vadd.f32 %v12514_v4, %v5386_v44 }
 0x244   : > { %8623 = vst [vmem:[%s12529_s17 + $0x28] sm:$0xff] %v8552_v63   ;;  %v6984_v14 = vadd.f32 %v6983_v20, %v6884_v48  ;;  %v7023_v7 = vmul.f32 %v6884_v48, %v6884_v48  ;;  %v8547_v33 = vpack.c.bf16 %v6884_v48, %v6881_v6 }
 0x246   : > { %v6985_v12 = vadd.f32 %v9548_v16, %v6984_v14  ;;  %v7054_v49 = vadd.f32 %v7053_v27, %v7023_v7  ;;  %8622 = vst [vmem:[%s12529_s17 + $0x20] sm:$0xff] %v8547_v33  }
 0x248   : > { %v7055_v32 = vadd.f32 %v7054_v49, %v7024_v13  ;;  %v9552_v26 = vpop.f32.mrf.mxu0  ;;  %v6986_v22 = vadd.f32 %v9549_v29, %v6985_v12 }
 0x249   : > { %v7028_v56 = vmul.f32 %v9552_v26, %v9552_v26 }
 0x24a   : > { %v6897_v0 = vpop.f32.mrf.mxu0  ;;  %v7056_v35 = vadd.f32 %v7055_v32, %v7025_v15 }
 0x24b   : > { %v6987_v1 = vadd.f32 %v6986_v22, %v6897_v0  ;;  %v7026_v23 = vmul.f32 %v6897_v0, %v6897_v0 }
 0x24c   : > { %v9553_v4 = vpop.f32.mrf.mxu0 }
 0x24d   : > { %v7057_v8 = vadd.f32 %v7056_v35, %v7026_v23  ;;  %v8562_v18 = vpack.c.bf16 %v9553_v4, %v9552_v26  ;;  %v7029_v39 = vmul.f32 %v9553_v4, %v9553_v4 }
 0x24e   : > { %v6900_v41 = vpop.f32.mrf.mxu0 }
 0x24f   : > { %8625 = vst [vmem:[%s12529_s17 + $0x38] sm:$0xff] %v8562_v18   ;;  %v6988_v55 = vadd.f32 %v6987_v1, %v6900_v41  ;;  %v7027_v31 = vmul.f32 %v6900_v41, %v6900_v41  ;;  %v8557_v53 = vpack.c.bf16 %v6900_v41, %v6897_v0  ;;  %v9508_v43 = vpop.f32.mrf.mxu1 }
 0x250   : > { %v6097_v16 = vadd.f32 %v9508_v43, %v12516_v17 }
 0x251   : > { %v6989_v58 = vadd.f32 %v9552_v26, %v6988_v55  ;;  %v7058_v24 = vadd.f32 %v7057_v8, %v7027_v31  ;;  %8624 = vst [vmem:[%s12529_s17 + $0x30] sm:$0xff] %v8557_v53   ;;  %v6032_v62 = vpop.f32.mrf.mxu1 }
 0x252   : > { %v6095_v57 = vadd.f32 %v6032_v62, %v12518_v28  ;;  %v6135_v27 = vmul.f32 %v6097_v16, %v6097_v16 }
 0x253   : > { %v7059_v10 = vadd.f32 %v7058_v24, %v7028_v56  ;;  %v9509_v40 = vpop.f32.mrf.mxu1  ;;  %v6990_v9 = vadd.f32 %v9553_v4, %v6989_v58 }
 0x254   : > { %v6098_v46 = vadd.f32 %v9509_v40, %v12520_v34  ;;  %v6133_v45 = vmul.f32 %v6095_v57, %v6095_v57 }
 0x255   : > { %v6035_v21 = vpop.f32.mrf.mxu1  ;;  %v7060_v20 = vadd.f32 %v7059_v10, %v7029_v39 }
 0x256   : > { %v9556_v19 = vpop.f32.mrf.mxu0  ;;  %v8492_v6 = vpack.c.bf16 %v6098_v46, %v6097_v16  ;;  %v6096_v52 = vadd.f32 %v6035_v21, %v12522_v50  ;;  %v6136_v33 = vmul.f32 %v6098_v46, %v6098_v46 }
 0x257   : > { %v7032_v0 = vmul.f32 %v9556_v19, %v9556_v19 }
 0x258   : > { %v6913_v37 = vpop.f32.mrf.mxu0  ;;  %8612 = vst [vmem:[%s12289_s14 + $0x48] sm:$0xff] %v8492_v6   ;;  %v6111_v42 = vadd.f32 %v6096_v52, %v6095_v57  ;;  %v6134_v29 = vmul.f32 %v6096_v52, %v6096_v52  ;;  %v8487_v17 = vpack.c.bf16 %v6096_v52, %v6095_v57 }
 0x259   : > { %v6991_v44 = vadd.f32 %v6990_v9, %v6913_v37  ;;  %v7030_v28 = vmul.f32 %v6913_v37, %v6913_v37 }
 0x25a   : > { %v9557_v34 = vpop.f32.mrf.mxu0  ;;  %v6112_v63 = vadd.f32 %v6111_v42, %v6097_v16  ;;  %v6149_v48 = vadd.f32 %v6134_v29, %v6133_v45  ;;  %8611 = vst [vmem:[%s12289_s14 + $0x40] sm:$0xff] %v8487_v17  }
 0x25b   : > { %v7061_v14 = vadd.f32 %v7060_v20, %v7030_v28  ;;  %v8572_v7 = vpack.c.bf16 %v9557_v34, %v9556_v19  ;;  %v7033_v8 = vmul.f32 %v9557_v34, %v9557_v34 }
 0x25c   : > { %v6150_v50 = vadd.f32 %v6149_v48, %v6135_v27  ;;  %v6916_v13 = vpop.f32.mrf.mxu0  ;;  %v6113_v12 = vadd.f32 %v6112_v63, %v6098_v46 }
 0x25d   : > { %8627 = vst [vmem:[%s12529_s17 + $0x48] sm:$0xff] %v8572_v7   ;;  %v6992_v49 = vadd.f32 %v6991_v44, %v6916_v13  ;;  %v7031_v15 = vmul.f32 %v6916_v13, %v6916_v13  ;;  %v8567_v32 = vpack.c.bf16 %v6916_v13, %v6913_v37  ;;  %v9512_v26 = vpop.f32.mrf.mxu1 }
 0x25e   : > { %v6151_v22 = vadd.f32 %v6150_v50, %v6136_v33  ;;  %v6101_v41 = vadd.f32 %v9512_v26, %v12531_v59 }
 0x25f   : > { %v6993_v35 = vadd.f32 %v9556_v19, %v6992_v49  ;;  %v7062_v1 = vadd.f32 %v7061_v14, %v7031_v15  ;;  %8626 = vst [vmem:[%s12529_s17 + $0x40] sm:$0xff] %v8567_v32   ;;  %v6048_v23 = vpop.f32.mrf.mxu1 }
 0x260   : > { %v6099_v4 = vadd.f32 %v6048_v23, %v12536_v25 }
 0x261   : > { %v7063_v18 = vadd.f32 %v7062_v1, %v7032_v0  ;;  %v9513_v55 = vpop.f32.mrf.mxu1  ;;  %v6994_v43 = vadd.f32 %v9557_v34, %v6993_v35 }
 0x262   : > { %v6114_v31 = vadd.f32 %v6113_v12, %v6099_v4  ;;  %v6137_v53 = vmul.f32 %v6099_v4, %v6099_v4  ;;  %v6102_v56 = vadd.f32 %v9513_v55, %v12541_v30  ;;  %v6139_v30 = vmul.f32 %v6101_v41, %v6101_v41 }
 0x263   : > { %v9560_v58 = vpop.f32.mrf.mxu0  ;;  %v6051_v24 = vpop.f32.mrf.mxu1  ;;  %v7064_v10 = vadd.f32 %v7063_v18, %v7033_v8 }
 0x264   : > { %v6152_v62 = vadd.f32 %v6151_v22, %v6137_v53  ;;  %v8502_v40 = vpack.c.bf16 %v6102_v56, %v6101_v41  ;;  %v6100_v25 = vadd.f32 %v6051_v24, %v12545_v2  ;;  %v6140_v2 = vmul.f32 %v6102_v56, %v6102_v56 }
 0x265   : > { %v6929_v16 = vpop.f32.mrf.mxu0  ;;  %v7036_v27 = vmul.f32 %v9560_v58, %v9560_v58 }
 0x266   : > { %v6995_v57 = vadd.f32 %v6994_v43, %v6929_v16  ;;  %v7034_v46 = vmul.f32 %v6929_v16, %v6929_v16  ;;  %8614 = vst [vmem:[%s12289_s14 + $0x58] sm:$0xff] %v8502_v40   ;;  %v6115_v39 = vadd.f32 %v6114_v31, %v6100_v25  ;;  %v6138_v9 = vmul.f32 %v6100_v25, %v6100_v25 }
 0x267   : > { %v9561_v59 = vpop.f32.mrf.mxu0  ;;  %v8497_v21 = vpack.c.bf16 %v6100_v25, %v6099_v4 }
 0x268   : > { %v7065_v19 = vadd.f32 %v7064_v10, %v7034_v46  ;;  %v8582_v6 = vpack.c.bf16 %v9561_v59, %v9560_v58  ;;  %v6116_v52 = vadd.f32 %v6115_v39, %v6101_v41  ;;  %v6153_v20 = vadd.f32 %v6152_v62, %v6138_v9 }
 0x269   : > { %8613 = vst [vmem:[%s12289_s14 + $0x50] sm:$0xff] %v8497_v21   ;;  %v6932_v45 = vpop.f32.mrf.mxu0  ;;  %v7037_v50 = vmul.f32 %v9561_v59, %v9561_v59 }
 0x26a   : > { %8629 = vst [vmem:[%s12529_s17 + $0x58] sm:$0xff] %v8582_v6   ;;  %v6996_v37 = vadd.f32 %v6995_v57, %v6932_v45  ;;  %v7035_v42 = vmul.f32 %v6932_v45, %v6932_v45  ;;  %v8577_v29 = vpack.c.bf16 %v6932_v45, %v6929_v16  ;;  %v6154_v17 = vadd.f32 %v6153_v20, %v6139_v30 }
 0x26b   : > { %v9516_v44 = vpop.f32.mrf.mxu1  ;;  %v6117_v28 = vadd.f32 %v6116_v52, %v6102_v56 }
 0x26c   : > { %v6997_v34 = vadd.f32 %v9560_v58, %v6996_v37  ;;  %v7066_v63 = vadd.f32 %v7065_v19, %v7035_v42  ;;  %8628 = vst [vmem:[%s12529_s17 + $0x50] sm:$0xff] %v8577_v29   ;;  %v6155_v14 = vadd.f32 %v6154_v17, %v6140_v2  ;;  %v6105_v13 = vadd.f32 %v9516_v44, %v12549_v38 }
 0x26d   : > { %v6064_v48 = vpop.f32.mrf.mxu1  ;;  %v3150_v2 = vrot.slane %v12439_v61, 4 }
 0x26e   : > { %v7067_v7 = vadd.f32 %v7066_v63, %v7036_v27  ;;  %v6103_v33 = vadd.f32 %v6064_v48, %v12553_v54  ;;  %v6998_v32 = vadd.f32 %v9561_v59, %v6997_v34  ;;  %v3188_v63 = vrot.slane %v12450_v47, 4 }
 0x26f   : > { %v9517_v12 = vpop.f32.mrf.mxu1 }
 0x270   : > { %v6118_v49 = vadd.f32 %v6117_v28, %v6103_v33  ;;  %v6141_v15 = vmul.f32 %v6103_v33, %v6103_v33  ;;  %v6106_v26 = vadd.f32 %v9517_v12, %v12559_v51  ;;  %v7068_v1 = vadd.f32 %v7067_v7, %v7037_v50 }
 0x271   : > { %v9564_v22 = vpop.f32.mrf.mxu0  ;;  %v6067_v0 = vpop.f32.mrf.mxu1  ;;  %v6143_v51 = vmul.f32 %v6105_v13, %v6105_v13  ;;  %v3151_v7 = vadd.f32 %v3150_v2, %v12439_v61 }
 0x272   : > { %v6156_v35 = vadd.f32 %v6155_v14, %v6141_v15  ;;  %v8512_v23 = vpack.c.bf16 %v6106_v26, %v6105_v13  ;;  %v6104_v54 = vadd.f32 %v6067_v0, %v12565_v36  ;;  %v6144_v36 = vmul.f32 %v6106_v26, %v6106_v26 }
 0x273   : > { %v6945_v4 = vpop.f32.mrf.mxu0  ;;  %v7040_v46 = vmul.f32 %v9564_v22, %v9564_v22  ;;  %v3189_v15 = vadd.f32 %v3188_v63, %v12450_v47 }
 0x274   : > { %v6999_v8 = vadd.f32 %v6998_v32, %v6945_v4  ;;  %v7038_v18 = vmul.f32 %v6945_v4, %v6945_v4  ;;  %8616 = vst [vmem:[%s12289_s14 + $0x68] sm:$0xff] %v8512_v23   ;;  %v6119_v41 = vadd.f32 %v6118_v49, %v6104_v54  ;;  %v6142_v55 = vmul.f32 %v6104_v54, %v6104_v54 }
 0x275   : > { %v9565_v38 = vpop.f32.mrf.mxu0  ;;  %v8507_v31 = vpack.c.bf16 %v6104_v54, %v6103_v33  ;;  %v3152_v23 = vrot.slane %v3151_v7, 2 }
 0x276   : > { %v7069_v53 = vadd.f32 %v7068_v1, %v7038_v18  ;;  %v8592_v43 = vpack.c.bf16 %v9565_v38, %v9564_v22  ;;  %v6120_v56 = vadd.f32 %v6119_v41, %v6105_v13  ;;  %v6157_v58 = vadd.f32 %v6156_v35, %v6142_v55 }
 0x277   : > { %8615 = vst [vmem:[%s12289_s14 + $0x60] sm:$0xff] %v8507_v31   ;;  %v6948_v24 = vpop.f32.mrf.mxu0  ;;  %v7041_v30 = vmul.f32 %v9565_v38, %v9565_v38  ;;  %v3190_v41 = vrot.slane %v3189_v15, 2 }
 0x278   : > { %8631 = vst [vmem:[%s12529_s17 + $0x68] sm:$0xff] %v8592_v43   ;;  %v7000_v62 = vadd.f32 %v6999_v8, %v6948_v24  ;;  %v7039_v10 = vmul.f32 %v6948_v24, %v6948_v24  ;;  %v8587_v40 = vpack.c.bf16 %v6948_v24, %v6945_v4  ;;  %v6158_v16 = vadd.f32 %v6157_v58, %v6143_v51 }
 0x279   : > { %v9520_v25 = vpop.f32.mrf.mxu1  ;;  %v6121_v57 = vadd.f32 %v6120_v56, %v6106_v26  ;;  %v3153_v51 = vadd.f32 %v3152_v23, %v3151_v7 }
 0x27a   : > { %v7001_v59 = vadd.f32 %v9564_v22, %v7000_v62  ;;  %v7070_v39 = vadd.f32 %v7069_v53, %v7039_v10  ;;  %8630 = vst [vmem:[%s12529_s17 + $0x60] sm:$0xff] %v8587_v40   ;;  %v6159_v21 = vadd.f32 %v6158_v16, %v6144_v36  ;;  %v6109_v52 = vadd.f32 %v9520_v25, %v12571_v11 }
 0x27b   : > { %v6080_v9 = vpop.f32.mrf.mxu1  ;;  %v3191_v10 = vadd.f32 %v3190_v41, %v3189_v15 }
 0x27c   : > { %v7071_v19 = vadd.f32 %v7070_v39, %v7040_v46  ;;  %v6107_v6 = vadd.f32 %v6080_v9, %v12574_v60  ;;  %v7002_v42 = vadd.f32 %v9565_v38, %v7001_v59  ;;  %v6147_v32 = vmul.f32 %v6109_v52, %v6109_v52 }
 0x27d   : > { %v9521_v20 = vpop.f32.mrf.mxu1 }
 0x27e   : > { %v6122_v45 = vadd.f32 %v6121_v57, %v6107_v6  ;;  %v6145_v37 = vmul.f32 %v6107_v6, %v6107_v6  ;;  %v6110_v29 = vadd.f32 %v9521_v20, %v12578_v5  ;;  %v7072_v27 = vadd.f32 %v7071_v19, %v7041_v30 }
 0x27f   : > { %v9568_v17 = vpop.f32.mrf.mxu0  ;;  %v6083_v44 = vpop.f32.mrf.mxu1  ;;  %v3154_v57 = vrot.slane %v3153_v51, 1 }
 0x280   : > { %v6160_v28 = vadd.f32 %v6159_v21, %v6145_v37  ;;  %v8522_v34 = vpack.c.bf16 %v6110_v29, %v6109_v52  ;;  %v6108_v11 = vadd.f32 %v6083_v44, %v12581_v3  ;;  %v6148_v61 = vmul.f32 %v6110_v29, %v6110_v29 }
 0x281   : > { %v6961_v60 = vpop.f32.mrf.mxu0  ;;  %v7044_v8 = vmul.f32 %v9568_v17, %v9568_v17  ;;  %v3192_v21 = vrot.slane %v3191_v10, 1  ;;  %v3155_v20 = vadd.f32 %v3154_v57, %v3153_v51 }
 0x282   : > { %v7003_v48 = vadd.f32 %v7002_v42, %v6961_v60  ;;  %v7042_v14 = vmul.f32 %v6961_v60, %v6961_v60  ;;  %8618 = vst [vmem:[%s12289_s14 + $0x78] sm:$0xff] %v8522_v34   ;;  %v6123_v33 = vadd.f32 %v6122_v45, %v6108_v11  ;;  %v6146_v50 = vmul.f32 %v6108_v11, %v6108_v11 }
 0x283   : > { %v9569_v5 = vpop.f32.mrf.mxu0  ;;  %v8517_v13 = vpack.c.bf16 %v6108_v11, %v6107_v6  ;;  %v3193_v2 = vadd.f32 %v3192_v21, %v3191_v10 }
 0x284   : > { %v7073_v12 = vadd.f32 %v7072_v27, %v7042_v14  ;;  %v8602_v49 = vpack.c.bf16 %v9569_v5, %v9568_v17  ;;  %v6124_v26 = vadd.f32 %v6123_v33, %v6109_v52  ;;  %v6161_v22 = vadd.f32 %v6160_v28, %v6146_v50 }
 0x285   : > { %8617 = vst [vmem:[%s12289_s14 + $0x70] sm:$0xff] %v8517_v13   ;;  %v6964_v3 = vpop.f32.mrf.mxu0  ;;  %v7045_v31 = vmul.f32 %v9569_v5, %v9569_v5 }
 0x286   : > { %8633 = vst [vmem:[%s12529_s17 + $0x78] sm:$0xff] %v8602_v49   ;;  %v7004_v0 = vadd.f32 %v7003_v48, %v6964_v3  ;;  %v7043_v35 = vmul.f32 %v6964_v3, %v6964_v3  ;;  %v8597_v1 = vpack.c.bf16 %v6964_v3, %v6961_v60  ;;  %v6125_v4 = vadd.f32 %v6124_v26, %v6110_v29 }
 0x287   : > { %v6162_v54 = vadd.f32 %v6161_v22, %v6147_v32 }
 0x288   : > { %v7005_v18 = vadd.f32 %v9568_v17, %v7004_v0  ;;  %v7074_v38 = vadd.f32 %v7073_v12, %v7043_v35  ;;  %8632 = vst [vmem:[%s12529_s17 + $0x70] sm:$0xff] %v8597_v1   ;;  %v6126_v47 = vrot.slane %v6125_v4, 4 }
 0x289   : > { %v6163_v55 = vadd.f32 %v6162_v54, %v6148_v61 }
 0x28a   : > { %v7006_v53 = vadd.f32 %v9569_v5, %v7005_v18  ;;  %v7075_v43 = vadd.f32 %v7074_v38, %v7044_v8  ;;  %v6127_v56 = vadd.f32 %v6126_v47, %v6125_v4 }
 0x28b   : > { %v6164_v58 = vrot.slane %v6163_v55, 4 }
 0x28c   : > { %v7007_v24 = vrot.slane %v7006_v53, 4  ;;  %v7076_v62 = vadd.f32 %v7075_v43, %v7045_v31  ;;  %v6128_v40 = vrot.slane %v6127_v56, 2 }
 0x28d   : > { %v6165_v36 = vadd.f32 %v6164_v58, %v6163_v55 }
 0x28e   : > { %v7008_v16 = vadd.f32 %v7007_v24, %v7006_v53  ;;  %v7077_v25 = vrot.slane %v7076_v62, 4  ;;  %v6129_v46 = vadd.f32 %v6128_v40, %v6127_v56 }
 0x28f   : > { %v6166_v59 = vrot.slane %v6165_v36, 2 }
 0x290   : > { %v7009_v39 = vrot.slane %v7008_v16, 2  ;;  %v7078_v9 = vadd.f32 %v7077_v25, %v7076_v62  ;;  %v6130_v19 = vrot.slane %v6129_v46, 1 }
 0x291   : > { %v6167_v6 = vadd.f32 %v6166_v59, %v6165_v36 }
 0x292   : > { %v7010_v30 = vadd.f32 %v7009_v39, %v7008_v16  ;;  %v7079_v52 = vrot.slane %v7078_v9, 2  ;;  %v6131_v45 = vadd.f32 %v6130_v19, %v6129_v46 }
 0x293   : > { %v6168_v37 = vrot.slane %v6167_v6, 1 }
 0x294   : > { %v7011_v42 = vrot.slane %v7010_v30, 1  ;;  %v7080_v29 = vadd.f32 %v7079_v52, %v7078_v9  ;;  %v6132_v17 = vadd.f32 %v6131_v45, %v3155_v20 }
 0x295   : > { %v6169_v44 = vadd.f32 %v6168_v37, %v6167_v6 }
 0x296   : > { %v7081_v28 = vrot.slane %v7080_v29, 1  ;;  %v7012_v34 = vadd.f32 %v7011_v42, %v7010_v30 }
 0x297   : > { %v6170_v27 = vadd.f32 %v6169_v44, %v3193_v2 }
 0x298   : > { %v7082_v63 = vadd.f32 %v7081_v28, %v7080_v29 }
 0x299   : > { %v6253_v60 = vsel %vm6252_vm6, %v6132_v17, %v6170_v27 }
 0x29a   : > { %6254 = vst [vmem:[%s280_s23] sm:$0x3] %v6253_v60  ;;  %v7244_v11 = vsel %vm6252_vm6, %v7012_v34, %v7082_v63 }
 0x29b   : > { %7245 = vst [vmem:[%s284_s27] sm:$0x3] %v7244_v11 }
 0x29c PF: > { %s17_s21 = sadd.s32 1, %s9808_s21  }
 0x29d   : > { %p14_p4 = scmp.ge.s32.totalorder %s17_s21, 4  }
 0x29f   :  { %16 = sbr.rel (!%p14_p4) target bundleno = 1 (0x1), region = 112 }

</bundles_post_ra>
